<compile_context>
chip_gen: v7x
topology: tpu7x:2x2x1
jax: 0.10.0
libtpu: 0.0.40
codegen_flags: <defaults>
</compile_context>

<pallas_src>
import functools

import jax
import jax.numpy as jnp
import numpy as np
from jax.experimental import pallas as pl
from jax.experimental.pallas import tpu as pltpu

N_FILTERS = (128, 256, 512, 1024)
BN_EPS = 1e-5
LEAKY_SLOPE = 0.01  # nn.LeakyReLU default


def _leaky_relu(x, slope=LEAKY_SLOPE):
    return jnp.where(x >= 0, x, slope * x)


def _encoder_kernel(x_ref,
                    w1_ref, b1_ref, w2_ref, b2_ref,
                    w3_ref, b3_ref, w4_ref, b4_ref,
                    feat_ref, acc_ref, *, n_points):
    """Grid = (B, N // TN).  Axis 0: batch (parallel). Axis 1: point tiles (reduction)."""
    j = pl.program_id(1)

    @pl.when(j == 0)
    def _():
        acc_ref[...] = jnp.zeros_like(acc_ref)

    x = x_ref[0]          # (TN, 3) f32
    w1 = w1_ref[...]      # (3, 128) f32

    # Layer 1: a K=3 contraction would waste the 128/256-deep MXU -> do it on
    # the VPU as an unrolled broadcast-FMA.
    h = (x[:, 0:1] * w1[0:1, :]
         + x[:, 1:2] * w1[1:2, :]
         + x[:, 2:3] * w1[2:3, :]) + b1_ref[...]
    h = _leaky_relu(h)                                              # (TN, 128) f32

    # Layers 2-4: bf16 MXU matmuls with f32 accumulation.
    h = _leaky_relu(jnp.dot(h.astype(jnp.bfloat16), w2_ref[...],
                            preferred_element_type=jnp.float32) + b2_ref[...])
    h = _leaky_relu(jnp.dot(h.astype(jnp.bfloat16), w3_ref[...],
                            preferred_element_type=jnp.float32) + b3_ref[...])
    h = _leaky_relu(jnp.dot(h.astype(jnp.bfloat16), w4_ref[...],
                            preferred_element_type=jnp.float32) + b4_ref[...])
    # h: (TN, 1024) f32

    # Sublane-dense partial sums for the mean-pool: (TN,1024) -> (TN//8,8,1024)
    # only re-labels vreg row-groups (no (8,128) tile boundary is crossed), so
    # the reduction over axis 0 is plain VPU adds; the single cross-sublane
    # (XLU) reduce happens once at j == last.
    tn, c = h.shape
    acc_ref[...] += jnp.sum(h.reshape(tn // 8, 8, c), axis=0)       # (8, 1024)

    @pl.when(j == pl.num_programs(1) - 1)
    def _():
        feat = jnp.sum(acc_ref[...], axis=0, keepdims=True) * (1.0 / n_points)
        feat_ref[0] = feat.astype(feat_ref.dtype)                   # (1, 1024)


def encoder_pointnet(x, params, *, tile_n=256):
    """x: (B, N, 3) float32, channel-last. Returns (B, 256)."""
    B, N, C = x.shape
    assert C == 3
    tile_n = min(tile_n, N)
    assert N % tile_n == 0 and tile_n % 8 == 0, "pad N to a multiple of tile_n"

    (w1, b1), (w2, b2), (w3, b3), (w4, b4), (w5, b5), (w6, b6) = params
    # bf16 weights for the MXU layers: halves weight DMA/VMEM, 2x+ MXU rate.
    w2b = w2.astype(jnp.bfloat16)
    w3b = w3.astype(jnp.bfloat16)
    w4b = w4.astype(jnp.bfloat16)

    def _const(arr):
        # Grid-invariant block: fetched once; single-buffer it (no point
        # spending VMEM double-buffering a constant-index block).
        return pl.BlockSpec(arr.shape, lambda i, j: (0,) * arr.ndim,
                            pipeline_mode=pl.Buffered(1))

    kernel = functools.partial(_encoder_kernel, n_points=N)

    flops = 2 * B * N * (3 * 128 + 128 * 256 + 256 * 512 + 512 * 1024)
    bytes_accessed = (x.size * x.dtype.itemsize
                      + w1.size * 4 + w2b.size * 2 + w3b.size * 2 + w4b.size * 2
                      + (b1.size + b2.size + b3.size + b4.size) * 4
                      + B * 1024 * 4)

    feat = pl.pallas_call(
        kernel,
        out_shape=jax.ShapeDtypeStruct((B, 1, 1024), jnp.float32),
        grid_spec=pltpu.PrefetchScalarGridSpec(
            num_scalar_prefetch=0,
            grid=(B, N // tile_n),
            in_specs=[
                pl.BlockSpec((1, tile_n, C), lambda i, j: (i, j, 0)),
                _const(w1), _const(b1), _const(w2b), _const(b2),
                _const(w3b), _const(b3), _const(w4b), _const(b4),
            ],
            out_specs=pl.BlockSpec((1, 1, 1024), lambda i, j: (i, 0, 0)),
            scratch_shapes=[pltpu.VMEM((8, 1024), jnp.float32)],
        ),
        compiler_params=pltpu.CompilerParams(
            dimension_semantics=("parallel", "arbitrary")),
        cost_estimate=pl.CostEstimate(flops=flops, transcendentals=0,
                                      bytes_accessed=bytes_accessed),
    )(x, w1, b1, w2b, b2, w3b, b3, w4b, b4)

    feat = feat.reshape(B, 1024)
    # FC head hoisted out of the grid: one batched M=B matmul pair (plain XLA).
    f = _leaky_relu(feat @ w5 + b5)
    return jnp.tanh(f @ w6 + b6)


# ----------------------------------------------------------------------------
# Deterministic parameter construction (PyTorch shapes), with eval-mode BN
# folded into the preceding conv.
# ----------------------------------------------------------------------------
def make_params(key):
    keys = iter(jax.random.split(key, 64))
    params = []

    prev_nf = 3
    for nf in N_FILTERS:
        # Conv1d(prev_nf, nf, 1): weight (nf, prev_nf, 1), bias (nf,)
        w = jax.random.normal(next(keys), (nf, prev_nf), jnp.float32) / np.sqrt(prev_nf)
        b = 0.1 * jax.random.normal(next(keys), (nf,), jnp.float32)
        # BatchNorm1d(nf): gamma, beta, running_mean, running_var (eval mode)
        gamma = 1.0 + 0.1 * jax.random.normal(next(keys), (nf,), jnp.float32)
        beta = 0.1 * jax.random.normal(next(keys), (nf,), jnp.float32)
        r_mean = 0.1 * jax.random.normal(next(keys), (nf,), jnp.float32)
        r_var = 1.0 + 0.1 * jax.random.uniform(next(keys), (nf,), jnp.float32)
        # Fold BN into conv:  y = ((x@W^T + b) - mean) * gamma/sqrt(var+eps) + beta
        scale = gamma / jnp.sqrt(r_var + BN_EPS)
        w_eff = (w * scale[:, None]).T                    # (prev_nf, nf), x @ w_eff
        b_eff = ((b - r_mean) * scale + beta)[None, :]    # (1, nf)
        params.append((w_eff, b_eff))
        prev_nf = nf

    # fc_layer: Linear(1024, 512), Linear(512, 256)
    w5 = jax.random.normal(next(keys), (512, 1024), jnp.float32) / np.sqrt(1024)
    b5 = 0.1 * jax.random.normal(next(keys), (512,), jnp.float32)
    w6 = jax.random.normal(next(keys), (256, 512), jnp.float32) / np.sqrt(512)
    b6 = 0.1 * jax.random.normal(next(keys), (256,), jnp.float32)
    params.append((w5.T, b5[None, :]))
    params.append((w6.T, b6[None, :]))
    return params


def reference_forward(x, params):
    """Pure-JAX f32 reference of the (BN-folded) forward pass."""
    (w1, b1), (w2, b2), (w3, b3), (w4, b4), (w5, b5), (w6, b6) = params
    h = x  # (B, N, 3)
    for w, b in ((w1, b1), (w2, b2), (w3, b3), (w4, b4)):
        h = _leaky_relu(jnp.einsum("bnc,cd->bnd", h, w) + b[None])
    feat = jnp.mean(h, axis=1)  # (B, 1024)
    f = _leaky_relu(feat @ w5 + b5)
    return jnp.tanh(f @ w6 + b6)


if __name__ == "__main__":
    key = jax.random.PRNGKey(0)
    k_x, k_p = jax.random.split(key)

    B, N = 2, 512  # 2 point clouds, 512 points x 3 coords (2 tiles of 256)
    x = jax.random.normal(k_x, (B, N, 3), jnp.float32)
    params = make_params(k_p)

    out = encoder_pointnet(x, params, tile_n=256)
    out = jax.block_until_ready(out)

    ref = jax.block_until_ready(reference_forward(x, params))
    # bf16 MXU matmuls with f32 accumulation -> looser tolerance than pure f32.
    np.testing.assert_allclose(np.asarray(out), np.asarray(ref), rtol=2e-2, atol=2e-2)
    assert out.shape == (B, 256)

    print("KERNEL_OK")
</pallas_src>

<mosaic_0001>
module attributes {stable_mosaic.version = 11 : i64} {
  func.func @_encoder_kernel(%arg0: i32, %arg1: i32, %arg2: memref<1x256x3xf32, #tpu.memory_space<vmem>>, %arg3: memref<3x128xf32, #tpu.memory_space<vmem>>, %arg4: memref<1x128xf32, #tpu.memory_space<vmem>>, %arg5: memref<128x256xbf16, #tpu.memory_space<vmem>>, %arg6: memref<1x256xf32, #tpu.memory_space<vmem>>, %arg7: memref<256x512xbf16, #tpu.memory_space<vmem>>, %arg8: memref<1x512xf32, #tpu.memory_space<vmem>>, %arg9: memref<512x1024xbf16, #tpu.memory_space<vmem>>, %arg10: memref<1x1024xf32, #tpu.memory_space<vmem>>, %arg11: memref<1x1x1024xf32, #tpu.memory_space<vmem>>, %arg12: memref<8x1024xf32, #tpu.memory_space<vmem>>) attributes {dimension_semantics = [#tpu.dimension_semantics<parallel>, #tpu.dimension_semantics<arbitrary>], iteration_bounds = array<i64: 2, 2>, scalar_prefetch = 0 : i64, scratch_operands = 1 : i64, tpu.core_type = #tpu.core_type<tc>, window_params = [{transform_indices = @transform_0, window_bounds = array<i64: 1, 256, 3>}, {pipeline_mode = #tpu.pipeline_mode<synchronous>, transform_indices = @transform_1, window_bounds = array<i64: 3, 128>}, {pipeline_mode = #tpu.pipeline_mode<synchronous>, transform_indices = @transform_2, window_bounds = array<i64: 1, 128>}, {pipeline_mode = #tpu.pipeline_mode<synchronous>, transform_indices = @transform_3, window_bounds = array<i64: 128, 256>}, {pipeline_mode = #tpu.pipeline_mode<synchronous>, transform_indices = @transform_4, window_bounds = array<i64: 1, 256>}, {pipeline_mode = #tpu.pipeline_mode<synchronous>, transform_indices = @transform_5, window_bounds = array<i64: 256, 512>}, {pipeline_mode = #tpu.pipeline_mode<synchronous>, transform_indices = @transform_6, window_bounds = array<i64: 1, 512>}, {pipeline_mode = #tpu.pipeline_mode<synchronous>, transform_indices = @transform_7, window_bounds = array<i64: 512, 1024>}, {pipeline_mode = #tpu.pipeline_mode<synchronous>, transform_indices = @transform_8, window_bounds = array<i64: 1, 1024>}, {transform_indices = @transform_9, window_bounds = array<i64: 1, 1, 1024>}]} {
    %c0_i32 = arith.constant 0 : i32
    %0 = arith.cmpi eq, %arg1, %c0_i32 : i32
    %1 = arith.extui %0 : i1 to i32
    %c0_i32_0 = arith.constant 0 : i32
    %2 = arith.cmpi ne, %1, %c0_i32_0 : i32
    scf.if %2 {
      %cst_35 = arith.constant 0.000000e+00 : f32
      %72 = vector.broadcast %cst_35 : f32 to vector<8x1024xf32>
      %c0_36 = arith.constant 0 : index
      %c0_37 = arith.constant 0 : index
      %73 = vector.load %arg12[%c0_36, %c0_37] : memref<8x1024xf32, #tpu.memory_space<vmem>>, vector<8x1024xf32>
      tpu.vector_store %arg12[%c0_36, %c0_37], %72 {strides = array<i32>} : memref<8x1024xf32, #tpu.memory_space<vmem>>, vector<8x1024xf32>,
    } else {
    }
    %c0 = arith.constant 0 : index
    %c0_1 = arith.constant 0 : index
    %c0_2 = arith.constant 0 : index
    %3 = vector.load %arg2[%c0, %c0_1, %c0_2] : memref<1x256x3xf32, #tpu.memory_space<vmem>>, vector<1x256x3xf32>
    %4 = vector.shape_cast %3 : vector<1x256x3xf32> to vector<256x3xf32>
    %c0_3 = arith.constant 0 : index
    %c0_4 = arith.constant 0 : index
    %5 = vector.load %arg3[%c0_3, %c0_4] : memref<3x128xf32, #tpu.memory_space<vmem>>, vector<3x128xf32>
    %6 = vector.extract_strided_slice %4 {offsets = [0, 0], sizes = [256, 1], strides = [1, 1]} : vector<256x3xf32> to vector<256x1xf32>
    %7 = vector.extract_strided_slice %5 {offsets = [0, 0], sizes = [1, 128], strides = [1, 1]} : vector<3x128xf32> to vector<1x128xf32>
    %8 = vector.broadcast %6 : vector<256x1xf32> to vector<256x128xf32>
    %9 = vector.broadcast %7 : vector<1x128xf32> to vector<256x128xf32>
    %10 = arith.mulf %8, %9 : vector<256x128xf32>
    %11 = vector.extract_strided_slice %4 {offsets = [0, 1], sizes = [256, 1], strides = [1, 1]} : vector<256x3xf32> to vector<256x1xf32>
    %12 = vector.extract_strided_slice %5 {offsets = [1, 0], sizes = [1, 128], strides = [1, 1]} : vector<3x128xf32> to vector<1x128xf32>
    %13 = vector.broadcast %11 : vector<256x1xf32> to vector<256x128xf32>
    %14 = vector.broadcast %12 : vector<1x128xf32> to vector<256x128xf32>
    %15 = arith.mulf %13, %14 : vector<256x128xf32>
    %16 = arith.addf %10, %15 : vector<256x128xf32>
    %17 = vector.extract_strided_slice %4 {offsets = [0, 2], sizes = [256, 1], strides = [1, 1]} : vector<256x3xf32> to vector<256x1xf32>
    %18 = vector.extract_strided_slice %5 {offsets = [2, 0], sizes = [1, 128], strides = [1, 1]} : vector<3x128xf32> to vector<1x128xf32>
    %19 = vector.broadcast %17 : vector<256x1xf32> to vector<256x128xf32>
    %20 = vector.broadcast %18 : vector<1x128xf32> to vector<256x128xf32>
    %21 = arith.mulf %19, %20 : vector<256x128xf32>
    %22 = arith.addf %16, %21 : vector<256x128xf32>
    %c0_5 = arith.constant 0 : index
    %c0_6 = arith.constant 0 : index
    %23 = vector.load %arg4[%c0_5, %c0_6] : memref<1x128xf32, #tpu.memory_space<vmem>>, vector<1x128xf32>
    %24 = vector.broadcast %23 : vector<1x128xf32> to vector<256x128xf32>
    %25 = arith.addf %22, %24 : vector<256x128xf32>
    %cst = arith.constant 0.000000e+00 : f32
    %26 = vector.broadcast %cst : f32 to vector<256x128xf32>
    %27 = arith.cmpf oge, %25, %26 : vector<256x128xf32>
    %cst_7 = arith.constant 0.00999999977 : f32
    %28 = vector.broadcast %cst_7 : f32 to vector<256x128xf32>
    %29 = arith.mulf %28, %25 : vector<256x128xf32>
    %30 = arith.select %27, %25, %29 : vector<256x128xi1>, vector<256x128xf32>
    %31 = arith.truncf %30 : vector<256x128xf32> to vector<256x128xbf16>
    %c0_8 = arith.constant 0 : index
    %c0_9 = arith.constant 0 : index
    %32 = vector.load %arg5[%c0_8, %c0_9] : memref<128x256xbf16, #tpu.memory_space<vmem>>, vector<128x256xbf16>
    %cst_10 = arith.constant dense<0.000000e+00> : vector<256x256xf32>
    %33 = tpu.matmul %31, %32, %cst_10 {dimension_numbers = #tpu.dot_dimension_numbers<[1], [0], [0], [1], [0, 0, 1, 1], [], []>} : vector<256x128xbf16>, vector<128x256xbf16>, vector<256x256xf32> -> vector<256x256xf32>
    %c0_11 = arith.constant 0 : index
    %c0_12 = arith.constant 0 : index
    %34 = vector.load %arg6[%c0_11, %c0_12] : memref<1x256xf32, #tpu.memory_space<vmem>>, vector<1x256xf32>
    %35 = vector.broadcast %34 : vector<1x256xf32> to vector<256x256xf32>
    %36 = arith.addf %33, %35 : vector<256x256xf32>
    %cst_13 = arith.constant 0.000000e+00 : f32
    %37 = vector.broadcast %cst_13 : f32 to vector<256x256xf32>
    %38 = arith.cmpf oge, %36, %37 : vector<256x256xf32>
    %cst_14 = arith.constant 0.00999999977 : f32
    %39 = vector.broadcast %cst_14 : f32 to vector<256x256xf32>
    %40 = arith.mulf %39, %36 : vector<256x256xf32>
    %41 = arith.select %38, %36, %40 : vector<256x256xi1>, vector<256x256xf32>
    %42 = arith.truncf %41 : vector<256x256xf32> to vector<256x256xbf16>
    %c0_15 = arith.constant 0 : index
    %c0_16 = arith.constant 0 : index
    %43 = vector.load %arg7[%c0_15, %c0_16] : memref<256x512xbf16, #tpu.memory_space<vmem>>, vector<256x512xbf16>
    %cst_17 = arith.constant dense<0.000000e+00> : vector<256x512xf32>
    %44 = tpu.matmul %42, %43, %cst_17 {dimension_numbers = #tpu.dot_dimension_numbers<[1], [0], [0], [1], [0, 0, 1, 1], [], []>} : vector<256x256xbf16>, vector<256x512xbf16>, vector<256x512xf32> -> vector<256x512xf32>
    %c0_18 = arith.constant 0 : index
    %c0_19 = arith.constant 0 : index
    %45 = vector.load %arg8[%c0_18, %c0_19] : memref<1x512xf32, #tpu.memory_space<vmem>>, vector<1x512xf32>
    %46 = vector.broadcast %45 : vector<1x512xf32> to vector<256x512xf32>
    %47 = arith.addf %44, %46 : vector<256x512xf32>
    %cst_20 = arith.constant 0.000000e+00 : f32
    %48 = vector.broadcast %cst_20 : f32 to vector<256x512xf32>
    %49 = arith.cmpf oge, %47, %48 : vector<256x512xf32>
    %cst_21 = arith.constant 0.00999999977 : f32
    %50 = vector.broadcast %cst_21 : f32 to vector<256x512xf32>
    %51 = arith.mulf %50, %47 : vector<256x512xf32>
    %52 = arith.select %49, %47, %51 : vector<256x512xi1>, vector<256x512xf32>
    %53 = arith.truncf %52 : vector<256x512xf32> to vector<256x512xbf16>
    %c0_22 = arith.constant 0 : index
    %c0_23 = arith.constant 0 : index
    %54 = vector.load %arg9[%c0_22, %c0_23] : memref<512x1024xbf16, #tpu.memory_space<vmem>>, vector<512x1024xbf16>
    %cst_24 = arith.constant dense<0.000000e+00> : vector<256x1024xf32>
    %55 = tpu.matmul %53, %54, %cst_24 {dimension_numbers = #tpu.dot_dimension_numbers<[1], [0], [0], [1], [0, 0, 1, 1], [], []>} : vector<256x512xbf16>, vector<512x1024xbf16>, vector<256x1024xf32> -> vector<256x1024xf32>
    %c0_25 = arith.constant 0 : index
    %c0_26 = arith.constant 0 : index
    %56 = vector.load %arg10[%c0_25, %c0_26] : memref<1x1024xf32, #tpu.memory_space<vmem>>, vector<1x1024xf32>
    %57 = vector.broadcast %56 : vector<1x1024xf32> to vector<256x1024xf32>
    %58 = arith.addf %55, %57 : vector<256x1024xf32>
    %cst_27 = arith.constant 0.000000e+00 : f32
    %59 = vector.broadcast %cst_27 : f32 to vector<256x1024xf32>
    %60 = arith.cmpf oge, %58, %59 : vector<256x1024xf32>
    %cst_28 = arith.constant 0.00999999977 : f32
    %61 = vector.broadcast %cst_28 : f32 to vector<256x1024xf32>
    %62 = arith.mulf %61, %58 : vector<256x1024xf32>
    %63 = arith.select %60, %58, %62 : vector<256x1024xi1>, vector<256x1024xf32>
    %c0_29 = arith.constant 0 : index
    %c0_30 = arith.constant 0 : index
    %64 = vector.load %arg12[%c0_29, %c0_30] : memref<8x1024xf32, #tpu.memory_space<vmem>>, vector<8x1024xf32>
    %65 = vector.shape_cast %63 : vector<256x1024xf32> to vector<32x8x1024xf32>
    %cst_31 = arith.constant dense<0.000000e+00> : vector<8x1024xf32>
    %66 = vector.multi_reduction <add>, %65, %cst_31 [0] : vector<32x8x1024xf32> to vector<8x1024xf32>
    %67 = arith.addf %64, %66 : vector<8x1024xf32>
    %c0_32 = arith.constant 0 : index
    %c0_33 = arith.constant 0 : index
    %68 = vector.load %arg12[%c0_32, %c0_33] : memref<8x1024xf32, #tpu.memory_space<vmem>>, vector<8x1024xf32>
    tpu.vector_store %arg12[%c0_32, %c0_33], %67 {strides = array<i32>} : memref<8x1024xf32, #tpu.memory_space<vmem>>, vector<8x1024xf32>,
    %c1_i32 = arith.constant 1 : i32
    %69 = arith.cmpi eq, %arg1, %c1_i32 : i32
    %70 = arith.extui %69 : i1 to i32
    %c0_i32_34 = arith.constant 0 : i32
    %71 = arith.cmpi ne, %70, %c0_i32_34 : i32
    scf.if %71 {
      %c0_35 = arith.constant 0 : index
      %c0_36 = arith.constant 0 : index
      %72 = vector.load %arg12[%c0_35, %c0_36] : memref<8x1024xf32, #tpu.memory_space<vmem>>, vector<8x1024xf32>
      %cst_37 = arith.constant dense<0.000000e+00> : vector<1024xf32>
      %73 = vector.multi_reduction <add>, %72, %cst_37 [0] : vector<8x1024xf32> to vector<1024xf32>
      %74 = vector.shape_cast %73 : vector<1024xf32> to vector<1x1024xf32>
      %cst_38 = arith.constant 0.001953125 : f32
      %75 = vector.broadcast %cst_38 : f32 to vector<1x1024xf32>
      %76 = arith.mulf %74, %75 : vector<1x1024xf32>
      %c0_39 = arith.constant 0 : index
      %c0_40 = arith.constant 0 : index
      %c0_41 = arith.constant 0 : index
      %77 = vector.load %arg11[%c0_39, %c0_40, %c0_41] : memref<1x1x1024xf32, #tpu.memory_space<vmem>>, vector<1x1x1024xf32>
      %78 = vector.shape_cast %77 : vector<1x1x1024xf32> to vector<1x1024xf32>
      %79 = vector.shape_cast %76 : vector<1x1024xf32> to vector<1x1x1024xf32>
      tpu.vector_store %arg11[%c0_39, %c0_40, %c0_41], %79 {strides = array<i32>} : memref<1x1x1024xf32, #tpu.memory_space<vmem>>, vector<1x1x1024xf32>,
    } else {
    }
    return
  }
  func.func @transform_0(%arg0: i32, %arg1: i32) -> (i32, i32, i32) {
    %c0_i32 = arith.constant 0 : i32
    %c0_i32_0 = arith.constant 0 : i32
    return %arg0, %arg1, %c0_i32 : i32, i32, i32
  }
  func.func @transform_1(%arg0: i32, %arg1: i32) -> (i32, i32) {
    %c0_i32 = arith.constant 0 : i32
    %c0_i32_0 = arith.constant 0 : i32
    %c0_i32_1 = arith.constant 0 : i32
    return %c0_i32, %c0_i32_0 : i32, i32
  }
  func.func @transform_2(%arg0: i32, %arg1: i32) -> (i32, i32) {
    %c0_i32 = arith.constant 0 : i32
    %c0_i32_0 = arith.constant 0 : i32
    %c0_i32_1 = arith.constant 0 : i32
    return %c0_i32, %c0_i32_0 : i32, i32
  }
  func.func @transform_3(%arg0: i32, %arg1: i32) -> (i32, i32) {
    %c0_i32 = arith.constant 0 : i32
    %c0_i32_0 = arith.constant 0 : i32
    %c0_i32_1 = arith.constant 0 : i32
    return %c0_i32, %c0_i32_0 : i32, i32
  }
  func.func @transform_4(%arg0: i32, %arg1: i32) -> (i32, i32) {
    %c0_i32 = arith.constant 0 : i32
    %c0_i32_0 = arith.constant 0 : i32
    %c0_i32_1 = arith.constant 0 : i32
    return %c0_i32, %c0_i32_0 : i32, i32
  }
  func.func @transform_5(%arg0: i32, %arg1: i32) -> (i32, i32) {
    %c0_i32 = arith.constant 0 : i32
    %c0_i32_0 = arith.constant 0 : i32
    %c0_i32_1 = arith.constant 0 : i32
    return %c0_i32, %c0_i32_0 : i32, i32
  }
  func.func @transform_6(%arg0: i32, %arg1: i32) -> (i32, i32) {
    %c0_i32 = arith.constant 0 : i32
    %c0_i32_0 = arith.constant 0 : i32
    %c0_i32_1 = arith.constant 0 : i32
    return %c0_i32, %c0_i32_0 : i32, i32
  }
  func.func @transform_7(%arg0: i32, %arg1: i32) -> (i32, i32) {
    %c0_i32 = arith.constant 0 : i32
    %c0_i32_0 = arith.constant 0 : i32
    %c0_i32_1 = arith.constant 0 : i32
    return %c0_i32, %c0_i32_0 : i32, i32
  }
  func.func @transform_8(%arg0: i32, %arg1: i32) -> (i32, i32) {
    %c0_i32 = arith.constant 0 : i32
    %c0_i32_0 = arith.constant 0 : i32
    %c0_i32_1 = arith.constant 0 : i32
    return %c0_i32, %c0_i32_0 : i32, i32
  }
  func.func @transform_9(%arg0: i32, %arg1: i32) -> (i32, i32, i32) {
    %c0_i32 = arith.constant 0 : i32
    %c0_i32_0 = arith.constant 0 : i32
    %c0_i32_1 = arith.constant 0 : i32
    return %arg0, %c0_i32, %c0_i32_0 : i32, i32, i32
  }
}

</mosaic_0001>

<bundles_post_ra>
// kernel: tpu_custom_call.1
= control target key start
LH: loop header
LB: loop body
LE: loop exit
PB: predicated region body
PF: predicated region fallthrough
CT: control target
= control target key end

     0   :  { %14 = vsyncpa [#allocation4], 0  ;;  %s11123_s0 = inlined_call_operand.vmem [shape: f32[2,512,3], index: 0, kind: input, shape index: {}]   ;;  %s11124_s1 = inlined_call_operand.vmem [shape: f32[3,128], index: 1, kind: input, shape index: {}]   ;;  %s11125_s2 = inlined_call_operand.vmem [shape: f32[1,128], index: 2, kind: input, shape index: {}]   ;;  %s11126_s3 = inlined_call_operand.vmem [shape: bf16[128,256], index: 3, kind: input, shape index: {}]   ;;  %s11127_s4 = inlined_call_operand.vmem [shape: f32[1,256], index: 4, kind: input, shape index: {}]   ;;  %s11128_s5 = inlined_call_operand.vmem [shape: bf16[256,512], index: 5, kind: input, shape index: {}]   ;;  %s11129_s6 = inlined_call_operand.vmem [shape: f32[1,512], index: 6, kind: input, shape index: {}]   ;;  %s11130_s7 = inlined_call_operand.hbm [shape: bf16[512,1024], index: 7, kind: input, shape index: {}]   ;;  %s11131_s8 = inlined_call_operand.vmem [shape: f32[1,1024], index: 8, kind: input, shape index: {}]   ;;  %s11132_s9 = inlined_call_operand.hbm [shape: f32[2,1,1024], index: 9, kind: output, shape index: {}]  }
   0x1   :  { %15 = vsyncpa [#allocation5], 0 }
   0x2   :  { %17 = vsyncpa [#allocation5 + $0x1], 0  ;;  %s8652_s30 = smov 0   ;;  %s8654_s10 = smov 0  }
   0x3   :  { %s8656_s11 = smov 0   ;;  %s8658_s12 = smov 0  }
   0x4   :  { %s8660_s13 = smov 0   ;;  %s8662_s14 = smov 0  }
   0x5   :  { %s8664_s15 = smov 0   ;;  %s8666_s16 = smov 0  }
   0x6 LB: > { %11214 = sst [smem:[#allocation9_spill]] %s8583_s14  ;;  %s7316_s17 = sadd.s32 4294967295, %s8591_s16   ;;  %s8591_s16 = sphi %s8666_s16, %s23_s16   ;;  %s8587_s15 = sphi %s8664_s15, %s11319_s15   ;;  %s8583_s14 = sphi %s8662_s14, %s11318_s14   ;;  %s8579_s13 = sphi %s8660_s13, %s11317_s13   ;;  %s8575_s12 = sphi %s8658_s12, %s11316_s12   ;;  %s8571_s11 = sphi %s8656_s11, %s11322_s11   ;;  %s8567_s10 = sphi %s8654_s10, %s11321_s10   ;;  %s8563_s30 = sphi %s8652_s30, %s11320_s30  }
   0x7   : > { %11215 = sst [smem:[#allocation10_spill]] %s8587_s15  ;;  %s7317_s18 = sadd.s32 4294967294, %s8591_s16  }
   0x8   : > { %s32_s19 = sadd.s32 1, %s8583_s14  ;;  %s35_s20 = sadd.s32 1, %s8587_s15 }
   0x9   : > { %p33_p0 = scmp.ge.s32.totalorder %s32_s19, 2  ;;  %s238_s21 = sadd.s32 1, %s8571_s11 }
   0xa   : > { %p248_p1 = scmp.ne.s32.totalorder %s8571_s11, %s8567_s10  ;;  %p249_p2 = scmp.eq.s32.totalorder %s7316_s17, 3 }
   0xb   : > { %s11324_s19 = smov (%p33_p0, %s32_s19), 0  ;;  %s11326_s20 = smov (!%p33_p0, %s35_s20), %s8587_s15 }
   0xc   : > { %11216 = sst [smem:[#allocation11_spill]] %s11324_s19  ;;  %p8702_p3 = por %p249_p2, %p248_p1 }
   0xd   : > { %p254_p4 = scmp.ne.s32.totalorder %s8567_s10, %s8563_s30  ;;  %p37_p5 = scmp.ge.s32.totalorder %s11326_s20, 2 }
   0xe   : > { %s11217_s22 = scalar_select %p8702_p3, 1, 0 }
   0xf   : > { %p255_p6 = scmp.eq.s32.totalorder %s7317_s18, 3  ;;  %p7318_p7 = scmp.ge.s32.totalorder %s8591_s16, 1 }
  0x10   : > { %p262_p8 = scmp.lt.s32.totalorder %s8591_s16, 5  ;;  %s11328_s20 = smov (%p37_p5, %s11326_s20), 0 }
  0x11   : > { %11218 = sst [smem:[#allocation12_spill]] %s11328_s20  ;;  %p8712_p9 = por %p255_p6, %p254_p4 }
  0x12   : > { %p8716_p10 = pnand %p7318_p7, %p262_p8  ;;  %s235_s25 = ssub.s32 %s8587_s15, %s11328_s20 }
  0x13   : > { %s11219_s23 = scalar_select %p8712_p9, 1, 0 }
  0x14   : > { %s11220_s24 = scalar_select %p8716_p10, 1, 0 }
  0x15   : > { %p236_p11 = scmp.eq.s32.totalorder %s235_s25, 0  ;;  %p8206_p12 = pneg %p8716_p10 }
  0x16   : > { %p8724_p13 = scmp.eq.s32.totalorder %s7316_s17, 0  ;;  %s8593_s28 = smov [#allocation3]  }
  0x17   : > { %s8729_s27 = scalar_select %p236_p11, %s8571_s11, %s238_s21  }
  0x18   : > { %s11221_s26 = scalar_select %p8724_p13, 1, 0 }
  0x19   : > { %s292_s29 = sshll.u32 %s8593_s28, 4  ;;  %p8733_p0 = pnand %p8724_p13, %p8206_p12  ;;  %s293_s29 = int_to_ptr.vmem [resolvable:$true] %s292_s29 }
  0x1a   : > { %s8465_s19 = scalar_lea.hbm %s11130_s7, 32768 }
  0x1b   : > { %p8466_p1 = scmp.ne.s32.totalorder %s11130_s7, %s8465_s19  ;;  %p8467_p2 = pneg %p8733_p0 }
  0x1c   : > { %p8472_p6 = scmp.lt.u32.totalorder %s8465_s19, %s11130_s7 }
  0x1d   : > { %p8468_p4 = pnand %p8467_p2, %p8466_p1 }
  0x1f   : > { %p8469_p5 = pneg %p8468_p4 }
  0x21   : > { %p8474_p7 = pnand %p8472_p6, %p8469_p5 }
  0x23   : > { %8477 = shalt.err (!%p8474_p7)
}
  0x24   : > { %s8478_s14 = scalar_lea.vmem %s293_s29, 32768  ;;  %p8486_p9 = scmp.lt.s32.totalorder %s293_s29, %s293_s29 }
  0x25   : > { %p8479_p8 = scmp.ne.s32.totalorder %s293_s29, %s8478_s14  ;;  %p8487_p3 = scmp.lt.s32.totalorder %s8478_s14, %s8478_s14 }
  0x27   : > { %p8481_p11 = pnand %p8479_p8, %p8467_p2  ;;  %p8488_p13 = por %p8487_p3, %p8486_p9 }
  0x29   : > { %p8482_p12 = pneg %p8481_p11 }
  0x2b   : > { %p8489_p10 = pnand %p8488_p13, %p8482_p12 }
  0x2d   : > { %8492 = shalt.err (!%p8489_p10)
}
  0x2e   : > { %s8594_s15 = smov 512   ;;  %s8595_s20 = smov 32  }
  0x2f   : > { %8209 = dma.hbm_to_vmem [thread:$0]  (!%p8733_p0), %s11130_s7, 32768, %s293_s29, [#allocation4], %s8594_s15, %s8594_s15, %s8595_s20  }
  0x30   : > { %p11223_p1 = scmp.ne.s32.totalorder %s11220_s24, 0 }
  0x32   : > { %324 = sbr.rel (%p11223_p1) target bundleno = 1655 (0x677), region = 56 }
  0x39   : > { %p11224_p4 = scmp.ne.s32.totalorder %s11221_s26, 0 }
  0x3b   : > { %8554 = dma.done.wait (%p11224_p4), [#allocation4], 32768  }
  0x3c   : > { %8556 = vsyncadd (%p11224_p4), [#allocation4], 4294934528  ;;  %s361_s14 = sand.u32 1, %s8567_s10   ;;  %s7324_s19 = sshll.u32 %s8575_s12, 5 }
  0x3d   : > { %s8763_s18 = sshll.u32 %s361_s14, 3  ;;  %p365_p3 = scmp.lt.s32.totalorder %s8579_s13, 1 }
  0x3e   : > { %p367_p9 = scmp.lt.s32.totalorder %s7324_s19, 63  ;;  %s363_s25 = scalar_lea.vmem [#allocation6], %s8763_s18 }
  0x3f   : > { %s366_s24 = scalar_select %p365_p3, %s8579_s13, 1 }
  0x40   : > { %s11330_s19 = smov (!%p367_p9, %s7324_s19), 63  ;;  %p7327_p10 = scmp.ne.s32.totalorder %s8575_s12, 0 }
  0x41   : > { %s7325_s29 = sshll.u32 %s366_s24, 6  ;;  %v8596_v0 = vmov (!%p7327_p10), 0.0  }
  0x42   : > { %s370_s21 = sadd.s32 %s7325_s29, %s11330_s19  ;;  %378 = sbr.rel (%p7327_p10) target bundleno = 73 (0x49), region = 64  ;;  %379 = vst [vmem:[#allocation2] sm:$0xff] (!%p7327_p10), %v8596_v0  ;;  %380 = vst [vmem:[#allocation2 + $0x8] sm:$0xff] (!%p7327_p10), %v8596_v0 }
  0x43   : > { %s7326_s28 = sshll.u32 %s370_s21, 3  ;;  %381 = vst [vmem:[#allocation2 + $0x10] sm:$0xff] (!%p7327_p10), %v8596_v0  ;;  %382 = vst [vmem:[#allocation2 + $0x18] sm:$0xff] (!%p7327_p10), %v8596_v0 }
  0x44   : > { %s8770_s20 = scalar_lea.vmem %s11123_s0, %s7326_s28  ;;  %383 = vst [vmem:[#allocation2 + $0x20] sm:$0xff] (!%p7327_p10), %v8596_v0  ;;  %384 = vst [vmem:[#allocation2 + $0x28] sm:$0xff] (!%p7327_p10), %v8596_v0 }
  0x45   : > { %385 = vst [vmem:[#allocation2 + $0x30] sm:$0xff] (!%p7327_p10), %v8596_v0  ;;  %386 = vst [vmem:[#allocation2 + $0x38] sm:$0xff] (!%p7327_p10), %v8596_v0 }
  0x49 PF: > { %v387_v1 = vld [vmem:[%s8770_s20] sm:$0xff]  ;;  %v8597_v2 = vmov 2   ;;  %v8598_v3 = vmov 1   ;;  %v389_v4 = vld [vmem:[%s8770_s20 + $0x10] sm:$0xff]  ;;  %v388_v5 = vld [vmem:[%s8770_s20 + $0x8] sm:$0xff]  ;;  %v8599_v6 = vmov 0   ;;  %v580_v48 = vlaneseq }
  0x4a   : > { %8290 = vset.pattern.permute.xlu0 %v8597_v2  ;;  %8289 = vset.pattern.permute.xlu1 %v8598_v3  ;;  %v8343_v7 = vld [vmem:[%s11126_s3 + $0x4] ss:$8 sps:$4 sm:$0xff]   ;;  %v8345_v9 = vld [vmem:[%s11126_s3] ss:$8 sps:$4 sm:$0xff]   ;;  %v8346_v10 = vld [vmem:[%s11126_s3 + $0x14] ss:$8 sps:$4 sm:$0xff]  }
  0x4b   : > { %813 = vperm.xlu0 %8290, %v387_v1   ;;  %617 = vperm.xlu1 %8289, %v387_v1   ;;  %v8785_v8 = vld [vmem:[%s8770_s20 + $0x20] sm:$0xff]  ;;  %v8348_v11 = vld [vmem:[%s11126_s3 + $0x10] ss:$8 sps:$4 sm:$0xff]   ;;  %v8352_v14 = vld [vmem:[%s11126_s3 + $0x34] ss:$8 sps:$4 sm:$0xff]   ;;  %v8932_v51 = vshrl.u32 %v580_v48, 7 }
  0x4c   : > { %1299 = vmatprep.mubr.bf16.mxu0 %v8599_v6  ;;  %1379 = vmatprep.mubr.bf16.mxu1 %v8599_v6  ;;  %v8349_v12 = vld [vmem:[%s11126_s3 + $0x24] ss:$8 sps:$4 sm:$0xff]   ;;  %v8351_v13 = vld [vmem:[%s11126_s3 + $0x20] ss:$8 sps:$4 sm:$0xff]   ;;  %v8354_v15 = vld [vmem:[%s11126_s3 + $0x30] ss:$8 sps:$4 sm:$0xff]  }
  0x4d   : > { %1267 = vmatprep.subr.bf16.mxu0 %v8343_v7  ;;  %7672 = vmatprep.subr.bf16.mxu1 %v8343_v7  ;;  %v8355_v16 = vld [vmem:[%s11126_s3 + $0x44] ss:$8 sps:$4 sm:$0xff]   ;;  %v390_v17 = vld [vmem:[%s8770_s20 + $0x18] sm:$0xff]  ;;  %v8357_v18 = vld [vmem:[%s11126_s3 + $0x40] ss:$8 sps:$4 sm:$0xff]   ;;  %11225 = vst [vmem:[#allocation13_spill] sm:$0xff] %v8932_v51 }
  0x4e   : > { %1268 = vmatpush1.bf16.msra.mxu0 %v8345_v9  ;;  %7680 = vmatpush1.bf16.msra.mxu1 %v8345_v9  ;;  %v8358_v19 = vld [vmem:[%s11126_s3 + $0x54] ss:$8 sps:$4 sm:$0xff]   ;;  %v392_v20 = vld [vmem:[%s8770_s20 + $0x28] sm:$0xff]  ;;  %v8360_v21 = vld [vmem:[%s11126_s3 + $0x50] ss:$8 sps:$4 sm:$0xff]   ;;  %v8936_v54 = vsub.s32 1, %v8932_v51 }
  0x4f   : > { %821 = vperm.xlu0 %8290, %v389_v4   ;;  %621 = vperm.xlu1 %8289, %v388_v5   ;;  %v8361_v22 = vld [vmem:[%s11126_s3 + $0x64] ss:$8 sps:$4 sm:$0xff]   ;;  %v394_v23 = vld [vmem:[%s8770_s20 + $0x38] sm:$0xff]  ;;  %v8363_v24 = vld [vmem:[%s11126_s3 + $0x60] ss:$8 sps:$4 sm:$0xff]   ;;  %v8939_v55 = vsub.s32 0, %v8932_v51 }
  0x50   : > { %1269 = vmatprep.subr.bf16.mxu0 %v8346_v10  ;;  %7673 = vmatprep.subr.bf16.mxu1 %v8346_v10  ;;  %v8364_v25 = vld [vmem:[%s11126_s3 + $0x74] ss:$8 sps:$4 sm:$0xff]   ;;  %v396_v26 = vld [vmem:[%s8770_s20 + $0x48] sm:$0xff]  ;;  %v8366_v27 = vld [vmem:[%s11126_s3 + $0x70] ss:$8 sps:$4 sm:$0xff]   ;;  %11226 = vst [vmem:[#allocation14_spill] sm:$0xff] %v8936_v54 }
  0x51   : > { %v8844_v28 = vld [vmem:[%s8770_s20 + $0x58] sm:$0xff]  ;;  %v8851_v29 = vld [vmem:[%s8770_s20 + $0x68] sm:$0xff]  ;;  %v393_v31 = vld [vmem:[%s8770_s20 + $0x30] sm:$0xff]  ;;  %11227 = vst [vmem:[#allocation15_spill] sm:$0xff] %v8939_v55  ;;  %v8949_v58 = vsub.s32 2, %v8932_v51  ;;  %p7665_p13 = scmp.ne.s32.totalorder %s8575_s12, 1 }
  0x52   : > { %1270 = vmatpush1.bf16.msra.mxu0 %v8348_v11  ;;  %7681 = vmatpush1.bf16.msra.mxu1 %v8348_v11  ;;  %v8855_v30 = vld [vmem:[%s8770_s20 + $0x78] sm:$0xff]  ;;  %v395_v32 = vld [vmem:[%s8770_s20 + $0x40] sm:$0xff]  ;;  %v397_v33 = vld [vmem:[%s8770_s20 + $0x50] sm:$0xff] }
  0x53   : > { %829 = vperm.xlu0 %8290, %v8785_v8   ;;  %8291 = vset.pattern.permute.xlu1 %v8597_v2  ;;  %v399_v34 = vld [vmem:[%s8770_s20 + $0x60] sm:$0xff]  ;;  %v401_v35 = vld [vmem:[%s8770_s20 + $0x70] sm:$0xff]  ;;  %v8883_v39 = vld [vmem:[%s8770_s20 + $0x88] sm:$0xff]  ;;  %11228 = vst [vmem:[#allocation16_spill] sm:$0xff] %v8949_v58 }
  0x54   : > { %817 = vperm.xlu1 %8291, %v388_v5   ;;  %1271 = vmatprep.subr.bf16.mxu0 %v8349_v12  ;;  %v8869_v36 = vld [vmem:[%s8770_s20 + $0x80] sm:$0xff]  ;;  %v8874_v37 = vld [vmem:[%s8770_s20 + $0x90] sm:$0xff]  ;;  %v8889_v40 = vld [vmem:[%s8770_s20 + $0x98] sm:$0xff] }
  0x55   : > { %7674 = vmatprep.subr.bf16.mxu1 %v8349_v12  ;;  %v8879_v38 = vld [vmem:[%s8770_s20 + $0xa0] sm:$0xff]  ;;  %v8893_v41 = vld [vmem:[%s8770_s20 + $0xa8] sm:$0xff]  ;;  %v8898_v42 = vld [vmem:[%s8770_s20 + $0xb8] sm:$0xff] }
  0x56   : > { %1272 = vmatpush1.bf16.msra.mxu0 %v8351_v13  ;;  %7682 = vmatpush1.bf16.msra.mxu1 %v8351_v13  ;;  %v8903_v43 = vld [vmem:[%s8770_s20 + $0xc8] sm:$0xff]  ;;  %v8908_v44 = vld [vmem:[%s8770_s20 + $0xd8] sm:$0xff]  ;;  %v8914_v45 = vld [vmem:[%s8770_s20 + $0xb0] sm:$0xff] }
  0x57   : > { %8297 = vset.pattern.permute.xlu0 %v8599_v6  ;;  %1273 = vmatprep.subr.bf16.mxu0 %v8352_v14  ;;  %v8920_v46 = vld [vmem:[%s8770_s20 + $0xc0] sm:$0xff]  ;;  %v8925_v47 = vld [vmem:[%s8770_s20 + $0xd0] sm:$0xff] }
  0x58   : > { %422 = vperm.xlu0 %8297, %v387_v1   ;;  %8292 = vset.pattern.permute.xlu1 %v8599_v6  ;;  %v8942_v56 = vld [vmem:[%s8770_s20 + $0xe0] sm:$0xff] }
  0x59   : > { %432 = vperm.xlu1 %8292, %v389_v4   ;;  %7675 = vmatprep.subr.bf16.mxu1 %v8352_v14  ;;  %v419_v57 = vld [vmem:[%s11124_s1] sm:$0x7] }
  0x5a   : > { %1274 = vmatpush1.bf16.msra.mxu0 %v8354_v15  ;;  %7683 = vmatpush1.bf16.msra.mxu1 %v8354_v15  ;;  %v8954_v61 = vrot.slane %v419_v57, %v8936_v54  ;;  %v8958_v62 = vrot.slane %v419_v57, %v8939_v55  ;;  %v8962_v63 = vrot.slane %v419_v57, %v8949_v58  ;;  %v8976_v10 = vld [vmem:[%s11125_s2] ss:$0 sm:$0xff] }
  0x5b   : > { %1275 = vmatprep.subr.bf16.mxu0 %v8355_v16  ;;  %7676 = vmatprep.subr.bf16.mxu1 %v8355_v16 }
  0x5c   : > { %427 = vperm.xlu0 %8297, %v388_v5  }
  0x5d   : > { %8293 = vset.pattern.permute.xlu1 %v8598_v3 }
  0x5e   : > { %625 = vperm.xlu1 %8293, %v389_v4   ;;  %1276 = vmatpush1.bf16.msra.mxu0 %v8357_v18 }
  0x5f   : > { %1277 = vmatprep.subr.bf16.mxu0 %v8358_v19  ;;  %7684 = vmatpush1.bf16.msra.mxu1 %v8357_v18 }
  0x60   : > { %437 = vperm.xlu0 %8297, %v390_v17   ;;  %7677 = vmatprep.subr.bf16.mxu1 %v8358_v19 }
  0x62   : > { %629 = vperm.xlu1 %8293, %v390_v17   ;;  %1278 = vmatpush1.bf16.msra.mxu0 %v8360_v21 }
  0x63   : > { %1279 = vmatprep.subr.bf16.mxu0 %v8361_v22  ;;  %7685 = vmatpush1.bf16.msra.mxu1 %v8360_v21 }
  0x64   : > { %447 = vperm.xlu0 %8297, %v392_v20   ;;  %7678 = vmatprep.subr.bf16.mxu1 %v8361_v22 }
  0x66   : > { %8294 = vset.pattern.permute.xlu1 %v8597_v2  ;;  %1280 = vmatpush1.bf16.msra.mxu0 %v8363_v24 }
  0x67   : > { %825 = vperm.xlu1 %8294, %v390_v17   ;;  %1281 = vmatprep.subr.bf16.mxu0 %v8364_v25 }
  0x68   : > { %457 = vperm.xlu0 %8297, %v394_v23   ;;  %7686 = vmatpush1.bf16.msra.mxu1 %v8363_v24 }
  0x69   : > { %7679 = vmatprep.subr.bf16.mxu1 %v8364_v25 }
  0x6a   : > { %1282 = vmatpush1.bf16.msra.mxu0 %v8366_v27 }
  0x6b   : > { %8295 = vset.pattern.permute.xlu1 %v8599_v6 }
  0x6c   : > { %442 = vperm.xlu1 %8295, %v8785_v8   ;;  %467 = vperm.xlu0 %8297, %v396_v26  }
  0x6d   : > { %7687 = vmatpush1.bf16.msra.mxu1 %v8366_v27 }
  0x70   : > { %8296 = vset.pattern.permute.xlu1 %v8598_v3  ;;  %477 = vperm.xlu0 %8297, %v8844_v28  }
  0x71   : > { %633 = vperm.xlu1 %8296, %v8785_v8   ;;  %v8970_v8 = vld [vmem:[%s8770_s20 + $0xe8] sm:$0xff] }
  0x74   : > { %487 = vperm.xlu0 %8297, %v8851_v29  }
  0x75   : > { %637 = vperm.xlu1 %8296, %v392_v20  }
  0x78   : > { %497 = vperm.xlu0 %8297, %v8855_v30  }
  0x79   : > { %8298 = vset.pattern.permute.xlu1 %v8597_v2 }
  0x7a   : > { %833 = vperm.xlu1 %8298, %v392_v20  }
  0x7c   : > { %8312 = vset.pattern.permute.xlu0 %v8597_v2 }
  0x7d   : > { %837 = vperm.xlu0 %8312, %v393_v31  }
  0x7e   : > { %8299 = vset.pattern.permute.xlu1 %v8599_v6 }
  0x7f   : > { %452 = vperm.xlu1 %8299, %v393_v31  }
  0x81   : > { %845 = vperm.xlu0 %8312, %v395_v32  }
  0x83   : > { %8300 = vset.pattern.permute.xlu1 %v8598_v3 }
  0x84   : > { %641 = vperm.xlu1 %8300, %v393_v31  }
  0x85   : > { %853 = vperm.xlu0 %8312, %v397_v33  }
  0x88   : > { %645 = vperm.xlu1 %8300, %v394_v23  }
  0x89   : > { %861 = vperm.xlu0 %8312, %v399_v34  }
  0x8c   : > { %8301 = vset.pattern.permute.xlu1 %v8597_v2 }
  0x8d   : > { %841 = vperm.xlu1 %8301, %v394_v23   ;;  %869 = vperm.xlu0 %8312, %v401_v35  }
  0x91   : > { %8302 = vset.pattern.permute.xlu1 %v8599_v6  ;;  %877 = vperm.xlu0 %8312, %v8869_v36  }
  0x92   : > { %462 = vperm.xlu1 %8302, %v395_v32  }
  0x95   : > { %885 = vperm.xlu0 %8312, %v8874_v37  }
  0x96   : > { %8303 = vset.pattern.permute.xlu1 %v8598_v3 }
  0x97   : > { %649 = vperm.xlu1 %8303, %v395_v32  }
  0x99   : > { %893 = vperm.xlu0 %8312, %v8879_v38  }
  0x9b   : > { %653 = vperm.xlu1 %8303, %v396_v26  }
  0x9d   : > { %8323 = vset.pattern.permute.xlu0 %v8599_v6 }
  0x9e   : > { %507 = vperm.xlu0 %8323, %v8883_v39  }
  0x9f   : > { %8304 = vset.pattern.permute.xlu1 %v8597_v2 }
  0xa0   : > { %849 = vperm.xlu1 %8304, %v396_v26  }
  0xa2   : > { %517 = vperm.xlu0 %8323, %v8889_v40  }
  0xa4   : > { %8305 = vset.pattern.permute.xlu1 %v8599_v6 }
  0xa5   : > { %472 = vperm.xlu1 %8305, %v397_v33  }
  0xa6   : > { %527 = vperm.xlu0 %8323, %v8893_v41  }
  0xa9   : > { %8306 = vset.pattern.permute.xlu1 %v8598_v3 }
  0xaa   : > { %657 = vperm.xlu1 %8306, %v397_v33   ;;  %537 = vperm.xlu0 %8323, %v8898_v42   ;;  %v8993_v33 = vld [vmem:[%s8770_s20 + $0xf8] sm:$0xff] }
  0xae   : > { %661 = vperm.xlu1 %8306, %v8844_v28   ;;  %547 = vperm.xlu0 %8323, %v8903_v43  }
  0xb2   : > { %8307 = vset.pattern.permute.xlu1 %v8597_v2  ;;  %557 = vperm.xlu0 %8323, %v8908_v44  }
  0xb3   : > { %857 = vperm.xlu1 %8307, %v8844_v28  }
  0xb6   : > { %8332 = vset.pattern.permute.xlu0 %v8597_v2 }
  0xb7   : > { %8308 = vset.pattern.permute.xlu1 %v8599_v6  ;;  %901 = vperm.xlu0 %8332, %v8914_v45  }
  0xb8   : > { %482 = vperm.xlu1 %8308, %v399_v34  }
  0xbb   : > { %909 = vperm.xlu0 %8332, %v8920_v46  }
  0xbc   : > { %8309 = vset.pattern.permute.xlu1 %v8598_v3 }
  0xbd   : > { %665 = vperm.xlu1 %8309, %v399_v34  }
  0xbf   : > { %917 = vperm.xlu0 %8332, %v8925_v47  }
  0xc1   : > { %669 = vperm.xlu1 %8309, %v8851_v29  }
  0xc3   : > { %925 = vperm.xlu0 %8332, %v8942_v56  }
  0xc5   : > { %8310 = vset.pattern.permute.xlu1 %v8597_v2 }
  0xc6   : > { %865 = vperm.xlu1 %8310, %v8851_v29  }
  0xc7   : > { %8337 = vset.pattern.permute.xlu0 %v8599_v6 }
  0xc8   : > { %567 = vperm.xlu0 %8337, %v8970_v8  }
  0xca   : > { %8311 = vset.pattern.permute.xlu1 %v8599_v6  ;;  %v618_v49 = vpop.permute.xlu1 %617  ;;  %v814_v50 = vpop.permute.xlu0 %813 }
  0xcb   : > { %492 = vperm.xlu1 %8311, %v401_v35   ;;  %v748_v1 = vmul.f32 %v8954_v61, %v618_v49  ;;  %v944_v4 = vmul.f32 %v8962_v63, %v814_v50 }
  0xcc   : > { %577 = vperm.xlu0 %8337, %v8993_v33  }
  0xce   : > { %v622_v52 = vpop.permute.xlu1 %621  ;;  %v822_v53 = vpop.permute.xlu0 %821 }
  0xcf   : > { %8313 = vset.pattern.permute.xlu1 %v8598_v3  ;;  %v749_v12 = vmul.f32 %v8954_v61, %v622_v52  ;;  %v946_v21 = vmul.f32 %v8962_v63, %v822_v53 }
  0xd0   : > { %673 = vperm.xlu1 %8313, %v401_v35   ;;  %8341 = vset.pattern.permute.xlu0 %v8597_v2 }
  0xd2   : > { %v8951_v59 = vpop.permute.xlu0 %829 }
  0xd3   : > { %v818_v60 = vpop.permute.xlu1 %817 }
  0xd4   : > { %677 = vperm.xlu1 %8313, %v8855_v30   ;;  %v945_v15 = vmul.f32 %v8962_v63, %v818_v60  ;;  %v9003_v60 = vld [vmem:[%s8770_s20 + $0xf0] sm:$0xff] }
  0xd5   : > { %933 = vperm.xlu0 %8341, %v9003_v60  }
  0xd7   : > { %v423_v0 = vpop.permute.xlu0 %422 }
  0xd8   : > { %v584_v5 = vmul.f32 %v8958_v62, %v423_v0  ;;  %8314 = vset.pattern.permute.xlu1 %v8597_v2  ;;  %v433_v7 = vpop.permute.xlu1 %432 }
  0xd9   : > { %873 = vperm.xlu1 %8314, %v8855_v30   ;;  %v586_v18 = vmul.f32 %v8958_v62, %v433_v7 }
  0xda   : > { %v780_v9 = vadd.f32 %v748_v1, %v584_v5 }
  0xdb   : > { %v428_v11 = vpop.permute.xlu0 %427 }
  0xdc   : > { %v976_v13 = vadd.f32 %v944_v4, %v780_v9  ;;  %v585_v14 = vmul.f32 %v8958_v62, %v428_v11 }
  0xdd   : > { %8315 = vset.pattern.permute.xlu1 %v8599_v6  ;;  %v626_v16 = vpop.permute.xlu1 %625 }
  0xde   : > { %v1015_v17 = vadd.f32 %v8976_v10, %v976_v13  ;;  %v781_v19 = vadd.f32 %v749_v12, %v585_v14  ;;  %v750_v20 = vmul.f32 %v8954_v61, %v626_v16  ;;  %502 = vperm.xlu1 %8315, %v8869_v36  }
  0xdf   : > { %v438_v22 = vpop.permute.xlu0 %437 }
  0xe0   : > { %v977_v23 = vadd.f32 %v945_v15, %v781_v19  ;;  %v782_v24 = vadd.f32 %v750_v20, %v586_v18  ;;  %v1079_v27 = vmul.f32 0.01, %v1015_v17  ;;  %v587_v29 = vmul.f32 %v8958_v62, %v438_v22 }
  0xe1   : > { %v630_v25 = vpop.permute.xlu1 %629  ;;  %vm1047_vm0 = vcmp.ge.f32.partialorder %v1015_v17, 0.0 }
  0xe2   : > { %v1016_v26 = vadd.f32 %v8976_v10, %v977_v23  ;;  %8316 = vset.pattern.permute.xlu1 %v8598_v3  ;;  %v978_v28 = vadd.f32 %v946_v21, %v782_v24  ;;  %v751_v30 = vmul.f32 %v8954_v61, %v630_v25  ;;  %v1111_v35 = vsel %vm1047_vm0, %v1015_v17, %v1079_v27 }
  0xe3   : > { %681 = vperm.xlu1 %8316, %v8869_v36   ;;  %v448_v31 = vpop.permute.xlu0 %447 }
  0xe4   : > { %vm1048_vm1 = vcmp.ge.f32.partialorder %v1016_v26, 0.0  ;;  %v1080_v32 = vmul.f32 0.01, %v1016_v26  ;;  %v1017_v49 = vadd.f32 %v8976_v10, %v978_v28  ;;  %v783_v50 = vadd.f32 %v751_v30, %v587_v29 }
  0xe5   : > { %v589_v19 = vmul.f32 %v8958_v62, %v448_v31 }
  0xe6   : > { %v826_v34 = vpop.permute.xlu1 %825  ;;  %v1112_v48 = vsel %vm1048_vm1, %v1016_v26, %v1080_v32  ;;  %v1081_v4 = vmul.f32 0.01, %v1017_v49  ;;  %vm1049_vm2 = vcmp.ge.f32.partialorder %v1017_v49, 0.0 }
  0xe7   : > { %v947_v52 = vmul.f32 %v8962_v63, %v826_v34  ;;  %685 = vperm.xlu1 %8316, %v8883_v39   ;;  %v1143_v36 = vpack.c.bf16 %v1112_v48, %v1111_v35  ;;  %v8999_v53 = vpop.permute.xlu0 %457 }
  0xe8   : > { %v1113_v9 = vsel %vm1049_vm2, %v1017_v49, %v1081_v4 }
  0xe9   : > { %v979_v57 = vadd.f32 %v947_v52, %v783_v50  ;;  %1300 = vmatmul.mubr.bf16.vlgmr.msra.gmra.mrb[0].mxu0 %v1143_v36  ;;  %v8369_v36 = vld [vmem:[%s11128_s5 + $0xc] ss:$16 sps:$4 sm:$0xff]  }
  0xea   : > { %1309 = vmatprep.mubr.bf16.mxu0 %v8599_v6  ;;  %2283 = vmatprep.subr.bf16.mxu0 %v8369_v36  ;;  %v8387_v36 = vld [vmem:[%s11128_s5 + $0xcc] ss:$16 sps:$4 sm:$0xff]  }
  0xeb   : > { %v1018_v0 = vadd.f32 %v8976_v10, %v979_v57  ;;  %8317 = vset.pattern.permute.xlu1 %v8597_v2  ;;  %v443_v1 = vpop.permute.xlu1 %442  ;;  %v9008_v5 = vpop.permute.xlu0 %467 }
  0xec   : > { %881 = vperm.xlu1 %8317, %v8883_v39   ;;  %v588_v15 = vmul.f32 %v8958_v62, %v443_v1  ;;  %v948_v39 = vmul.f32 %v8962_v63, %v8951_v59  ;;  %v591_v1 = vmul.f32 %v8958_v62, %v8999_v53 }
  0xed   : > { %vm1050_vm3 = vcmp.ge.f32.partialorder %v1018_v0, 0.0  ;;  %v1082_v7 = vmul.f32 0.01, %v1018_v0 }
  0xef   : > { %v1114_v11 = vsel %vm1050_vm3, %v1018_v0, %v1082_v7  ;;  %v9013_v14 = vpop.permute.xlu0 %477 }
  0xf0   : > { %8318 = vset.pattern.permute.xlu1 %v8599_v6  ;;  %v634_v12 = vpop.permute.xlu1 %633  ;;  %v1144_v13 = vpack.c.bf16 %v1114_v11, %v1113_v9  ;;  %v8372_v9 = vld [vmem:[%s11128_s5 + $0x2c] ss:$16 sps:$4 sm:$0xff]  }
  0xf1   : > { %v752_v16 = vmul.f32 %v8954_v61, %v634_v12  ;;  %512 = vperm.xlu1 %8318, %v8874_v37   ;;  %v8370_v12 = vld [vmem:[%s11128_s5 + $0x28] ss:$16 sps:$4 sm:$0xff]  }
  0xf2   : > { %1310 = vmatmul.mubr.bf16.gmra.mrb[4].mxu0 %v1144_v13 }
  0xf3   : > { %v784_v17 = vadd.f32 %v752_v16, %v588_v15  ;;  %1319 = vmatprep.mubr.bf16.mxu0 %v8599_v6  ;;  %v9025_v22 = vpop.permute.xlu0 %487 }
  0xf4   : > { %v638_v18 = vpop.permute.xlu1 %637 }
  0xf5   : > { %8319 = vset.pattern.permute.xlu1 %v8598_v3  ;;  %v980_v20 = vadd.f32 %v948_v39, %v784_v17  ;;  %v753_v21 = vmul.f32 %v8954_v61, %v638_v18  ;;  %v8375_v39 = vld [vmem:[%s11128_s5 + $0x4c] ss:$16 sps:$4 sm:$0xff]  }
  0xf6   : > { %689 = vperm.xlu1 %8319, %v8874_v37  }
  0xf7   : > { %v1019_v24 = vadd.f32 %v8976_v10, %v980_v20  ;;  %v785_v59 = vadd.f32 %v753_v21, %v589_v19  ;;  %v9030_v27 = vpop.permute.xlu0 %497  ;;  %v8378_v21 = vld [vmem:[%s11128_s5 + $0x6c] ss:$16 sps:$4 sm:$0xff]  }
  0xf9   : > { %v834_v23 = vpop.permute.xlu1 %833  ;;  %v1083_v30 = vmul.f32 0.01, %v1019_v24  ;;  %vm1051_vm4 = vcmp.ge.f32.partialorder %v1019_v24, 0.0 }
  0xfa   : > { %v949_v25 = vmul.f32 %v8962_v63, %v834_v23  ;;  %693 = vperm.xlu1 %8319, %v8889_v40   ;;  %v8376_v23 = vld [vmem:[%s11128_s5 + $0x68] ss:$16 sps:$4 sm:$0xff]  }
  0xfb   : > { %v1115_v32 = vsel %vm1051_vm4, %v1019_v24, %v1083_v30  ;;  %v8381_v30 = vld [vmem:[%s11128_s5 + $0x8c] ss:$16 sps:$4 sm:$0xff]  }
  0xfc   : > { %v981_v26 = vadd.f32 %v949_v25, %v785_v59  ;;  %v838_v31 = vpop.permute.xlu0 %837 }
  0xfd   : > { %v950_v52 = vmul.f32 %v8962_v63, %v838_v31  ;;  %v8379_v31 = vld [vmem:[%s11128_s5 + $0x88] ss:$16 sps:$4 sm:$0xff]  }
  0xfe   : > { %v1020_v28 = vadd.f32 %v8976_v10, %v981_v26  ;;  %8320 = vset.pattern.permute.xlu1 %v8597_v2  ;;  %v453_v29 = vpop.permute.xlu1 %452 }
  0xff   : > { %889 = vperm.xlu1 %8320, %v8889_v40   ;;  %v590_v49 = vmul.f32 %v8958_v62, %v453_v29  ;;  %v8367_v40 = vld [vmem:[%s11128_s5 + $0x8] ss:$16 sps:$4 sm:$0xff]  }
 0x100   : > { %vm1052_vm5 = vcmp.ge.f32.partialorder %v1020_v28, 0.0  ;;  %v1084_v37 = vmul.f32 0.01, %v1020_v28  ;;  %2284 = vmatpush1.bf16.msra.mxu0 %v8367_v40  ;;  %v846_v24 = vpop.permute.xlu0 %845 }
 0x101   : > { %2285 = vmatprep.subr.bf16.mxu0 %v8372_v9 }
 0x102   : > { %v1116_v34 = vsel %vm1052_vm5, %v1020_v28, %v1084_v37  ;;  %v952_v37 = vmul.f32 %v8962_v63, %v846_v24 }
 0x103   : > { %8321 = vset.pattern.permute.xlu1 %v8599_v6  ;;  %v642_v35 = vpop.permute.xlu1 %641  ;;  %v1145_v48 = vpack.c.bf16 %v1116_v34, %v1115_v32 }
 0x104   : > { %v754_v50 = vmul.f32 %v8954_v61, %v642_v35  ;;  %522 = vperm.xlu1 %8321, %v8879_v38   ;;  %2286 = vmatpush1.bf16.msra.mxu0 %v8370_v12  ;;  %v8384_v35 = vld [vmem:[%s11128_s5 + $0xac] ss:$16 sps:$4 sm:$0xff]   ;;  %v8388_v12 = vld [vmem:[%s11128_s5 + $0xe8] ss:$16 sps:$4 sm:$0xff]  }
 0x105   : > { %1320 = vmatmul.mubr.bf16.gmra.mrb[8].mxu0 %v1145_v48  ;;  %2287 = vmatprep.subr.bf16.mxu0 %v8375_v39  ;;  %v593_v48 = vmul.f32 %v8958_v62, %v9008_v5  ;;  %v8391_v39 = vld [vmem:[%s11128_s5 + $0x108] ss:$16 sps:$4 sm:$0xff]  }
 0x106   : > { %v786_v57 = vadd.f32 %v754_v50, %v590_v49  ;;  %1329 = vmatprep.mubr.bf16.mxu0 %v8599_v6 }
 0x107   : > { %v646_v0 = vpop.permute.xlu1 %645 }
 0x108   : > { %8322 = vset.pattern.permute.xlu1 %v8598_v3  ;;  %v982_v4 = vadd.f32 %v950_v52, %v786_v57  ;;  %v755_v7 = vmul.f32 %v8954_v61, %v646_v0  ;;  %v8382_v52 = vld [vmem:[%s11128_s5 + $0xa8] ss:$16 sps:$4 sm:$0xff]  }
 0x109   : > { %697 = vperm.xlu1 %8322, %v8879_v38   ;;  %v8373_v38 = vld [vmem:[%s11128_s5 + $0x48] ss:$16 sps:$4 sm:$0xff]  }
 0x10a   : > { %v1021_v13 = vadd.f32 %v8976_v10, %v982_v4  ;;  %v787_v15 = vadd.f32 %v755_v7, %v591_v1  ;;  %2288 = vmatpush1.bf16.msra.mxu0 %v8373_v38  ;;  %v8390_v4 = vld [vmem:[%s11128_s5 + $0xec] ss:$16 sps:$4 sm:$0xff]  }
 0x10b   : > { %2289 = vmatprep.subr.bf16.mxu0 %v8378_v21  ;;  %v8394_v21 = vld [vmem:[%s11128_s5 + $0x128] ss:$16 sps:$4 sm:$0xff]  }
 0x10c   : > { %v842_v11 = vpop.permute.xlu1 %841  ;;  %v1085_v17 = vmul.f32 0.01, %v1021_v13  ;;  %vm1053_vm6 = vcmp.ge.f32.partialorder %v1021_v13, 0.0 }
 0x10d   : > { %v951_v16 = vmul.f32 %v8962_v63, %v842_v11  ;;  %701 = vperm.xlu1 %8322, %v8893_v41  }
 0x10e   : > { %v1117_v59 = vsel %vm1053_vm6, %v1021_v13, %v1085_v17  ;;  %2290 = vmatpush1.bf16.msra.mxu0 %v8376_v23  ;;  %v8396_v23 = vld [vmem:[%s11128_s5 + $0x12c] ss:$16 sps:$4 sm:$0xff]  }
 0x10f   : > { %v983_v53 = vadd.f32 %v951_v16, %v787_v15  ;;  %2291 = vmatprep.subr.bf16.mxu0 %v8381_v30  ;;  %v8393_v15 = vld [vmem:[%s11128_s5 + $0x10c] ss:$16 sps:$4 sm:$0xff]   ;;  %v854_v16 = vpop.permute.xlu0 %853 }
 0x111   : > { %v1022_v18 = vadd.f32 %v8976_v10, %v983_v53  ;;  %8324 = vset.pattern.permute.xlu1 %v8597_v2  ;;  %v463_v19 = vpop.permute.xlu1 %462 }
 0x112   : > { %897 = vperm.xlu1 %8324, %v8893_v41   ;;  %v592_v28 = vmul.f32 %v8958_v62, %v463_v19  ;;  %2292 = vmatpush1.bf16.msra.mxu0 %v8379_v31 }
 0x113   : > { %v1086_v20 = vmul.f32 0.01, %v1022_v18  ;;  %vm1054_vm7 = vcmp.ge.f32.partialorder %v1022_v18, 0.0  ;;  %2293 = vmatprep.subr.bf16.mxu0 %v8384_v35 }
 0x115   : > { %v1118_v25 = vsel %vm1054_vm7, %v1022_v18, %v1086_v20  ;;  %v954_v20 = vmul.f32 %v8962_v63, %v854_v16  ;;  %v597_v16 = vmul.f32 %v8958_v62, %v9025_v22 }
 0x116   : > { %8325 = vset.pattern.permute.xlu1 %v8599_v6  ;;  %v650_v26 = vpop.permute.xlu1 %649  ;;  %v1146_v41 = vpack.c.bf16 %v1118_v25, %v1117_v59  ;;  %2294 = vmatpush1.bf16.msra.mxu0 %v8382_v52  ;;  %v595_v25 = vmul.f32 %v8958_v62, %v9013_v14  ;;  %v8403_v52 = vld [vmem:[%s11128_s5 + $0x188] ss:$16 sps:$4 sm:$0xff]  }
 0x117   : > { %v756_v29 = vmul.f32 %v8954_v61, %v650_v26  ;;  %532 = vperm.xlu1 %8325, %v8914_v45   ;;  %2295 = vmatprep.subr.bf16.mxu0 %v8387_v36  ;;  %v862_v36 = vpop.permute.xlu0 %861 }
 0x118   : > { %1330 = vmatmul.mubr.bf16.gmra.mrb[12].mxu0 %v1146_v41 }
 0x119   : > { %v788_v32 = vadd.f32 %v756_v29, %v592_v28  ;;  %1339 = vmatprep.mubr.bf16.mxu0 %v8599_v6  ;;  %v8399_v28 = vld [vmem:[%s11128_s5 + $0x14c] ss:$16 sps:$4 sm:$0xff]   ;;  %v8397_v29 = vld [vmem:[%s11128_s5 + $0x148] ss:$16 sps:$4 sm:$0xff]  }
 0x11a   : > { %v654_v34 = vpop.permute.xlu1 %653 }
 0x11b   : > { %8326 = vset.pattern.permute.xlu1 %v8598_v3  ;;  %v984_v49 = vadd.f32 %v952_v37, %v788_v32  ;;  %v757_v50 = vmul.f32 %v8954_v61, %v654_v34  ;;  %v8400_v32 = vld [vmem:[%s11128_s5 + $0x168] ss:$16 sps:$4 sm:$0xff]  }
 0x11c   : > { %705 = vperm.xlu1 %8326, %v8914_v45   ;;  %v8385_v45 = vld [vmem:[%s11128_s5 + $0xc8] ss:$16 sps:$4 sm:$0xff]  }
 0x11d   : > { %v1023_v57 = vadd.f32 %v8976_v10, %v984_v49  ;;  %v789_v0 = vadd.f32 %v757_v50, %v593_v48  ;;  %2296 = vmatpush1.bf16.msra.mxu0 %v8385_v45  ;;  %v8405_v50 = vld [vmem:[%s11128_s5 + $0x18c] ss:$16 sps:$4 sm:$0xff]  }
 0x11e   : > { %2297 = vmatprep.subr.bf16.mxu0 %v8390_v4 }
 0x11f   : > { %v850_v40 = vpop.permute.xlu1 %849  ;;  %v1087_v7 = vmul.f32 0.01, %v1023_v57  ;;  %vm1055_vm8 = vcmp.ge.f32.partialorder %v1023_v57, 0.0 }
 0x120   : > { %v953_v5 = vmul.f32 %v8962_v63, %v850_v40  ;;  %709 = vperm.xlu1 %8326, %v8898_v42  }
 0x121   : > { %2298 = vmatpush1.bf16.msra.mxu0 %v8388_v12  ;;  %v1119_v53 = vsel %vm1055_vm8, %v1023_v57, %v1087_v7  ;;  %v8411_v12 = vld [vmem:[%s11128_s5 + $0x1cc] ss:$16 sps:$4 sm:$0xff]  }
 0x122   : > { %v985_v1 = vadd.f32 %v953_v5, %v789_v0  ;;  %2299 = vmatprep.subr.bf16.mxu0 %v8393_v15  ;;  %v8408_v5 = vld [vmem:[%s11128_s5 + $0x1ac] ss:$16 sps:$4 sm:$0xff]   ;;  %v8409_v15 = vld [vmem:[%s11128_s5 + $0x1c8] ss:$16 sps:$4 sm:$0xff]  }
 0x124   : > { %v1024_v9 = vadd.f32 %v8976_v10, %v985_v1  ;;  %8327 = vset.pattern.permute.xlu1 %v8597_v2  ;;  %v473_v11 = vpop.permute.xlu1 %472  ;;  %v8406_v1 = vld [vmem:[%s11128_s5 + $0x1a8] ss:$16 sps:$4 sm:$0xff]  }
 0x125   : > { %905 = vperm.xlu1 %8327, %v8898_v42   ;;  %v594_v18 = vmul.f32 %v8958_v62, %v473_v11  ;;  %2300 = vmatpush1.bf16.msra.mxu0 %v8391_v39  ;;  %v8414_v39 = vld [vmem:[%s11128_s5 + $0x4] ss:$16 sps:$4 sm:$0xff]  }
 0x126   : > { %v1088_v13 = vmul.f32 0.01, %v1024_v9  ;;  %vm1056_vm9 = vcmp.ge.f32.partialorder %v1024_v9, 0.0  ;;  %2301 = vmatprep.subr.bf16.mxu0 %v8396_v23  ;;  %2090 = vmatprep.subr.bf16.mxu1 %v8414_v39 }
 0x128   : > { %v1120_v38 = vsel %vm1056_vm9, %v1024_v9, %v1088_v13  ;;  %v956_v9 = vmul.f32 %v8962_v63, %v862_v36 }
 0x129   : > { %8328 = vset.pattern.permute.xlu1 %v8599_v6  ;;  %v658_v17 = vpop.permute.xlu1 %657  ;;  %v1147_v42 = vpack.c.bf16 %v1120_v38, %v1119_v53  ;;  %2302 = vmatpush1.bf16.msra.mxu0 %v8394_v21 }
 0x12a   : > { %v758_v19 = vmul.f32 %v8954_v61, %v658_v17  ;;  %542 = vperm.xlu1 %8328, %v8920_v46   ;;  %2303 = vmatprep.subr.bf16.mxu0 %v8399_v28  ;;  %v8417_v17 = vld [vmem:[%s11128_s5 + $0x1ec] ss:$16 sps:$4 sm:$0xff]  }
 0x12b   : > { %1340 = vmatmul.mubr.bf16.gmra.mrb[16].mxu0 %v1147_v42  ;;  %v8415_v42 = vld [vmem:[%s11128_s5 + $0x1e8] ss:$16 sps:$4 sm:$0xff]  }
 0x12c   : > { %v790_v24 = vadd.f32 %v758_v19, %v594_v18  ;;  %1349 = vmatprep.mubr.bf16.mxu0 %v8599_v6 }
 0x12d   : > { %v662_v59 = vpop.permute.xlu1 %661  ;;  %2304 = vmatpush1.bf16.msra.mxu0 %v8397_v29 }
 0x12e   : > { %8329 = vset.pattern.permute.xlu1 %v8598_v3  ;;  %v986_v26 = vadd.f32 %v954_v20, %v790_v24  ;;  %v759_v41 = vmul.f32 %v8954_v61, %v662_v59 }
 0x12f   : > { %713 = vperm.xlu1 %8329, %v8920_v46   ;;  %v8402_v46 = vld [vmem:[%s11128_s5 + $0x16c] ss:$16 sps:$4 sm:$0xff]  }
 0x130   : > { %v1025_v37 = vadd.f32 %v8976_v10, %v986_v26  ;;  %v791_v31 = vadd.f32 %v759_v41, %v595_v25  ;;  %2305 = vmatprep.subr.bf16.mxu0 %v8402_v46  ;;  %v870_v25 = vpop.permute.xlu0 %869 }
 0x131   : > { %2306 = vmatpush1.bf16.msra.mxu0 %v8400_v32  ;;  %v599_v32 = vmul.f32 %v8958_v62, %v9030_v27 }
 0x132   : > { %v858_v30 = vpop.permute.xlu1 %857  ;;  %v1089_v35 = vmul.f32 0.01, %v1025_v37  ;;  %vm1057_vm10 = vcmp.ge.f32.partialorder %v1025_v37, 0.0  ;;  %2307 = vmatprep.subr.bf16.mxu0 %v8405_v50 }
 0x133   : > { %v955_v14 = vmul.f32 %v8962_v63, %v858_v30  ;;  %717 = vperm.xlu1 %8329, %v8903_v43  }
 0x134   : > { %v1121_v57 = vsel %vm1057_vm10, %v1025_v37, %v1089_v35  ;;  %v878_v46 = vpop.permute.xlu0 %877 }
 0x135   : > { %v987_v34 = vadd.f32 %v955_v14, %v791_v31  ;;  %2308 = vmatpush1.bf16.msra.mxu0 %v8403_v52  ;;  %v958_v31 = vmul.f32 %v8962_v63, %v870_v25 }
 0x136   : > { %2309 = vmatprep.subr.bf16.mxu0 %v8408_v5 }
 0x137   : > { %v1026_v48 = vadd.f32 %v8976_v10, %v987_v34  ;;  %8330 = vset.pattern.permute.xlu1 %v8597_v2  ;;  %v483_v49 = vpop.permute.xlu1 %482 }
 0x138   : > { %913 = vperm.xlu1 %8330, %v8903_v43   ;;  %v596_v4 = vmul.f32 %v8958_v62, %v483_v49 }
 0x139   : > { %v1090_v40 = vmul.f32 0.01, %v1026_v48  ;;  %vm1058_vm11 = vcmp.ge.f32.partialorder %v1026_v48, 0.0  ;;  %2310 = vmatpush1.bf16.msra.mxu0 %v8406_v1 }
 0x13a   : > { %2311 = vmatprep.subr.bf16.mxu0 %v8411_v12 }
 0x13b   : > { %v1122_v0 = vsel %vm1058_vm11, %v1026_v48, %v1090_v40  ;;  %v886_v40 = vpop.permute.xlu0 %885 }
 0x13c   : > { %8331 = vset.pattern.permute.xlu1 %v8599_v6  ;;  %v666_v45 = vpop.permute.xlu1 %665  ;;  %v1148_v43 = vpack.c.bf16 %v1122_v0, %v1121_v57 }
 0x13d   : > { %v760_v7 = vmul.f32 %v8954_v61, %v666_v45  ;;  %552 = vperm.xlu1 %8331, %v8925_v47   ;;  %2312 = vmatpush1.bf16.msra.mxu0 %v8409_v15 }
 0x13e   : > { %1350 = vmatmul.mubr.bf16.gmra.mrb[20].mxu0 %v1148_v43  ;;  %2313 = vmatprep.subr.bf16.mxu0 %v8417_v17 }
 0x13f   : > { %v792_v11 = vadd.f32 %v760_v7, %v596_v4  ;;  %1359 = vmatprep.mubr.bf16.mxu0 %v8599_v6  ;;  %v9219_v5 = vpop.permute.xlu0 %893 }
 0x140   : > { %v670_v13 = vpop.permute.xlu1 %669 }
 0x141   : > { %8333 = vset.pattern.permute.xlu1 %v8598_v3  ;;  %v988_v53 = vadd.f32 %v956_v9, %v792_v11  ;;  %v761_v38 = vmul.f32 %v8954_v61, %v670_v13  ;;  %2314 = vmatpush1.bf16.msra.mxu0 %v8415_v42  ;;  %v960_v11 = vmul.f32 %v8962_v63, %v878_v46  ;;  %v8426_v46 = vld [vmem:[%s11128_s5 + $0x64] ss:$16 sps:$4 sm:$0xff]  }
 0x142   : > { %721 = vperm.xlu1 %8333, %v8925_v47  }
 0x143   : > { %v1027_v22 = vadd.f32 %v8976_v10, %v988_v53  ;;  %v793_v19 = vadd.f32 %v761_v38, %v597_v16  ;;  %v508_v12 = vpop.permute.xlu0 %507 }
 0x144   : > { %v601_v16 = vmul.f32 %v8958_v62, %v508_v12 }
 0x145   : > { %v866_v18 = vpop.permute.xlu1 %865  ;;  %v1091_v21 = vmul.f32 0.01, %v1027_v22  ;;  %vm1059_vm12 = vcmp.ge.f32.partialorder %v1027_v22, 0.0 }
 0x146   : > { %v957_v47 = vmul.f32 %v8962_v63, %v866_v18  ;;  %725 = vperm.xlu1 %8333, %v8908_v44  }
 0x147   : > { %v1123_v26 = vsel %vm1059_vm12, %v1027_v22, %v1091_v21  ;;  %v8412_v21 = vld [vmem:[%s11128_s5] ss:$16 sps:$4 sm:$0xff]  }
 0x148   : > { %v989_v20 = vadd.f32 %v957_v47, %v793_v19 }
 0x14a   : > { %v1028_v23 = vadd.f32 %v8976_v10, %v989_v20  ;;  %8334 = vset.pattern.permute.xlu1 %v8597_v2  ;;  %v493_v24 = vpop.permute.xlu1 %492 }
 0x14b   : > { %921 = vperm.xlu1 %8334, %v8908_v44   ;;  %v598_v30 = vmul.f32 %v8958_v62, %v493_v24 }
 0x14c   : > { %v1092_v59 = vmul.f32 0.01, %v1028_v23  ;;  %vm1060_vm13 = vcmp.ge.f32.partialorder %v1028_v23, 0.0 }
 0x14e   : > { %v1124_v41 = vsel %vm1060_vm13, %v1028_v23, %v1092_v59  ;;  %v8420_v59 = vld [vmem:[%s11128_s5 + $0x24] ss:$16 sps:$4 sm:$0xff]  }
 0x14f   : > { %8335 = vset.pattern.permute.xlu1 %v8599_v6  ;;  %v674_v28 = vpop.permute.xlu1 %673  ;;  %v1149_v29 = vpack.c.bf16 %v1124_v41, %v1123_v26  ;;  %v518_v41 = vpop.permute.xlu0 %517 }
 0x150   : > { %v762_v37 = vmul.f32 %v8954_v61, %v674_v28  ;;  %562 = vperm.xlu1 %8335, %v8942_v56   ;;  %v8418_v28 = vld [vmem:[%s11128_s5 + $0x20] ss:$16 sps:$4 sm:$0xff]  }
 0x151   : > { %1360 = vmatmul.mubr.bf16.gmra.mrb[24].mxu0 %v1149_v29 }
 0x152   : > { %v794_v44 = vadd.f32 %v762_v37, %v598_v30  ;;  %1369 = vmatprep.mubr.bf16.mxu0 %v8599_v6  ;;  %v8423_v30 = vld [vmem:[%s11128_s5 + $0x44] ss:$16 sps:$4 sm:$0xff]  }
 0x153   : > { %v678_v14 = vpop.permute.xlu1 %677 }
 0x154   : > { %8336 = vset.pattern.permute.xlu1 %v8598_v3  ;;  %v990_v34 = vadd.f32 %v958_v31, %v794_v44  ;;  %v763_v35 = vmul.f32 %v8954_v61, %v678_v14  ;;  %v603_v31 = vmul.f32 %v8958_v62, %v518_v41  ;;  %v8421_v14 = vld [vmem:[%s11128_s5 + $0x40] ss:$16 sps:$4 sm:$0xff]  }
 0x155   : > { %729 = vperm.xlu1 %8336, %v8942_v56   ;;  %v8442_v41 = vld [vmem:[%s11128_s5 + $0x120] ss:$16 sps:$4 sm:$0xff]  }
 0x156   : > { %v1029_v49 = vadd.f32 %v8976_v10, %v990_v34  ;;  %v795_v50 = vadd.f32 %v763_v35, %v599_v32 }
 0x158   : > { %v874_v48 = vpop.permute.xlu1 %873  ;;  %v1093_v57 = vmul.f32 0.01, %v1029_v49  ;;  %vm1061_vm14 = vcmp.ge.f32.partialorder %v1029_v49, 0.0 }
 0x159   : > { %v959_v52 = vmul.f32 %v8962_v63, %v874_v48  ;;  %733 = vperm.xlu1 %8336, %v8970_v8  }
 0x15a   : > { %v1125_v45 = vsel %vm1061_vm14, %v1029_v49, %v1093_v57  ;;  %v8424_v49 = vld [vmem:[%s11128_s5 + $0x60] ss:$16 sps:$4 sm:$0xff]  }
 0x15b   : > { %v991_v36 = vadd.f32 %v959_v52, %v795_v50  ;;  %v8429_v52 = vld [vmem:[%s11128_s5 + $0x84] ss:$16 sps:$4 sm:$0xff]  }
 0x15d   : > { %v1030_v0 = vadd.f32 %v8976_v10, %v991_v36  ;;  %8338 = vset.pattern.permute.xlu1 %v8597_v2  ;;  %v503_v27 = vpop.permute.xlu1 %502 }
 0x15e   : > { %929 = vperm.xlu1 %8338, %v8970_v8   ;;  %v600_v7 = vmul.f32 %v8958_v62, %v503_v27  ;;  %v8427_v27 = vld [vmem:[%s11128_s5 + $0x80] ss:$16 sps:$4 sm:$0xff]  }
 0x15f   : > { %v1094_v56 = vmul.f32 0.01, %v1030_v0  ;;  %vm1062_vm15 = vcmp.ge.f32.partialorder %v1030_v0, 0.0 }
 0x161   : > { %v1126_v43 = vsel %vm1062_vm15, %v1030_v0, %v1094_v56 }
 0x162   : > { %8339 = vset.pattern.permute.xlu1 %v8599_v6  ;;  %v682_v1 = vpop.permute.xlu1 %681  ;;  %v1150_v4 = vpack.c.bf16 %v1126_v43, %v1125_v45  ;;  %v8432_v45 = vld [vmem:[%s11128_s5 + $0xa4] ss:$16 sps:$4 sm:$0xff]  }
 0x163   : > { %v764_v9 = vmul.f32 %v8954_v61, %v682_v1  ;;  %572 = vperm.xlu1 %8339, %v9003_v60  }
 0x164   : > { %1370 = vmatmul.mubr.bf16.gmra.mrb[28].mxu0 %v1150_v4 }
 0x165   : > { %v796_v8 = vadd.f32 %v764_v9, %v600_v7 }
 0x166   : > { %v686_v13 = vpop.permute.xlu1 %685 }
 0x167   : > { %8340 = vset.pattern.permute.xlu1 %v8598_v3  ;;  %v992_v15 = vadd.f32 %v960_v11, %v796_v8  ;;  %v765_v53 = vmul.f32 %v8954_v61, %v686_v13  ;;  %v8430_v11 = vld [vmem:[%s11128_s5 + $0xa0] ss:$16 sps:$4 sm:$0xff]   ;;  %v8435_v13 = vld [vmem:[%s11128_s5 + $0xc4] ss:$16 sps:$4 sm:$0xff]  }
 0x168   : > { %737 = vperm.xlu1 %8340, %v9003_v60  }
 0x169   : > { %v1031_v39 = vadd.f32 %v8976_v10, %v992_v15  ;;  %v797_v17 = vadd.f32 %v765_v53, %v601_v16  ;;  %v964_v15 = vmul.f32 %v8962_v63, %v9219_v5 }
 0x16b   : > { %v882_v38 = vpop.permute.xlu1 %881  ;;  %v1095_v19 = vmul.f32 0.01, %v1031_v39  ;;  %vm1063_vm0 = vcmp.ge.f32.partialorder %v1031_v39, 0.0 }
 0x16c   : > { %v961_v42 = vmul.f32 %v8962_v63, %v882_v38  ;;  %741 = vperm.xlu1 %8340, %v8993_v33   ;;  %v8433_v38 = vld [vmem:[%s11128_s5 + $0xc0] ss:$16 sps:$4 sm:$0xff]  }
 0x16d   : > { %v1127_v60 = vsel %vm1063_vm0, %v1031_v39, %v1095_v19  ;;  %v8438_v39 = vld [vmem:[%s11128_s5 + $0xe4] ss:$16 sps:$4 sm:$0xff]  }
 0x16e   : > { %v993_v18 = vadd.f32 %v961_v42, %v797_v17  ;;  %v8441_v19 = vld [vmem:[%s11128_s5 + $0x104] ss:$16 sps:$4 sm:$0xff]  }
 0x170   : > { %v1032_v22 = vadd.f32 %v8976_v10, %v993_v18  ;;  %8342 = vset.pattern.permute.xlu1 %v8597_v2  ;;  %v513_v3 = vpop.permute.xlu1 %512 }
 0x171   : > { %937 = vperm.xlu1 %8342, %v8993_v33   ;;  %v602_v2 = vmul.f32 %v8958_v62, %v513_v3  ;;  %v962_v33 = vmul.f32 %v8962_v63, %v886_v40  ;;  %v528_v40 = vpop.permute.xlu0 %527 }
 0x172   : > { %v1096_v47 = vmul.f32 0.01, %v1032_v22  ;;  %vm1064_vm1 = vcmp.ge.f32.partialorder %v1032_v22, 0.0  ;;  %v605_v42 = vmul.f32 %v8958_v62, %v528_v40 }
 0x174   : > { %v1128_v20 = vsel %vm1064_vm1, %v1032_v22, %v1096_v47  ;;  %v8436_v22 = vld [vmem:[%s11128_s5 + $0xe0] ss:$16 sps:$4 sm:$0xff]  }
 0x175   : > { %v690_v23 = vpop.permute.xlu1 %689  ;;  %v1151_v24 = vpack.c.bf16 %v1128_v20, %v1127_v60  ;;  %v538_v9 = vpop.permute.xlu0 %537 }
 0x176   : > { %v766_v25 = vmul.f32 %v8954_v61, %v690_v23 }
 0x177   : > { %1380 = vmatmul.mubr.bf16.vlgmr.msra.gmra.mrb[0].mxu1 %v1151_v24  ;;  %v8439_v24 = vld [vmem:[%s11128_s5 + $0x100] ss:$16 sps:$4 sm:$0xff]  }
 0x178   : > { %v798_v26 = vadd.f32 %v766_v25, %v602_v2  ;;  %1389 = vmatprep.mubr.bf16.mxu1 %v8599_v6  ;;  %2091 = vmatpush1.bf16.msra.mxu1 %v8412_v21 }
 0x179   : > { %v694_v29 = vpop.permute.xlu1 %693  ;;  %2092 = vmatprep.subr.bf16.mxu1 %v8420_v59  ;;  %v9294_v18 = vpop.permute.xlu0 %547  ;;  %v8444_v59 = vld [vmem:[%s11128_s5 + $0x124] ss:$16 sps:$4 sm:$0xff]  }
 0x17a   : > { %v994_v37 = vadd.f32 %v962_v33, %v798_v26  ;;  %v767_v44 = vmul.f32 %v8954_v61, %v694_v29 }
 0x17c   : > { %2093 = vmatpush1.bf16.msra.mxu1 %v8418_v28  ;;  %v1033_v34 = vadd.f32 %v8976_v10, %v994_v37  ;;  %v799_v35 = vadd.f32 %v767_v44, %v603_v31  ;;  %v8447_v28 = vld [vmem:[%s11128_s5 + $0x144] ss:$16 sps:$4 sm:$0xff]  }
 0x17d   : > { %2094 = vmatprep.subr.bf16.mxu1 %v8423_v30  ;;  %v9304_v23 = vpop.permute.xlu0 %557 }
 0x17e   : > { %v890_v32 = vpop.permute.xlu1 %889  ;;  %v1097_v0 = vmul.f32 0.01, %v1033_v34  ;;  %vm1065_vm2 = vcmp.ge.f32.partialorder %v1033_v34, 0.0 }
 0x17f   : > { %v963_v48 = vmul.f32 %v8962_v63, %v890_v32  ;;  %v8445_v32 = vld [vmem:[%s11128_s5 + $0x140] ss:$16 sps:$4 sm:$0xff]  }
 0x180   : > { %2095 = vmatpush1.bf16.msra.mxu1 %v8421_v14  ;;  %v1129_v43 = vsel %vm1065_vm2, %v1033_v34, %v1097_v0 }
 0x181   : > { %v995_v50 = vadd.f32 %v963_v48, %v799_v35  ;;  %2096 = vmatprep.subr.bf16.mxu1 %v8426_v46  ;;  %v902_v29 = vpop.permute.xlu0 %901  ;;  %v8450_v35 = vld [vmem:[%s11128_s5 + $0x164] ss:$16 sps:$4 sm:$0xff]  }
 0x182   : > { %v966_v34 = vmul.f32 %v8962_v63, %v902_v29 }
 0x183   : > { %v1034_v36 = vadd.f32 %v8976_v10, %v995_v50  ;;  %v523_v57 = vpop.permute.xlu1 %522  ;;  %v8448_v50 = vld [vmem:[%s11128_s5 + $0x160] ss:$16 sps:$4 sm:$0xff]  }
 0x184   : > { %2097 = vmatpush1.bf16.msra.mxu1 %v8424_v49  ;;  %v604_v8 = vmul.f32 %v8958_v62, %v523_v57  ;;  %v8453_v57 = vld [vmem:[%s11128_s5 + $0x184] ss:$16 sps:$4 sm:$0xff]  }
 0x185   : > { %v1098_v56 = vmul.f32 0.01, %v1034_v36  ;;  %vm1066_vm3 = vcmp.ge.f32.partialorder %v1034_v36, 0.0  ;;  %2098 = vmatprep.subr.bf16.mxu1 %v8429_v52  ;;  %v607_v52 = vmul.f32 %v8958_v62, %v538_v9 }
 0x187   : > { %v1130_v1 = vsel %vm1066_vm3, %v1034_v36, %v1098_v56 }
 0x188   : > { %v698_v4 = vpop.permute.xlu1 %697  ;;  %v1152_v7 = vpack.c.bf16 %v1130_v1, %v1129_v43  ;;  %2099 = vmatpush1.bf16.msra.mxu1 %v8427_v27  ;;  %v8451_v27 = vld [vmem:[%s11128_s5 + $0x180] ss:$16 sps:$4 sm:$0xff]   ;;  %v8456_v1 = vld [vmem:[%s11128_s5 + $0x1a4] ss:$16 sps:$4 sm:$0xff]  }
 0x189   : > { %v768_v12 = vmul.f32 %v8954_v61, %v698_v4  ;;  %2100 = vmatprep.subr.bf16.mxu1 %v8432_v45 }
 0x18a   : > { %1390 = vmatmul.mubr.bf16.gmra.mrb[4].mxu1 %v1152_v7  ;;  %v8454_v7 = vld [vmem:[%s11128_s5 + $0x1a0] ss:$16 sps:$4 sm:$0xff]  }
 0x18b   : > { %v800_v16 = vadd.f32 %v768_v12, %v604_v8  ;;  %1399 = vmatprep.mubr.bf16.mxu1 %v8599_v6  ;;  %v8459_v12 = vld [vmem:[%s11128_s5 + $0x1c4] ss:$16 sps:$4 sm:$0xff]  }
 0x18c   : > { %v702_v53 = vpop.permute.xlu1 %701  ;;  %2101 = vmatpush1.bf16.msra.mxu1 %v8430_v11 }
 0x18d   : > { %2102 = vmatprep.subr.bf16.mxu1 %v8435_v13  ;;  %v996_v17 = vadd.f32 %v964_v15, %v800_v16  ;;  %v769_v5 = vmul.f32 %v8954_v61, %v702_v53  ;;  %v910_v15 = vpop.permute.xlu0 %909 }
 0x18f   : > { %v1035_v47 = vadd.f32 %v8976_v10, %v996_v17  ;;  %v801_v60 = vadd.f32 %v769_v5, %v605_v42  ;;  %v8462_v17 = vld [vmem:[%s11128_s5 + $0x1e4] ss:$16 sps:$4 sm:$0xff]  }
 0x190   : > { %2103 = vmatpush1.bf16.msra.mxu1 %v8433_v38  ;;  %v8457_v38 = vld [vmem:[%s11128_s5 + $0x1c0] ss:$16 sps:$4 sm:$0xff]  }
 0x191   : > { %v898_v3 = vpop.permute.xlu1 %897  ;;  %2104 = vmatprep.subr.bf16.mxu1 %v8438_v39  ;;  %v1099_v33 = vmul.f32 0.01, %v1035_v47  ;;  %vm1067_vm4 = vcmp.ge.f32.partialorder %v1035_v47, 0.0 }
 0x192   : > { %v965_v20 = vmul.f32 %v8962_v63, %v898_v3 }
 0x193   : > { %v1131_v30 = vsel %vm1067_vm4, %v1035_v47, %v1099_v33 }
 0x194   : > { %v997_v21 = vadd.f32 %v965_v20, %v801_v60  ;;  %2105 = vmatpush1.bf16.msra.mxu1 %v8436_v22  ;;  %v968_v22 = vmul.f32 %v8962_v63, %v910_v15  ;;  %v609_v20 = vmul.f32 %v8958_v62, %v9294_v18 }
 0x195   : > { %2106 = vmatprep.subr.bf16.mxu1 %v8441_v19  ;;  %v8460_v19 = vld [vmem:[%s11128_s5 + $0x1e0] ss:$16 sps:$4 sm:$0xff]  }
 0x196   : > { %v1036_v2 = vadd.f32 %v8976_v10, %v997_v21  ;;  %v533_v25 = vpop.permute.xlu1 %532 }
 0x197   : > { %v606_v14 = vmul.f32 %v8958_v62, %v533_v25 }
 0x198   : > { %v1100_v26 = vmul.f32 0.01, %v1036_v2  ;;  %vm1068_vm5 = vcmp.ge.f32.partialorder %v1036_v2, 0.0  ;;  %2107 = vmatpush1.bf16.msra.mxu1 %v8439_v24  ;;  %v1175_v24 = vld [vmem:[%s11127_s4] sm:$0x3] }
 0x199   : > { %2108 = vmatprep.subr.bf16.mxu1 %v8444_v59  ;;  %v9374_v59 = vld [vmem:[%s11125_s2] ss:$0 sm:$0xff]  ;;  %v9379_v18 = vrot.slane %v1175_v24, %v8939_v55 }
 0x19a   : > { %v1132_v37 = vsel %vm1068_vm5, %v1036_v2, %v1100_v26 }
 0x19b   : > { %v706_v31 = vpop.permute.xlu1 %705  ;;  %v1153_v44 = vpack.c.bf16 %v1132_v37, %v1131_v30 }
 0x19c   : > { %v770_v46 = vmul.f32 %v8954_v61, %v706_v31  ;;  %2109 = vmatpush1.bf16.msra.mxu1 %v8442_v41 }
 0x19d   : > { %1400 = vmatmul.mubr.bf16.gmra.mrb[8].mxu1 %v1153_v44  ;;  %2110 = vmatprep.subr.bf16.mxu1 %v8447_v28  ;;  %v9382_v28 = vrot.slane %v1175_v24, %v8936_v54 }
 0x19e   : > { %v802_v48 = vadd.f32 %v770_v46, %v606_v14  ;;  %1409 = vmatprep.mubr.bf16.mxu1 %v8599_v6 }
 0x19f   : > { %v710_v49 = vpop.permute.xlu1 %709 }
 0x1a0   : > { %2111 = vmatpush1.bf16.msra.mxu1 %v8445_v32  ;;  %v998_v40 = vadd.f32 %v966_v34, %v802_v48  ;;  %v771_v36 = vmul.f32 %v8954_v61, %v710_v49 }
 0x1a1   : > { %2112 = vmatprep.subr.bf16.mxu1 %v8450_v35 }
 0x1a2   : > { %v1037_v56 = vadd.f32 %v8976_v10, %v998_v40  ;;  %v803_v45 = vadd.f32 %v771_v36, %v607_v52  ;;  %v918_v36 = vpop.permute.xlu0 %917 }
 0x1a4   : > { %v906_v0 = vpop.permute.xlu1 %905  ;;  %2113 = vmatpush1.bf16.msra.mxu1 %v8448_v50  ;;  %v1101_v9 = vmul.f32 0.01, %v1037_v56  ;;  %vm1069_vm6 = vcmp.ge.f32.partialorder %v1037_v56, 0.0 }
 0x1a5   : > { %v967_v43 = vmul.f32 %v8962_v63, %v906_v0  ;;  %2114 = vmatprep.subr.bf16.mxu1 %v8453_v57 }
 0x1a6   : > { %v1133_v16 = vsel %vm1069_vm6, %v1037_v56, %v1101_v9  ;;  %v970_v9 = vmul.f32 %v8962_v63, %v918_v36 }
 0x1a7   : > { %v999_v4 = vadd.f32 %v967_v43, %v803_v45 }
 0x1a8   : > { %2115 = vmatpush1.bf16.msra.mxu1 %v8451_v27 }
 0x1a9   : > { %v1038_v11 = vadd.f32 %v8976_v10, %v999_v4  ;;  %v543_v8 = vpop.permute.xlu1 %542  ;;  %2116 = vmatprep.subr.bf16.mxu1 %v8456_v1 }
 0x1aa   : > { %v608_v42 = vmul.f32 %v8958_v62, %v543_v8 }
 0x1ab   : > { %v1102_v13 = vmul.f32 0.01, %v1038_v11  ;;  %vm1070_vm7 = vcmp.ge.f32.partialorder %v1038_v11, 0.0 }
 0x1ac   : > { %2117 = vmatpush1.bf16.msra.mxu1 %v8454_v7 }
 0x1ad   : > { %v1134_v53 = vsel %vm1070_vm7, %v1038_v11, %v1102_v13  ;;  %2118 = vmatprep.subr.bf16.mxu1 %v8459_v12 }
 0x1ae   : > { %v714_v39 = vpop.permute.xlu1 %713  ;;  %v1154_v10 = vpack.c.bf16 %v1134_v53, %v1133_v16 }
 0x1af   : > { %v772_v5 = vmul.f32 %v8954_v61, %v714_v39 }
 0x1b0   : > { %1410 = vmatmul.mubr.bf16.gmra.mrb[12].mxu1 %v1154_v10 }
 0x1b1   : > { %v804_v3 = vadd.f32 %v772_v5, %v608_v42  ;;  %1419 = vmatprep.mubr.bf16.mxu1 %v8599_v6  ;;  %2119 = vmatpush1.bf16.msra.mxu1 %v8457_v38 }
 0x1b2   : > { %v718_v47 = vpop.permute.xlu1 %717  ;;  %2120 = vmatprep.subr.bf16.mxu1 %v8462_v17 }
 0x1b3   : > { %v1000_v60 = vadd.f32 %v968_v22, %v804_v3  ;;  %v773_v21 = vmul.f32 %v8954_v61, %v718_v47 }
 0x1b5   : > { %2121 = vmatpush1.bf16.msra.mxu1 %v8460_v19  ;;  %v1039_v2 = vadd.f32 %v9374_v59, %v1000_v60  ;;  %v805_v33 = vadd.f32 %v773_v21, %v609_v20  ;;  %v611_v20 = vmul.f32 %v8958_v62, %v9304_v23 }
 0x1b7   : > { %v914_v25 = vpop.permute.xlu1 %913  ;;  %v1103_v29 = vmul.f32 0.01, %v1039_v2  ;;  %vm1071_vm8 = vcmp.ge.f32.partialorder %v1039_v2, 0.0 }
 0x1b8   : > { %v969_v26 = vmul.f32 %v8962_v63, %v914_v25 }
 0x1b9   : > { %v1135_v50 = vsel %vm1071_vm8, %v1039_v2, %v1103_v29 }
 0x1ba   : > { %v1001_v41 = vadd.f32 %v969_v26, %v805_v33 }
 0x1bc   : > { %v1040_v30 = vadd.f32 %v9374_v59, %v1001_v41  ;;  %v1301_v37 = vpop.f32.mrb[0].mxu0  ;;  %v553_v31 = vpop.permute.xlu1 %552 }
 0x1bd   : > { %v1302_v44 = vadd.f32 %v1301_v37, %v9379_v18  ;;  %v1303_v14 = vpop.f32.mrb[1].mxu0  ;;  %v610_v45 = vmul.f32 %v8958_v62, %v553_v31 }
 0x1be   : > { %v1104_v46 = vmul.f32 0.01, %v1040_v30  ;;  %v1304_v32 = vadd.f32 %v1303_v14, %v9382_v28  ;;  %v1305_v34 = vpop.f32.mrb[2].mxu0  ;;  %vm1072_vm9 = vcmp.ge.f32.partialorder %v1040_v30, 0.0 }
 0x1bf   : > { %v1524_v35 = vmul.f32 0.01, %v1302_v44  ;;  %v1306_v48 = vadd.f32 %v1305_v34, %v9379_v18  ;;  %v1307_v49 = vpop.f32.mrb[3].mxu0  ;;  %vm1460_vm10 = vcmp.ge.f32.partialorder %v1302_v44, 0.0 }
 0x1c0   : > { %v1525_v52 = vmul.f32 0.01, %v1304_v32  ;;  %v1308_v40 = vadd.f32 %v1307_v49, %v9382_v28  ;;  %v1136_v57 = vsel %vm1072_vm9, %v1040_v30, %v1104_v46  ;;  %vm1461_vm11 = vcmp.ge.f32.partialorder %v1304_v32, 0.0 }
 0x1c1   : > { %vm1462_vm12 = vcmp.ge.f32.partialorder %v1306_v48, 0.0  ;;  %v1526_v0 = vmul.f32 0.01, %v1306_v48  ;;  %v722_v27 = vpop.permute.xlu1 %721  ;;  %v1155_v56 = vpack.c.bf16 %v1136_v57, %v1135_v50  ;;  %v1588_v4 = vsel %vm1460_vm10, %v1302_v44, %v1524_v35  ;;  %v926_v35 = vpop.permute.xlu0 %925 }
 0x1c2   : > { %vm1463_vm13 = vcmp.ge.f32.partialorder %v1308_v40, 0.0  ;;  %v1527_v43 = vmul.f32 0.01, %v1308_v40  ;;  %v774_v1 = vmul.f32 %v8954_v61, %v722_v27  ;;  %v1589_v12 = vsel %vm1461_vm11, %v1304_v32, %v1525_v52 }
 0x1c3   : > { %v1590_v7 = vsel %vm1462_vm12, %v1306_v48, %v1526_v0  ;;  %1420 = vmatmul.mubr.bf16.gmra.mrb[16].mxu1 %v1155_v56 }
 0x1c4   : > { %v9392_v11 = vpack.c.bf16 %v1590_v7, %v1588_v4  ;;  %v806_v8 = vadd.f32 %v774_v1, %v610_v45  ;;  %v1591_v13 = vsel %vm1463_vm13, %v1308_v40, %v1527_v43  ;;  %1429 = vmatprep.mubr.bf16.mxu1 %v8599_v6  ;;  %v972_v45 = vmul.f32 %v8962_v63, %v926_v35 }
 0x1c5   : > { %v1311_v15 = vpop.f32.mrb[4].mxu0  ;;  %v726_v16 = vpop.permute.xlu1 %725  ;;  %v9395_v53 = vpack.c.bf16 %v1591_v13, %v1589_v12 }
 0x1c6   : > { %v1312_v38 = vadd.f32 %v1311_v15, %v9379_v18  ;;  %v1313_v39 = vpop.f32.mrb[5].mxu0  ;;  %v1002_v42 = vadd.f32 %v970_v9, %v806_v8  ;;  %v775_v5 = vmul.f32 %v8954_v61, %v726_v16  ;;  %v568_v0 = vpop.permute.xlu0 %567 }
 0x1c7   : > { %v1314_v10 = vadd.f32 %v1313_v39, %v9382_v28  ;;  %v1315_v17 = vpop.f32.mrb[6].mxu0  ;;  %2315 = vmatprep.mubr.bf16.mxu0 %v9395_v53  ;;  %v613_v8 = vmul.f32 %v8958_v62, %v568_v0 }
 0x1c8   : > { %v1317_v22 = vpop.f32.mrb[7].mxu0  ;;  %2316 = vmatmul.mubr.bf16.vlgmr.msra.gmra.mrb[32].mxu0 %v9392_v11  ;;  %v1528_v3 = vmul.f32 0.01, %v1312_v38  ;;  %v1316_v47 = vadd.f32 %v1315_v17, %v9379_v18  ;;  %vm1464_vm14 = vcmp.ge.f32.partialorder %v1312_v38, 0.0  ;;  %v1041_v25 = vadd.f32 %v9374_v59, %v1002_v42 }
 0x1c9   : > { %v1529_v19 = vmul.f32 0.01, %v1314_v10  ;;  %v1318_v60 = vadd.f32 %v1317_v22, %v9382_v28  ;;  %vm1465_vm15 = vcmp.ge.f32.partialorder %v1314_v10, 0.0  ;;  %v807_v33 = vadd.f32 %v775_v5, %v611_v20 }
 0x1ca   : > { %v922_v21 = vpop.permute.xlu1 %921  ;;  %vm1466_vm0 = vcmp.ge.f32.partialorder %v1316_v47, 0.0  ;;  %v1530_v24 = vmul.f32 0.01, %v1316_v47  ;;  %v1592_v30 = vsel %vm1464_vm14, %v1312_v38, %v1528_v3  ;;  %v1105_v46 = vmul.f32 0.01, %v1041_v25 }
 0x1cb   : > { %vm1467_vm1 = vcmp.ge.f32.partialorder %v1318_v60, 0.0  ;;  %v1531_v2 = vmul.f32 0.01, %v1318_v60  ;;  %v971_v26 = vmul.f32 %v8962_v63, %v922_v21  ;;  %v1593_v41 = vsel %vm1465_vm15, %v1314_v10, %v1529_v19 }
 0x1cc   : > { %v1594_v37 = vsel %vm1466_vm0, %v1316_v47, %v1530_v24  ;;  %vm1073_vm2 = vcmp.ge.f32.partialorder %v1041_v25, 0.0 }
 0x1cd   : > { %v1595_v29 = vsel %vm1467_vm1, %v1318_v60, %v1531_v2  ;;  %v1003_v31 = vadd.f32 %v971_v26, %v807_v33  ;;  %v9410_v23 = vpack.c.bf16 %v1594_v37, %v1592_v30  ;;  %v1137_v49 = vsel %vm1073_vm2, %v1041_v25, %v1105_v46  ;;  %v578_v25 = vpop.permute.xlu0 %577 }
 0x1ce   : > { %v9408_v44 = vpack.c.bf16 %v1595_v29, %v1593_v41 }
 0x1cf   : > { %v563_v14 = vpop.permute.xlu1 %562  ;;  %v1042_v32 = vadd.f32 %v9374_v59, %v1003_v31 }
 0x1d0   : > { %2325 = vmatprep.mubr.bf16.mxu0 %v9408_v44  ;;  %v612_v52 = vmul.f32 %v8958_v62, %v563_v14 }
 0x1d1   : > { %2326 = vmatmul.mubr.bf16.gmra.mrb[36].mxu0 %v9410_v23  ;;  %v1106_v34 = vmul.f32 0.01, %v1042_v32  ;;  %vm1074_vm3 = vcmp.ge.f32.partialorder %v1042_v32, 0.0  ;;  %v934_v37 = vpop.permute.xlu0 %933 }
 0x1d3   : > { %v1138_v50 = vsel %vm1074_vm3, %v1042_v32, %v1106_v34 }
 0x1d4   : > { %v730_v48 = vpop.permute.xlu1 %729  ;;  %v1156_v36 = vpack.c.bf16 %v1138_v50, %v1137_v49 }
 0x1d5   : > { %v776_v40 = vmul.f32 %v8954_v61, %v730_v48  ;;  %v974_v48 = vmul.f32 %v8962_v63, %v934_v37 }
 0x1d6   : > { %1430 = vmatmul.mubr.bf16.gmra.mrb[20].mxu1 %v1156_v36 }
 0x1d7   : > { %v808_v57 = vadd.f32 %v776_v40, %v612_v52  ;;  %1439 = vmatprep.mubr.bf16.mxu1 %v8599_v6 }
 0x1d8   : > { %v1321_v27 = vpop.f32.mrb[8].mxu0  ;;  %v734_v56 = vpop.permute.xlu1 %733 }
 0x1d9   : > { %v1322_v43 = vadd.f32 %v1321_v27, %v9379_v18  ;;  %v1323_v1 = vpop.f32.mrb[9].mxu0  ;;  %v1004_v9 = vadd.f32 %v972_v45, %v808_v57  ;;  %v777_v12 = vmul.f32 %v8954_v61, %v734_v56 }
 0x1da   : > { %v1324_v4 = vadd.f32 %v1323_v1, %v9382_v28  ;;  %v1325_v7 = vpop.f32.mrb[10].mxu0 }
 0x1db   : > { %v1327_v13 = vpop.f32.mrb[11].mxu0  ;;  %v1532_v15 = vmul.f32 0.01, %v1322_v43  ;;  %v1326_v38 = vadd.f32 %v1325_v7, %v9379_v18  ;;  %vm1468_vm4 = vcmp.ge.f32.partialorder %v1322_v43, 0.0  ;;  %v1043_v5 = vadd.f32 %v9374_v59, %v1004_v9 }
 0x1dc   : > { %v1533_v16 = vmul.f32 0.01, %v1324_v4  ;;  %v1328_v39 = vadd.f32 %v1327_v13, %v9382_v28  ;;  %vm1469_vm5 = vcmp.ge.f32.partialorder %v1324_v4, 0.0  ;;  %v809_v22 = vadd.f32 %v777_v12, %v613_v8 }
 0x1dd   : > { %v930_v10 = vpop.permute.xlu1 %929  ;;  %vm1470_vm6 = vcmp.ge.f32.partialorder %v1326_v38, 0.0  ;;  %v1534_v17 = vmul.f32 0.01, %v1326_v38  ;;  %v1596_v60 = vsel %vm1468_vm4, %v1322_v43, %v1532_v15  ;;  %v1107_v41 = vmul.f32 0.01, %v1043_v5 }
 0x1de   : > { %vm1471_vm7 = vcmp.ge.f32.partialorder %v1328_v39, 0.0  ;;  %v1535_v42 = vmul.f32 0.01, %v1328_v39  ;;  %v973_v3 = vmul.f32 %v8962_v63, %v930_v10  ;;  %v1597_v19 = vsel %vm1469_vm5, %v1324_v4, %v1533_v16 }
 0x1df   : > { %v1598_v20 = vsel %vm1470_vm6, %v1326_v38, %v1534_v17  ;;  %vm1075_vm8 = vcmp.ge.f32.partialorder %v1043_v5, 0.0  ;;  %v615_v7 = vmul.f32 %v8958_v62, %v578_v25 }
 0x1e0   : > { %v1599_v47 = vsel %vm1471_vm7, %v1328_v39, %v1535_v42  ;;  %v1005_v21 = vadd.f32 %v973_v3, %v809_v22  ;;  %v9429_v2 = vpack.c.bf16 %v1598_v20, %v1596_v60  ;;  %v1139_v31 = vsel %vm1075_vm8, %v1043_v5, %v1107_v41 }
 0x1e1   : > { %v9427_v24 = vpack.c.bf16 %v1599_v47, %v1597_v19 }
 0x1e2   : > { %v573_v33 = vpop.permute.xlu1 %572  ;;  %v1044_v26 = vadd.f32 %v9374_v59, %v1005_v21 }
 0x1e3   : > { %2335 = vmatprep.mubr.bf16.mxu0 %v9427_v24  ;;  %v614_v46 = vmul.f32 %v8958_v62, %v573_v33 }
 0x1e4   : > { %2336 = vmatmul.mubr.bf16.gmra.mrb[40].mxu0 %v9429_v2  ;;  %v1108_v29 = vmul.f32 0.01, %v1044_v26  ;;  %vm1076_vm9 = vcmp.ge.f32.partialorder %v1044_v26, 0.0 }
 0x1e6   : > { %v1140_v14 = vsel %vm1076_vm9, %v1044_v26, %v1108_v29 }
 0x1e7   : > { %v738_v30 = vpop.permute.xlu1 %737  ;;  %v1157_v34 = vpack.c.bf16 %v1140_v14, %v1139_v31 }
 0x1e8   : > { %v778_v32 = vmul.f32 %v8954_v61, %v738_v30 }
 0x1e9   : > { %1440 = vmatmul.mubr.bf16.gmra.mrb[24].mxu1 %v1157_v34 }
 0x1ea   : > { %v810_v35 = vadd.f32 %v778_v32, %v614_v46  ;;  %1449 = vmatprep.mubr.bf16.mxu1 %v8599_v6 }
 0x1eb   : > { %v1331_v49 = vpop.f32.mrb[12].mxu0  ;;  %v742_v50 = vpop.permute.xlu1 %741 }
 0x1ec   : > { %v1332_v52 = vadd.f32 %v1331_v49, %v9379_v18  ;;  %v1333_v40 = vpop.f32.mrb[13].mxu0  ;;  %v1006_v0 = vadd.f32 %v974_v48, %v810_v35  ;;  %v779_v27 = vmul.f32 %v8954_v61, %v742_v50 }
 0x1ed   : > { %v1334_v36 = vadd.f32 %v1333_v40, %v9382_v28  ;;  %v1335_v57 = vpop.f32.mrb[14].mxu0 }
 0x1ee   : > { %v1337_v56 = vpop.f32.mrb[15].mxu0  ;;  %v1536_v45 = vmul.f32 0.01, %v1332_v52  ;;  %v1336_v1 = vadd.f32 %v1335_v57, %v9379_v18  ;;  %vm1472_vm10 = vcmp.ge.f32.partialorder %v1332_v52, 0.0  ;;  %v1045_v12 = vadd.f32 %v9374_v59, %v1006_v0 }
 0x1ef   : > { %v1537_v43 = vmul.f32 0.01, %v1334_v36  ;;  %v1338_v4 = vadd.f32 %v1337_v56, %v9382_v28  ;;  %vm1473_vm11 = vcmp.ge.f32.partialorder %v1334_v36, 0.0  ;;  %v811_v13 = vadd.f32 %v779_v27, %v615_v7  ;;  %v2928_v7 = vld [vmem:[#allocation3 + $0x20] sm:$0xff] }
 0x1f0   : > { %v938_v6 = vpop.permute.xlu1 %937  ;;  %vm1474_vm12 = vcmp.ge.f32.partialorder %v1336_v1, 0.0  ;;  %v1538_v9 = vmul.f32 0.01, %v1336_v1  ;;  %v1600_v38 = vsel %vm1472_vm10, %v1332_v52, %v1536_v45  ;;  %v1109_v62 = vmul.f32 0.01, %v1045_v12 }
 0x1f1   : > { %vm1475_vm13 = vcmp.ge.f32.partialorder %v1338_v4, 0.0  ;;  %v1539_v8 = vmul.f32 0.01, %v1338_v4  ;;  %v975_v61 = vmul.f32 %v8962_v63, %v938_v6  ;;  %v1601_v15 = vsel %vm1473_vm11, %v1334_v36, %v1537_v43 }
 0x1f2   : > { %v1602_v39 = vsel %vm1474_vm12, %v1336_v1, %v1538_v9  ;;  %vm1077_vm14 = vcmp.ge.f32.partialorder %v1045_v12, 0.0  ;;  %v2929_v9 = vld [vmem:[#allocation3 + $0x28] sm:$0xff] }
 0x1f3   : > { %v1603_v16 = vsel %vm1475_vm13, %v1338_v4, %v1539_v8  ;;  %v1007_v10 = vadd.f32 %v975_v61, %v811_v13  ;;  %v9446_v42 = vpack.c.bf16 %v1602_v39, %v1600_v38  ;;  %v1141_v3 = vsel %vm1077_vm14, %v1045_v12, %v1109_v62  ;;  %v2924_v4 = vld [vmem:[#allocation3] sm:$0xff] }
 0x1f4   : > { %v1659_v17 = vpack.c.bf16 %v1603_v16, %v1601_v15  ;;  %v7410_v6 = vcombine.high %v2924_v4, %v2928_v7  ;;  %v7409_v12 = vcombine.low %v2924_v4, %v2928_v7  ;;  %v2964_v4 = vld [vmem:[#allocation3 + $0x140] sm:$0xff] }
 0x1f5   : > { %v1046_v5 = vadd.f32 %v9374_v59, %v1007_v10  ;;  %v2932_v10 = vld [vmem:[#allocation3 + $0x40] sm:$0xff] }
 0x1f6   : > { %2345 = vmatprep.mubr.bf16.mxu0 %v1659_v17  ;;  %4502 = vmatprep.subr.bf16.mxu1 %v7410_v6  ;;  %v2968_v7 = vld [vmem:[#allocation3 + $0x160] sm:$0xff] }
 0x1f7   : > { %2346 = vmatmul.mubr.bf16.gmra.mrb[44].mxu0 %v9446_v42  ;;  %v1110_v22 = vmul.f32 0.01, %v1046_v5  ;;  %vm1078_vm15 = vcmp.ge.f32.partialorder %v1046_v5, 0.0 }
 0x1f9   : > { %v1142_v19 = vsel %vm1078_vm15, %v1046_v5, %v1110_v22 }
 0x1fa   : > { %v1158_v63 = vpack.c.bf16 %v1142_v19, %v1141_v3  ;;  %v2937_v19 = vld [vmem:[#allocation3 + $0x68] sm:$0xff] }
 0x1fc   : > { %1450 = vmatmul.mubr.bf16.gmra.mrb[28].mxu1 %v1158_v63 }
 0x1fd   : > { %2122 = vmatprep.mubr.bf16.mxu1 %v9395_v53 }
 0x1fe   : > { %v1341_v47 = vpop.f32.mrb[16].mxu0 }
 0x1ff   : > { %v1342_v60 = vadd.f32 %v1341_v47, %v9379_v18  ;;  %v1343_v20 = vpop.f32.mrb[17].mxu0 }
 0x200   : > { %v1344_v21 = vadd.f32 %v1343_v20, %v9382_v28  ;;  %v1345_v25 = vpop.f32.mrb[18].mxu0 }
 0x201   : > { %v1540_v59 = vmul.f32 0.01, %v1342_v60  ;;  %v1346_v33 = vadd.f32 %v1345_v25, %v9379_v18  ;;  %v1347_v26 = vpop.f32.mrb[19].mxu0  ;;  %vm1476_vm0 = vcmp.ge.f32.partialorder %v1342_v60, 0.0 }
 0x202   : > { %v1541_v41 = vmul.f32 0.01, %v1344_v21  ;;  %v1348_v29 = vadd.f32 %v1347_v26, %v9382_v28  ;;  %vm1477_vm1 = vcmp.ge.f32.partialorder %v1344_v21, 0.0  ;;  %v2944_v26 = vld [vmem:[#allocation3 + $0xa0] sm:$0xff] }
 0x203   : > { %vm1478_vm2 = vcmp.ge.f32.partialorder %v1346_v33, 0.0  ;;  %v1542_v30 = vmul.f32 0.01, %v1346_v33  ;;  %v1604_v37 = vsel %vm1476_vm0, %v1342_v60, %v1540_v59 }
 0x204   : > { %vm1479_vm3 = vcmp.ge.f32.partialorder %v1348_v29, 0.0  ;;  %v1543_v53 = vmul.f32 0.01, %v1348_v29  ;;  %2123 = vmatmul.mubr.bf16.vlgmr.msra.gmra.mrb[32].mxu1 %v9392_v11  ;;  %v1605_v14 = vsel %vm1477_vm1, %v1344_v21, %v1541_v41  ;;  %v2941_v41 = vld [vmem:[#allocation3 + $0x88] sm:$0xff] }
 0x205   : > { %v1606_v31 = vsel %vm1478_vm2, %v1346_v33, %v1542_v30  ;;  %2132 = vmatprep.mubr.bf16.mxu1 %v9408_v44  ;;  %4503 = vmatpush1.bf16.msra.mxu1 %v7409_v12  ;;  %v2940_v33 = vld [vmem:[#allocation3 + $0x80] sm:$0xff] }
 0x206   : > { %v1607_v46 = vsel %vm1479_vm3, %v1348_v29, %v1543_v53  ;;  %v1660_v32 = vpack.c.bf16 %v1606_v31, %v1604_v37  ;;  %v7426_v53 = vcombine.high %v2940_v33, %v2944_v26  ;;  %v2945_v37 = vld [vmem:[#allocation3 + $0xa8] sm:$0xff] }
 0x207   : > { %v1661_v34 = vpack.c.bf16 %v1607_v46, %v1605_v14 }
 0x209   : > { %2355 = vmatprep.mubr.bf16.mxu0 %v1661_v34 }
 0x20a   : > { %2356 = vmatmul.mubr.bf16.gmra.mrb[48].mxu0 %v1660_v32 }
 0x20c   : > { %2133 = vmatmul.mubr.bf16.gmra.mrb[36].mxu1 %v9410_v23 }
 0x20d   : > { %2142 = vmatprep.mubr.bf16.mxu1 %v9427_v24 }
 0x211   : > { %v1351_v35 = vpop.f32.mrb[20].mxu0 }
 0x212   : > { %v1352_v48 = vadd.f32 %v1351_v35, %v9379_v18  ;;  %v1353_v49 = vpop.f32.mrb[21].mxu0  ;;  %v7427_v35 = vcombine.low %v2941_v41, %v2945_v37 }
 0x213   : > { %v1354_v11 = vadd.f32 %v1353_v49, %v9382_v28  ;;  %v1355_v50 = vpop.f32.mrb[22].mxu0  ;;  %v2948_v49 = vld [vmem:[#allocation3 + $0xc0] sm:$0xff] }
 0x214   : > { %v1544_v52 = vmul.f32 0.01, %v1352_v48  ;;  %v1356_v44 = vadd.f32 %v1355_v50, %v9379_v18  ;;  %v1357_v40 = vpop.f32.mrb[23].mxu0  ;;  %vm1480_vm4 = vcmp.ge.f32.partialorder %v1352_v48, 0.0  ;;  %2143 = vmatmul.mubr.bf16.gmra.mrb[40].mxu1 %v9429_v2  ;;  %v2925_v2 = vld [vmem:[#allocation3 + $0x8] sm:$0xff] }
 0x215   : > { %v1545_v36 = vmul.f32 0.01, %v1354_v11  ;;  %v1358_v57 = vadd.f32 %v1357_v40, %v9382_v28  ;;  %vm1481_vm5 = vcmp.ge.f32.partialorder %v1354_v11, 0.0  ;;  %2152 = vmatprep.mubr.bf16.mxu1 %v1659_v17  ;;  %v7411_v13 = vcombine.low %v2925_v2, %v2929_v9  ;;  %v2936_v17 = vld [vmem:[#allocation3 + $0x60] sm:$0xff]  ;;  %v2949_v50 = vld [vmem:[#allocation3 + $0xc8] sm:$0xff] }
 0x216   : > { %vm1482_vm6 = vcmp.ge.f32.partialorder %v1356_v44, 0.0  ;;  %v1546_v23 = vmul.f32 0.01, %v1356_v44  ;;  %v1608_v0 = vsel %vm1480_vm4, %v1352_v48, %v1544_v52  ;;  %v7412_v61 = vcombine.high %v2925_v2, %v2929_v9  ;;  %v2965_v2 = vld [vmem:[#allocation3 + $0x148] sm:$0xff] }
 0x217   : > { %vm1483_vm7 = vcmp.ge.f32.partialorder %v1358_v57, 0.0  ;;  %v1547_v24 = vmul.f32 0.01, %v1358_v57  ;;  %v1609_v56 = vsel %vm1481_vm5, %v1354_v11, %v1545_v36  ;;  %v7418_v3 = vcombine.high %v2932_v10, %v2936_v17  ;;  %v2952_v11 = vld [vmem:[#allocation3 + $0xe0] sm:$0xff] }
 0x218   : > { %v1610_v27 = vsel %vm1482_vm6, %v1356_v44, %v1546_v23  ;;  %4888 = vmatprep.subr.bf16.mxu0 %v7412_v61  ;;  %v7417_v60 = vcombine.low %v2932_v10, %v2936_v17  ;;  %v7428_v48 = vcombine.high %v2941_v41, %v2945_v37  ;;  %v7434_v52 = vcombine.high %v2948_v49, %v2952_v11  ;;  %v2953_v44 = vld [vmem:[#allocation3 + $0xe8] sm:$0xff]  ;;  %v2956_v36 = vld [vmem:[#allocation3 + $0x100] sm:$0xff] }
 0x219   : > { %v1611_v45 = vsel %vm1483_vm7, %v1358_v57, %v1547_v24  ;;  %v1662_v43 = vpack.c.bf16 %v1610_v27, %v1608_v0  ;;  %4889 = vmatpush1.bf16.msra.mxu0 %v7411_v13  ;;  %4504 = vmatprep.subr.bf16.mxu1 %v7418_v3  ;;  %v7436_v40 = vcombine.high %v2949_v50, %v2953_v44  ;;  %v2960_v57 = vld [vmem:[#allocation3 + $0x120] sm:$0xff]  ;;  %v2957_v23 = vld [vmem:[#allocation3 + $0x108] sm:$0xff] }
 0x21a   : > { %v1663_v1 = vpack.c.bf16 %v1611_v45, %v1609_v56  ;;  %4505 = vmatpush1.bf16.msra.mxu1 %v7417_v60  ;;  %v7435_v24 = vcombine.low %v2949_v50, %v2953_v44  ;;  %v2961_v0 = vld [vmem:[#allocation3 + $0x128] sm:$0xff]  ;;  %v7433_v27 = vcombine.low %v2948_v49, %v2952_v11  ;;  %v7442_v45 = vcombine.high %v2956_v36, %v2960_v57  ;;  %v2984_v41 = vld [vmem:[#allocation3 + $0x1e0] sm:$0xff] }
 0x21b   : > { %4506 = vmatprep.subr.bf16.mxu1 %v7426_v53  ;;  %v7444_v56 = vcombine.high %v2957_v23, %v2961_v0  ;;  %v7450_v9 = vcombine.high %v2964_v4, %v2968_v7  ;;  %v2992_v49 = vld [vmem:[#allocation3 + $0x220] sm:$0xff]  ;;  %v2989_v11 = vld [vmem:[#allocation3 + $0x208] sm:$0xff] }
 0x21c   : > { %2365 = vmatprep.mubr.bf16.mxu0 %v1663_v1  ;;  %2153 = vmatmul.mubr.bf16.gmra.mrb[44].mxu1 %v9446_v42  ;;  %v2933_v42 = vld [vmem:[#allocation3 + $0x48] sm:$0xff] }
 0x21d   : > { %2366 = vmatmul.mubr.bf16.gmra.mrb[52].mxu0 %v1662_v43  ;;  %2162 = vmatprep.mubr.bf16.mxu1 %v1661_v34  ;;  %v7419_v21 = vcombine.low %v2933_v42, %v2937_v19  ;;  %v7420_v59 = vcombine.high %v2933_v42, %v2937_v19  ;;  %v7449_v42 = vcombine.low %v2964_v4, %v2968_v7  ;;  %v2993_v50 = vld [vmem:[#allocation3 + $0x228] sm:$0xff]  ;;  %v3004_v4 = vld [vmem:[#allocation3 + $0x280] sm:$0xff] }
 0x21e   : > { %v7476_v44 = vcombine.high %v2989_v11, %v2993_v50  ;;  %v3008_v7 = vld [vmem:[#allocation3 + $0x2a0] sm:$0xff] }
 0x21f   : > { %4890 = vmatprep.subr.bf16.mxu0 %v7420_v59 }
 0x220   : > { %4891 = vmatpush1.bf16.msra.mxu0 %v7419_v21 }
 0x221   : > { %4892 = vmatprep.subr.bf16.mxu0 %v7428_v48  ;;  %v2988_v48 = vld [vmem:[#allocation3 + $0x200] sm:$0xff] }
 0x224   : > { %v1361_v8 = vpop.f32.mrb[24].mxu0  ;;  %2163 = vmatmul.mubr.bf16.gmra.mrb[48].mxu1 %v1660_v32  ;;  %v7425_v32 = vcombine.low %v2940_v33, %v2944_v26  ;;  %4893 = vmatpush1.bf16.msra.mxu0 %v7427_v35  ;;  %v2980_v26 = vld [vmem:[#allocation3 + $0x1c0] sm:$0xff] }
 0x225   : > { %v1362_v15 = vadd.f32 %v1361_v8, %v9379_v18  ;;  %v1363_v16 = vpop.f32.mrb[25].mxu0  ;;  %2172 = vmatprep.mubr.bf16.mxu1 %v1663_v1  ;;  %4894 = vmatprep.subr.bf16.mxu0 %v7436_v40  ;;  %v7441_v1 = vcombine.low %v2956_v36, %v2960_v57  ;;  %v2969_v8 = vld [vmem:[#allocation3 + $0x168] sm:$0xff]  ;;  %v7474_v40 = vcombine.high %v2988_v48, %v2992_v49  ;;  %v2996_v57 = vld [vmem:[#allocation3 + $0x240] sm:$0xff] }
 0x226   : > { %v1364_v38 = vadd.f32 %v1363_v16, %v9382_v28  ;;  %v1365_v39 = vpop.f32.mrb[26].mxu0  ;;  %4507 = vmatpush1.bf16.msra.mxu1 %v7425_v32  ;;  %v7452_v61 = vcombine.high %v2965_v2, %v2969_v8  ;;  %v7475_v36 = vcombine.low %v2989_v11, %v2993_v50  ;;  %v3033_v50 = vld [vmem:[#allocation3 + $0x368] sm:$0xff] }
 0x227   : > { %v1548_v62 = vmul.f32 0.01, %v1362_v15  ;;  %v1366_v5 = vadd.f32 %v1365_v39, %v9379_v18  ;;  %v1367_v22 = vpop.f32.mrb[27].mxu0  ;;  %vm1484_vm8 = vcmp.ge.f32.partialorder %v1362_v15, 0.0  ;;  %4508 = vmatprep.subr.bf16.mxu1 %v7434_v52  ;;  %v7465_v52 = vcombine.low %v2980_v26, %v2984_v41 }
 0x228   : > { %v1549_v63 = vmul.f32 0.01, %v1364_v38  ;;  %v1368_v47 = vadd.f32 %v1367_v22, %v9382_v28  ;;  %vm1485_vm9 = vcmp.ge.f32.partialorder %v1364_v38, 0.0  ;;  %4895 = vmatpush1.bf16.msra.mxu0 %v7435_v24  ;;  %v2997_v24 = vld [vmem:[#allocation3 + $0x248] sm:$0xff] }
 0x229   : > { %vm1486_vm10 = vcmp.ge.f32.partialorder %v1366_v5, 0.0  ;;  %v1550_v20 = vmul.f32 0.01, %v1366_v5  ;;  %v1612_v29 = vsel %vm1484_vm8, %v1362_v15, %v1548_v62  ;;  %4896 = vmatprep.subr.bf16.mxu0 %v7444_v56  ;;  %v2972_v62 = vld [vmem:[#allocation3 + $0x180] sm:$0xff] }
 0x22a   : > { %vm1487_vm11 = vcmp.ge.f32.partialorder %v1368_v47, 0.0  ;;  %v1551_v25 = vmul.f32 0.01, %v1368_v47  ;;  %v1613_v31 = vsel %vm1485_vm9, %v1364_v38, %v1549_v63  ;;  %4509 = vmatpush1.bf16.msra.mxu1 %v7433_v27  ;;  %v7451_v38 = vcombine.low %v2965_v2, %v2969_v8  ;;  %v2973_v63 = vld [vmem:[#allocation3 + $0x188] sm:$0xff] }
 0x22b   : > { %v1614_v30 = vsel %vm1486_vm10, %v1366_v5, %v1550_v20  ;;  %4510 = vmatprep.subr.bf16.mxu1 %v7442_v45  ;;  %v2976_v5 = vld [vmem:[#allocation3 + $0x1a0] sm:$0xff]  ;;  %v7473_v27 = vcombine.low %v2988_v48, %v2992_v49  ;;  %v3005_v2 = vld [vmem:[#allocation3 + $0x288] sm:$0xff] }
 0x22c   : > { %v1615_v14 = vsel %vm1487_vm11, %v1368_v47, %v1551_v25  ;;  %v1664_v46 = vpack.c.bf16 %v1614_v30, %v1612_v29  ;;  %2173 = vmatmul.mubr.bf16.gmra.mrb[52].mxu1 %v1662_v43  ;;  %v7443_v43 = vcombine.low %v2957_v23, %v2961_v0  ;;  %v7458_v19 = vcombine.high %v2972_v62, %v2976_v5  ;;  %v2977_v47 = vld [vmem:[#allocation3 + $0x1a8] sm:$0xff]  ;;  %v3000_v23 = vld [vmem:[#allocation3 + $0x260] sm:$0xff] }
 0x22d   : > { %v1665_v34 = vpack.c.bf16 %v1615_v14, %v1613_v31  ;;  %v7459_v21 = vcombine.low %v2973_v63, %v2977_v47  ;;  %v7460_v33 = vcombine.high %v2973_v63, %v2977_v47  ;;  %v2981_v29 = vld [vmem:[#allocation3 + $0x1c8] sm:$0xff]  ;;  %v7482_v45 = vcombine.high %v2996_v57, %v3000_v23  ;;  %v3012_v47 = vld [vmem:[#allocation3 + $0x2c0] sm:$0xff] }
 0x22e   : > { %4897 = vmatpush1.bf16.msra.mxu0 %v7443_v43  ;;  %4511 = vmatpush1.bf16.msra.mxu1 %v7441_v1  ;;  %v2985_v31 = vld [vmem:[#allocation3 + $0x1e8] sm:$0xff]  ;;  %v7489_v63 = vcombine.low %v3004_v4, %v3008_v7  ;;  %v3032_v48 = vld [vmem:[#allocation3 + $0x360] sm:$0xff] }
 0x22f   : > { %2182 = vmatprep.mubr.bf16.mxu1 %v1665_v34  ;;  %2375 = vmatprep.mubr.bf16.mxu0 %v1665_v34  ;;  %v7468_v32 = vcombine.high %v2981_v29, %v2985_v31  ;;  %v7466_v34 = vcombine.high %v2980_v26, %v2984_v41  ;;  %v7467_v35 = vcombine.low %v2981_v29, %v2985_v31  ;;  %v3001_v0 = vld [vmem:[#allocation3 + $0x268] sm:$0xff]  ;;  %v3020_v41 = vld [vmem:[#allocation3 + $0x300] sm:$0xff] }
 0x230   : > { %2376 = vmatmul.mubr.bf16.gmra.mrb[56].mxu0 %v1664_v46  ;;  %4898 = vmatprep.subr.bf16.mxu0 %v7452_v61  ;;  %v7484_v56 = vcombine.high %v2997_v24, %v3001_v0  ;;  %v7483_v43 = vcombine.low %v2997_v24, %v3001_v0  ;;  %v3009_v8 = vld [vmem:[#allocation3 + $0x2a8] sm:$0xff]  ;;  %v7481_v61 = vcombine.low %v2996_v57, %v3000_v23  ;;  %v3024_v29 = vld [vmem:[#allocation3 + $0x320] sm:$0xff] }
 0x231   : > { %4512 = vmatprep.subr.bf16.mxu1 %v7450_v9  ;;  %v3029_v49 = vld [vmem:[#allocation3 + $0x348] sm:$0xff]  ;;  %v3040_v57 = vld [vmem:[#allocation3 + $0x3a0] sm:$0xff] }
 0x232   : > { %4899 = vmatpush1.bf16.msra.mxu0 %v7451_v38  ;;  %4513 = vmatpush1.bf16.msra.mxu1 %v7449_v42  ;;  %v3037_v23 = vld [vmem:[#allocation3 + $0x388] sm:$0xff]  ;;  %v7515_v24 = vcombine.low %v3029_v49, %v3033_v50 }
 0x233   : > { %4514 = vmatprep.subr.bf16.mxu1 %v7458_v19  ;;  %4900 = vmatprep.subr.bf16.mxu0 %v7460_v33  ;;  %v3041_v0 = vld [vmem:[#allocation3 + $0x3a8] sm:$0xff] }
 0x234   : > { %2183 = vmatmul.mubr.bf16.gmra.mrb[56].mxu1 %v1664_v46  ;;  %v7457_v46 = vcombine.low %v2972_v62, %v2976_v5  ;;  %v3013_v5 = vld [vmem:[#allocation3 + $0x2c8] sm:$0xff] }
 0x236   : > { %4901 = vmatpush1.bf16.msra.mxu0 %v7459_v21  ;;  %4515 = vmatpush1.bf16.msra.mxu1 %v7457_v46 }
 0x237   : > { %v1371_v6 = vpop.f32.mrb[28].mxu0  ;;  %4902 = vmatprep.subr.bf16.mxu0 %v7468_v32  ;;  %4516 = vmatprep.subr.bf16.mxu1 %v7466_v34  ;;  %v7506_v34 = vcombine.high %v3020_v41, %v3024_v29 }
 0x238   : > { %v1372_v12 = vadd.f32 %v1371_v6, %v9379_v18  ;;  %v1373_v13 = vpop.f32.mrb[29].mxu0 }
 0x239   : > { %v1374_v15 = vadd.f32 %v1373_v13, %v9382_v28  ;;  %v1375_v16 = vpop.f32.mrb[30].mxu0 }
 0x23a   : > { %v1552_v39 = vmul.f32 0.01, %v1372_v12  ;;  %v1376_v10 = vadd.f32 %v1375_v16, %v9379_v18  ;;  %v1377_v17 = vpop.f32.mrb[31].mxu0  ;;  %vm1488_vm12 = vcmp.ge.f32.partialorder %v1372_v12, 0.0  ;;  %4903 = vmatpush1.bf16.msra.mxu0 %v7467_v35  ;;  %4517 = vmatpush1.bf16.msra.mxu1 %v7465_v52  ;;  %v3028_v35 = vld [vmem:[#allocation3 + $0x340] sm:$0xff]  ;;  %v7505_v52 = vcombine.low %v3020_v41, %v3024_v29 }
 0x23b   : > { %v1553_v22 = vmul.f32 0.01, %v1374_v15  ;;  %v1378_v3 = vadd.f32 %v1377_v17, %v9382_v28  ;;  %vm1489_vm13 = vcmp.ge.f32.partialorder %v1374_v15, 0.0  ;;  %4904 = vmatprep.subr.bf16.mxu0 %v7476_v44  ;;  %4518 = vmatprep.subr.bf16.mxu1 %v7474_v40  ;;  %v7491_v17 = vcombine.low %v3005_v2, %v3009_v8 }
 0x23c   : > { %vm1490_vm14 = vcmp.ge.f32.partialorder %v1376_v10, 0.0  ;;  %v1554_v60 = vmul.f32 0.01, %v1376_v10  ;;  %v1616_v25 = vsel %vm1488_vm12, %v1372_v12, %v1552_v39  ;;  %v7516_v44 = vcombine.high %v3029_v49, %v3033_v50 }
 0x23d   : > { %vm1491_vm15 = vcmp.ge.f32.partialorder %v1378_v3, 0.0  ;;  %v1555_v20 = vmul.f32 0.01, %v1378_v3  ;;  %v1617_v30 = vsel %vm1489_vm13, %v1374_v15, %v1553_v22  ;;  %v7492_v15 = vcombine.high %v3005_v2, %v3009_v8  ;;  %v3048_v2 = vld [vmem:[#allocation3 + $0x3e0] sm:$0xff] }
 0x23e   : > { %v1618_v59 = vsel %vm1490_vm14, %v1376_v10, %v1554_v60  ;;  %4905 = vmatpush1.bf16.msra.mxu0 %v7475_v36  ;;  %4519 = vmatpush1.bf16.msra.mxu1 %v7473_v27  ;;  %v7490_v10 = vcombine.high %v3004_v4, %v3008_v7  ;;  %v3016_v60 = vld [vmem:[#allocation3 + $0x2e0] sm:$0xff]  ;;  %v7514_v40 = vcombine.high %v3028_v35, %v3032_v48 }
 0x23f   : > { %v1619_v53 = vsel %vm1491_vm15, %v1378_v3, %v1555_v20  ;;  %v1666_v37 = vpack.c.bf16 %v1618_v59, %v1616_v25  ;;  %4906 = vmatprep.subr.bf16.mxu0 %v7484_v56  ;;  %4520 = vmatprep.subr.bf16.mxu1 %v7482_v45  ;;  %v3017_v3 = vld [vmem:[#allocation3 + $0x2e8] sm:$0xff]  ;;  %v7497_v46 = vcombine.low %v3012_v47, %v3016_v60  ;;  %v3036_v36 = vld [vmem:[#allocation3 + $0x380] sm:$0xff] }
 0x240   : > { %v1667_v14 = vpack.c.bf16 %v1619_v53, %v1617_v30  ;;  %v7500_v25 = vcombine.high %v3013_v5, %v3017_v3  ;;  %v3021_v30 = vld [vmem:[#allocation3 + $0x308] sm:$0xff]  ;;  %v7499_v31 = vcombine.low %v3013_v5, %v3017_v3  ;;  %v7513_v27 = vcombine.low %v3028_v35, %v3032_v48  ;;  %v3044_v7 = vld [vmem:[#allocation3 + $0x3c0] sm:$0xff] }
 0x241   : > { %v7524_v56 = vcombine.high %v3037_v23, %v3041_v0  ;;  %v7523_v8 = vcombine.low %v3037_v23, %v3041_v0 }
 0x242   : > { %2192 = vmatprep.mubr.bf16.mxu1 %v1667_v14  ;;  %2385 = vmatprep.mubr.bf16.mxu0 %v1667_v14  ;;  %v3025_v14 = vld [vmem:[#allocation3 + $0x328] sm:$0xff] }
 0x243   : > { %2193 = vmatmul.mubr.bf16.gmra.mrb[60].mxu1 %v1666_v37  ;;  %2386 = vmatmul.mubr.bf16.gmra.mrb[60].mxu0 %v1666_v37  ;;  %v7498_v37 = vcombine.high %v3012_v47, %v3016_v60  ;;  %v7508_v32 = vcombine.high %v3021_v30, %v3025_v14  ;;  %v7507_v11 = vcombine.low %v3021_v30, %v3025_v14 }
 0x244   : > { %4907 = vmatpush1.bf16.msra.mxu0 %v7483_v43  ;;  %4521 = vmatpush1.bf16.msra.mxu1 %v7481_v61  ;;  %v7522_v43 = vcombine.high %v3036_v36, %v3040_v57 }
 0x245   : > { %4908 = vmatprep.subr.bf16.mxu0 %v7492_v15  ;;  %4522 = vmatprep.subr.bf16.mxu1 %v7490_v10 }
 0x248   : > { %4909 = vmatpush1.bf16.msra.mxu0 %v7491_v17  ;;  %4523 = vmatpush1.bf16.msra.mxu1 %v7489_v63  ;;  %v7530_v17 = vcombine.high %v3044_v7, %v3048_v2 }
 0x249   : > { %4910 = vmatprep.subr.bf16.mxu0 %v7500_v25  ;;  %4524 = vmatprep.subr.bf16.mxu1 %v7498_v37 }
 0x24a   : > { %v1381_v1 = vpop.f32.mrb[0].mxu1 }
 0x24b   : > { %v1382_v6 = vadd.f32 %v1381_v1, %v9379_v18  ;;  %v1383_v9 = vpop.f32.mrb[1].mxu1 }
 0x24c   : > { %v1384_v12 = vadd.f32 %v1383_v9, %v9382_v28  ;;  %v1385_v13 = vpop.f32.mrb[2].mxu1  ;;  %4911 = vmatpush1.bf16.msra.mxu0 %v7499_v31  ;;  %4525 = vmatpush1.bf16.msra.mxu1 %v7497_v46 }
 0x24d   : > { %v1556_v16 = vmul.f32 0.01, %v1382_v6  ;;  %v1386_v38 = vadd.f32 %v1385_v13, %v9379_v18  ;;  %v1387_v39 = vpop.f32.mrb[3].mxu1  ;;  %vm1492_vm0 = vcmp.ge.f32.partialorder %v1382_v6, 0.0  ;;  %4912 = vmatprep.subr.bf16.mxu0 %v7508_v32  ;;  %4526 = vmatprep.subr.bf16.mxu1 %v7506_v34  ;;  %v3049_v13 = vld [vmem:[#allocation3 + $0x3e8] sm:$0xff] }
 0x24e   : > { %v1557_v42 = vmul.f32 0.01, %v1384_v12  ;;  %v1388_v62 = vadd.f32 %v1387_v39, %v9382_v28  ;;  %vm1493_vm1 = vcmp.ge.f32.partialorder %v1384_v12, 0.0 }
 0x24f   : > { %vm1494_vm2 = vcmp.ge.f32.partialorder %v1386_v38, 0.0  ;;  %v1558_v22 = vmul.f32 0.01, %v1386_v38  ;;  %v1620_v20 = vsel %vm1492_vm0, %v1382_v6, %v1556_v16 }
 0x250   : > { %vm1495_vm3 = vcmp.ge.f32.partialorder %v1388_v62, 0.0  ;;  %v1559_v19 = vmul.f32 0.01, %v1388_v62  ;;  %v1621_v59 = vsel %vm1493_vm1, %v1384_v12, %v1557_v42  ;;  %4913 = vmatpush1.bf16.msra.mxu0 %v7507_v11  ;;  %4527 = vmatpush1.bf16.msra.mxu1 %v7505_v52  ;;  %v3045_v12 = vld [vmem:[#allocation3 + $0x3c8] sm:$0xff] }
 0x251   : > { %v1622_v21 = vsel %vm1494_vm2, %v1386_v38, %v1558_v22  ;;  %4914 = vmatprep.subr.bf16.mxu0 %v7516_v44  ;;  %4528 = vmatprep.subr.bf16.mxu1 %v7514_v40  ;;  %v7521_v38 = vcombine.low %v3036_v36, %v3040_v57  ;;  %v7531_v22 = vcombine.low %v3045_v12, %v3049_v13 }
 0x252   : > { %v1623_v33 = vsel %vm1495_vm3, %v1388_v62, %v1559_v19  ;;  %v1668_v26 = vpack.c.bf16 %v1622_v21, %v1620_v20  ;;  %v7532_v62 = vcombine.high %v3045_v12, %v3049_v13  ;;  %v7529_v21 = vcombine.low %v3044_v7, %v3048_v2 }
 0x253   : > { %v1669_v53 = vpack.c.bf16 %v1623_v33, %v1621_v59 }
 0x254   : > { %4915 = vmatpush1.bf16.msra.mxu0 %v7515_v24  ;;  %4529 = vmatpush1.bf16.msra.mxu1 %v7513_v27 }
 0x255   : > { %2202 = vmatprep.mubr.bf16.mxu1 %v1669_v53  ;;  %2395 = vmatprep.mubr.bf16.mxu0 %v1669_v53 }
 0x256   : > { %2203 = vmatmul.mubr.bf16.gmra.mrb[64].mxu1 %v1668_v26  ;;  %2396 = vmatmul.mubr.bf16.gmra.mrb[64].mxu0 %v1668_v26 }
 0x257   : > { %4916 = vmatprep.subr.bf16.mxu0 %v7524_v56  ;;  %4530 = vmatprep.subr.bf16.mxu1 %v7522_v43 }
 0x258   : > { %4917 = vmatpush1.bf16.msra.mxu0 %v7523_v8  ;;  %4531 = vmatpush1.bf16.msra.mxu1 %v7521_v38  ;;  %v11140_v8 = vsub.s32 3, %v8932_v51 }
 0x259   : > { %4918 = vmatprep.subr.bf16.mxu0 %v7532_v62  ;;  %4532 = vmatprep.subr.bf16.mxu1 %v7530_v17 }
 0x25c   : > { %4919 = vmatpush1.bf16.msra.mxu0 %v7531_v22  ;;  %4533 = vmatpush1.bf16.msra.mxu1 %v7529_v21 }
 0x25d   : > { %v1391_v45 = vpop.f32.mrb[4].mxu1 }
 0x25e   : > { %v1392_v1 = vadd.f32 %v1391_v45, %v9379_v18  ;;  %v1393_v4 = vpop.f32.mrb[5].mxu1 }
 0x25f   : > { %v1394_v6 = vadd.f32 %v1393_v4, %v9382_v28  ;;  %v1395_v9 = vpop.f32.mrb[6].mxu1 }
 0x260   : > { %v1560_v61 = vmul.f32 0.01, %v1392_v1  ;;  %v1396_v15 = vadd.f32 %v1395_v9, %v9379_v18  ;;  %v1397_v16 = vpop.f32.mrb[7].mxu1  ;;  %vm1496_vm4 = vcmp.ge.f32.partialorder %v1392_v1, 0.0  ;;  %v9493_v9 = vld [vmem:[%s11129_s6] sm:$0xf] }
 0x261   : > { %v1561_v39 = vmul.f32 0.01, %v1394_v6  ;;  %v1398_v10 = vadd.f32 %v1397_v16, %v9382_v28  ;;  %vm1497_vm5 = vcmp.ge.f32.partialorder %v1394_v6, 0.0  ;;  %v9500_v38 = vrot.slane %v9493_v9, %v8949_v58 }
 0x262   : > { %vm1498_vm6 = vcmp.ge.f32.partialorder %v1396_v15, 0.0  ;;  %v1562_v42 = vmul.f32 0.01, %v1396_v15  ;;  %v1624_v3 = vsel %vm1496_vm4, %v1392_v1, %v1560_v61 }
 0x263   : > { %vm1499_vm7 = vcmp.ge.f32.partialorder %v1398_v10, 0.0  ;;  %v1563_v5 = vmul.f32 0.01, %v1398_v10  ;;  %v1625_v63 = vsel %vm1497_vm5, %v1394_v6, %v1561_v39 }
 0x264   : > { %v1626_v19 = vsel %vm1498_vm6, %v1396_v15, %v1562_v42  ;;  %v9506_v42 = vrot.slane %v9493_v9, %v11140_v8 }
 0x265   : > { %v1627_v47 = vsel %vm1499_vm7, %v1398_v10, %v1563_v5  ;;  %v1670_v60 = vpack.c.bf16 %v1626_v19, %v1624_v3 }
 0x266   : > { %v1671_v20 = vpack.c.bf16 %v1627_v47, %v1625_v63 }
 0x268   : > { %2212 = vmatprep.mubr.bf16.mxu1 %v1671_v20  ;;  %2405 = vmatprep.mubr.bf16.mxu0 %v1671_v20 }
 0x269   : > { %2213 = vmatmul.mubr.bf16.gmra.mrb[68].mxu1 %v1670_v60  ;;  %2406 = vmatmul.mubr.bf16.gmra.mrb[68].mxu0 %v1670_v60 }
 0x270   : > { %v1401_v25 = vpop.f32.mrb[8].mxu1 }
 0x271   : > { %v1402_v59 = vadd.f32 %v1401_v25, %v9379_v18  ;;  %v1403_v33 = vpop.f32.mrb[9].mxu1 }
 0x272   : > { %v1404_v26 = vadd.f32 %v1403_v33, %v9382_v28  ;;  %v1405_v41 = vpop.f32.mrb[10].mxu1 }
 0x273   : > { %v1564_v29 = vmul.f32 0.01, %v1402_v59  ;;  %v1406_v30 = vadd.f32 %v1405_v41, %v9379_v18  ;;  %v1407_v53 = vpop.f32.mrb[11].mxu1  ;;  %vm1500_vm8 = vcmp.ge.f32.partialorder %v1402_v59, 0.0 }
 0x274   : > { %v1565_v37 = vmul.f32 0.01, %v1404_v26  ;;  %v1408_v31 = vadd.f32 %v1407_v53, %v9382_v28  ;;  %vm1501_vm9 = vcmp.ge.f32.partialorder %v1404_v26, 0.0 }
 0x275   : > { %vm1502_vm10 = vcmp.ge.f32.partialorder %v1406_v30, 0.0  ;;  %v1566_v14 = vmul.f32 0.01, %v1406_v30  ;;  %v1628_v32 = vsel %vm1500_vm8, %v1402_v59, %v1564_v29 }
 0x276   : > { %vm1503_vm11 = vcmp.ge.f32.partialorder %v1408_v31, 0.0  ;;  %v1567_v46 = vmul.f32 0.01, %v1408_v31  ;;  %v1629_v35 = vsel %vm1501_vm9, %v1404_v26, %v1565_v37 }
 0x277   : > { %v1630_v34 = vsel %vm1502_vm10, %v1406_v30, %v1566_v14 }
 0x278   : > { %v1631_v48 = vsel %vm1503_vm11, %v1408_v31, %v1567_v46  ;;  %v1672_v49 = vpack.c.bf16 %v1630_v34, %v1628_v32 }
 0x279   : > { %v1673_v11 = vpack.c.bf16 %v1631_v48, %v1629_v35 }
 0x27b   : > { %2222 = vmatprep.mubr.bf16.mxu1 %v1673_v11  ;;  %2415 = vmatprep.mubr.bf16.mxu0 %v1673_v11 }
 0x27c   : > { %2223 = vmatmul.mubr.bf16.gmra.mrb[72].mxu1 %v1672_v49  ;;  %2416 = vmatmul.mubr.bf16.gmra.mrb[72].mxu0 %v1672_v49 }
 0x283   : > { %v1411_v50 = vpop.f32.mrb[12].mxu1 }
 0x284   : > { %v1412_v52 = vadd.f32 %v1411_v50, %v9379_v18  ;;  %v1413_v44 = vpop.f32.mrb[13].mxu1 }
 0x285   : > { %v1414_v40 = vadd.f32 %v1413_v44, %v9382_v28  ;;  %v1415_v36 = vpop.f32.mrb[14].mxu1 }
 0x286   : > { %v1568_v57 = vmul.f32 0.01, %v1412_v52  ;;  %v1416_v23 = vadd.f32 %v1415_v36, %v9379_v18  ;;  %v1417_v24 = vpop.f32.mrb[15].mxu1  ;;  %vm1504_vm12 = vcmp.ge.f32.partialorder %v1412_v52, 0.0 }
 0x287   : > { %v1569_v0 = vmul.f32 0.01, %v1414_v40  ;;  %v1418_v27 = vadd.f32 %v1417_v24, %v9382_v28  ;;  %vm1505_vm13 = vcmp.ge.f32.partialorder %v1414_v40, 0.0 }
 0x288   : > { %vm1506_vm14 = vcmp.ge.f32.partialorder %v1416_v23, 0.0  ;;  %v1570_v56 = vmul.f32 0.01, %v1416_v23  ;;  %v1632_v43 = vsel %vm1504_vm12, %v1412_v52, %v1568_v57 }
 0x289   : > { %vm1507_vm15 = vcmp.ge.f32.partialorder %v1418_v27, 0.0  ;;  %v1571_v45 = vmul.f32 0.01, %v1418_v27  ;;  %v1633_v4 = vsel %vm1505_vm13, %v1414_v40, %v1569_v0 }
 0x28a   : > { %v1634_v1 = vsel %vm1506_vm14, %v1416_v23, %v1570_v56 }
 0x28b   : > { %v1635_v7 = vsel %vm1507_vm15, %v1418_v27, %v1571_v45  ;;  %v1674_v2 = vpack.c.bf16 %v1634_v1, %v1632_v43 }
 0x28c   : > { %v1675_v6 = vpack.c.bf16 %v1635_v7, %v1633_v4 }
 0x28e   : > { %2232 = vmatprep.mubr.bf16.mxu1 %v1675_v6  ;;  %2425 = vmatprep.mubr.bf16.mxu0 %v1675_v6 }
 0x28f   : > { %2233 = vmatmul.mubr.bf16.gmra.mrb[76].mxu1 %v1674_v2  ;;  %2426 = vmatmul.mubr.bf16.gmra.mrb[76].mxu0 %v1674_v2 }
 0x296   : > { %v1421_v12 = vpop.f32.mrb[16].mxu1 }
 0x297   : > { %v1422_v13 = vadd.f32 %v1421_v12, %v9379_v18  ;;  %v1423_v61 = vpop.f32.mrb[17].mxu1 }
 0x298   : > { %v1424_v15 = vadd.f32 %v1423_v61, %v9382_v28  ;;  %v1425_v16 = vpop.f32.mrb[18].mxu1 }
 0x299   : > { %v1572_v39 = vmul.f32 0.01, %v1422_v13  ;;  %v1426_v10 = vadd.f32 %v1425_v16, %v9379_v18  ;;  %v1427_v17 = vpop.f32.mrb[19].mxu1  ;;  %vm1508_vm0 = vcmp.ge.f32.partialorder %v1422_v13, 0.0 }
 0x29a   : > { %v1573_v62 = vmul.f32 0.01, %v1424_v15  ;;  %v1428_v5 = vadd.f32 %v1427_v17, %v9382_v28  ;;  %vm1509_vm1 = vcmp.ge.f32.partialorder %v1424_v15, 0.0 }
 0x29b   : > { %vm1510_vm2 = vcmp.ge.f32.partialorder %v1426_v10, 0.0  ;;  %v1574_v22 = vmul.f32 0.01, %v1426_v10  ;;  %v2317_v3 = vpop.f32.mrb[32].mxu0  ;;  %v1636_v21 = vsel %vm1508_vm0, %v1422_v13, %v1572_v39 }
 0x29c   : > { %vm1511_vm3 = vcmp.ge.f32.partialorder %v1428_v5, 0.0  ;;  %v1575_v19 = vmul.f32 0.01, %v1428_v5  ;;  %v2318_v63 = vadd.f32 %v2317_v3, %v9500_v38  ;;  %v2319_v47 = vpop.f32.mrb[33].mxu0  ;;  %v1637_v41 = vsel %vm1509_vm1, %v1424_v15, %v1573_v62 }
 0x29d   : > { %v2320_v60 = vadd.f32 %v2319_v47, %v9506_v42  ;;  %v2321_v20 = vpop.f32.mrb[34].mxu0  ;;  %v1638_v25 = vsel %vm1510_vm2, %v1426_v10, %v1574_v22 }
 0x29e   : > { %v2606_v59 = vmul.f32 0.01, %v2318_v63  ;;  %v2322_v33 = vadd.f32 %v2321_v20, %v9500_v38  ;;  %v2323_v26 = vpop.f32.mrb[35].mxu0  ;;  %v1639_v29 = vsel %vm1511_vm3, %v1428_v5, %v1575_v19  ;;  %vm2478_vm4 = vcmp.ge.f32.partialorder %v2318_v63, 0.0 }
 0x29f   : > { %v2607_v30 = vmul.f32 0.01, %v2320_v60  ;;  %v2324_v53 = vadd.f32 %v2323_v26, %v9506_v42  ;;  %v1677_v37 = vpack.c.bf16 %v1639_v29, %v1637_v41  ;;  %vm2479_vm5 = vcmp.ge.f32.partialorder %v2320_v60, 0.0 }
 0x2a0   : > { %vm2482_vm6 = vcmp.ge.f32.partialorder %v2322_v33, 0.0  ;;  %v2610_v31 = vmul.f32 0.01, %v2322_v33  ;;  %v1676_v14 = vpack.c.bf16 %v1638_v25, %v1636_v21  ;;  %v2734_v32 = vsel %vm2478_vm4, %v2318_v63, %v2606_v59 }
 0x2a1   : > { %vm2483_vm7 = vcmp.ge.f32.partialorder %v2324_v53, 0.0  ;;  %v2611_v46 = vmul.f32 0.01, %v2324_v53  ;;  %2242 = vmatprep.mubr.bf16.mxu1 %v1677_v37  ;;  %2435 = vmatprep.mubr.bf16.mxu0 %v1677_v37  ;;  %v2735_v35 = vsel %vm2479_vm5, %v2320_v60, %v2607_v30 }
 0x2a2   : > { %v2738_v34 = vsel %vm2482_vm6, %v2322_v33, %v2610_v31  ;;  %2243 = vmatmul.mubr.bf16.gmra.mrb[80].mxu1 %v1676_v14  ;;  %2436 = vmatmul.mubr.bf16.gmra.mrb[80].mxu0 %v1676_v14 }
 0x2a3   : > { %v9513_v48 = vpack.c.bf16 %v2738_v34, %v2734_v32  ;;  %v2739_v49 = vsel %vm2483_vm7, %v2324_v53, %v2611_v46 }
 0x2a4   : > { %v9515_v11 = vpack.c.bf16 %v2739_v49, %v2735_v35  ;;  %v2327_v50 = vpop.f32.mrb[36].mxu0 }
 0x2a5   : > { %11229 = vst [vmem:[#allocation17_spill] sm:$0xff] %v9513_v48  ;;  %v2328_v52 = vadd.f32 %v2327_v50, %v9500_v38  ;;  %v2329_v44 = vpop.f32.mrb[37].mxu0 }
 0x2a6   : > { %11230 = vst [vmem:[#allocation18_spill] sm:$0xff] %v9515_v11  ;;  %v2330_v40 = vadd.f32 %v2329_v44, %v9506_v42  ;;  %v2331_v36 = vpop.f32.mrb[38].mxu0 }
 0x2a7   : > { %v2614_v57 = vmul.f32 0.01, %v2328_v52  ;;  %v2332_v23 = vadd.f32 %v2331_v36, %v9500_v38  ;;  %v2333_v24 = vpop.f32.mrb[39].mxu0  ;;  %vm2486_vm8 = vcmp.ge.f32.partialorder %v2328_v52, 0.0 }
 0x2a8   : > { %v2615_v0 = vmul.f32 0.01, %v2330_v40  ;;  %v2334_v27 = vadd.f32 %v2333_v24, %v9506_v42  ;;  %vm2487_vm9 = vcmp.ge.f32.partialorder %v2330_v40, 0.0 }
 0x2a9   : > { %vm2490_vm10 = vcmp.ge.f32.partialorder %v2332_v23, 0.0  ;;  %v2618_v56 = vmul.f32 0.01, %v2332_v23  ;;  %v1431_v43 = vpop.f32.mrb[20].mxu1  ;;  %v2742_v1 = vsel %vm2486_vm8, %v2328_v52, %v2614_v57 }
 0x2aa   : > { %vm2491_vm11 = vcmp.ge.f32.partialorder %v2334_v27, 0.0  ;;  %v2619_v45 = vmul.f32 0.01, %v2334_v27  ;;  %v1432_v7 = vadd.f32 %v1431_v43, %v9379_v18  ;;  %v1433_v2 = vpop.f32.mrb[21].mxu1  ;;  %v2743_v6 = vsel %vm2487_vm9, %v2330_v40, %v2615_v0 }
 0x2ab   : > { %v2746_v4 = vsel %vm2490_vm10, %v2332_v23, %v2618_v56  ;;  %v1434_v61 = vadd.f32 %v1433_v2, %v9382_v28  ;;  %v1435_v15 = vpop.f32.mrb[22].mxu1 }
 0x2ac   : > { %v9522_v12 = vpack.c.bf16 %v2746_v4, %v2742_v1  ;;  %v2747_v13 = vsel %vm2491_vm11, %v2334_v27, %v2619_v45  ;;  %v1576_v39 = vmul.f32 0.01, %v1432_v7  ;;  %v1436_v10 = vadd.f32 %v1435_v15, %v9379_v18  ;;  %v1437_v17 = vpop.f32.mrb[23].mxu1  ;;  %v9541_v15 = vld [vmem:[#allocation3 + $0x400] sm:$0xff] }
 0x2ad   : > { %v9525_v16 = vpack.c.bf16 %v2747_v13, %v2743_v6  ;;  %vm1512_vm12 = vcmp.ge.f32.partialorder %v1432_v7, 0.0  ;;  %v1577_v62 = vmul.f32 0.01, %v1434_v61  ;;  %v1438_v5 = vadd.f32 %v1437_v17, %v9382_v28 }
 0x2ae   : > { %vm1513_vm13 = vcmp.ge.f32.partialorder %v1434_v61, 0.0  ;;  %vm1514_vm14 = vcmp.ge.f32.partialorder %v1436_v10, 0.0  ;;  %v1578_v22 = vmul.f32 0.01, %v1436_v10  ;;  %v1640_v19 = vsel %vm1512_vm12, %v1432_v7, %v1576_v39  ;;  %v9543_v39 = vld [vmem:[#allocation3 + $0x420] sm:$0xff] }
 0x2af   : > { %vm1515_vm15 = vcmp.ge.f32.partialorder %v1438_v5, 0.0  ;;  %v1579_v3 = vmul.f32 0.01, %v1438_v5  ;;  %v1641_v47 = vsel %vm1513_vm13, %v1434_v61, %v1577_v62  ;;  %v7538_v17 = vcombine.high %v9541_v15, %v9543_v39  ;;  %v9549_v62 = vld [vmem:[#allocation3 + $0x428] sm:$0xff] }
 0x2b0   : > { %v1642_v63 = vsel %vm1514_vm14, %v1436_v10, %v1578_v22  ;;  %v9545_v10 = vld [vmem:[#allocation3 + $0x408] sm:$0xff] }
 0x2b1   : > { %v1643_v60 = vsel %vm1515_vm15, %v1438_v5, %v1579_v3  ;;  %v1678_v20 = vpack.c.bf16 %v1642_v63, %v1640_v19  ;;  %v7540_v5 = vcombine.high %v9545_v10, %v9549_v62  ;;  %4695 = vmatprep.subr.bf16.mxu1 %v7538_v17 }
 0x2b2   : > { %v1679_v21 = vpack.c.bf16 %v1643_v60, %v1641_v47 }
 0x2b3   : > { %5081 = vmatprep.subr.bf16.mxu0 %v7540_v5  ;;  %v7539_v5 = vcombine.low %v9545_v10, %v9549_v62 }
 0x2b4   : > { %2252 = vmatprep.mubr.bf16.mxu1 %v1679_v21  ;;  %2445 = vmatprep.mubr.bf16.mxu0 %v1679_v21 }
 0x2b5   : > { %2253 = vmatmul.mubr.bf16.gmra.mrb[84].mxu1 %v1678_v20  ;;  %2446 = vmatmul.mubr.bf16.gmra.mrb[84].mxu0 %v1678_v20 }
 0x2b7   : > { %v2337_v25 = vpop.f32.mrb[40].mxu0 }
 0x2b8   : > { %v2338_v59 = vadd.f32 %v2337_v25, %v9500_v38  ;;  %v2339_v33 = vpop.f32.mrb[41].mxu0 }
 0x2b9   : > { %v2340_v26 = vadd.f32 %v2339_v33, %v9506_v42  ;;  %v2341_v41 = vpop.f32.mrb[42].mxu0 }
 0x2ba   : > { %v2622_v29 = vmul.f32 0.01, %v2338_v59  ;;  %v2342_v30 = vadd.f32 %v2341_v41, %v9500_v38  ;;  %v2343_v53 = vpop.f32.mrb[43].mxu0  ;;  %vm2494_vm0 = vcmp.ge.f32.partialorder %v2338_v59, 0.0 }
 0x2bb   : > { %v2623_v37 = vmul.f32 0.01, %v2340_v26  ;;  %v2344_v31 = vadd.f32 %v2343_v53, %v9506_v42  ;;  %vm2495_vm1 = vcmp.ge.f32.partialorder %v2340_v26, 0.0 }
 0x2bc   : > { %vm2498_vm2 = vcmp.ge.f32.partialorder %v2342_v30, 0.0  ;;  %v2626_v14 = vmul.f32 0.01, %v2342_v30  ;;  %v1441_v32 = vpop.f32.mrb[24].mxu1  ;;  %v2750_v34 = vsel %vm2494_vm0, %v2338_v59, %v2622_v29 }
 0x2bd   : > { %vm2499_vm3 = vcmp.ge.f32.partialorder %v2344_v31, 0.0  ;;  %v2627_v46 = vmul.f32 0.01, %v2344_v31  ;;  %v1442_v49 = vadd.f32 %v1441_v32, %v9379_v18  ;;  %v1443_v50 = vpop.f32.mrb[25].mxu1  ;;  %v2751_v52 = vsel %vm2495_vm1, %v2340_v26, %v2623_v37 }
 0x2be   : > { %v2754_v35 = vsel %vm2498_vm2, %v2342_v30, %v2626_v14  ;;  %v1444_v36 = vadd.f32 %v1443_v50, %v9382_v28  ;;  %v1445_v57 = vpop.f32.mrb[26].mxu1 }
 0x2bf   : > { %v9534_v44 = vpack.c.bf16 %v2754_v35, %v2750_v34  ;;  %v2755_v40 = vsel %vm2499_vm3, %v2344_v31, %v2627_v46  ;;  %v1580_v24 = vmul.f32 0.01, %v1442_v49  ;;  %v1446_v0 = vadd.f32 %v1445_v57, %v9379_v18  ;;  %v1447_v27 = vpop.f32.mrb[27].mxu1 }
 0x2c0   : > { %v9537_v23 = vpack.c.bf16 %v2755_v40, %v2751_v52  ;;  %vm1516_vm4 = vcmp.ge.f32.partialorder %v1442_v49, 0.0  ;;  %v1581_v56 = vmul.f32 0.01, %v1444_v36  ;;  %v1448_v45 = vadd.f32 %v1447_v27, %v9382_v28 }
 0x2c1   : > { %vm1517_vm5 = vcmp.ge.f32.partialorder %v1444_v36, 0.0  ;;  %vm1518_vm6 = vcmp.ge.f32.partialorder %v1446_v0, 0.0  ;;  %v1582_v43 = vmul.f32 0.01, %v1446_v0  ;;  %v1644_v4 = vsel %vm1516_vm4, %v1442_v49, %v1580_v24 }
 0x2c2   : > { %vm1519_vm7 = vcmp.ge.f32.partialorder %v1448_v45, 0.0  ;;  %v1583_v1 = vmul.f32 0.01, %v1448_v45  ;;  %v1645_v2 = vsel %vm1517_vm5, %v1444_v36, %v1581_v56  ;;  %v9567_v24 = vrot.slane %v9493_v9, %v8939_v55  ;;  %v9573_v56 = vld [vmem:[#allocation3 + $0x440] sm:$0xff] }
 0x2c3   : > { %v1646_v7 = vsel %vm1518_vm6, %v1446_v0, %v1582_v43  ;;  %v9571_v27 = vrot.slane %v9493_v9, %v8936_v54 }
 0x2c4   : > { %v1647_v6 = vsel %vm1519_vm7, %v1448_v45, %v1583_v1  ;;  %v1680_v13 = vpack.c.bf16 %v1646_v7, %v1644_v4  ;;  %v9579_v1 = vld [vmem:[#allocation3 + $0x468] sm:$0xff] }
 0x2c5   : > { %v1681_v61 = vpack.c.bf16 %v1647_v6, %v1645_v2 }
 0x2c7   : > { %2262 = vmatprep.mubr.bf16.mxu1 %v1681_v61  ;;  %2455 = vmatprep.mubr.bf16.mxu0 %v1681_v61 }
 0x2c8   : > { %2263 = vmatmul.mubr.bf16.gmra.mrb[88].mxu1 %v1680_v13  ;;  %2456 = vmatmul.mubr.bf16.gmra.mrb[88].mxu0 %v1680_v13  ;;  %v7537_v13 = vcombine.low %v9541_v15, %v9543_v39 }
 0x2ca   : > { %v2347_v22 = vpop.f32.mrb[44].mxu0 }
 0x2cb   : > { %v2348_v3 = vadd.f32 %v2347_v22, %v9500_v38  ;;  %v2349_v19 = vpop.f32.mrb[45].mxu0 }
 0x2cc   : > { %v2350_v63 = vadd.f32 %v2349_v19, %v9506_v42  ;;  %v2351_v47 = vpop.f32.mrb[46].mxu0  ;;  %v9590_v19 = vld [vmem:[#allocation3 + $0x4a0] sm:$0xff] }
 0x2cd   : > { %v2630_v60 = vmul.f32 0.01, %v2348_v3  ;;  %v2352_v20 = vadd.f32 %v2351_v47, %v9500_v38  ;;  %v2353_v21 = vpop.f32.mrb[47].mxu0  ;;  %vm2502_vm8 = vcmp.ge.f32.partialorder %v2348_v3, 0.0 }
 0x2ce   : > { %v2631_v25 = vmul.f32 0.01, %v2350_v63  ;;  %v2354_v59 = vadd.f32 %v2353_v21, %v9506_v42  ;;  %vm2503_vm9 = vcmp.ge.f32.partialorder %v2350_v63, 0.0 }
 0x2cf   : > { %vm2506_vm10 = vcmp.ge.f32.partialorder %v2352_v20, 0.0  ;;  %v2634_v33 = vmul.f32 0.01, %v2352_v20  ;;  %v1451_v41 = vpop.f32.mrb[28].mxu1  ;;  %v2758_v29 = vsel %vm2502_vm8, %v2348_v3, %v2630_v60  ;;  %v9588_v3 = vld [vmem:[#allocation3 + $0x480] sm:$0xff] }
 0x2d0   : > { %vm2507_vm11 = vcmp.ge.f32.partialorder %v2354_v59, 0.0  ;;  %v2635_v26 = vmul.f32 0.01, %v2354_v59  ;;  %v1452_v53 = vadd.f32 %v1451_v41, %v9379_v18  ;;  %v1453_v37 = vpop.f32.mrb[29].mxu1  ;;  %v2759_v31 = vsel %vm2503_vm9, %v2350_v63, %v2631_v25  ;;  %v9599_v25 = vld [vmem:[#allocation3 + $0x488] sm:$0xff] }
 0x2d1   : > { %v2762_v30 = vsel %vm2506_vm10, %v2352_v20, %v2634_v33  ;;  %v1454_v32 = vadd.f32 %v1453_v37, %v9382_v28  ;;  %v1455_v34 = vpop.f32.mrb[30].mxu1  ;;  %v7554_v37 = vcombine.high %v9588_v3, %v9590_v19 }
 0x2d2   : > { %v9558_v14 = vpack.c.bf16 %v2762_v30, %v2758_v29  ;;  %v2763_v46 = vsel %vm2507_vm11, %v2354_v59, %v2635_v26  ;;  %v1584_v49 = vmul.f32 0.01, %v1452_v53  ;;  %v1456_v50 = vadd.f32 %v1455_v34, %v9379_v18  ;;  %v1457_v52 = vpop.f32.mrb[31].mxu1  ;;  %v9575_v18 = vld [vmem:[#allocation3 + $0x460] sm:$0xff]  ;;  %v9601_v59 = vld [vmem:[#allocation3 + $0x4a8] sm:$0xff] }
 0x2d3   : > { %v9561_v35 = vpack.c.bf16 %v2763_v46, %v2759_v31  ;;  %vm1520_vm12 = vcmp.ge.f32.partialorder %v1452_v53, 0.0  ;;  %v1585_v40 = vmul.f32 0.01, %v1454_v32  ;;  %v1458_v36 = vadd.f32 %v1457_v52, %v9382_v28  ;;  %v9577_v28 = vld [vmem:[#allocation3 + $0x448] sm:$0xff]  ;;  %v9609_v31 = vld [vmem:[#allocation3 + $0x4c0] sm:$0xff] }
 0x2d4   : > { %vm1521_vm13 = vcmp.ge.f32.partialorder %v1454_v32, 0.0  ;;  %vm1522_vm14 = vcmp.ge.f32.partialorder %v1456_v50, 0.0  ;;  %v1586_v57 = vmul.f32 0.01, %v1456_v50  ;;  %v1648_v45 = vsel %vm1520_vm12, %v1452_v53, %v1584_v49  ;;  %v9611_v46 = vld [vmem:[#allocation3 + $0x4e0] sm:$0xff]  ;;  %v9617_v52 = vld [vmem:[#allocation3 + $0x4c8] sm:$0xff] }
 0x2d5   : > { %vm1523_vm15 = vcmp.ge.f32.partialorder %v1458_v36, 0.0  ;;  %v1587_v0 = vmul.f32 0.01, %v1458_v36  ;;  %v1649_v7 = vsel %vm1521_vm13, %v1454_v32, %v1585_v40  ;;  %v7545_v22 = vcombine.low %v9573_v56, %v9575_v18  ;;  %v9619_v40 = vld [vmem:[#allocation3 + $0x4e8] sm:$0xff] }
 0x2d6   : > { %v1650_v43 = vsel %vm1522_vm14, %v1456_v50, %v1586_v57  ;;  %v7546_v60 = vcombine.high %v9573_v56, %v9575_v18  ;;  %v7547_v20 = vcombine.low %v9577_v28, %v9579_v1  ;;  %v7548_v21 = vcombine.high %v9577_v28, %v9579_v1  ;;  %v9690_v18 = vld [vmem:[#allocation3 + $0x508] sm:$0xff] }
 0x2d7   : > { %v2124_v4 = vpop.f32.mrb[32].mxu1  ;;  %v1651_v2 = vsel %vm1523_vm15, %v1458_v36, %v1587_v0  ;;  %v1682_v6 = vpack.c.bf16 %v1650_v43, %v1648_v45  ;;  %v7553_v29 = vcombine.low %v9588_v3, %v9590_v19  ;;  %v7555_v49 = vcombine.low %v9599_v25, %v9601_v59  ;;  %v9692_v28 = vld [vmem:[#allocation3 + $0x528] sm:$0xff]  ;;  %v9735_v19 = vld [vmem:[#allocation3 + $0x580] sm:$0xff] }
 0x2d8   : > { %v2125_v9 = vadd.f32 %v2124_v4, %v9567_v24  ;;  %v2126_v61 = vpop.f32.mrb[33].mxu1  ;;  %v1683_v17 = vpack.c.bf16 %v1651_v2, %v1649_v7  ;;  %v7556_v50 = vcombine.high %v9599_v25, %v9601_v59  ;;  %v9737_v25 = vld [vmem:[#allocation3 + $0x5a0] sm:$0xff] }
 0x2d9   : > { %v2127_v63 = vadd.f32 %v2126_v61, %v9571_v27  ;;  %v2128_v47 = vpop.f32.mrb[34].mxu1 }
 0x2da   : > { %vm2476_vm0 = vcmp.ge.f32.partialorder %v2125_v9, 0.0  ;;  %v2604_v33 = vmul.f32 0.01, %v2125_v9  ;;  %v2129_v26 = vadd.f32 %v2128_v47, %v9567_v24  ;;  %v2130_v41 = vpop.f32.mrb[35].mxu1  ;;  %2272 = vmatprep.mubr.bf16.mxu1 %v1683_v17  ;;  %2465 = vmatprep.mubr.bf16.mxu0 %v1683_v17 }
 0x2db   : > { %vm2477_vm1 = vcmp.ge.f32.partialorder %v2127_v63, 0.0  ;;  %v2605_v30 = vmul.f32 0.01, %v2127_v63  ;;  %v2131_v53 = vadd.f32 %v2130_v41, %v9571_v27  ;;  %2273 = vmatmul.mubr.bf16.gmra.mrb[92].mxu1 %v1682_v6  ;;  %2466 = vmatmul.mubr.bf16.gmra.mrb[92].mxu0 %v1682_v6 }
 0x2dc   : > { %vm2480_vm2 = vcmp.ge.f32.partialorder %v2129_v26, 0.0  ;;  %v2608_v32 = vmul.f32 0.01, %v2129_v26  ;;  %v2732_v36 = vsel %vm2476_vm0, %v2125_v9, %v2604_v33  ;;  %v7562_v9 = vcombine.high %v9609_v31, %v9611_v46 }
 0x2dd   : > { %v2357_v34 = vpop.f32.mrb[48].mxu0  ;;  %vm2481_vm3 = vcmp.ge.f32.partialorder %v2131_v53, 0.0  ;;  %v2609_v57 = vmul.f32 0.01, %v2131_v53  ;;  %v2733_v43 = vsel %vm2477_vm1, %v2127_v63, %v2605_v30 }
 0x2de   : > { %v2358_v0 = vadd.f32 %v2357_v34, %v9500_v38  ;;  %v2359_v45 = vpop.f32.mrb[49].mxu0  ;;  %v2736_v4 = vsel %vm2480_vm2, %v2129_v26, %v2608_v32 }
 0x2df   : > { %v2360_v7 = vadd.f32 %v2359_v45, %v9506_v42  ;;  %v2361_v2 = vpop.f32.mrb[50].mxu0  ;;  %v9627_v61 = vpack.c.bf16 %v2736_v4, %v2732_v36  ;;  %v2737_v17 = vsel %vm2481_vm3, %v2131_v53, %v2609_v57  ;;  %v2134_v47 = vpop.f32.mrb[36].mxu1 }
 0x2e0   : > { %v2363_v41 = vpop.f32.mrb[51].mxu0  ;;  %v9633_v34 = vpack.c.bf16 %v2737_v17, %v2733_v43  ;;  %vm2510_vm4 = vcmp.ge.f32.partialorder %v2358_v0, 0.0  ;;  %v2638_v63 = vmul.f32 0.01, %v2358_v0  ;;  %v2135_v26 = vadd.f32 %v2134_v47, %v9567_v24  ;;  %v2136_v30 = vpop.f32.mrb[37].mxu1 }
 0x2e1   : > { %v2639_v32 = vmul.f32 0.01, %v2360_v7  ;;  %v2362_v36 = vadd.f32 %v2361_v2, %v9500_v38  ;;  %v2137_v53 = vadd.f32 %v2136_v30, %v9571_v27  ;;  %v2364_v57 = vadd.f32 %v2363_v41, %v9506_v42  ;;  %v2138_v45 = vpop.f32.mrb[38].mxu1 }
 0x2e2   : > { %vm2511_vm5 = vcmp.ge.f32.partialorder %v2360_v7, 0.0  ;;  %vm2484_vm6 = vcmp.ge.f32.partialorder %v2135_v26, 0.0  ;;  %v2612_v4 = vmul.f32 0.01, %v2135_v26  ;;  %v2139_v8 = vadd.f32 %v2138_v45, %v9567_v24  ;;  %v2140_v43 = vpop.f32.mrb[39].mxu1  ;;  %4534 = vmatprep.mubr.bf16.mxu1 %v9633_v34  ;;  %4920 = vmatprep.mubr.bf16.mxu0 %v9633_v34 }
 0x2e3   : > { %vm2514_vm7 = vcmp.ge.f32.partialorder %v2362_v36, 0.0  ;;  %v2642_v17 = vmul.f32 0.01, %v2362_v36  ;;  %vm2485_vm8 = vcmp.ge.f32.partialorder %v2137_v53, 0.0  ;;  %v2613_v47 = vmul.f32 0.01, %v2137_v53  ;;  %4535 = vmatmul.mubr.bf16.vlgmr.msra.gmra.mrb[96].mxu1 %v9627_v61  ;;  %4921 = vmatmul.mubr.bf16.vlgmr.msra.gmra.mrb[96].mxu0 %v9627_v61 }
 0x2e4   : > { %v2766_v2 = vsel %vm2510_vm4, %v2358_v0, %v2638_v63  ;;  %vm2515_vm9 = vcmp.ge.f32.partialorder %v2364_v57, 0.0  ;;  %v2643_v41 = vmul.f32 0.01, %v2364_v57  ;;  %vm2488_vm10 = vcmp.ge.f32.partialorder %v2139_v8, 0.0  ;;  %4696 = vmatpush1.bf16.msra.mxu1 %v7537_v13  ;;  %5082 = vmatpush1.bf16.msra.mxu0 %v7539_v5  ;;  %v9663_v13 = vld [vmem:[#allocation3 + $0x500] sm:$0xff] }
 0x2e5   : > { %v2767_v30 = vsel %vm2511_vm5, %v2360_v7, %v2639_v32  ;;  %v2770_v45 = vsel %vm2514_vm7, %v2362_v36, %v2642_v17  ;;  %v2616_v33 = vmul.f32 0.01, %v2139_v8  ;;  %v2141_v6 = vadd.f32 %v2140_v43, %v9571_v27  ;;  %4697 = vmatprep.subr.bf16.mxu1 %v7546_v60  ;;  %5083 = vmatprep.subr.bf16.mxu0 %v7548_v21  ;;  %v9665_v5 = vld [vmem:[#allocation3 + $0x520] sm:$0xff] }
 0x2e6   : > { %v2740_v15 = vsel %vm2484_vm6, %v2135_v26, %v2612_v4  ;;  %v9660_v39 = vpack.c.bf16 %v2770_v45, %v2766_v2  ;;  %v2741_v10 = vsel %vm2485_vm8, %v2137_v53, %v2613_v47  ;;  %v2771_v62 = vsel %vm2515_vm9, %v2364_v57, %v2643_v41  ;;  %v9706_v47 = vld [vmem:[#allocation3 + $0x540] sm:$0xff]  ;;  %v9710_v41 = vld [vmem:[#allocation3 + $0x548] sm:$0xff] }
 0x2e7   : > { %v9667_v0 = vpack.c.bf16 %v2771_v62, %v2767_v30  ;;  %v2744_v7 = vsel %vm2488_vm10, %v2139_v8, %v2616_v33  ;;  %vm2489_vm11 = vcmp.ge.f32.partialorder %v2141_v6, 0.0  ;;  %v2617_v60 = vmul.f32 0.01, %v2141_v6  ;;  %v2144_v63 = vpop.f32.mrb[40].mxu1  ;;  %v9708_v2 = vld [vmem:[#allocation3 + $0x560] sm:$0xff] }
 0x2e8   : > { %v9670_v32 = vpack.c.bf16 %v2744_v7, %v2740_v15  ;;  %v2145_v21 = vadd.f32 %v2144_v63, %v9567_v24  ;;  %v2146_v26 = vpop.f32.mrb[41].mxu1  ;;  %4698 = vmatpush1.bf16.msra.mxu1 %v7545_v22  ;;  %5084 = vmatpush1.bf16.msra.mxu0 %v7547_v20  ;;  %v7564_v36 = vcombine.high %v9617_v52, %v9619_v40 }
 0x2e9   : > { %v2745_v8 = vsel %vm2489_vm11, %v2141_v6, %v2617_v60  ;;  %v2147_v33 = vadd.f32 %v2146_v26, %v9571_v27  ;;  %v2148_v53 = vpop.f32.mrb[42].mxu1  ;;  %4699 = vmatprep.subr.bf16.mxu1 %v7554_v37  ;;  %5085 = vmatprep.subr.bf16.mxu0 %v7556_v50  ;;  %v7569_v56 = vcombine.low %v9663_v13, %v9665_v5 }
 0x2ea   : > { %v9694_v1 = vpack.c.bf16 %v2745_v8, %v2741_v10  ;;  %vm2492_vm12 = vcmp.ge.f32.partialorder %v2145_v21, 0.0  ;;  %v2620_v22 = vmul.f32 0.01, %v2145_v21  ;;  %v2149_v20 = vadd.f32 %v2148_v53, %v9567_v24  ;;  %v2150_v6 = vpop.f32.mrb[43].mxu1  ;;  %v9715_v10 = vld [vmem:[#allocation3 + $0x568] sm:$0xff] }
 0x2eb   : > { %vm2493_vm13 = vcmp.ge.f32.partialorder %v2147_v33, 0.0  ;;  %v2621_v37 = vmul.f32 0.01, %v2147_v33  ;;  %v2151_v57 = vadd.f32 %v2150_v6, %v9571_v27  ;;  %v7570_v50 = vcombine.high %v9663_v13, %v9665_v5 }
 0x2ec   : > { %vm2496_vm14 = vcmp.ge.f32.partialorder %v2149_v20, 0.0  ;;  %v2624_v4 = vmul.f32 0.01, %v2149_v20  ;;  %4544 = vmatprep.mubr.bf16.mxu1 %v9694_v1  ;;  %4930 = vmatprep.mubr.bf16.mxu0 %v9694_v1  ;;  %v7571_v43 = vcombine.low %v9690_v18, %v9692_v28  ;;  %v7572_v17 = vcombine.high %v9690_v18, %v9692_v28 }
 0x2ed   : > { %v2748_v30 = vsel %vm2492_vm12, %v2145_v21, %v2620_v22  ;;  %v2749_v45 = vsel %vm2493_vm13, %v2147_v33, %v2621_v37  ;;  %vm2497_vm15 = vcmp.ge.f32.partialorder %v2151_v57, 0.0  ;;  %v2625_v15 = vmul.f32 0.01, %v2151_v57  ;;  %4545 = vmatmul.mubr.bf16.gmra.mrb[100].mxu1 %v9670_v32  ;;  %4931 = vmatmul.mubr.bf16.gmra.mrb[100].mxu0 %v9670_v32 }
 0x2ee   : > { %v2752_v62 = vsel %vm2496_vm14, %v2149_v20, %v2624_v4  ;;  %4700 = vmatpush1.bf16.msra.mxu1 %v7553_v29  ;;  %5086 = vmatpush1.bf16.msra.mxu0 %v7555_v49  ;;  %v7578_v60 = vcombine.high %v9706_v47, %v9708_v2  ;;  %v7580_v22 = vcombine.high %v9710_v41, %v9715_v10 }
 0x2ef   : > { %v9728_v63 = vpack.c.bf16 %v2752_v62, %v2748_v30  ;;  %v2753_v21 = vsel %vm2497_vm15, %v2151_v57, %v2625_v15  ;;  %v2154_v26 = vpop.f32.mrb[44].mxu1  ;;  %4701 = vmatprep.subr.bf16.mxu1 %v7562_v9  ;;  %5087 = vmatprep.subr.bf16.mxu0 %v7564_v36  ;;  %v9745_v9 = vld [vmem:[#allocation3 + $0x588] sm:$0xff] }
 0x2f0   : > { %v2367_v8 = vpop.f32.mrb[52].mxu0  ;;  %v9739_v59 = vpack.c.bf16 %v2753_v21, %v2749_v45  ;;  %v2155_v29 = vadd.f32 %v2154_v26, %v9567_v24  ;;  %v2156_v49 = vpop.f32.mrb[45].mxu1  ;;  %v9747_v36 = vld [vmem:[#allocation3 + $0x5a8] sm:$0xff] }
 0x2f1   : > { %11231 = vst [vmem:[#allocation19_spill] sm:$0xff] %v9728_v63  ;;  %v2368_v33 = vadd.f32 %v2367_v8, %v9500_v38  ;;  %v2369_v53 = vpop.f32.mrb[53].mxu0  ;;  %v2157_v20 = vadd.f32 %v2156_v49, %v9571_v27  ;;  %v2158_v6 = vpop.f32.mrb[46].mxu1  ;;  %v11233_v49 = vcombine.low %v9609_v31, %v9611_v46  ;;  %v7587_v4 = vcombine.low %v9745_v9, %v9747_v36 }
 0x2f2   : > { %11232 = vst [vmem:[#allocation20_spill] sm:$0xff] %v9739_v59  ;;  %v2370_v37 = vadd.f32 %v2369_v53, %v9506_v42  ;;  %v2371_v57 = vpop.f32.mrb[54].mxu0  ;;  %vm2500_vm0 = vcmp.ge.f32.partialorder %v2155_v29, 0.0  ;;  %v2628_v45 = vmul.f32 0.01, %v2155_v29  ;;  %4554 = vmatprep.mubr.bf16.mxu1 %v9739_v59  ;;  %4940 = vmatprep.mubr.bf16.mxu0 %v9739_v59  ;;  %v2159_v21 = vadd.f32 %v2158_v6, %v9567_v24  ;;  %v2160_v26 = vpop.f32.mrb[47].mxu1 }
 0x2f3   : > { %vm2518_vm1 = vcmp.ge.f32.partialorder %v2368_v33, 0.0  ;;  %v2646_v15 = vmul.f32 0.01, %v2368_v33  ;;  %vm2501_vm2 = vcmp.ge.f32.partialorder %v2157_v20, 0.0  ;;  %v2629_v62 = vmul.f32 0.01, %v2157_v20  ;;  %4702 = vmatpush1.bf16.msra.mxu1 %v11233_v49 }
 0x2f4   : > { %v2373_v8 = vpop.f32.mrb[55].mxu0  ;;  %v11234_v53 = vcombine.low %v9617_v52, %v9619_v40  ;;  %v2756_v30 = vsel %vm2500_vm0, %v2155_v29, %v2628_v45  ;;  %vm2519_vm3 = vcmp.ge.f32.partialorder %v2370_v37, 0.0  ;;  %v2647_v3 = vmul.f32 0.01, %v2370_v37  ;;  %4703 = vmatprep.subr.bf16.mxu1 %v7570_v50 }
 0x2f5   : > { %v2161_v7 = vadd.f32 %v2160_v26, %v9571_v27  ;;  %v2774_v31 = vsel %vm2518_vm1, %v2368_v33, %v2646_v15  ;;  %vm2504_vm4 = vcmp.ge.f32.partialorder %v2159_v21, 0.0  ;;  %v2632_v46 = vmul.f32 0.01, %v2159_v21  ;;  %4555 = vmatmul.mubr.bf16.gmra.mrb[104].mxu1 %v9728_v63  ;;  %4941 = vmatmul.mubr.bf16.gmra.mrb[104].mxu0 %v9728_v63 }
 0x2f6   : > { %5088 = vmatpush1.bf16.msra.mxu0 %v11234_v53  ;;  %v2372_v52 = vadd.f32 %v2371_v57, %v9500_v38  ;;  %v2757_v40 = vsel %vm2501_vm2, %v2157_v20, %v2629_v62  ;;  %v2374_v6 = vadd.f32 %v2373_v8, %v9506_v42  ;;  %v2775_v50 = vsel %vm2519_vm3, %v2370_v37, %v2647_v3 }
 0x2f7   : > { %5089 = vmatprep.subr.bf16.mxu0 %v7572_v17  ;;  %vm2505_vm5 = vcmp.ge.f32.partialorder %v2161_v7, 0.0  ;;  %v2633_v29 = vmul.f32 0.01, %v2161_v7  ;;  %v2760_v45 = vsel %vm2504_vm4, %v2159_v21, %v2632_v46  ;;  %v2164_v33 = vpop.f32.mrb[48].mxu1  ;;  %4704 = vmatpush1.bf16.msra.mxu1 %v7569_v56  ;;  %v11237_v49 = vcombine.low %v9706_v47, %v9708_v2 }
 0x2f8   : > { %vm2522_vm6 = vcmp.ge.f32.partialorder %v2372_v52, 0.0  ;;  %v2650_v17 = vmul.f32 0.01, %v2372_v52  ;;  %v9783_v57 = vpack.c.bf16 %v2760_v45, %v2756_v30  ;;  %vm2523_vm7 = vcmp.ge.f32.partialorder %v2374_v6, 0.0  ;;  %v2166_v62 = vpop.f32.mrb[49].mxu1  ;;  %4705 = vmatprep.subr.bf16.mxu1 %v7578_v60 }
 0x2f9   : > { %v2761_v20 = vsel %vm2505_vm5, %v2161_v7, %v2633_v29  ;;  %v2651_v15 = vmul.f32 0.01, %v2374_v6  ;;  %v2165_v13 = vadd.f32 %v2164_v33, %v9567_v24  ;;  %v2167_v5 = vadd.f32 %v2166_v62, %v9571_v27  ;;  %v2168_v56 = vpop.f32.mrb[50].mxu1 }
 0x2fa   : > { %5090 = vmatpush1.bf16.msra.mxu0 %v7571_v43  ;;  %11235 = vst [vmem:[#allocation21_spill] sm:$0xff] %v9783_v57  ;;  %v9788_v3 = vpack.c.bf16 %v2761_v20, %v2757_v40  ;;  %v2778_v37 = vsel %vm2522_vm6, %v2372_v52, %v2650_v17  ;;  %v2169_v43 = vadd.f32 %v2168_v56, %v9567_v24  ;;  %v2170_v7 = vpop.f32.mrb[51].mxu1 }
 0x2fb   : > { %5091 = vmatprep.subr.bf16.mxu0 %v7580_v22  ;;  %v9792_v18 = vpack.c.bf16 %v2778_v37, %v2774_v31  ;;  %v2779_v28 = vsel %vm2523_vm7, %v2374_v6, %v2651_v15  ;;  %v7588_v30 = vcombine.high %v9745_v9, %v9747_v36  ;;  %vm2508_vm8 = vcmp.ge.f32.partialorder %v2165_v13, 0.0  ;;  %4706 = vmatpush1.bf16.msra.mxu1 %v11237_v49  ;;  %v3109_v6 = vld [vmem:[#allocation3 + $0x5c8] sm:$0xff] }
 0x2fc   : > { %11236 = vst [vmem:[#allocation22_spill] sm:$0xff] %v9788_v3  ;;  %v9797_v21 = vpack.c.bf16 %v2779_v28, %v2775_v50  ;;  %v2636_v60 = vmul.f32 0.01, %v2165_v13  ;;  %vm2509_vm9 = vcmp.ge.f32.partialorder %v2167_v5, 0.0  ;;  %4564 = vmatprep.mubr.bf16.mxu1 %v9788_v3  ;;  %4950 = vmatprep.mubr.bf16.mxu0 %v9788_v3  ;;  %v2637_v22 = vmul.f32 0.01, %v2167_v5 }
 0x2fd   : > { %vm2512_vm10 = vcmp.ge.f32.partialorder %v2169_v43, 0.0  ;;  %v2640_v26 = vmul.f32 0.01, %v2169_v43  ;;  %v2171_v8 = vadd.f32 %v2170_v7, %v9571_v27  ;;  %v11238_v53 = vcombine.low %v9710_v41, %v9715_v10  ;;  %4565 = vmatmul.mubr.bf16.gmra.mrb[108].mxu1 %v9783_v57  ;;  %4951 = vmatmul.mubr.bf16.gmra.mrb[108].mxu0 %v9783_v57  ;;  %v3108_v41 = vld [vmem:[#allocation3 + $0x5c0] sm:$0xff]  ;;  %v3113_v15 = vld [vmem:[#allocation3 + $0x5e8] sm:$0xff] }
 0x2fe   : > { %v2764_v31 = vsel %vm2508_vm8, %v2165_v13, %v2636_v60  ;;  %v11239_v40 = vcombine.high %v9735_v19, %v9737_v25  ;;  %v2765_v47 = vsel %vm2509_vm9, %v2167_v5, %v2637_v22  ;;  %v3112_v10 = vld [vmem:[#allocation3 + $0x5e0] sm:$0xff]  ;;  %v11241_v33 = vcombine.low %v9735_v19, %v9737_v25 }
 0x2ff   : > { %5092 = vmatpush1.bf16.msra.mxu0 %v11238_v53  ;;  %v2768_v46 = vsel %vm2512_vm10, %v2169_v43, %v2640_v26  ;;  %vm2513_vm11 = vcmp.ge.f32.partialorder %v2171_v8, 0.0  ;;  %v2641_v52 = vmul.f32 0.01, %v2171_v8  ;;  %v2174_v29 = vpop.f32.mrb[52].mxu1  ;;  %v7593_v20 = vcombine.low %v3108_v41, %v3112_v10 }
 0x300   : > { %4707 = vmatprep.subr.bf16.mxu1 %v11239_v40  ;;  %5093 = vmatprep.subr.bf16.mxu0 %v7588_v30  ;;  %v9814_v2 = vpack.c.bf16 %v2768_v46, %v2764_v31  ;;  %v2175_v50 = vadd.f32 %v2174_v29, %v9567_v24  ;;  %v2176_v17 = vpop.f32.mrb[53].mxu1  ;;  %v7594_v5 = vcombine.high %v3108_v41, %v3112_v10 }
 0x301   : > { %v2769_v45 = vsel %vm2513_vm11, %v2171_v8, %v2641_v52  ;;  %4708 = vmatpush1.bf16.msra.mxu1 %v11241_v33  ;;  %v2177_v37 = vadd.f32 %v2176_v17, %v9571_v27  ;;  %v2178_v13 = vpop.f32.mrb[54].mxu1  ;;  %v7595_v56 = vcombine.low %v3109_v6, %v3113_v15  ;;  %v7596_v25 = vcombine.high %v3109_v6, %v3113_v15 }
 0x302   : > { %11240 = vst [vmem:[#allocation23_spill] sm:$0xff] %v9814_v2  ;;  %v9823_v62 = vpack.c.bf16 %v2769_v45, %v2765_v47  ;;  %vm2516_vm12 = vcmp.ge.f32.partialorder %v2175_v50, 0.0  ;;  %v2644_v28 = vmul.f32 0.01, %v2175_v50  ;;  %v2179_v43 = vadd.f32 %v2178_v13, %v9567_v24  ;;  %v2180_v7 = vpop.f32.mrb[55].mxu1  ;;  %4709 = vmatprep.subr.bf16.mxu1 %v7594_v5  ;;  %v3116_v45 = vld [vmem:[#allocation3 + $0x600] sm:$0xff] }
 0x303   : > { %5094 = vmatpush1.bf16.msra.mxu0 %v7587_v4  ;;  %v2377_v19 = vpop.f32.mrb[56].mxu0  ;;  %vm2517_vm13 = vcmp.ge.f32.partialorder %v2177_v37, 0.0  ;;  %v2645_v30 = vmul.f32 0.01, %v2177_v37  ;;  %v2181_v9 = vadd.f32 %v2180_v7, %v9571_v27 }
 0x304   : > { %11242 = vst [vmem:[#allocation24_spill] sm:$0xff] %v9823_v62  ;;  %4574 = vmatprep.mubr.bf16.mxu1 %v9823_v62  ;;  %4960 = vmatprep.mubr.bf16.mxu0 %v9823_v62  ;;  %v2378_v36 = vadd.f32 %v2377_v19, %v9500_v38  ;;  %v2379_v4 = vpop.f32.mrb[57].mxu0  ;;  %v2772_v60 = vsel %vm2516_vm12, %v2175_v50, %v2644_v28  ;;  %vm2520_vm14 = vcmp.ge.f32.partialorder %v2179_v43, 0.0  ;;  %v2648_v22 = vmul.f32 0.01, %v2179_v43  ;;  %v3120_v50 = vld [vmem:[#allocation3 + $0x620] sm:$0xff] }
 0x305   : > { %v2380_v26 = vadd.f32 %v2379_v4, %v9506_v42  ;;  %v2381_v8 = vpop.f32.mrb[58].mxu0  ;;  %5095 = vmatprep.subr.bf16.mxu0 %v7596_v25  ;;  %v2773_v49 = vsel %vm2517_vm13, %v2177_v37, %v2645_v30  ;;  %vm2521_vm15 = vcmp.ge.f32.partialorder %v2181_v9, 0.0  ;;  %v2649_v53 = vmul.f32 0.01, %v2181_v9  ;;  %4575 = vmatmul.mubr.bf16.gmra.mrb[112].mxu1 %v9814_v2  ;;  %v3117_v4 = vld [vmem:[#allocation3 + $0x608] sm:$0xff] }
 0x306   : > { %vm2526_vm0 = vcmp.ge.f32.partialorder %v2378_v36, 0.0  ;;  %4961 = vmatmul.mubr.bf16.gmra.mrb[112].mxu0 %v9814_v2  ;;  %v2383_v31 = vpop.f32.mrb[59].mxu0  ;;  %v2776_v46 = vsel %vm2520_vm14, %v2179_v43, %v2648_v22  ;;  %v2654_v52 = vmul.f32 0.01, %v2378_v36  ;;  %4710 = vmatpush1.bf16.msra.mxu1 %v7593_v20  ;;  %v2382_v41 = vadd.f32 %v2381_v8, %v9500_v38 }
 0x307   : > { %vm2527_vm1 = vcmp.ge.f32.partialorder %v2380_v26, 0.0  ;;  %v2655_v40 = vmul.f32 0.01, %v2380_v26  ;;  %5096 = vmatpush1.bf16.msra.mxu0 %v7595_v56  ;;  %v9834_v47 = vpack.c.bf16 %v2776_v46, %v2772_v60  ;;  %v2777_v29 = vsel %vm2521_vm15, %v2181_v9, %v2649_v53  ;;  %v2184_v6 = vpop.f32.mrb[56].mxu1  ;;  %v3121_v60 = vld [vmem:[#allocation3 + $0x628] sm:$0xff] }
 0x308   : > { %v2384_v10 = vadd.f32 %v2383_v31, %v9506_v42  ;;  %v9838_v17 = vpack.c.bf16 %v2777_v29, %v2773_v49  ;;  %v2782_v33 = vsel %vm2526_vm0, %v2378_v36, %v2654_v52  ;;  %v2185_v15 = vadd.f32 %v2184_v6, %v9567_v24  ;;  %v2186_v37 = vpop.f32.mrb[57].mxu1  ;;  %v3124_v52 = vld [vmem:[#allocation3 + $0x640] sm:$0xff]  ;;  %v3125_v29 = vld [vmem:[#allocation3 + $0x648] sm:$0xff] }
 0x309   : > { %11243 = vst [vmem:[#allocation25_spill] sm:$0xff] %v9834_v47  ;;  %vm2530_vm2 = vcmp.ge.f32.partialorder %v2382_v41, 0.0  ;;  %v2658_v20 = vmul.f32 0.01, %v2382_v41  ;;  %v2783_v5 = vsel %vm2527_vm1, %v2380_v26, %v2655_v40  ;;  %v2187_v28 = vadd.f32 %v2186_v37, %v9571_v27  ;;  %v2188_v43 = vpop.f32.mrb[58].mxu1  ;;  %v3128_v40 = vld [vmem:[#allocation3 + $0x660] sm:$0xff] }
 0x30a   : > { %11244 = vst [vmem:[#allocation26_spill] sm:$0xff] %v9838_v17  ;;  %vm2531_vm3 = vcmp.ge.f32.partialorder %v2384_v10, 0.0  ;;  %v2659_v13 = vmul.f32 0.01, %v2384_v10  ;;  %v2652_v56 = vmul.f32 0.01, %v2185_v15  ;;  %4584 = vmatprep.mubr.bf16.mxu1 %v9838_v17  ;;  %4970 = vmatprep.mubr.bf16.mxu0 %v9838_v17  ;;  %v7601_v7 = vcombine.low %v3116_v45, %v3120_v50 }
 0x30b   : > { %v2786_v19 = vsel %vm2530_vm2, %v2382_v41, %v2658_v20  ;;  %v2189_v30 = vadd.f32 %v2188_v43, %v9567_v24  ;;  %v2190_v9 = vpop.f32.mrb[59].mxu1  ;;  %v7602_v36 = vcombine.high %v3116_v45, %v3120_v50  ;;  %vm2524_vm4 = vcmp.ge.f32.partialorder %v2185_v15, 0.0  ;;  %v3129_v45 = vld [vmem:[#allocation3 + $0x668] sm:$0xff] }
 0x30c   : > { %v2787_v25 = vsel %vm2531_vm3, %v2384_v10, %v2659_v13  ;;  %v9847_v22 = vpack.c.bf16 %v2786_v19, %v2782_v33  ;;  %v2653_v8 = vmul.f32 0.01, %v2187_v28  ;;  %v2191_v53 = vadd.f32 %v2190_v9, %v9571_v27  ;;  %v3137_v9 = vld [vmem:[#allocation3 + $0x6a8] sm:$0xff] }
 0x30d   : > { %v9849_v26 = vpack.c.bf16 %v2787_v25, %v2783_v5  ;;  %vm2528_vm5 = vcmp.ge.f32.partialorder %v2189_v30, 0.0  ;;  %v2656_v49 = vmul.f32 0.01, %v2189_v30  ;;  %4585 = vmatmul.mubr.bf16.gmra.mrb[116].mxu1 %v9834_v47  ;;  %vm2525_vm6 = vcmp.ge.f32.partialorder %v2187_v28, 0.0  ;;  %4711 = vmatprep.subr.bf16.mxu1 %v7602_v36 }
 0x30e   : > { %4971 = vmatmul.mubr.bf16.gmra.mrb[116].mxu0 %v9834_v47  ;;  %v7603_v31 = vcombine.low %v3117_v4, %v3121_v60  ;;  %v7604_v46 = vcombine.high %v3117_v4, %v3121_v60  ;;  %v2780_v41 = vsel %vm2524_vm4, %v2185_v15, %v2652_v56  ;;  %vm2529_vm7 = vcmp.ge.f32.partialorder %v2191_v53, 0.0  ;;  %4712 = vmatpush1.bf16.msra.mxu1 %v7601_v7  ;;  %v3132_v15 = vld [vmem:[#allocation3 + $0x680] sm:$0xff]  ;;  %v3133_v7 = vld [vmem:[#allocation3 + $0x688] sm:$0xff] }
 0x30f   : > { %v2784_v10 = vsel %vm2528_vm5, %v2189_v30, %v2656_v49  ;;  %v2657_v6 = vmul.f32 0.01, %v2191_v53  ;;  %v7609_v33 = vcombine.low %v3124_v52, %v3128_v40  ;;  %v7610_v37 = vcombine.high %v3124_v52, %v3128_v40  ;;  %v3136_v56 = vld [vmem:[#allocation3 + $0x6a0] sm:$0xff] }
 0x310   : > { %v9854_v50 = vpack.c.bf16 %v2784_v10, %v2780_v41  ;;  %5097 = vmatprep.subr.bf16.mxu0 %v7604_v46  ;;  %v2781_v20 = vsel %vm2525_vm6, %v2187_v28, %v2653_v8  ;;  %v7612_v5 = vcombine.high %v3125_v29, %v3129_v45  ;;  %v7611_v19 = vcombine.low %v3125_v29, %v3129_v45  ;;  %v3140_v46 = vld [vmem:[#allocation3 + $0x6c0] sm:$0xff] }
 0x311   : > { %v2785_v13 = vsel %vm2529_vm7, %v2191_v53, %v2657_v6  ;;  %5098 = vmatpush1.bf16.msra.mxu0 %v7603_v31  ;;  %4713 = vmatprep.subr.bf16.mxu1 %v7610_v37  ;;  %v7617_v25 = vcombine.low %v3132_v15, %v3136_v56  ;;  %v7618_v30 = vcombine.high %v3132_v15, %v3136_v56  ;;  %v3144_v52 = vld [vmem:[#allocation3 + $0x6e0] sm:$0xff] }
 0x312   : > { %11245 = vst [vmem:[#allocation27_spill] sm:$0xff] %v9854_v50  ;;  %v9857_v43 = vpack.c.bf16 %v2785_v13, %v2781_v20  ;;  %5099 = vmatprep.subr.bf16.mxu0 %v7612_v5  ;;  %4714 = vmatpush1.bf16.msra.mxu1 %v7609_v33  ;;  %v7620_v4 = vcombine.high %v3133_v7, %v3137_v9 }
 0x313   : > { %4715 = vmatprep.subr.bf16.mxu1 %v7618_v30  ;;  %v7619_v31 = vcombine.low %v3133_v7, %v3137_v9  ;;  %v7625_v37 = vcombine.low %v3140_v46, %v3144_v52 }
 0x314   : > { %11246 = vst [vmem:[#allocation28_spill] sm:$0xff] %v9857_v43  ;;  %4594 = vmatprep.mubr.bf16.mxu1 %v9857_v43  ;;  %4980 = vmatprep.mubr.bf16.mxu0 %v9857_v43 }
 0x315   : > { %4595 = vmatmul.mubr.bf16.gmra.mrb[120].mxu1 %v9854_v50  ;;  %5100 = vmatpush1.bf16.msra.mxu0 %v7611_v19 }
 0x316   : > { %4981 = vmatmul.mubr.bf16.gmra.mrb[120].mxu0 %v9854_v50  ;;  %v2194_v28 = vpop.f32.mrb[60].mxu1  ;;  %v2387_v36 = vpop.f32.mrb[60].mxu0  ;;  %5101 = vmatprep.subr.bf16.mxu0 %v7620_v4 }
 0x317   : > { %v2195_v60 = vadd.f32 %v2194_v28, %v9567_v24  ;;  %v2388_v8 = vadd.f32 %v2387_v36, %v9500_v38  ;;  %v2196_v49 = vpop.f32.mrb[61].mxu1  ;;  %v2389_v53 = vpop.f32.mrb[61].mxu0  ;;  %4716 = vmatpush1.bf16.msra.mxu1 %v7617_v25  ;;  %v3141_v28 = vld [vmem:[#allocation3 + $0x6c8] sm:$0xff] }
 0x318   : > { %v2197_v40 = vadd.f32 %v2196_v49, %v9571_v27  ;;  %v2390_v29 = vadd.f32 %v2389_v53, %v9506_v42  ;;  %v2198_v41 = vpop.f32.mrb[62].mxu1  ;;  %v2391_v10 = vpop.f32.mrb[62].mxu0  ;;  %v3145_v36 = vld [vmem:[#allocation3 + $0x6e8] sm:$0xff] }
 0x319   : > { %vm2532_vm8 = vcmp.ge.f32.partialorder %v2195_v60, 0.0  ;;  %v2660_v6 = vmul.f32 0.01, %v2195_v60  ;;  %vm2534_vm9 = vcmp.ge.f32.partialorder %v2388_v8, 0.0  ;;  %v2662_v45 = vmul.f32 0.01, %v2388_v8  ;;  %5102 = vmatpush1.bf16.msra.mxu0 %v7619_v31 }
 0x31a   : > { %vm2533_vm10 = vcmp.ge.f32.partialorder %v2197_v40, 0.0  ;;  %v2661_v33 = vmul.f32 0.01, %v2197_v40  ;;  %vm2535_vm11 = vcmp.ge.f32.partialorder %v2390_v29, 0.0  ;;  %v2663_v13 = vmul.f32 0.01, %v2390_v29 }
 0x31b   : > { %v2788_v20 = vsel %vm2532_vm8, %v2195_v60, %v2660_v6  ;;  %v2199_v5 = vadd.f32 %v2198_v41, %v9567_v24  ;;  %v2392_v19 = vadd.f32 %v2391_v10, %v9500_v38  ;;  %v2200_v15 = vpop.f32.mrb[63].mxu1  ;;  %v2393_v56 = vpop.f32.mrb[63].mxu0  ;;  %v2790_v7 = vsel %vm2534_vm9, %v2388_v8, %v2662_v45 }
 0x31c   : > { %v2789_v30 = vsel %vm2533_vm10, %v2197_v40, %v2661_v33  ;;  %v2201_v25 = vadd.f32 %v2200_v15, %v9571_v27  ;;  %v2394_v9 = vadd.f32 %v2393_v56, %v9506_v42  ;;  %v2791_v41 = vsel %vm2535_vm11, %v2390_v29, %v2663_v13  ;;  %v3149_v29 = vld [vmem:[#allocation3 + $0x708] sm:$0xff] }
 0x31d   : > { %vm2536_vm12 = vcmp.ge.f32.partialorder %v2199_v5, 0.0  ;;  %v2664_v4 = vmul.f32 0.01, %v2199_v5  ;;  %vm2538_vm13 = vcmp.ge.f32.partialorder %v2392_v19, 0.0  ;;  %v2666_v60 = vmul.f32 0.01, %v2392_v19 }
 0x31e   : > { %vm2537_vm14 = vcmp.ge.f32.partialorder %v2201_v25, 0.0  ;;  %v2665_v49 = vmul.f32 0.01, %v2201_v25  ;;  %vm2539_vm15 = vcmp.ge.f32.partialorder %v2394_v9, 0.0  ;;  %v2667_v53 = vmul.f32 0.01, %v2394_v9 }
 0x31f   : > { %v2792_v10 = vsel %vm2536_vm12, %v2199_v5, %v2664_v4  ;;  %v2794_v31 = vsel %vm2538_vm13, %v2392_v19, %v2666_v60  ;;  %v7626_v8 = vcombine.high %v3140_v46, %v3144_v52  ;;  %v7628_v51 = vcombine.high %v3141_v28, %v3145_v36  ;;  %v3148_v46 = vld [vmem:[#allocation3 + $0x700] sm:$0xff]  ;;  %v3153_v5 = vld [vmem:[#allocation3 + $0x728] sm:$0xff] }
 0x320   : > { %v9872_v40 = vpack.c.bf16 %v2792_v10, %v2788_v20  ;;  %v9874_v6 = vpack.c.bf16 %v2794_v31, %v2790_v7  ;;  %v2793_v45 = vsel %vm2537_vm14, %v2201_v25, %v2665_v49  ;;  %v2795_v33 = vsel %vm2539_vm15, %v2394_v9, %v2667_v53  ;;  %v3152_v52 = vld [vmem:[#allocation3 + $0x720] sm:$0xff] }
 0x321   : > { %v9876_v15 = vpack.c.bf16 %v2793_v45, %v2789_v30  ;;  %v9878_v56 = vpack.c.bf16 %v2795_v33, %v2791_v41  ;;  %4717 = vmatprep.subr.bf16.mxu1 %v7626_v8  ;;  %v7627_v54 = vcombine.low %v3141_v28, %v3145_v36  ;;  %5103 = vmatprep.subr.bf16.mxu0 %v7628_v51  ;;  %v3156_v4 = vld [vmem:[#allocation3 + $0x740] sm:$0xff] }
 0x322   : > { %11247 = vst [vmem:[#allocation29_spill] sm:$0xff] %v9872_v40  ;;  %4718 = vmatpush1.bf16.msra.mxu1 %v7625_v37  ;;  %v7633_v20 = vcombine.low %v3148_v46, %v3152_v52  ;;  %v7634_v13 = vcombine.high %v3148_v46, %v3152_v52  ;;  %v7635_v30 = vcombine.low %v3149_v29, %v3153_v5  ;;  %v3160_v51 = vld [vmem:[#allocation3 + $0x760] sm:$0xff] }
 0x323   : > { %11248 = vst [vmem:[#allocation30_spill] sm:$0xff] %v9876_v15  ;;  %4604 = vmatprep.mubr.bf16.mxu1 %v9876_v15  ;;  %4990 = vmatprep.mubr.bf16.mxu0 %v9876_v15  ;;  %v7636_v37 = vcombine.high %v3149_v29, %v3153_v5  ;;  %v7641_v8 = vcombine.low %v3156_v4, %v3160_v51 }
 0x324   : > { %4605 = vmatmul.mubr.bf16.gmra.mrb[124].mxu1 %v9872_v40  ;;  %4991 = vmatmul.mubr.bf16.gmra.mrb[124].mxu0 %v9872_v40 }
 0x325   : > { %5104 = vmatpush1.bf16.msra.mxu0 %v7627_v54  ;;  %4719 = vmatprep.subr.bf16.mxu1 %v7634_v13 }
 0x326   : > { %5105 = vmatprep.subr.bf16.mxu0 %v7636_v37  ;;  %4720 = vmatpush1.bf16.msra.mxu1 %v7633_v20  ;;  %v3157_v37 = vld [vmem:[#allocation3 + $0x748] sm:$0xff] }
 0x329   : > { %v2204_v19 = vpop.f32.mrb[64].mxu1  ;;  %v2397_v7 = vpop.f32.mrb[64].mxu0  ;;  %5106 = vmatpush1.bf16.msra.mxu0 %v7635_v30  ;;  %v3161_v30 = vld [vmem:[#allocation3 + $0x768] sm:$0xff] }
 0x32a   : > { %v2205_v25 = vadd.f32 %v2204_v19, %v9567_v24  ;;  %v2398_v9 = vadd.f32 %v2397_v7, %v9500_v38  ;;  %v2206_v28 = vpop.f32.mrb[65].mxu1  ;;  %v2399_v36 = vpop.f32.mrb[65].mxu0  ;;  %v7644_v40 = vcombine.high %v3157_v37, %v3161_v30  ;;  %v7643_v15 = vcombine.low %v3157_v37, %v3161_v30 }
 0x32b   : > { %v2207_v54 = vadd.f32 %v2206_v28, %v9571_v27  ;;  %v2400_v60 = vadd.f32 %v2399_v36, %v9506_v42  ;;  %v2208_v49 = vpop.f32.mrb[66].mxu1  ;;  %v2401_v53 = vpop.f32.mrb[66].mxu0 }
 0x32c   : > { %vm2540_vm0 = vcmp.ge.f32.partialorder %v2205_v25, 0.0  ;;  %v2668_v41 = vmul.f32 0.01, %v2205_v25  ;;  %vm2542_vm1 = vcmp.ge.f32.partialorder %v2398_v9, 0.0  ;;  %v2670_v10 = vmul.f32 0.01, %v2398_v9  ;;  %5107 = vmatprep.subr.bf16.mxu0 %v7644_v40 }
 0x32d   : > { %vm2541_vm2 = vcmp.ge.f32.partialorder %v2207_v54, 0.0  ;;  %v2669_v31 = vmul.f32 0.01, %v2207_v54  ;;  %vm2543_vm3 = vcmp.ge.f32.partialorder %v2400_v60, 0.0  ;;  %v2671_v33 = vmul.f32 0.01, %v2400_v60  ;;  %5108 = vmatpush1.bf16.msra.mxu0 %v7643_v15 }
 0x32e   : > { %v2796_v45 = vsel %vm2540_vm0, %v2205_v25, %v2668_v41  ;;  %v2209_v46 = vadd.f32 %v2208_v49, %v9567_v24  ;;  %v2402_v52 = vadd.f32 %v2401_v53, %v9500_v38  ;;  %v2210_v29 = vpop.f32.mrb[67].mxu1  ;;  %v2403_v13 = vpop.f32.mrb[67].mxu0  ;;  %v2798_v5 = vsel %vm2542_vm1, %v2398_v9, %v2670_v10 }
 0x32f   : > { %v2797_v19 = vsel %vm2541_vm2, %v2207_v54, %v2669_v31  ;;  %v2211_v20 = vadd.f32 %v2210_v29, %v9571_v27  ;;  %v2404_v7 = vadd.f32 %v2403_v13, %v9506_v42  ;;  %v2799_v53 = vsel %vm2543_vm3, %v2400_v60, %v2671_v33  ;;  %v3169_v33 = vld [vmem:[#allocation3 + $0x7a8] sm:$0xff] }
 0x330   : > { %vm2544_vm4 = vcmp.ge.f32.partialorder %v2209_v46, 0.0  ;;  %v2672_v28 = vmul.f32 0.01, %v2209_v46  ;;  %vm2546_vm5 = vcmp.ge.f32.partialorder %v2402_v52, 0.0  ;;  %v2674_v36 = vmul.f32 0.01, %v2402_v52 }
 0x331   : > { %vm2545_vm6 = vcmp.ge.f32.partialorder %v2211_v20, 0.0  ;;  %v2673_v25 = vmul.f32 0.01, %v2211_v20  ;;  %vm2547_vm7 = vcmp.ge.f32.partialorder %v2404_v7, 0.0  ;;  %v2675_v49 = vmul.f32 0.01, %v2404_v7 }
 0x332   : > { %v2800_v41 = vsel %vm2544_vm4, %v2209_v46, %v2672_v28  ;;  %v2802_v58 = vsel %vm2546_vm5, %v2402_v52, %v2674_v36  ;;  %v7642_v9 = vcombine.high %v3156_v4, %v3160_v51  ;;  %v3168_v4 = vld [vmem:[#allocation3 + $0x7a0] sm:$0xff]  ;;  %v3165_v51 = vld [vmem:[#allocation3 + $0x788] sm:$0xff] }
 0x333   : > { %v9893_v54 = vpack.c.bf16 %v2800_v41, %v2796_v45  ;;  %v9895_v10 = vpack.c.bf16 %v2802_v58, %v2798_v5  ;;  %v2801_v31 = vsel %vm2545_vm6, %v2211_v20, %v2673_v25  ;;  %v2803_v29 = vsel %vm2547_vm7, %v2404_v7, %v2675_v49  ;;  %v3164_v58 = vld [vmem:[#allocation3 + $0x780] sm:$0xff]  ;;  %v3173_v7 = vld [vmem:[#allocation3 + $0x7c8] sm:$0xff] }
 0x334   : > { %v9897_v13 = vpack.c.bf16 %v2801_v31, %v2797_v19  ;;  %v9899_v55 = vpack.c.bf16 %v2803_v29, %v2799_v53  ;;  %4721 = vmatprep.subr.bf16.mxu1 %v7642_v9  ;;  %v7649_v60 = vcombine.low %v3164_v58, %v3168_v4  ;;  %v7650_v45 = vcombine.high %v3164_v58, %v3168_v4  ;;  %v3172_v19 = vld [vmem:[#allocation3 + $0x7c0] sm:$0xff]  ;;  %v3177_v25 = vld [vmem:[#allocation3 + $0x7e8] sm:$0xff] }
 0x335   : > { %11249 = vst [vmem:[#allocation31_spill] sm:$0xff] %v9893_v54  ;;  %4722 = vmatpush1.bf16.msra.mxu1 %v7641_v8  ;;  %v7651_v5 = vcombine.low %v3165_v51, %v3169_v33  ;;  %v7652_v8 = vcombine.high %v3165_v51, %v3169_v33  ;;  %v3176_v20 = vld [vmem:[#allocation3 + $0x7e0] sm:$0xff]  ;;  %v7659_v31 = vcombine.low %v3173_v7, %v3177_v25 }
 0x336   : > { %11250 = vst [vmem:[#allocation32_spill] sm:$0xff] %v9897_v13  ;;  %4614 = vmatprep.mubr.bf16.mxu1 %v9897_v13  ;;  %5000 = vmatprep.mubr.bf16.mxu0 %v9897_v13  ;;  %v7657_v15 = vcombine.low %v3172_v19, %v3176_v20  ;;  %v7658_v36 = vcombine.high %v3172_v19, %v3176_v20 }
 0x337   : > { %4615 = vmatmul.mubr.bf16.gmra.mrb[128].mxu1 %v9893_v54  ;;  %5001 = vmatmul.mubr.bf16.gmra.mrb[128].mxu0 %v9893_v54  ;;  %v9917_v54 = vld [vmem:[#allocation3 + $0x18] sm:$0xff] }
 0x338   : > { %4723 = vmatprep.subr.bf16.mxu1 %v7650_v45  ;;  %5109 = vmatprep.subr.bf16.mxu0 %v7652_v8 }
 0x339   : > { %4724 = vmatpush1.bf16.msra.mxu1 %v7649_v60  ;;  %5110 = vmatpush1.bf16.msra.mxu0 %v7651_v5  ;;  %v9911_v60 = vld [vmem:[#allocation3 + $0x10] sm:$0xff] }
 0x33a   : > { %4725 = vmatprep.subr.bf16.mxu1 %v7658_v36  ;;  %v9915_v36 = vld [vmem:[#allocation3 + $0x30] sm:$0xff] }
 0x33b   : > { %v7414_v43 = vcombine.high %v9911_v60, %v9915_v36 }
 0x33c   : > { %v2214_v46 = vpop.f32.mrb[68].mxu1  ;;  %v2407_v52 = vpop.f32.mrb[68].mxu0 }
 0x33d   : > { %v2215_v37 = vadd.f32 %v2214_v46, %v9567_v24  ;;  %v2408_v30 = vadd.f32 %v2407_v52, %v9500_v38  ;;  %v2216_v28 = vpop.f32.mrb[69].mxu1  ;;  %v2409_v40 = vpop.f32.mrb[69].mxu0  ;;  %4726 = vmatpush1.bf16.msra.mxu1 %v7657_v15 }
 0x33e   : > { %v2217_v49 = vadd.f32 %v2216_v28, %v9571_v27  ;;  %v2410_v53 = vadd.f32 %v2409_v40, %v9506_v42  ;;  %v2218_v41 = vpop.f32.mrb[70].mxu1  ;;  %v2411_v9 = vpop.f32.mrb[70].mxu0  ;;  %5274 = vmatprep.subr.bf16.mxu1 %v7414_v43 }
 0x33f   : > { %vm2548_vm8 = vcmp.ge.f32.partialorder %v2215_v37, 0.0  ;;  %v2676_v29 = vmul.f32 0.01, %v2215_v37  ;;  %vm2550_vm9 = vcmp.ge.f32.partialorder %v2408_v30, 0.0  ;;  %v2678_v58 = vmul.f32 0.01, %v2408_v30 }
 0x340   : > { %vm2549_vm10 = vcmp.ge.f32.partialorder %v2217_v49, 0.0  ;;  %v2677_v4 = vmul.f32 0.01, %v2217_v49  ;;  %vm2551_vm11 = vcmp.ge.f32.partialorder %v2410_v53, 0.0  ;;  %v2679_v51 = vmul.f32 0.01, %v2410_v53 }
 0x341   : > { %v2804_v45 = vsel %vm2548_vm8, %v2215_v37, %v2676_v29  ;;  %v2806_v33 = vsel %vm2550_vm9, %v2408_v30, %v2678_v58  ;;  %v2219_v46 = vadd.f32 %v2218_v41, %v9567_v24  ;;  %v2412_v52 = vadd.f32 %v2411_v9, %v9500_v38  ;;  %v2220_v19 = vpop.f32.mrb[71].mxu1  ;;  %v2413_v8 = vpop.f32.mrb[71].mxu0  ;;  %v9919_v37 = vld [vmem:[#allocation3 + $0x38] sm:$0xff] }
 0x342   : > { %v2805_v20 = vsel %vm2549_vm10, %v2217_v49, %v2677_v4  ;;  %v2807_v28 = vsel %vm2551_vm11, %v2410_v53, %v2679_v51  ;;  %v2221_v40 = vadd.f32 %v2220_v19, %v9571_v27  ;;  %v2414_v5 = vadd.f32 %v2413_v8, %v9506_v42 }
 0x343   : > { %vm2552_vm12 = vcmp.ge.f32.partialorder %v2219_v46, 0.0  ;;  %v2680_v30 = vmul.f32 0.01, %v2219_v46  ;;  %vm2554_vm13 = vcmp.ge.f32.partialorder %v2412_v52, 0.0  ;;  %v2682_v41 = vmul.f32 0.01, %v2412_v52 }
 0x344   : > { %vm2553_vm14 = vcmp.ge.f32.partialorder %v2221_v40, 0.0  ;;  %v2681_v9 = vmul.f32 0.01, %v2221_v40  ;;  %vm2555_vm15 = vcmp.ge.f32.partialorder %v2414_v5, 0.0  ;;  %v2683_v49 = vmul.f32 0.01, %v2414_v5 }
 0x345   : > { %v2808_v53 = vsel %vm2552_vm12, %v2219_v46, %v2680_v30  ;;  %v2810_v29 = vsel %vm2554_vm13, %v2412_v52, %v2682_v41  ;;  %v7660_v58 = vcombine.high %v3173_v7, %v3177_v25  ;;  %v7416_v25 = vcombine.high %v9917_v54, %v9919_v37 }
 0x346   : > { %v9923_v4 = vpack.c.bf16 %v2808_v53, %v2804_v45  ;;  %v9925_v51 = vpack.c.bf16 %v2810_v29, %v2806_v33  ;;  %v2809_v19 = vsel %vm2553_vm14, %v2221_v40, %v2681_v9  ;;  %v2811_v8 = vsel %vm2555_vm15, %v2414_v5, %v2683_v49 }
 0x347   : > { %v9927_v13 = vpack.c.bf16 %v2809_v19, %v2805_v20  ;;  %v9929_v50 = vpack.c.bf16 %v2811_v8, %v2807_v28  ;;  %5111 = vmatprep.subr.bf16.mxu0 %v7660_v58 }
 0x348   : > { %11251 = vst [vmem:[#allocation33_spill] sm:$0xff] %v9923_v4  ;;  %5112 = vmatpush1.bf16.msra.mxu0 %v7659_v31 }
 0x349   : > { %11252 = vst [vmem:[#allocation34_spill] sm:$0xff] %v9927_v13  ;;  %4624 = vmatprep.mubr.bf16.mxu1 %v9927_v13  ;;  %5010 = vmatprep.mubr.bf16.mxu0 %v9927_v13 }
 0x34a   : > { %4625 = vmatmul.mubr.bf16.gmra.mrb[132].mxu1 %v9923_v4  ;;  %5011 = vmatmul.mubr.bf16.gmra.mrb[132].mxu0 %v9923_v4 }
 0x34b   : > { %5660 = vmatprep.subr.bf16.mxu0 %v7416_v25 }
 0x34f   : > { %v2224_v45 = vpop.f32.mrb[72].mxu1  ;;  %v2417_v33 = vpop.f32.mrb[72].mxu0 }
 0x350   : > { %v2225_v46 = vadd.f32 %v2224_v45, %v9567_v24  ;;  %v2418_v52 = vadd.f32 %v2417_v33, %v9500_v38  ;;  %v2226_v31 = vpop.f32.mrb[73].mxu1  ;;  %v2419_v20 = vpop.f32.mrb[73].mxu0 }
 0x351   : > { %v2227_v28 = vadd.f32 %v2226_v31, %v9571_v27  ;;  %v2420_v40 = vadd.f32 %v2419_v20, %v9506_v42  ;;  %v2228_v5 = vpop.f32.mrb[74].mxu1  ;;  %v2421_v30 = vpop.f32.mrb[74].mxu0 }
 0x352   : > { %vm2556_vm0 = vcmp.ge.f32.partialorder %v2225_v46, 0.0  ;;  %v2684_v41 = vmul.f32 0.01, %v2225_v46  ;;  %vm2558_vm1 = vcmp.ge.f32.partialorder %v2418_v52, 0.0  ;;  %v2686_v9 = vmul.f32 0.01, %v2418_v52 }
 0x353   : > { %vm2557_vm2 = vcmp.ge.f32.partialorder %v2227_v28, 0.0  ;;  %v2685_v43 = vmul.f32 0.01, %v2227_v28  ;;  %vm2559_vm3 = vcmp.ge.f32.partialorder %v2420_v40, 0.0  ;;  %v2687_v49 = vmul.f32 0.01, %v2420_v40 }
 0x354   : > { %v2229_v53 = vadd.f32 %v2228_v5, %v9567_v24  ;;  %v2422_v29 = vadd.f32 %v2421_v30, %v9500_v38  ;;  %v2230_v58 = vpop.f32.mrb[75].mxu1  ;;  %v2423_v19 = vpop.f32.mrb[75].mxu0  ;;  %v2812_v8 = vsel %vm2556_vm0, %v2225_v46, %v2684_v41  ;;  %v2814_v25 = vsel %vm2558_vm1, %v2418_v52, %v2686_v9 }
 0x355   : > { %v2231_v45 = vadd.f32 %v2230_v58, %v9571_v27  ;;  %v2424_v33 = vadd.f32 %v2423_v19, %v9506_v42  ;;  %v2813_v5 = vsel %vm2557_vm2, %v2227_v28, %v2685_v43  ;;  %v2815_v30 = vsel %vm2559_vm3, %v2420_v40, %v2687_v49 }
 0x356   : > { %vm2560_vm4 = vcmp.ge.f32.partialorder %v2229_v53, 0.0  ;;  %v2688_v31 = vmul.f32 0.01, %v2229_v53  ;;  %vm2562_vm5 = vcmp.ge.f32.partialorder %v2422_v29, 0.0  ;;  %v2690_v20 = vmul.f32 0.01, %v2422_v29 }
 0x357   : > { %vm2561_vm6 = vcmp.ge.f32.partialorder %v2231_v45, 0.0  ;;  %v2689_v7 = vmul.f32 0.01, %v2231_v45  ;;  %vm2563_vm7 = vcmp.ge.f32.partialorder %v2424_v33, 0.0  ;;  %v2691_v15 = vmul.f32 0.01, %v2424_v33 }
 0x358   : > { %v2816_v4 = vsel %vm2560_vm4, %v2229_v53, %v2688_v31  ;;  %v2818_v13 = vsel %vm2562_vm5, %v2422_v29, %v2690_v20 }
 0x359   : > { %v9951_v46 = vpack.c.bf16 %v2816_v4, %v2812_v8  ;;  %v9953_v52 = vpack.c.bf16 %v2818_v13, %v2814_v25  ;;  %v2817_v41 = vsel %vm2561_vm6, %v2231_v45, %v2689_v7  ;;  %v2819_v9 = vsel %vm2563_vm7, %v2424_v33, %v2691_v15 }
 0x35a   : > { %v9955_v58 = vpack.c.bf16 %v2817_v41, %v2813_v5  ;;  %v9957_v19 = vpack.c.bf16 %v2819_v9, %v2815_v30 }
 0x35b   : > { %11253 = vst [vmem:[#allocation35_spill] sm:$0xff] %v9951_v46 }
 0x35c   : > { %11254 = vst [vmem:[#allocation36_spill] sm:$0xff] %v9955_v58  ;;  %4634 = vmatprep.mubr.bf16.mxu1 %v9955_v58  ;;  %5020 = vmatprep.mubr.bf16.mxu0 %v9955_v58 }
 0x35d   : > { %4635 = vmatmul.mubr.bf16.gmra.mrb[136].mxu1 %v9951_v46  ;;  %5021 = vmatmul.mubr.bf16.gmra.mrb[136].mxu0 %v9951_v46 }
 0x362   : > { %v2234_v28 = vpop.f32.mrb[76].mxu1  ;;  %v2427_v40 = vpop.f32.mrb[76].mxu0 }
 0x363   : > { %v2235_v4 = vadd.f32 %v2234_v28, %v9567_v24  ;;  %v2428_v13 = vadd.f32 %v2427_v40, %v9500_v38  ;;  %v2236_v7 = vpop.f32.mrb[77].mxu1  ;;  %v2429_v15 = vpop.f32.mrb[77].mxu0 }
 0x364   : > { %v2237_v43 = vadd.f32 %v2236_v7, %v9571_v27  ;;  %v2430_v49 = vadd.f32 %v2429_v15, %v9506_v42  ;;  %v2238_v53 = vpop.f32.mrb[78].mxu1  ;;  %v2431_v29 = vpop.f32.mrb[78].mxu0 }
 0x365   : > { %vm2564_vm8 = vcmp.ge.f32.partialorder %v2235_v4, 0.0  ;;  %v2692_v8 = vmul.f32 0.01, %v2235_v4  ;;  %vm2566_vm9 = vcmp.ge.f32.partialorder %v2428_v13, 0.0  ;;  %v2694_v25 = vmul.f32 0.01, %v2428_v13 }
 0x366   : > { %vm2565_vm10 = vcmp.ge.f32.partialorder %v2237_v43, 0.0  ;;  %v2693_v45 = vmul.f32 0.01, %v2237_v43  ;;  %vm2567_vm11 = vcmp.ge.f32.partialorder %v2430_v49, 0.0  ;;  %v2695_v33 = vmul.f32 0.01, %v2430_v49 }
 0x367   : > { %v2239_v31 = vadd.f32 %v2238_v53, %v9567_v24  ;;  %v2432_v20 = vadd.f32 %v2431_v29, %v9500_v38  ;;  %v2240_v5 = vpop.f32.mrb[79].mxu1  ;;  %v2433_v30 = vpop.f32.mrb[79].mxu0  ;;  %v2820_v41 = vsel %vm2564_vm8, %v2235_v4, %v2692_v8  ;;  %v2822_v9 = vsel %vm2566_vm9, %v2428_v13, %v2694_v25 }
 0x368   : > { %v2241_v28 = vadd.f32 %v2240_v5, %v9571_v27  ;;  %v2434_v40 = vadd.f32 %v2433_v30, %v9506_v42  ;;  %v2821_v53 = vsel %vm2565_vm10, %v2237_v43, %v2693_v45  ;;  %v2823_v29 = vsel %vm2567_vm11, %v2430_v49, %v2695_v33 }
 0x369   : > { %vm2568_vm12 = vcmp.ge.f32.partialorder %v2239_v31, 0.0  ;;  %v2696_v7 = vmul.f32 0.01, %v2239_v31  ;;  %vm2570_vm13 = vcmp.ge.f32.partialorder %v2432_v20, 0.0  ;;  %v2698_v15 = vmul.f32 0.01, %v2432_v20 }
 0x36a   : > { %vm2569_vm14 = vcmp.ge.f32.partialorder %v2241_v28, 0.0  ;;  %v2697_v46 = vmul.f32 0.01, %v2241_v28  ;;  %vm2571_vm15 = vcmp.ge.f32.partialorder %v2434_v40, 0.0  ;;  %v2699_v58 = vmul.f32 0.01, %v2434_v40 }
 0x36b   : > { %v2824_v47 = vsel %vm2568_vm12, %v2239_v31, %v2696_v7  ;;  %v2826_v17 = vsel %vm2570_vm13, %v2432_v20, %v2698_v15 }
 0x36c   : > { %v9973_v4 = vpack.c.bf16 %v2824_v47, %v2820_v41  ;;  %v9975_v13 = vpack.c.bf16 %v2826_v17, %v2822_v9  ;;  %v2825_v8 = vsel %vm2569_vm14, %v2241_v28, %v2697_v46  ;;  %v2827_v25 = vsel %vm2571_vm15, %v2434_v40, %v2699_v58 }
 0x36d   : > { %v9977_v5 = vpack.c.bf16 %v2825_v8, %v2821_v53  ;;  %v9979_v30 = vpack.c.bf16 %v2827_v25, %v2823_v29 }
 0x36e   : > { %11255 = vst [vmem:[#allocation37_spill] sm:$0xff] %v9973_v4 }
 0x36f   : > { %11256 = vst [vmem:[#allocation38_spill] sm:$0xff] %v9977_v5  ;;  %4644 = vmatprep.mubr.bf16.mxu1 %v9977_v5  ;;  %5030 = vmatprep.mubr.bf16.mxu0 %v9977_v5 }
 0x370   : > { %4645 = vmatmul.mubr.bf16.gmra.mrb[140].mxu1 %v9973_v4  ;;  %5031 = vmatmul.mubr.bf16.gmra.mrb[140].mxu0 %v9973_v4 }
 0x375   : > { %v2244_v43 = vpop.f32.mrb[80].mxu1  ;;  %v2437_v49 = vpop.f32.mrb[80].mxu0 }
 0x376   : > { %v2245_v47 = vadd.f32 %v2244_v43, %v9567_v24  ;;  %v2438_v17 = vadd.f32 %v2437_v49, %v9500_v38  ;;  %v2246_v46 = vpop.f32.mrb[81].mxu1  ;;  %v2439_v58 = vpop.f32.mrb[81].mxu0 }
 0x377   : > { %v2247_v45 = vadd.f32 %v2246_v46, %v9571_v27  ;;  %v2440_v33 = vadd.f32 %v2439_v58, %v9506_v42  ;;  %v2248_v31 = vpop.f32.mrb[82].mxu1  ;;  %v2441_v20 = vpop.f32.mrb[82].mxu0 }
 0x378   : > { %vm2572_vm0 = vcmp.ge.f32.partialorder %v2245_v47, 0.0  ;;  %v2700_v41 = vmul.f32 0.01, %v2245_v47  ;;  %vm2574_vm1 = vcmp.ge.f32.partialorder %v2438_v17, 0.0  ;;  %v2702_v9 = vmul.f32 0.01, %v2438_v17 }
 0x379   : > { %vm2573_vm2 = vcmp.ge.f32.partialorder %v2247_v45, 0.0  ;;  %v2701_v28 = vmul.f32 0.01, %v2247_v45  ;;  %vm2575_vm3 = vcmp.ge.f32.partialorder %v2440_v33, 0.0  ;;  %v2703_v40 = vmul.f32 0.01, %v2440_v33 }
 0x37a   : > { %v2249_v7 = vadd.f32 %v2248_v31, %v9567_v24  ;;  %v2442_v15 = vadd.f32 %v2441_v20, %v9500_v38  ;;  %v2250_v53 = vpop.f32.mrb[83].mxu1  ;;  %v2443_v29 = vpop.f32.mrb[83].mxu0  ;;  %v2828_v8 = vsel %vm2572_vm0, %v2245_v47, %v2700_v41  ;;  %v2830_v25 = vsel %vm2574_vm1, %v2438_v17, %v2702_v9 }
 0x37b   : > { %v2251_v43 = vadd.f32 %v2250_v53, %v9571_v27  ;;  %v2444_v49 = vadd.f32 %v2443_v29, %v9506_v42  ;;  %v2829_v31 = vsel %vm2573_vm2, %v2247_v45, %v2701_v28  ;;  %v2831_v20 = vsel %vm2575_vm3, %v2440_v33, %v2703_v40 }
 0x37c   : > { %vm2576_vm4 = vcmp.ge.f32.partialorder %v2249_v7, 0.0  ;;  %v2704_v46 = vmul.f32 0.01, %v2249_v7  ;;  %vm2578_vm5 = vcmp.ge.f32.partialorder %v2442_v15, 0.0  ;;  %v2706_v58 = vmul.f32 0.01, %v2442_v15 }
 0x37d   : > { %vm2577_vm6 = vcmp.ge.f32.partialorder %v2251_v43, 0.0  ;;  %v2705_v4 = vmul.f32 0.01, %v2251_v43  ;;  %vm2579_vm7 = vcmp.ge.f32.partialorder %v2444_v49, 0.0  ;;  %v2707_v5 = vmul.f32 0.01, %v2444_v49 }
 0x37e   : > { %v2832_v2 = vsel %vm2576_vm4, %v2249_v7, %v2704_v46  ;;  %v2834_v62 = vsel %vm2578_vm5, %v2442_v15, %v2706_v58 }
 0x37f   : > { %v9995_v47 = vpack.c.bf16 %v2832_v2, %v2828_v8  ;;  %v9997_v17 = vpack.c.bf16 %v2834_v62, %v2830_v25  ;;  %v2833_v41 = vsel %vm2577_vm6, %v2251_v43, %v2705_v4  ;;  %v2835_v9 = vsel %vm2579_vm7, %v2444_v49, %v2707_v5 }
 0x380   : > { %v9999_v53 = vpack.c.bf16 %v2833_v41, %v2829_v31  ;;  %v10001_v29 = vpack.c.bf16 %v2835_v9, %v2831_v20 }
 0x381   : > { %11257 = vst [vmem:[#allocation39_spill] sm:$0xff] %v9995_v47 }
 0x382   : > { %11258 = vst [vmem:[#allocation40_spill] sm:$0xff] %v9999_v53  ;;  %4654 = vmatprep.mubr.bf16.mxu1 %v9999_v53  ;;  %5040 = vmatprep.mubr.bf16.mxu0 %v9999_v53 }
 0x383   : > { %4655 = vmatmul.mubr.bf16.gmra.mrb[144].mxu1 %v9995_v47  ;;  %5041 = vmatmul.mubr.bf16.gmra.mrb[144].mxu0 %v9995_v47 }
 0x388   : > { %v2254_v45 = vpop.f32.mrb[84].mxu1  ;;  %v2447_v33 = vpop.f32.mrb[84].mxu0 }
 0x389   : > { %v2255_v2 = vadd.f32 %v2254_v45, %v9567_v24  ;;  %v2448_v62 = vadd.f32 %v2447_v33, %v9500_v38  ;;  %v2256_v4 = vpop.f32.mrb[85].mxu1  ;;  %v2449_v5 = vpop.f32.mrb[85].mxu0 }
 0x38a   : > { %v2257_v28 = vadd.f32 %v2256_v4, %v9571_v27  ;;  %v2450_v40 = vadd.f32 %v2449_v5, %v9506_v42  ;;  %v2258_v7 = vpop.f32.mrb[86].mxu1  ;;  %v2451_v15 = vpop.f32.mrb[86].mxu0 }
 0x38b   : > { %vm2580_vm8 = vcmp.ge.f32.partialorder %v2255_v2, 0.0  ;;  %v2708_v8 = vmul.f32 0.01, %v2255_v2  ;;  %vm2582_vm9 = vcmp.ge.f32.partialorder %v2448_v62, 0.0  ;;  %v2710_v25 = vmul.f32 0.01, %v2448_v62 }
 0x38c   : > { %vm2581_vm10 = vcmp.ge.f32.partialorder %v2257_v28, 0.0  ;;  %v2709_v43 = vmul.f32 0.01, %v2257_v28  ;;  %vm2583_vm11 = vcmp.ge.f32.partialorder %v2450_v40, 0.0  ;;  %v2711_v49 = vmul.f32 0.01, %v2450_v40 }
 0x38d   : > { %v2259_v46 = vadd.f32 %v2258_v7, %v9567_v24  ;;  %v2452_v58 = vadd.f32 %v2451_v15, %v9500_v38  ;;  %v2260_v31 = vpop.f32.mrb[87].mxu1  ;;  %v2453_v20 = vpop.f32.mrb[87].mxu0  ;;  %v2836_v41 = vsel %vm2580_vm8, %v2255_v2, %v2708_v8  ;;  %v2838_v9 = vsel %vm2582_vm9, %v2448_v62, %v2710_v25 }
 0x38e   : > { %v2261_v45 = vadd.f32 %v2260_v31, %v9571_v27  ;;  %v2454_v33 = vadd.f32 %v2453_v20, %v9506_v42  ;;  %v2837_v7 = vsel %vm2581_vm10, %v2257_v28, %v2709_v43  ;;  %v2839_v15 = vsel %vm2583_vm11, %v2450_v40, %v2711_v49 }
 0x38f   : > { %vm2584_vm12 = vcmp.ge.f32.partialorder %v2259_v46, 0.0  ;;  %v2712_v4 = vmul.f32 0.01, %v2259_v46  ;;  %vm2586_vm13 = vcmp.ge.f32.partialorder %v2452_v58, 0.0  ;;  %v2714_v5 = vmul.f32 0.01, %v2452_v58 }
 0x390   : > { %vm2585_vm14 = vcmp.ge.f32.partialorder %v2261_v45, 0.0  ;;  %v2713_v47 = vmul.f32 0.01, %v2261_v45  ;;  %vm2587_vm15 = vcmp.ge.f32.partialorder %v2454_v33, 0.0  ;;  %v2715_v53 = vmul.f32 0.01, %v2454_v33 }
 0x391   : > { %v2840_v57 = vsel %vm2584_vm12, %v2259_v46, %v2712_v4  ;;  %v2842_v3 = vsel %vm2586_vm13, %v2452_v58, %v2714_v5 }
 0x392   : > { %v10017_v2 = vpack.c.bf16 %v2840_v57, %v2836_v41  ;;  %v10019_v62 = vpack.c.bf16 %v2842_v3, %v2838_v9  ;;  %v2841_v8 = vsel %vm2585_vm14, %v2261_v45, %v2713_v47  ;;  %v2843_v25 = vsel %vm2587_vm15, %v2454_v33, %v2715_v53 }
 0x393   : > { %v10021_v31 = vpack.c.bf16 %v2841_v8, %v2837_v7  ;;  %v10023_v20 = vpack.c.bf16 %v2843_v25, %v2839_v15 }
 0x394   : > { %11259 = vst [vmem:[#allocation41_spill] sm:$0xff] %v10017_v2  ;;  %11260 = vst [vmem:[#allocation42_spill] sm:$0xff] %v10019_v62 }
 0x395   : > { %11261 = vst [vmem:[#allocation43_spill] sm:$0xff] %v10021_v31  ;;  %11262 = vst [vmem:[#allocation44_spill] sm:$0xff] %v10023_v20  ;;  %4664 = vmatprep.mubr.bf16.mxu1 %v10021_v31  ;;  %5050 = vmatprep.mubr.bf16.mxu0 %v10021_v31 }
 0x396   : > { %4665 = vmatmul.mubr.bf16.gmra.mrb[148].mxu1 %v10017_v2  ;;  %5051 = vmatmul.mubr.bf16.gmra.mrb[148].mxu0 %v10017_v2 }
 0x39b   : > { %v2264_v28 = vpop.f32.mrb[88].mxu1  ;;  %v2457_v40 = vpop.f32.mrb[88].mxu0 }
 0x39c   : > { %v2265_v57 = vadd.f32 %v2264_v28, %v9567_v24  ;;  %v2458_v3 = vadd.f32 %v2457_v40, %v9500_v38  ;;  %v2266_v47 = vpop.f32.mrb[89].mxu1  ;;  %v2459_v53 = vpop.f32.mrb[89].mxu0 }
 0x39d   : > { %v2267_v43 = vadd.f32 %v2266_v47, %v9571_v27  ;;  %v2460_v49 = vadd.f32 %v2459_v53, %v9506_v42  ;;  %v2268_v46 = vpop.f32.mrb[90].mxu1  ;;  %v2461_v58 = vpop.f32.mrb[90].mxu0 }
 0x39e   : > { %vm2588_vm0 = vcmp.ge.f32.partialorder %v2265_v57, 0.0  ;;  %v2716_v41 = vmul.f32 0.01, %v2265_v57  ;;  %vm2590_vm1 = vcmp.ge.f32.partialorder %v2458_v3, 0.0  ;;  %v2718_v9 = vmul.f32 0.01, %v2458_v3 }
 0x39f   : > { %vm2589_vm2 = vcmp.ge.f32.partialorder %v2267_v43, 0.0  ;;  %v2717_v45 = vmul.f32 0.01, %v2267_v43  ;;  %vm2591_vm3 = vcmp.ge.f32.partialorder %v2460_v49, 0.0  ;;  %v2719_v33 = vmul.f32 0.01, %v2460_v49 }
 0x3a0   : > { %v2269_v4 = vadd.f32 %v2268_v46, %v9567_v24  ;;  %v2462_v5 = vadd.f32 %v2461_v58, %v9500_v38  ;;  %v2270_v7 = vpop.f32.mrb[91].mxu1  ;;  %v2463_v15 = vpop.f32.mrb[91].mxu0  ;;  %v2844_v8 = vsel %vm2588_vm0, %v2265_v57, %v2716_v41  ;;  %v2846_v25 = vsel %vm2590_vm1, %v2458_v3, %v2718_v9 }
 0x3a1   : > { %v2271_v28 = vadd.f32 %v2270_v7, %v9571_v27  ;;  %v2464_v40 = vadd.f32 %v2463_v15, %v9506_v42  ;;  %v2845_v46 = vsel %vm2589_vm2, %v2267_v43, %v2717_v45  ;;  %v2847_v58 = vsel %vm2591_vm3, %v2460_v49, %v2719_v33 }
 0x3a2   : > { %vm2592_vm4 = vcmp.ge.f32.partialorder %v2269_v4, 0.0  ;;  %v2720_v47 = vmul.f32 0.01, %v2269_v4  ;;  %vm2594_vm5 = vcmp.ge.f32.partialorder %v2462_v5, 0.0  ;;  %v2722_v53 = vmul.f32 0.01, %v2462_v5 }
 0x3a3   : > { %vm2593_vm6 = vcmp.ge.f32.partialorder %v2271_v28, 0.0  ;;  %v2721_v2 = vmul.f32 0.01, %v2271_v28  ;;  %vm2595_vm7 = vcmp.ge.f32.partialorder %v2464_v40, 0.0  ;;  %v2723_v31 = vmul.f32 0.01, %v2464_v40 }
 0x3a4   : > { %v2848_v63 = vsel %vm2592_vm4, %v2269_v4, %v2720_v47  ;;  %v2850_v59 = vsel %vm2594_vm5, %v2462_v5, %v2722_v53 }
 0x3a5   : > { %v10039_v57 = vpack.c.bf16 %v2848_v63, %v2844_v8  ;;  %v10041_v3 = vpack.c.bf16 %v2850_v59, %v2846_v25  ;;  %v2849_v41 = vsel %vm2593_vm6, %v2271_v28, %v2721_v2  ;;  %v2851_v9 = vsel %vm2595_vm7, %v2464_v40, %v2723_v31 }
 0x3a6   : > { %v10043_v7 = vpack.c.bf16 %v2849_v41, %v2845_v46  ;;  %v10045_v15 = vpack.c.bf16 %v2851_v9, %v2847_v58 }
 0x3a7   : > { %11263 = vst [vmem:[#allocation45_spill] sm:$0xff] %v10039_v57  ;;  %11264 = vst [vmem:[#allocation46_spill] sm:$0xff] %v10041_v3 }
 0x3a8   : > { %11265 = vst [vmem:[#allocation47_spill] sm:$0xff] %v10043_v7  ;;  %11266 = vst [vmem:[#allocation48_spill] sm:$0xff] %v10045_v15  ;;  %4674 = vmatprep.mubr.bf16.mxu1 %v10043_v7  ;;  %5060 = vmatprep.mubr.bf16.mxu0 %v10043_v7 }
 0x3a9   : > { %4675 = vmatmul.mubr.bf16.gmra.mrb[152].mxu1 %v10039_v57  ;;  %5061 = vmatmul.mubr.bf16.gmra.mrb[152].mxu0 %v10039_v57 }
 0x3ae   : > { %v2274_v43 = vpop.f32.mrb[92].mxu1  ;;  %v2467_v49 = vpop.f32.mrb[92].mxu0 }
 0x3af   : > { %v2275_v63 = vadd.f32 %v2274_v43, %v9567_v24  ;;  %v2468_v59 = vadd.f32 %v2467_v49, %v9500_v38  ;;  %v2276_v2 = vpop.f32.mrb[93].mxu1  ;;  %v2469_v31 = vpop.f32.mrb[93].mxu0 }
 0x3b0   : > { %v2277_v45 = vadd.f32 %v2276_v2, %v9571_v27  ;;  %v2470_v33 = vadd.f32 %v2469_v31, %v9506_v42  ;;  %v2278_v4 = vpop.f32.mrb[94].mxu1  ;;  %v2471_v5 = vpop.f32.mrb[94].mxu0 }
 0x3b1   : > { %vm2596_vm8 = vcmp.ge.f32.partialorder %v2275_v63, 0.0  ;;  %v2724_v8 = vmul.f32 0.01, %v2275_v63  ;;  %vm2598_vm9 = vcmp.ge.f32.partialorder %v2468_v59, 0.0  ;;  %v2726_v25 = vmul.f32 0.01, %v2468_v59 }
 0x3b2   : > { %vm2597_vm10 = vcmp.ge.f32.partialorder %v2277_v45, 0.0  ;;  %v2725_v28 = vmul.f32 0.01, %v2277_v45  ;;  %vm2599_vm11 = vcmp.ge.f32.partialorder %v2470_v33, 0.0  ;;  %v2727_v40 = vmul.f32 0.01, %v2470_v33 }
 0x3b3   : > { %v2279_v47 = vadd.f32 %v2278_v4, %v9567_v24  ;;  %v2472_v53 = vadd.f32 %v2471_v5, %v9500_v38  ;;  %v2280_v46 = vpop.f32.mrb[95].mxu1  ;;  %v2473_v58 = vpop.f32.mrb[95].mxu0  ;;  %v2852_v41 = vsel %vm2596_vm8, %v2275_v63, %v2724_v8  ;;  %v2854_v9 = vsel %vm2598_vm9, %v2468_v59, %v2726_v25 }
 0x3b4   : > { %v2281_v43 = vadd.f32 %v2280_v46, %v9571_v27  ;;  %v2474_v49 = vadd.f32 %v2473_v58, %v9506_v42  ;;  %v2853_v24 = vsel %vm2597_vm10, %v2277_v45, %v2725_v28  ;;  %v2855_v38 = vsel %vm2599_vm11, %v2470_v33, %v2727_v40  ;;  %v10075_v45 = vld [vmem:[#allocation3 + $0x410] sm:$0xff]  ;;  %v10083_v28 = vld [vmem:[#allocation3 + $0x438] sm:$0xff] }
 0x3b5   : > { %vm2600_vm12 = vcmp.ge.f32.partialorder %v2279_v47, 0.0  ;;  %v2728_v2 = vmul.f32 0.01, %v2279_v47  ;;  %vm2602_vm13 = vcmp.ge.f32.partialorder %v2472_v53, 0.0  ;;  %v2730_v31 = vmul.f32 0.01, %v2472_v53 }
 0x3b6   : > { %vm2601_vm14 = vcmp.ge.f32.partialorder %v2281_v43, 0.0  ;;  %v2729_v57 = vmul.f32 0.01, %v2281_v43  ;;  %vm2603_vm15 = vcmp.ge.f32.partialorder %v2474_v49, 0.0  ;;  %v2731_v7 = vmul.f32 0.01, %v2474_v49 }
 0x3b7   : > { %v2856_v4 = vsel %vm2600_vm12, %v2279_v47, %v2728_v2  ;;  %v2858_v5 = vsel %vm2602_vm13, %v2472_v53, %v2730_v31  ;;  %v2934_v40 = vld [vmem:[#allocation3 + $0x50] sm:$0xff]  ;;  %v2935_v46 = vld [vmem:[#allocation3 + $0x58] sm:$0xff] }
 0x3b8   : > { %v10061_v63 = vpack.c.bf16 %v2856_v4, %v2852_v41  ;;  %v10063_v59 = vpack.c.bf16 %v2858_v5, %v2854_v9  ;;  %v2857_v27 = vsel %vm2601_vm14, %v2281_v43, %v2729_v57  ;;  %v2859_v42 = vsel %vm2603_vm15, %v2474_v49, %v2731_v7  ;;  %v10077_v57 = vld [vmem:[#allocation3 + $0x430] sm:$0xff]  ;;  %v10079_v7 = vld [vmem:[#allocation3 + $0x418] sm:$0xff] }
 0x3b9   : > { %v10065_v8 = vpack.c.bf16 %v2857_v27, %v2853_v24  ;;  %v10067_v25 = vpack.c.bf16 %v2859_v42, %v2855_v38  ;;  %v2938_v53 = vld [vmem:[#allocation3 + $0x70] sm:$0xff]  ;;  %v2939_v58 = vld [vmem:[#allocation3 + $0x78] sm:$0xff]  ;;  %v11269_v24 = vcombine.low %v9911_v60, %v9915_v36  ;;  %v11270_v38 = vcombine.low %v9917_v54, %v9919_v37 }
 0x3ba   : > { %11267 = vst [vmem:[#allocation49_spill] sm:$0xff] %v10063_v59  ;;  %v2942_v41 = vld [vmem:[#allocation3 + $0x90] sm:$0xff]  ;;  %v7422_v9 = vcombine.high %v2934_v40, %v2938_v53  ;;  %v7424_v43 = vcombine.high %v2935_v46, %v2939_v58  ;;  %v2943_v2 = vld [vmem:[#allocation3 + $0x98] sm:$0xff]  ;;  %v7421_v4 = vcombine.low %v2934_v40, %v2938_v53  ;;  %v7423_v5 = vcombine.low %v2935_v46, %v2939_v58 }
 0x3bb   : > { %11268 = vst [vmem:[#allocation50_spill] sm:$0xff] %v10067_v25  ;;  %4684 = vmatprep.mubr.bf16.mxu1 %v10065_v8  ;;  %5070 = vmatprep.mubr.bf16.mxu0 %v10065_v8  ;;  %v2946_v49 = vld [vmem:[#allocation3 + $0xb0] sm:$0xff]  ;;  %v2947_v31 = vld [vmem:[#allocation3 + $0xb8] sm:$0xff] }
 0x3bc   : > { %4685 = vmatmul.mubr.bf16.gmra.mrb[156].mxu1 %v10061_v63  ;;  %5071 = vmatmul.mubr.bf16.gmra.mrb[156].mxu0 %v10061_v63  ;;  %v7430_v27 = vcombine.high %v2942_v41, %v2946_v49  ;;  %v7432_v42 = vcombine.high %v2943_v2, %v2947_v31  ;;  %v2950_v47 = vld [vmem:[#allocation3 + $0xd0] sm:$0xff]  ;;  %v7429_v60 = vcombine.low %v2942_v41, %v2946_v49  ;;  %v2959_v46 = vld [vmem:[#allocation3 + $0x118] sm:$0xff] }
 0x3bd   : > { %4727 = vmatprep.mubr.bf16.mxu1 %v9515_v11  ;;  %5113 = vmatprep.mubr.bf16.mxu0 %v9515_v11  ;;  %v2954_v33 = vld [vmem:[#allocation3 + $0xf0] sm:$0xff]  ;;  %v2955_v11 = vld [vmem:[#allocation3 + $0xf8] sm:$0xff]  ;;  %v7431_v54 = vcombine.low %v2943_v2, %v2947_v31 }
 0x3be   : > { %v7438_v36 = vcombine.high %v2950_v47, %v2954_v33  ;;  %v2958_v40 = vld [vmem:[#allocation3 + $0x110] sm:$0xff]  ;;  %v2963_v58 = vld [vmem:[#allocation3 + $0x138] sm:$0xff]  ;;  %v7437_v41 = vcombine.low %v2950_v47, %v2954_v33 }
 0x3bf   : > { %v2962_v53 = vld [vmem:[#allocation3 + $0x130] sm:$0xff]  ;;  %v7448_v49 = vcombine.high %v2959_v46, %v2963_v58  ;;  %v2979_v33 = vld [vmem:[#allocation3 + $0x1b8] sm:$0xff] }
 0x3c0   : > { %v2966_v2 = vld [vmem:[#allocation3 + $0x150] sm:$0xff] }
 0x3c1   : > { %v2970_v31 = vld [vmem:[#allocation3 + $0x170] sm:$0xff] }
 0x3c2   : > { %v7453_v47 = vcombine.low %v2966_v2, %v2970_v31 }
 0x3c4   : > { %4728 = vmatmul.mubr.bf16.vlgmr.msra.gmra.mrb[96].mxu1 %v9513_v48  ;;  %5114 = vmatmul.mubr.bf16.vlgmr.msra.gmra.mrb[96].mxu0 %v9513_v48  ;;  %v2951_v48 = vld [vmem:[#allocation3 + $0xd8] sm:$0xff] }
 0x3c5   : > { %5275 = vmatpush1.bf16.msra.mxu1 %v11269_v24  ;;  %5661 = vmatpush1.bf16.msra.mxu0 %v11270_v38  ;;  %v7440_v37 = vcombine.high %v2951_v48, %v2955_v11  ;;  %v2967_v24 = vld [vmem:[#allocation3 + $0x158] sm:$0xff] }
 0x3c6   : > { %4737 = vmatprep.mubr.bf16.mxu1 %v9525_v16  ;;  %5123 = vmatprep.mubr.bf16.mxu0 %v9525_v16  ;;  %v2971_v38 = vld [vmem:[#allocation3 + $0x178] sm:$0xff] }
 0x3c7   : > { %5276 = vmatprep.subr.bf16.mxu1 %v7422_v9  ;;  %5662 = vmatprep.subr.bf16.mxu0 %v7424_v43  ;;  %v7439_v9 = vcombine.low %v2951_v48, %v2955_v11  ;;  %v7446_v43 = vcombine.high %v2958_v40, %v2962_v53  ;;  %v2978_v48 = vld [vmem:[#allocation3 + $0x1b0] sm:$0xff]  ;;  %v2975_v11 = vld [vmem:[#allocation3 + $0x198] sm:$0xff] }
 0x3c9   : > { %5277 = vmatpush1.bf16.msra.mxu1 %v7421_v4  ;;  %5663 = vmatpush1.bf16.msra.mxu0 %v7423_v5  ;;  %v7445_v4 = vcombine.low %v2958_v40, %v2962_v53  ;;  %v7447_v5 = vcombine.low %v2959_v46, %v2963_v58  ;;  %v2982_v40 = vld [vmem:[#allocation3 + $0x1d0] sm:$0xff]  ;;  %v2983_v46 = vld [vmem:[#allocation3 + $0x1d8] sm:$0xff] }
 0x3ca   : > { %5278 = vmatprep.subr.bf16.mxu1 %v7430_v27  ;;  %5664 = vmatprep.subr.bf16.mxu0 %v7432_v42  ;;  %v7454_v27 = vcombine.high %v2966_v2, %v2970_v31  ;;  %v7456_v42 = vcombine.high %v2967_v24, %v2971_v38  ;;  %v2986_v53 = vld [vmem:[#allocation3 + $0x1f0] sm:$0xff]  ;;  %v2987_v58 = vld [vmem:[#allocation3 + $0x1f8] sm:$0xff] }
 0x3cb   : > { %v2994_v2 = vld [vmem:[#allocation3 + $0x230] sm:$0xff]  ;;  %v2991_v31 = vld [vmem:[#allocation3 + $0x218] sm:$0xff] }
 0x3cc   : > { %4738 = vmatmul.mubr.bf16.gmra.mrb[100].mxu1 %v9522_v12  ;;  %5124 = vmatmul.mubr.bf16.gmra.mrb[100].mxu0 %v9522_v12 }
 0x3cd   : > { %4747 = vmatprep.mubr.bf16.mxu1 %v9537_v23  ;;  %5133 = vmatprep.mubr.bf16.mxu0 %v9537_v23 }
 0x3ce   : > { %5279 = vmatpush1.bf16.msra.mxu1 %v7429_v60  ;;  %5665 = vmatpush1.bf16.msra.mxu0 %v7431_v54  ;;  %v2974_v60 = vld [vmem:[#allocation3 + $0x190] sm:$0xff]  ;;  %v7455_v54 = vcombine.low %v2967_v24, %v2971_v38  ;;  %v2995_v24 = vld [vmem:[#allocation3 + $0x238] sm:$0xff]  ;;  %v7469_v38 = vcombine.low %v2982_v40, %v2986_v53 }
 0x3cf   : > { %5280 = vmatprep.subr.bf16.mxu1 %v7438_v36  ;;  %5666 = vmatprep.subr.bf16.mxu0 %v7440_v37  ;;  %v7462_v36 = vcombine.high %v2974_v60, %v2978_v48  ;;  %v7464_v37 = vcombine.high %v2975_v11, %v2979_v33 }
 0x3d2   : > { %5281 = vmatpush1.bf16.msra.mxu1 %v7437_v41  ;;  %5667 = vmatpush1.bf16.msra.mxu0 %v7439_v9  ;;  %v7461_v41 = vcombine.low %v2974_v60, %v2978_v48  ;;  %v7463_v9 = vcombine.low %v2975_v11, %v2979_v33  ;;  %v2998_v60 = vld [vmem:[#allocation3 + $0x250] sm:$0xff]  ;;  %v2999_v11 = vld [vmem:[#allocation3 + $0x258] sm:$0xff] }
 0x3d3   : > { %5282 = vmatprep.subr.bf16.mxu1 %v7446_v43  ;;  %5668 = vmatprep.subr.bf16.mxu0 %v7448_v49  ;;  %v7470_v43 = vcombine.high %v2982_v40, %v2986_v53  ;;  %v7472_v49 = vcombine.high %v2983_v46, %v2987_v58  ;;  %v3002_v48 = vld [vmem:[#allocation3 + $0x270] sm:$0xff]  ;;  %v3003_v33 = vld [vmem:[#allocation3 + $0x278] sm:$0xff] }
 0x3d4   : > { %4748 = vmatmul.mubr.bf16.gmra.mrb[104].mxu1 %v9534_v44  ;;  %5134 = vmatmul.mubr.bf16.gmra.mrb[104].mxu0 %v9534_v44  ;;  %v3010_v40 = vld [vmem:[#allocation3 + $0x2b0] sm:$0xff]  ;;  %v3007_v53 = vld [vmem:[#allocation3 + $0x298] sm:$0xff] }
 0x3d5   : > { %4757 = vmatprep.mubr.bf16.mxu1 %v9561_v35  ;;  %5143 = vmatprep.mubr.bf16.mxu0 %v9561_v35 }
 0x3d6   : > { %5283 = vmatpush1.bf16.msra.mxu1 %v7445_v4  ;;  %5669 = vmatpush1.bf16.msra.mxu0 %v7447_v5  ;;  %v2990_v4 = vld [vmem:[#allocation3 + $0x210] sm:$0xff]  ;;  %v7471_v5 = vcombine.low %v2983_v46, %v2987_v58  ;;  %v3011_v46 = vld [vmem:[#allocation3 + $0x2b8] sm:$0xff]  ;;  %v7485_v58 = vcombine.low %v2998_v60, %v3002_v48 }
 0x3d7   : > { %5284 = vmatprep.subr.bf16.mxu1 %v7454_v27  ;;  %5670 = vmatprep.subr.bf16.mxu0 %v7456_v42  ;;  %v7478_v27 = vcombine.high %v2990_v4, %v2994_v2  ;;  %v7480_v42 = vcombine.high %v2991_v31, %v2995_v24 }
 0x3da   : > { %5285 = vmatpush1.bf16.msra.mxu1 %v7453_v47  ;;  %5671 = vmatpush1.bf16.msra.mxu0 %v7455_v54  ;;  %v7477_v47 = vcombine.low %v2990_v4, %v2994_v2  ;;  %v7479_v54 = vcombine.low %v2991_v31, %v2995_v24  ;;  %v3014_v4 = vld [vmem:[#allocation3 + $0x2d0] sm:$0xff]  ;;  %v3015_v31 = vld [vmem:[#allocation3 + $0x2d8] sm:$0xff] }
 0x3db   : > { %5286 = vmatprep.subr.bf16.mxu1 %v7462_v36  ;;  %5672 = vmatprep.subr.bf16.mxu0 %v7464_v37  ;;  %v7486_v36 = vcombine.high %v2998_v60, %v3002_v48  ;;  %v7488_v37 = vcombine.high %v2999_v11, %v3003_v33  ;;  %v3018_v2 = vld [vmem:[#allocation3 + $0x2f0] sm:$0xff]  ;;  %v3019_v24 = vld [vmem:[#allocation3 + $0x2f8] sm:$0xff] }
 0x3dc   : > { %4758 = vmatmul.mubr.bf16.gmra.mrb[108].mxu1 %v9558_v14  ;;  %5144 = vmatmul.mubr.bf16.gmra.mrb[108].mxu0 %v9558_v14  ;;  %v3026_v60 = vld [vmem:[#allocation3 + $0x330] sm:$0xff]  ;;  %v3023_v48 = vld [vmem:[#allocation3 + $0x318] sm:$0xff] }
 0x3dd   : > { %4767 = vmatprep.mubr.bf16.mxu1 %v9667_v0  ;;  %5153 = vmatprep.mubr.bf16.mxu0 %v9667_v0 }
 0x3de   : > { %5287 = vmatpush1.bf16.msra.mxu1 %v7461_v41  ;;  %5673 = vmatpush1.bf16.msra.mxu0 %v7463_v9  ;;  %v3006_v41 = vld [vmem:[#allocation3 + $0x290] sm:$0xff]  ;;  %v7487_v9 = vcombine.low %v2999_v11, %v3003_v33  ;;  %v3027_v11 = vld [vmem:[#allocation3 + $0x338] sm:$0xff]  ;;  %v7501_v33 = vcombine.low %v3014_v4, %v3018_v2 }
 0x3df   : > { %5288 = vmatprep.subr.bf16.mxu1 %v7470_v43  ;;  %5674 = vmatprep.subr.bf16.mxu0 %v7472_v49  ;;  %v7494_v43 = vcombine.high %v3006_v41, %v3010_v40  ;;  %v7496_v49 = vcombine.high %v3007_v53, %v3011_v46 }
 0x3e2   : > { %5289 = vmatpush1.bf16.msra.mxu1 %v7469_v38  ;;  %5675 = vmatpush1.bf16.msra.mxu0 %v7471_v5  ;;  %v7493_v38 = vcombine.low %v3006_v41, %v3010_v40  ;;  %v7495_v5 = vcombine.low %v3007_v53, %v3011_v46  ;;  %v3030_v41 = vld [vmem:[#allocation3 + $0x350] sm:$0xff]  ;;  %v3031_v53 = vld [vmem:[#allocation3 + $0x358] sm:$0xff] }
 0x3e3   : > { %5290 = vmatprep.subr.bf16.mxu1 %v7478_v27  ;;  %5676 = vmatprep.subr.bf16.mxu0 %v7480_v42  ;;  %v7502_v27 = vcombine.high %v3014_v4, %v3018_v2  ;;  %v7504_v42 = vcombine.high %v3015_v31, %v3019_v24  ;;  %v3034_v40 = vld [vmem:[#allocation3 + $0x370] sm:$0xff]  ;;  %v3035_v46 = vld [vmem:[#allocation3 + $0x378] sm:$0xff] }
 0x3e4   : > { %4768 = vmatmul.mubr.bf16.gmra.mrb[112].mxu1 %v9660_v39  ;;  %5154 = vmatmul.mubr.bf16.gmra.mrb[112].mxu0 %v9660_v39  ;;  %v3042_v4 = vld [vmem:[#allocation3 + $0x3b0] sm:$0xff]  ;;  %v3039_v2 = vld [vmem:[#allocation3 + $0x398] sm:$0xff] }
 0x3e5   : > { %4777 = vmatprep.mubr.bf16.mxu1 %v9797_v21  ;;  %5163 = vmatprep.mubr.bf16.mxu0 %v9797_v21 }
 0x3e6   : > { %5291 = vmatpush1.bf16.msra.mxu1 %v7477_v47  ;;  %5677 = vmatpush1.bf16.msra.mxu0 %v7479_v54  ;;  %v3022_v47 = vld [vmem:[#allocation3 + $0x310] sm:$0xff]  ;;  %v7503_v54 = vcombine.low %v3015_v31, %v3019_v24  ;;  %v3043_v31 = vld [vmem:[#allocation3 + $0x3b8] sm:$0xff]  ;;  %v7517_v24 = vcombine.low %v3030_v41, %v3034_v40 }
 0x3e7   : > { %5292 = vmatprep.subr.bf16.mxu1 %v7486_v36  ;;  %5678 = vmatprep.subr.bf16.mxu0 %v7488_v37  ;;  %v7510_v36 = vcombine.high %v3022_v47, %v3026_v60  ;;  %v7512_v37 = vcombine.high %v3023_v48, %v3027_v11 }
 0x3ea   : > { %5293 = vmatpush1.bf16.msra.mxu1 %v7485_v58  ;;  %5679 = vmatpush1.bf16.msra.mxu0 %v7487_v9  ;;  %v7509_v58 = vcombine.low %v3022_v47, %v3026_v60  ;;  %v7511_v9 = vcombine.low %v3023_v48, %v3027_v11  ;;  %v3046_v47 = vld [vmem:[#allocation3 + $0x3d0] sm:$0xff]  ;;  %v3047_v48 = vld [vmem:[#allocation3 + $0x3d8] sm:$0xff] }
 0x3eb   : > { %5294 = vmatprep.subr.bf16.mxu1 %v7494_v43  ;;  %5680 = vmatprep.subr.bf16.mxu0 %v7496_v49  ;;  %v7518_v43 = vcombine.high %v3030_v41, %v3034_v40  ;;  %v7520_v49 = vcombine.high %v3031_v53, %v3035_v46  ;;  %v3050_v60 = vld [vmem:[#allocation3 + $0x3f0] sm:$0xff]  ;;  %v3051_v11 = vld [vmem:[#allocation3 + $0x3f8] sm:$0xff] }
 0x3ec   : > { %4778 = vmatmul.mubr.bf16.gmra.mrb[116].mxu1 %v9792_v18  ;;  %5164 = vmatmul.mubr.bf16.gmra.mrb[116].mxu0 %v9792_v18  ;;  %v7533_v41 = vcombine.low %v3046_v47, %v3050_v60  ;;  %v7535_v40 = vcombine.low %v3047_v48, %v3051_v11 }
 0x3ed   : > { %4787 = vmatprep.mubr.bf16.mxu1 %v9849_v26  ;;  %5173 = vmatprep.mubr.bf16.mxu0 %v9849_v26 }
 0x3ee   : > { %5295 = vmatpush1.bf16.msra.mxu1 %v7493_v38  ;;  %5681 = vmatpush1.bf16.msra.mxu0 %v7495_v5  ;;  %v3038_v38 = vld [vmem:[#allocation3 + $0x390] sm:$0xff]  ;;  %v7519_v5 = vcombine.low %v3031_v53, %v3035_v46  ;;  %v7542_v53 = vcombine.high %v10075_v45, %v10077_v57  ;;  %v7544_v46 = vcombine.high %v10079_v7, %v10083_v28 }
 0x3ef   : > { %5296 = vmatprep.subr.bf16.mxu1 %v7502_v27  ;;  %5682 = vmatprep.subr.bf16.mxu0 %v7504_v42  ;;  %v7526_v27 = vcombine.high %v3038_v38, %v3042_v4  ;;  %v7528_v42 = vcombine.high %v3039_v2, %v3043_v31 }
 0x3f2   : > { %5297 = vmatpush1.bf16.msra.mxu1 %v7501_v33  ;;  %5683 = vmatpush1.bf16.msra.mxu0 %v7503_v54  ;;  %v7525_v33 = vcombine.low %v3038_v38, %v3042_v4  ;;  %v7527_v54 = vcombine.low %v3039_v2, %v3043_v31  ;;  %v3070_v38 = vld [vmem:[#allocation3 + $0x490] sm:$0xff] }
 0x3f3   : > { %5298 = vmatprep.subr.bf16.mxu1 %v7510_v36  ;;  %5684 = vmatprep.subr.bf16.mxu0 %v7512_v37  ;;  %v7534_v36 = vcombine.high %v3046_v47, %v3050_v60  ;;  %v7536_v37 = vcombine.high %v3047_v48, %v3051_v11  ;;  %v3074_v31 = vld [vmem:[#allocation3 + $0x4b0] sm:$0xff] }
 0x3f4   : > { %4788 = vmatmul.mubr.bf16.gmra.mrb[120].mxu1 %v9847_v22  ;;  %5174 = vmatmul.mubr.bf16.gmra.mrb[120].mxu0 %v9847_v22  ;;  %v7558_v60 = vcombine.high %v3070_v38, %v3074_v31  ;;  %v3078_v11 = vld [vmem:[#allocation3 + $0x4d0] sm:$0xff] }
 0x3f5   : > { %4797 = vmatprep.mubr.bf16.mxu1 %v9878_v56  ;;  %5183 = vmatprep.mubr.bf16.mxu0 %v9878_v56 }
 0x3f6   : > { %5299 = vmatpush1.bf16.msra.mxu1 %v7509_v58  ;;  %5685 = vmatpush1.bf16.msra.mxu0 %v7511_v9  ;;  %v3062_v58 = vld [vmem:[#allocation3 + $0x450] sm:$0xff] }
 0x3f7   : > { %5300 = vmatprep.subr.bf16.mxu1 %v7518_v43  ;;  %5686 = vmatprep.subr.bf16.mxu0 %v7520_v49  ;;  %v3066_v9 = vld [vmem:[#allocation3 + $0x470] sm:$0xff]  ;;  %v3063_v43 = vld [vmem:[#allocation3 + $0x458] sm:$0xff] }
 0x3f8   : > { %v3067_v49 = vld [vmem:[#allocation3 + $0x478] sm:$0xff]  ;;  %v7550_v4 = vcombine.high %v3062_v58, %v3066_v9 }
 0x3f9   : > { %v7552_v2 = vcombine.high %v3063_v43, %v3067_v49  ;;  %v7551_v47 = vcombine.low %v3063_v43, %v3067_v49  ;;  %v3094_v43 = vld [vmem:[#allocation3 + $0x550] sm:$0xff] }
 0x3fa   : > { %5301 = vmatpush1.bf16.msra.mxu1 %v7517_v24  ;;  %5687 = vmatpush1.bf16.msra.mxu0 %v7519_v5  ;;  %v3071_v24 = vld [vmem:[#allocation3 + $0x498] sm:$0xff]  ;;  %v3098_v49 = vld [vmem:[#allocation3 + $0x570] sm:$0xff] }
 0x3fb   : > { %5302 = vmatprep.subr.bf16.mxu1 %v7526_v27  ;;  %5688 = vmatprep.subr.bf16.mxu0 %v7528_v42  ;;  %v3075_v5 = vld [vmem:[#allocation3 + $0x4b8] sm:$0xff]  ;;  %v11271_v27 = vcombine.low %v10075_v45, %v10077_v57  ;;  %v7549_v42 = vcombine.low %v3062_v58, %v3066_v9  ;;  %v7557_v45 = vcombine.low %v3070_v38, %v3074_v31 }
 0x3fc   : > { %4798 = vmatmul.mubr.bf16.gmra.mrb[124].mxu1 %v9874_v6  ;;  %5184 = vmatmul.mubr.bf16.gmra.mrb[124].mxu0 %v9874_v6  ;;  %v7560_v48 = vcombine.high %v3071_v24, %v3075_v5  ;;  %v7559_v57 = vcombine.low %v3071_v24, %v3075_v5  ;;  %v3095_v38 = vld [vmem:[#allocation3 + $0x558] sm:$0xff]  ;;  %v7582_v31 = vcombine.high %v3094_v43, %v3098_v49  ;;  %v3102_v5 = vld [vmem:[#allocation3 + $0x590] sm:$0xff] }
 0x3fd   : > { %4807 = vmatprep.mubr.bf16.mxu1 %v9899_v55  ;;  %5193 = vmatprep.mubr.bf16.mxu0 %v9899_v55 }
 0x3fe   : > { %5303 = vmatpush1.bf16.msra.mxu1 %v7525_v33  ;;  %5689 = vmatpush1.bf16.msra.mxu0 %v7527_v54  ;;  %v3079_v33 = vld [vmem:[#allocation3 + $0x4d8] sm:$0xff] }
 0x3ff   : > { %5304 = vmatprep.subr.bf16.mxu1 %v7534_v36  ;;  %5690 = vmatprep.subr.bf16.mxu0 %v7536_v37  ;;  %v3083_v54 = vld [vmem:[#allocation3 + $0x4f8] sm:$0xff]  ;;  %v3086_v36 = vld [vmem:[#allocation3 + $0x510] sm:$0xff] }
 0x400   : > { %v3087_v37 = vld [vmem:[#allocation3 + $0x518] sm:$0xff] }
 0x402   : > { %5305 = vmatpush1.bf16.msra.mxu1 %v7533_v41  ;;  %5691 = vmatpush1.bf16.msra.mxu0 %v7535_v40  ;;  %v3091_v41 = vld [vmem:[#allocation3 + $0x538] sm:$0xff]  ;;  %v11273_v40 = vld [vmem:[#allocation20_spill] sm:$0xff] }
 0x403   : > { %5467 = vmatprep.subr.bf16.mxu1 %v7542_v53  ;;  %5853 = vmatprep.subr.bf16.mxu0 %v7544_v46  ;;  %v7567_v46 = vcombine.low %v3079_v33, %v3083_v54  ;;  %v7576_v9 = vcombine.high %v3087_v37, %v3091_v41 }
 0x404   : > { %4808 = vmatmul.mubr.bf16.gmra.mrb[128].mxu1 %v9895_v10  ;;  %5194 = vmatmul.mubr.bf16.gmra.mrb[128].mxu0 %v9895_v10 }
 0x405   : > { %4817 = vmatprep.mubr.bf16.mxu1 %v9929_v50  ;;  %5203 = vmatprep.mubr.bf16.mxu0 %v9929_v50 }
 0x40c   : > { %4818 = vmatmul.mubr.bf16.gmra.mrb[132].mxu1 %v9925_v51  ;;  %5204 = vmatmul.mubr.bf16.gmra.mrb[132].mxu0 %v9925_v51 }
 0x40d   : > { %4827 = vmatprep.mubr.bf16.mxu1 %v9957_v19  ;;  %5213 = vmatprep.mubr.bf16.mxu0 %v9957_v19 }
 0x414   : > { %4828 = vmatmul.mubr.bf16.gmra.mrb[136].mxu1 %v9953_v52  ;;  %5214 = vmatmul.mubr.bf16.gmra.mrb[136].mxu0 %v9953_v52 }
 0x415   : > { %4837 = vmatprep.mubr.bf16.mxu1 %v9979_v30  ;;  %5223 = vmatprep.mubr.bf16.mxu0 %v9979_v30 }
 0x41c   : > { %4838 = vmatmul.mubr.bf16.gmra.mrb[140].mxu1 %v9975_v13  ;;  %5224 = vmatmul.mubr.bf16.gmra.mrb[140].mxu0 %v9975_v13 }
 0x41d   : > { %4847 = vmatprep.mubr.bf16.mxu1 %v10001_v29  ;;  %5233 = vmatprep.mubr.bf16.mxu0 %v10001_v29 }
 0x424   : > { %4848 = vmatmul.mubr.bf16.gmra.mrb[144].mxu1 %v9997_v17  ;;  %5234 = vmatmul.mubr.bf16.gmra.mrb[144].mxu0 %v9997_v17 }
 0x425   : > { %4857 = vmatprep.mubr.bf16.mxu1 %v10023_v20  ;;  %5243 = vmatprep.mubr.bf16.mxu0 %v10023_v20 }
 0x42c   : > { %4858 = vmatmul.mubr.bf16.gmra.mrb[148].mxu1 %v10019_v62  ;;  %5244 = vmatmul.mubr.bf16.gmra.mrb[148].mxu0 %v10019_v62 }
 0x42d   : > { %4867 = vmatprep.mubr.bf16.mxu1 %v10045_v15  ;;  %5253 = vmatprep.mubr.bf16.mxu0 %v10045_v15 }
 0x434   : > { %4868 = vmatmul.mubr.bf16.gmra.mrb[152].mxu1 %v10041_v3  ;;  %5254 = vmatmul.mubr.bf16.gmra.mrb[152].mxu0 %v10041_v3 }
 0x435   : > { %4877 = vmatprep.mubr.bf16.mxu1 %v10067_v25  ;;  %5263 = vmatprep.mubr.bf16.mxu0 %v10067_v25 }
 0x43c   : > { %4878 = vmatmul.mubr.bf16.gmra.mrb[156].mxu1 %v10063_v59  ;;  %5264 = vmatmul.mubr.bf16.gmra.mrb[156].mxu0 %v10063_v59 }
 0x43d   : > { %5306 = vmatprep.mubr.bf16.mxu1 %v9633_v34  ;;  %5692 = vmatprep.mubr.bf16.mxu0 %v9633_v34  ;;  %v11272_v34 = vcombine.low %v10079_v7, %v10083_v28  ;;  %v7568_v28 = vcombine.high %v3079_v33, %v3083_v54  ;;  %v3110_v54 = vld [vmem:[#allocation3 + $0x5d0] sm:$0xff] }
 0x444   : > { %5307 = vmatmul.mubr.bf16.vlgmr.msra.gmra.mrb[160].mxu1 %v9627_v61  ;;  %5693 = vmatmul.mubr.bf16.vlgmr.msra.gmra.mrb[160].mxu0 %v9627_v61  ;;  %v3082_v61 = vld [vmem:[#allocation3 + $0x4f0] sm:$0xff] }
 0x445   : > { %5468 = vmatpush1.bf16.msra.mxu1 %v11271_v27  ;;  %5854 = vmatpush1.bf16.msra.mxu0 %v11272_v34  ;;  %v7566_v7 = vcombine.high %v3078_v11, %v3082_v61  ;;  %v7565_v53 = vcombine.low %v3078_v11, %v3082_v61  ;;  %v11274_v27 = vld [vmem:[#allocation19_spill] sm:$0xff]  ;;  %v3106_v34 = vld [vmem:[#allocation3 + $0x5b0] sm:$0xff] }
 0x446   : > { %5316 = vmatprep.mubr.bf16.mxu1 %v9694_v1  ;;  %5702 = vmatprep.mubr.bf16.mxu0 %v9694_v1  ;;  %v3090_v1 = vld [vmem:[#allocation3 + $0x530] sm:$0xff]  ;;  %v7590_v61 = vcombine.high %v3102_v5, %v3106_v34 }
 0x447   : > { %5469 = vmatprep.subr.bf16.mxu1 %v7550_v4  ;;  %5855 = vmatprep.subr.bf16.mxu0 %v7552_v2  ;;  %v7574_v58 = vcombine.high %v3086_v36, %v3090_v1  ;;  %v3099_v4 = vld [vmem:[#allocation3 + $0x578] sm:$0xff]  ;;  %v7575_v2 = vcombine.low %v3087_v37, %v3091_v41  ;;  %v3118_v41 = vld [vmem:[#allocation3 + $0x610] sm:$0xff] }
 0x448   : > { %v7584_v24 = vcombine.high %v3095_v38, %v3099_v4  ;;  %v7583_v11 = vcombine.low %v3095_v38, %v3099_v4 }
 0x449   : > { %5470 = vmatpush1.bf16.msra.mxu1 %v7549_v42  ;;  %5856 = vmatpush1.bf16.msra.mxu0 %v7551_v47  ;;  %v3103_v42 = vld [vmem:[#allocation3 + $0x598] sm:$0xff] }
 0x44a   : > { %5471 = vmatprep.subr.bf16.mxu1 %v7558_v60  ;;  %5857 = vmatprep.subr.bf16.mxu0 %v7560_v48  ;;  %v3107_v47 = vld [vmem:[#allocation3 + $0x5b8] sm:$0xff]  ;;  %v7581_v48 = vcombine.low %v3094_v43, %v3098_v49 }
 0x44b   : > { %v11275_v60 = vld [vmem:[#allocation22_spill] sm:$0xff]  ;;  %v7592_v33 = vcombine.high %v3103_v42, %v3107_v47 }
 0x44c   : > { %5317 = vmatmul.mubr.bf16.gmra.mrb[164].mxu1 %v9670_v32  ;;  %5703 = vmatmul.mubr.bf16.gmra.mrb[164].mxu0 %v9670_v32  ;;  %v7573_v32 = vcombine.low %v3086_v36, %v3090_v1  ;;  %v7591_v36 = vcombine.low %v3103_v42, %v3107_v47  ;;  %v3134_v47 = vld [vmem:[#allocation3 + $0x690] sm:$0xff] }
 0x44d   : > { %5326 = vmatprep.mubr.bf16.mxu1 %v11273_v40  ;;  %5712 = vmatprep.mubr.bf16.mxu0 %v11273_v40  ;;  %v11276_v40 = vld [vmem:[#allocation21_spill] sm:$0xff] }
 0x44e   : > { %5472 = vmatpush1.bf16.msra.mxu1 %v7557_v45  ;;  %5858 = vmatpush1.bf16.msra.mxu0 %v7559_v57  ;;  %v3114_v45 = vld [vmem:[#allocation3 + $0x5f0] sm:$0xff]  ;;  %v3111_v57 = vld [vmem:[#allocation3 + $0x5d8] sm:$0xff] }
 0x44f   : > { %5473 = vmatprep.subr.bf16.mxu1 %v7566_v7  ;;  %5859 = vmatprep.subr.bf16.mxu0 %v7568_v28  ;;  %v3115_v7 = vld [vmem:[#allocation3 + $0x5f8] sm:$0xff]  ;;  %v7589_v28 = vcombine.low %v3102_v5, %v3106_v34  ;;  %v7598_v1 = vcombine.high %v3110_v54, %v3114_v45  ;;  %v7597_v43 = vcombine.low %v3110_v54, %v3114_v45 }
 0x450   : > { %v7600_v37 = vcombine.high %v3111_v57, %v3115_v7  ;;  %v7599_v49 = vcombine.low %v3111_v57, %v3115_v7 }
 0x452   : > { %5474 = vmatpush1.bf16.msra.mxu1 %v7565_v53  ;;  %5860 = vmatpush1.bf16.msra.mxu0 %v7567_v46  ;;  %v3122_v53 = vld [vmem:[#allocation3 + $0x630] sm:$0xff]  ;;  %v3119_v46 = vld [vmem:[#allocation3 + $0x618] sm:$0xff] }
 0x453   : > { %5475 = vmatprep.subr.bf16.mxu1 %v7574_v58  ;;  %5861 = vmatprep.subr.bf16.mxu0 %v7576_v9  ;;  %v3123_v58 = vld [vmem:[#allocation3 + $0x638] sm:$0xff]  ;;  %v11277_v9 = vld [vmem:[#allocation24_spill] sm:$0xff]  ;;  %v7606_v38 = vcombine.high %v3118_v41, %v3122_v53  ;;  %v7605_v5 = vcombine.low %v3118_v41, %v3122_v53 }
 0x454   : > { %5327 = vmatmul.mubr.bf16.gmra.mrb[168].mxu1 %v11274_v27  ;;  %5713 = vmatmul.mubr.bf16.gmra.mrb[168].mxu0 %v11274_v27  ;;  %v7608_v4 = vcombine.high %v3119_v46, %v3123_v58  ;;  %v7607_v27 = vcombine.low %v3119_v46, %v3123_v58  ;;  %v3150_v58 = vld [vmem:[#allocation3 + $0x710] sm:$0xff] }
 0x455   : > { %5336 = vmatprep.mubr.bf16.mxu1 %v11275_v60  ;;  %5722 = vmatprep.mubr.bf16.mxu0 %v11275_v60  ;;  %v11278_v60 = vld [vmem:[#allocation23_spill] sm:$0xff] }
 0x456   : > { %5476 = vmatpush1.bf16.msra.mxu1 %v7573_v32  ;;  %5862 = vmatpush1.bf16.msra.mxu0 %v7575_v2  ;;  %v3126_v32 = vld [vmem:[#allocation3 + $0x650] sm:$0xff] }
 0x457   : > { %5477 = vmatprep.subr.bf16.mxu1 %v7582_v31  ;;  %5863 = vmatprep.subr.bf16.mxu0 %v7584_v24  ;;  %v3130_v2 = vld [vmem:[#allocation3 + $0x670] sm:$0xff]  ;;  %v3127_v31 = vld [vmem:[#allocation3 + $0x658] sm:$0xff] }
 0x458   : > { %v3131_v24 = vld [vmem:[#allocation3 + $0x678] sm:$0xff]  ;;  %v7614_v34 = vcombine.high %v3126_v32, %v3130_v2  ;;  %v7613_v54 = vcombine.low %v3126_v32, %v3130_v2 }
 0x459   : > { %v7616_v42 = vcombine.high %v3127_v31, %v3131_v24  ;;  %v7615_v45 = vcombine.low %v3127_v31, %v3131_v24 }
 0x45a   : > { %5478 = vmatpush1.bf16.msra.mxu1 %v7581_v48  ;;  %5864 = vmatpush1.bf16.msra.mxu0 %v7583_v11  ;;  %v3138_v48 = vld [vmem:[#allocation3 + $0x6b0] sm:$0xff]  ;;  %v3135_v11 = vld [vmem:[#allocation3 + $0x698] sm:$0xff] }
 0x45b   : > { %5479 = vmatprep.subr.bf16.mxu1 %v7590_v61  ;;  %5865 = vmatprep.subr.bf16.mxu0 %v7592_v33  ;;  %v3139_v61 = vld [vmem:[#allocation3 + $0x6b8] sm:$0xff]  ;;  %v7622_v57 = vcombine.high %v3134_v47, %v3138_v48  ;;  %v7621_v41 = vcombine.low %v3134_v47, %v3138_v48 }
 0x45c   : > { %5337 = vmatmul.mubr.bf16.gmra.mrb[172].mxu1 %v11276_v40  ;;  %5723 = vmatmul.mubr.bf16.gmra.mrb[172].mxu0 %v11276_v40  ;;  %v11279_v33 = vld [vmem:[#allocation26_spill] sm:$0xff]  ;;  %v7624_v7 = vcombine.high %v3135_v11, %v3139_v61  ;;  %v7623_v40 = vcombine.low %v3135_v11, %v3139_v61  ;;  %v3166_v61 = vld [vmem:[#allocation3 + $0x790] sm:$0xff] }
 0x45d   : > { %5346 = vmatprep.mubr.bf16.mxu1 %v11277_v9  ;;  %5732 = vmatprep.mubr.bf16.mxu0 %v11277_v9  ;;  %v11280_v9 = vld [vmem:[#allocation25_spill] sm:$0xff] }
 0x45e   : > { %5480 = vmatpush1.bf16.msra.mxu1 %v7589_v28  ;;  %5866 = vmatpush1.bf16.msra.mxu0 %v7591_v36  ;;  %v3142_v28 = vld [vmem:[#allocation3 + $0x6d0] sm:$0xff] }
 0x45f   : > { %5481 = vmatprep.subr.bf16.mxu1 %v7598_v1  ;;  %5867 = vmatprep.subr.bf16.mxu0 %v7600_v37  ;;  %v3146_v36 = vld [vmem:[#allocation3 + $0x6f0] sm:$0xff]  ;;  %v3143_v1 = vld [vmem:[#allocation3 + $0x6d8] sm:$0xff] }
 0x460   : > { %v3147_v37 = vld [vmem:[#allocation3 + $0x6f8] sm:$0xff]  ;;  %v7630_v53 = vcombine.high %v3142_v28, %v3146_v36  ;;  %v7629_v32 = vcombine.low %v3142_v28, %v3146_v36 }
 0x461   : > { %v7632_v46 = vcombine.high %v3143_v1, %v3147_v37  ;;  %v7631_v2 = vcombine.low %v3143_v1, %v3147_v37 }
 0x462   : > { %5482 = vmatpush1.bf16.msra.mxu1 %v7597_v43  ;;  %5868 = vmatpush1.bf16.msra.mxu0 %v7599_v49  ;;  %v3154_v43 = vld [vmem:[#allocation3 + $0x730] sm:$0xff]  ;;  %v3151_v49 = vld [vmem:[#allocation3 + $0x718] sm:$0xff] }
 0x463   : > { %5483 = vmatprep.subr.bf16.mxu1 %v7606_v38  ;;  %5869 = vmatprep.subr.bf16.mxu0 %v7608_v4  ;;  %v3155_v38 = vld [vmem:[#allocation3 + $0x738] sm:$0xff]  ;;  %v11281_v4 = vld [vmem:[#allocation28_spill] sm:$0xff]  ;;  %v7638_v31 = vcombine.high %v3150_v58, %v3154_v43  ;;  %v7637_v47 = vcombine.low %v3150_v58, %v3154_v43 }
 0x464   : > { %5347 = vmatmul.mubr.bf16.gmra.mrb[176].mxu1 %v11278_v60  ;;  %5733 = vmatmul.mubr.bf16.gmra.mrb[176].mxu0 %v11278_v60  ;;  %v7640_v24 = vcombine.high %v3151_v49, %v3155_v38  ;;  %v7639_v60 = vcombine.low %v3151_v49, %v3155_v38  ;;  %v11284_v38 = vld [vmem:[#allocation29_spill] sm:$0xff] }
 0x465   : > { %5356 = vmatprep.mubr.bf16.mxu1 %v11279_v33  ;;  %5742 = vmatprep.mubr.bf16.mxu0 %v11279_v33  ;;  %v11282_v33 = vld [vmem:[#allocation27_spill] sm:$0xff] }
 0x466   : > { %5484 = vmatpush1.bf16.msra.mxu1 %v7605_v5  ;;  %5870 = vmatpush1.bf16.msra.mxu0 %v7607_v27  ;;  %v3158_v5 = vld [vmem:[#allocation3 + $0x750] sm:$0xff] }
 0x467   : > { %5485 = vmatprep.subr.bf16.mxu1 %v7614_v34  ;;  %5871 = vmatprep.subr.bf16.mxu0 %v7616_v42  ;;  %v3162_v27 = vld [vmem:[#allocation3 + $0x770] sm:$0xff]  ;;  %v3159_v34 = vld [vmem:[#allocation3 + $0x758] sm:$0xff] }
 0x468   : > { %v3163_v42 = vld [vmem:[#allocation3 + $0x778] sm:$0xff]  ;;  %v7646_v48 = vcombine.high %v3158_v5, %v3162_v27  ;;  %v7645_v28 = vcombine.low %v3158_v5, %v3162_v27  ;;  %v11288_v5 = vld [vmem:[#allocation33_spill] sm:$0xff]  ;;  %v11289_v27 = vld [vmem:[#allocation36_spill] sm:$0xff] }
 0x469   : > { %v7648_v11 = vcombine.high %v3159_v34, %v3163_v42  ;;  %v7647_v36 = vcombine.low %v3159_v34, %v3163_v42  ;;  %v3180_v34 = vld [vmem:[%s11131_s8] sm:$0xff] }
 0x46a   : > { %5486 = vmatpush1.bf16.msra.mxu1 %v7613_v54  ;;  %5872 = vmatpush1.bf16.msra.mxu0 %v7615_v45  ;;  %v3170_v54 = vld [vmem:[#allocation3 + $0x7b0] sm:$0xff]  ;;  %v3167_v45 = vld [vmem:[#allocation3 + $0x798] sm:$0xff]  ;;  %v11290_v42 = vld [vmem:[#allocation35_spill] sm:$0xff] }
 0x46b   : > { %5487 = vmatprep.subr.bf16.mxu1 %v7622_v57  ;;  %5873 = vmatprep.subr.bf16.mxu0 %v7624_v7  ;;  %v3171_v57 = vld [vmem:[#allocation3 + $0x7b8] sm:$0xff]  ;;  %v7654_v1 = vcombine.high %v3166_v61, %v3170_v54  ;;  %v7653_v58 = vcombine.low %v3166_v61, %v3170_v54 }
 0x46c   : > { %5357 = vmatmul.mubr.bf16.gmra.mrb[180].mxu1 %v11280_v9  ;;  %5743 = vmatmul.mubr.bf16.gmra.mrb[180].mxu0 %v11280_v9  ;;  %v11283_v7 = vld [vmem:[#allocation30_spill] sm:$0xff]  ;;  %v7656_v37 = vcombine.high %v3167_v45, %v3171_v57  ;;  %v7655_v9 = vcombine.low %v3167_v45, %v3171_v57  ;;  %v11295_v45 = vld [vmem:[#allocation13_spill] sm:$0xff] }
 0x46d   : > { %5366 = vmatprep.mubr.bf16.mxu1 %v11281_v4  ;;  %5752 = vmatprep.mubr.bf16.mxu0 %v11281_v4  ;;  %v11285_v4 = vld [vmem:[#allocation32_spill] sm:$0xff]  ;;  %v11293_v61 = vld [vmem:[#allocation38_spill] sm:$0xff]  ;;  %v11296_v57 = vsub.s32 3, %v11295_v45 }
 0x46e   : > { %5488 = vmatpush1.bf16.msra.mxu1 %v7621_v41  ;;  %5874 = vmatpush1.bf16.msra.mxu0 %v7623_v40  ;;  %v3174_v41 = vld [vmem:[#allocation3 + $0x7d0] sm:$0xff] }
 0x46f   : > { %5489 = vmatprep.subr.bf16.mxu1 %v7630_v53  ;;  %5875 = vmatprep.subr.bf16.mxu0 %v7632_v46  ;;  %v3178_v40 = vld [vmem:[#allocation3 + $0x7f0] sm:$0xff]  ;;  %v3175_v53 = vld [vmem:[#allocation3 + $0x7d8] sm:$0xff] }
 0x470   : > { %v3179_v46 = vld [vmem:[#allocation3 + $0x7f8] sm:$0xff]  ;;  %v7662_v43 = vcombine.high %v3174_v41, %v3178_v40 }
 0x471   : > { %v7664_v49 = vcombine.high %v3175_v53, %v3179_v46 }
 0x472   : > { %5490 = vmatpush1.bf16.msra.mxu1 %v7629_v32  ;;  %5876 = vmatpush1.bf16.msra.mxu0 %v7631_v2  ;;  %v7661_v32 = vcombine.low %v3174_v41, %v3178_v40  ;;  %v7663_v2 = vcombine.low %v3175_v53, %v3179_v46 }
 0x473   : > { %5491 = vmatprep.subr.bf16.mxu1 %v7638_v31  ;;  %5877 = vmatprep.subr.bf16.mxu0 %v7640_v24  ;;  %v11286_v31 = vld [vmem:[#allocation31_spill] sm:$0xff]  ;;  %v11287_v24 = vld [vmem:[#allocation34_spill] sm:$0xff] }
 0x474   : > { %5367 = vmatmul.mubr.bf16.gmra.mrb[184].mxu1 %v11282_v33  ;;  %5753 = vmatmul.mubr.bf16.gmra.mrb[184].mxu0 %v11282_v33  ;;  %v11294_v33 = vld [vmem:[#allocation14_spill] sm:$0xff] }
 0x475   : > { %5376 = vmatprep.mubr.bf16.mxu1 %v11283_v7  ;;  %5762 = vmatprep.mubr.bf16.mxu0 %v11283_v7  ;;  %v10221_v54 = vrot.slane %v3180_v34, %v11294_v33  ;;  %v10225_v7 = vrot.slane %v3180_v34, %v11296_v57  ;;  %v11298_v33 = vld [vmem:[#allocation40_spill] sm:$0xff] }
 0x476   : > { %5492 = vmatpush1.bf16.msra.mxu1 %v7637_v47  ;;  %5878 = vmatpush1.bf16.msra.mxu0 %v7639_v60  ;;  %v11291_v47 = vld [vmem:[#allocation15_spill] sm:$0xff] }
 0x477   : > { %5493 = vmatprep.subr.bf16.mxu1 %v7646_v48  ;;  %5879 = vmatprep.subr.bf16.mxu0 %v7648_v11  ;;  %v10213_v60 = vrot.slane %v3180_v34, %v11291_v47  ;;  %v11292_v48 = vld [vmem:[#allocation16_spill] sm:$0xff] }
 0x478   : > { %v10216_v11 = vrot.slane %v3180_v34, %v11292_v48 }
 0x47a   : > { %5494 = vmatpush1.bf16.msra.mxu1 %v7645_v28  ;;  %5880 = vmatpush1.bf16.msra.mxu0 %v7647_v36 }
 0x47b   : > { %5495 = vmatprep.subr.bf16.mxu1 %v7654_v1  ;;  %5881 = vmatprep.subr.bf16.mxu0 %v7656_v37 }
 0x47c   : > { %5377 = vmatmul.mubr.bf16.gmra.mrb[188].mxu1 %v11284_v38  ;;  %5763 = vmatmul.mubr.bf16.gmra.mrb[188].mxu0 %v11284_v38 }
 0x47d   : > { %5386 = vmatprep.mubr.bf16.mxu1 %v11285_v4  ;;  %5772 = vmatprep.mubr.bf16.mxu0 %v11285_v4 }
 0x47e   : > { %5496 = vmatpush1.bf16.msra.mxu1 %v7653_v58  ;;  %5882 = vmatpush1.bf16.msra.mxu0 %v7655_v9 }
 0x47f   : > { %5497 = vmatprep.subr.bf16.mxu1 %v7662_v43  ;;  %5883 = vmatprep.subr.bf16.mxu0 %v7664_v49 }
 0x482   : > { %5498 = vmatpush1.bf16.msra.mxu1 %v7661_v32  ;;  %5884 = vmatpush1.bf16.msra.mxu0 %v7663_v2 }
 0x484   : > { %5387 = vmatmul.mubr.bf16.gmra.mrb[192].mxu1 %v11286_v31  ;;  %5773 = vmatmul.mubr.bf16.gmra.mrb[192].mxu0 %v11286_v31 }
 0x485   : > { %5396 = vmatprep.mubr.bf16.mxu1 %v11287_v24  ;;  %5782 = vmatprep.mubr.bf16.mxu0 %v11287_v24 }
 0x48c   : > { %5397 = vmatmul.mubr.bf16.gmra.mrb[196].mxu1 %v11288_v5  ;;  %5783 = vmatmul.mubr.bf16.gmra.mrb[196].mxu0 %v11288_v5  ;;  %v11297_v5 = vld [vmem:[#allocation37_spill] sm:$0xff] }
 0x48d   : > { %5406 = vmatprep.mubr.bf16.mxu1 %v11289_v27  ;;  %5792 = vmatprep.mubr.bf16.mxu0 %v11289_v27 }
 0x494   : > { %5407 = vmatmul.mubr.bf16.gmra.mrb[200].mxu1 %v11290_v42  ;;  %5793 = vmatmul.mubr.bf16.gmra.mrb[200].mxu0 %v11290_v42 }
 0x495   : > { %5416 = vmatprep.mubr.bf16.mxu1 %v11293_v61  ;;  %5802 = vmatprep.mubr.bf16.mxu0 %v11293_v61 }
 0x497   : > { %v4729_v28 = vpop.f32.mrb[96].mxu1  ;;  %v5115_v36 = vpop.f32.mrb[96].mxu0 }
 0x498   : > { %v7688_v1 = vadd.f32 %v4729_v28, %v10213_v60  ;;  %v7752_v37 = vadd.f32 %v5115_v36, %v10216_v11  ;;  %v4731_v41 = vpop.f32.mrb[97].mxu1  ;;  %v5117_v40 = vpop.f32.mrb[97].mxu0 }
 0x499   : > { %v7689_v53 = vadd.f32 %v4731_v41, %v10221_v54  ;;  %v7753_v46 = vadd.f32 %v5117_v40, %v10225_v7  ;;  %v4733_v58 = vpop.f32.mrb[98].mxu1  ;;  %v5119_v9 = vpop.f32.mrb[98].mxu0 }
 0x49a   : > { %vm6046_vm0 = vcmp.ge.f32.partialorder %v7688_v1, 0.0  ;;  %v6302_v43 = vmul.f32 0.01, %v7688_v1  ;;  %vm6048_vm1 = vcmp.ge.f32.partialorder %v7752_v37, 0.0  ;;  %v6304_v49 = vmul.f32 0.01, %v7752_v37 }
 0x49b   : > { %vm6047_vm2 = vcmp.ge.f32.partialorder %v7689_v53, 0.0  ;;  %v6303_v38 = vmul.f32 0.01, %v7689_v53  ;;  %vm6049_vm3 = vcmp.ge.f32.partialorder %v7753_v46, 0.0  ;;  %v6305_v4 = vmul.f32 0.01, %v7753_v46 }
 0x49c   : > { %v7690_v32 = vadd.f32 %v4733_v58, %v10213_v60  ;;  %v7754_v2 = vadd.f32 %v5119_v9, %v10216_v11  ;;  %v4735_v31 = vpop.f32.mrb[99].mxu1  ;;  %v5121_v24 = vpop.f32.mrb[99].mxu0  ;;  %5417 = vmatmul.mubr.bf16.gmra.mrb[204].mxu1 %v11297_v5  ;;  %v6558_v27 = vsel %vm6046_vm0, %v7688_v1, %v6302_v43  ;;  %v6560_v34 = vsel %vm6048_vm1, %v7752_v37, %v6304_v49 }
 0x49d   : > { %v7691_v42 = vadd.f32 %v4735_v31, %v10221_v54  ;;  %v7755_v47 = vadd.f32 %v5121_v24, %v10225_v7  ;;  %5803 = vmatmul.mubr.bf16.gmra.mrb[204].mxu0 %v11297_v5  ;;  %5426 = vmatprep.mubr.bf16.mxu1 %v11298_v33  ;;  %v6559_v36 = vsel %vm6047_vm2, %v7689_v53, %v6303_v38 }
 0x49e   : > { %vm6054_vm4 = vcmp.ge.f32.partialorder %v7690_v32, 0.0  ;;  %v6310_v48 = vmul.f32 0.01, %v7690_v32  ;;  %vm6056_vm5 = vcmp.ge.f32.partialorder %v7754_v2, 0.0  ;;  %v6312_v61 = vmul.f32 0.01, %v7754_v2  ;;  %5812 = vmatprep.mubr.bf16.mxu0 %v11298_v33 }
 0x49f   : > { %vm6055_vm6 = vcmp.ge.f32.partialorder %v7691_v42, 0.0  ;;  %v6311_v57 = vmul.f32 0.01, %v7691_v42  ;;  %vm6057_vm7 = vcmp.ge.f32.partialorder %v7755_v47, 0.0  ;;  %v6313_v28 = vmul.f32 0.01, %v7755_v47 }
 0x4a0   : > { %v6561_v1 = vsel %vm6049_vm3, %v7753_v46, %v6305_v4  ;;  %v6566_v37 = vsel %vm6054_vm4, %v7690_v32, %v6310_v48  ;;  %v6568_v41 = vsel %vm6056_vm5, %v7754_v2, %v6312_v61  ;;  %v4739_v40 = vpop.f32.mrb[100].mxu1  ;;  %v5125_v58 = vpop.f32.mrb[100].mxu0 }
 0x4a1   : > { %v6822_v9 = vadd.f32 %v6566_v37, %v6558_v27  ;;  %v6884_v43 = vadd.f32 %v6568_v41, %v6560_v34  ;;  %v6567_v49 = vsel %vm6055_vm6, %v7691_v42, %v6311_v57  ;;  %v6569_v31 = vsel %vm6057_vm7, %v7755_v47, %v6313_v28  ;;  %v4741_v24 = vpop.f32.mrb[101].mxu1  ;;  %v5127_v5 = vpop.f32.mrb[101].mxu0  ;;  %v11299_v47 = vld [vmem:[#allocation39_spill] sm:$0xff] }
 0x4a2   : > { %v6853_v45 = vadd.f32 %v6567_v49, %v6559_v36  ;;  %v6915_v33 = vadd.f32 %v6569_v31, %v6561_v1  ;;  %v7692_v59 = vadd.f32 %v4739_v40, %v10213_v60  ;;  %v7756_v25 = vadd.f32 %v5125_v58, %v10216_v11  ;;  %v4743_v3 = vpop.f32.mrb[102].mxu1  ;;  %v5129_v53 = vpop.f32.mrb[102].mxu0  ;;  %v11300_v57 = vld [vmem:[#allocation43_spill] sm:$0xff] }
 0x4a3   : > { %v7693_v46 = vadd.f32 %v4741_v24, %v10221_v54  ;;  %v7757_v38 = vadd.f32 %v5127_v5, %v10225_v7  ;;  %v7694_v4 = vadd.f32 %v4743_v3, %v10213_v60  ;;  %v7758_v32 = vadd.f32 %v5129_v53, %v10216_v11  ;;  %v4745_v2 = vpop.f32.mrb[103].mxu1  ;;  %v5131_v27 = vpop.f32.mrb[103].mxu0 }
 0x4a4   : > { %vm6062_vm8 = vcmp.ge.f32.partialorder %v7692_v59, 0.0  ;;  %v6318_v34 = vmul.f32 0.01, %v7692_v59  ;;  %vm6064_vm9 = vcmp.ge.f32.partialorder %v7756_v25, 0.0  ;;  %v6320_v42 = vmul.f32 0.01, %v7756_v25  ;;  %5427 = vmatmul.mubr.bf16.gmra.mrb[208].mxu1 %v11299_v47 }
 0x4a5   : > { %vm6063_vm10 = vcmp.ge.f32.partialorder %v7693_v46, 0.0  ;;  %v6319_v48 = vmul.f32 0.01, %v7693_v46  ;;  %vm6065_vm11 = vcmp.ge.f32.partialorder %v7757_v38, 0.0  ;;  %v6321_v61 = vmul.f32 0.01, %v7757_v38  ;;  %5813 = vmatmul.mubr.bf16.gmra.mrb[208].mxu0 %v11299_v47  ;;  %5436 = vmatprep.mubr.bf16.mxu1 %v11300_v57 }
 0x4a6   : > { %v6574_v28 = vsel %vm6062_vm8, %v7692_v59, %v6318_v34  ;;  %v6576_v3 = vsel %vm6064_vm9, %v7756_v25, %v6320_v42  ;;  %vm6070_vm12 = vcmp.ge.f32.partialorder %v7694_v4, 0.0  ;;  %v6326_v36 = vmul.f32 0.01, %v7694_v4  ;;  %5822 = vmatprep.mubr.bf16.mxu0 %v11300_v57  ;;  %v11301_v57 = vld [vmem:[#allocation41_spill] sm:$0xff] }
 0x4a7   : > { %v6823_v1 = vadd.f32 %v6822_v9, %v6574_v28  ;;  %v6885_v37 = vadd.f32 %v6884_v43, %v6576_v3  ;;  %v6575_v41 = vsel %vm6063_vm10, %v7693_v46, %v6319_v48  ;;  %v6577_v40 = vsel %vm6065_vm11, %v7757_v38, %v6321_v61  ;;  %v4749_v58 = vpop.f32.mrb[104].mxu1  ;;  %v5135_v49 = vpop.f32.mrb[104].mxu0 }
 0x4a8   : > { %v6854_v31 = vadd.f32 %v6853_v45, %v6575_v41  ;;  %v6916_v24 = vadd.f32 %v6915_v33, %v6577_v40  ;;  %v6582_v5 = vsel %vm6070_vm12, %v7694_v4, %v6326_v36  ;;  %vm6072_vm13 = vcmp.ge.f32.partialorder %v7758_v32, 0.0  ;;  %v4751_v53 = vpop.f32.mrb[105].mxu1  ;;  %v5137_v47 = vpop.f32.mrb[105].mxu0  ;;  %v11302_v36 = vld [vmem:[#allocation47_spill] sm:$0xff] }
 0x4a9   : > { %v6824_v15 = vadd.f32 %v6823_v1, %v6582_v5  ;;  %v6328_v62 = vmul.f32 0.01, %v7758_v32  ;;  %v7695_v59 = vadd.f32 %v4745_v2, %v10221_v54  ;;  %v7759_v25 = vadd.f32 %v5131_v27, %v10225_v7  ;;  %v4753_v34 = vpop.f32.mrb[106].mxu1  ;;  %v5139_v42 = vpop.f32.mrb[106].mxu0 }
 0x4aa   : > { %v7696_v9 = vadd.f32 %v4749_v58, %v10213_v60  ;;  %v7760_v43 = vadd.f32 %v5135_v49, %v10216_v11  ;;  %v7697_v46 = vadd.f32 %v4751_v53, %v10221_v54  ;;  %v7761_v45 = vadd.f32 %v5137_v47, %v10225_v7  ;;  %v4755_v33 = vpop.f32.mrb[107].mxu1  ;;  %v5141_v38 = vpop.f32.mrb[107].mxu0 }
 0x4ab   : > { %v6584_v4 = vsel %vm6072_vm13, %v7758_v32, %v6328_v62  ;;  %vm6071_vm14 = vcmp.ge.f32.partialorder %v7695_v59, 0.0  ;;  %v6327_v48 = vmul.f32 0.01, %v7695_v59  ;;  %vm6073_vm15 = vcmp.ge.f32.partialorder %v7759_v25, 0.0 }
 0x4ac   : > { %v6886_v61 = vadd.f32 %v6885_v37, %v6584_v4  ;;  %v6329_v2 = vmul.f32 0.01, %v7759_v25  ;;  %vm6078_vm0 = vcmp.ge.f32.partialorder %v7696_v9, 0.0  ;;  %v6334_v27 = vmul.f32 0.01, %v7696_v9  ;;  %5437 = vmatmul.mubr.bf16.gmra.mrb[212].mxu1 %v11301_v57 }
 0x4ad   : > { %v6583_v28 = vsel %vm6071_vm14, %v7695_v59, %v6327_v48  ;;  %vm6080_vm1 = vcmp.ge.f32.partialorder %v7760_v43, 0.0  ;;  %v6336_v3 = vmul.f32 0.01, %v7760_v43  ;;  %vm6079_vm2 = vcmp.ge.f32.partialorder %v7697_v46, 0.0  ;;  %5823 = vmatmul.mubr.bf16.gmra.mrb[212].mxu0 %v11301_v57  ;;  %5446 = vmatprep.mubr.bf16.mxu1 %v11302_v36 }
 0x4ae   : > { %v6855_v1 = vadd.f32 %v6854_v31, %v6583_v28  ;;  %v6585_v41 = vsel %vm6073_vm15, %v7759_v25, %v6329_v2  ;;  %v6590_v62 = vsel %vm6078_vm0, %v7696_v9, %v6334_v27  ;;  %v6335_v32 = vmul.f32 0.01, %v7697_v46  ;;  %5832 = vmatprep.mubr.bf16.mxu0 %v11302_v36  ;;  %v11303_v36 = vld [vmem:[#allocation45_spill] sm:$0xff] }
 0x4af   : > { %v6917_v37 = vadd.f32 %v6916_v24, %v6585_v41  ;;  %v6825_v40 = vadd.f32 %v6824_v15, %v6590_v62  ;;  %v6592_v58 = vsel %vm6080_vm1, %v7760_v43, %v6336_v3  ;;  %vm6081_vm3 = vcmp.ge.f32.partialorder %v7761_v45, 0.0  ;;  %v4759_v49 = vpop.f32.mrb[108].mxu1  ;;  %v5145_v5 = vpop.f32.mrb[108].mxu0 }
 0x4b0   : > { %v6887_v53 = vadd.f32 %v6886_v61, %v6592_v58  ;;  %v6591_v47 = vsel %vm6079_vm2, %v7697_v46, %v6335_v32  ;;  %v6337_v59 = vmul.f32 0.01, %v7761_v45  ;;  %v7698_v4 = vadd.f32 %v4753_v34, %v10213_v60  ;;  %v4761_v48 = vpop.f32.mrb[109].mxu1  ;;  %v5147_v57 = vpop.f32.mrb[109].mxu0 }
 0x4b1   : > { %v6856_v20 = vadd.f32 %v6855_v1, %v6591_v47  ;;  %v7762_v31 = vadd.f32 %v5139_v42, %v10216_v11  ;;  %v7699_v25 = vadd.f32 %v4755_v33, %v10221_v54  ;;  %v7763_v9 = vadd.f32 %v5141_v38, %v10225_v7  ;;  %v4763_v24 = vpop.f32.mrb[110].mxu1  ;;  %v5149_v15 = vpop.f32.mrb[110].mxu0 }
 0x4b2   : > { %v6593_v43 = vsel %vm6081_vm3, %v7761_v45, %v6337_v59  ;;  %vm6086_vm4 = vcmp.ge.f32.partialorder %v7698_v4, 0.0  ;;  %v6342_v2 = vmul.f32 0.01, %v7698_v4  ;;  %v7700_v61 = vadd.f32 %v4759_v49, %v10213_v60  ;;  %v4765_v46 = vpop.f32.mrb[111].mxu1  ;;  %v10266_v27 = vpop.f32.mrb[111].mxu0 }
 0x4b3   : > { %v6918_v34 = vadd.f32 %v6917_v37, %v6593_v43  ;;  %vm6088_vm5 = vcmp.ge.f32.partialorder %v7762_v31, 0.0  ;;  %v6344_v28 = vmul.f32 0.01, %v7762_v31  ;;  %vm6087_vm6 = vcmp.ge.f32.partialorder %v7699_v25, 0.0 }
 0x4b4   : > { %v6598_v3 = vsel %vm6086_vm4, %v7698_v4, %v6342_v2  ;;  %v6343_v42 = vmul.f32 0.01, %v7699_v25  ;;  %vm6089_vm7 = vcmp.ge.f32.partialorder %v7763_v9, 0.0  ;;  %v6345_v33 = vmul.f32 0.01, %v7763_v9  ;;  %5447 = vmatmul.mubr.bf16.gmra.mrb[216].mxu1 %v11303_v36 }
 0x4b5   : > { %v6826_v38 = vadd.f32 %v6825_v40, %v6598_v3  ;;  %v6600_v1 = vsel %vm6088_vm5, %v7762_v31, %v6344_v28  ;;  %vm6094_vm8 = vcmp.ge.f32.partialorder %v7700_v61, 0.0  ;;  %v6350_v45 = vmul.f32 0.01, %v7700_v61  ;;  %5833 = vmatmul.mubr.bf16.gmra.mrb[216].mxu0 %v11303_v36  ;;  %5456 = vmatprep.mubr.bf16.mxu1 %v10065_v8 }
 0x4b6   : > { %v6888_v41 = vadd.f32 %v6887_v53, %v6600_v1  ;;  %v6599_v62 = vsel %vm6087_vm6, %v7699_v25, %v6343_v42  ;;  %v6601_v32 = vsel %vm6089_vm7, %v7763_v9, %v6345_v33  ;;  %v7764_v37 = vadd.f32 %v5145_v5, %v10216_v11  ;;  %5842 = vmatprep.mubr.bf16.mxu0 %v10065_v8 }
 0x4b7   : > { %v6857_v58 = vadd.f32 %v6856_v20, %v6599_v62  ;;  %v6919_v49 = vadd.f32 %v6918_v34, %v6601_v32  ;;  %v6606_v47 = vsel %vm6094_vm8, %v7700_v61, %v6350_v45  ;;  %v7701_v59 = vadd.f32 %v4761_v48, %v10221_v54  ;;  %v4769_v40 = vpop.f32.mrb[112].mxu1  ;;  %v5155_v4 = vpop.f32.mrb[112].mxu0 }
 0x4b8   : > { %v6827_v31 = vadd.f32 %v6826_v38, %v6606_v47  ;;  %vm6096_vm9 = vcmp.ge.f32.partialorder %v7764_v37, 0.0  ;;  %v6352_v43 = vmul.f32 0.01, %v7764_v37  ;;  %v7765_v2 = vadd.f32 %v5147_v57, %v10225_v7  ;;  %v4771_v28 = vpop.f32.mrb[113].mxu1  ;;  %v5157_v53 = vpop.f32.mrb[113].mxu0 }
 0x4b9   : > { %vm6095_vm10 = vcmp.ge.f32.partialorder %v7701_v59, 0.0  ;;  %v6351_v25 = vmul.f32 0.01, %v7701_v59  ;;  %v7702_v5 = vadd.f32 %v4763_v24, %v10213_v60  ;;  %v7766_v8 = vadd.f32 %v5149_v15, %v10216_v11  ;;  %v4773_v20 = vpop.f32.mrb[114].mxu1  ;;  %v5159_v9 = vpop.f32.mrb[114].mxu0 }
 0x4ba   : > { %v6608_v61 = vsel %vm6096_vm9, %v7764_v37, %v6352_v43  ;;  %vm6097_vm11 = vcmp.ge.f32.partialorder %v7765_v2, 0.0  ;;  %v6353_v48 = vmul.f32 0.01, %v7765_v2  ;;  %v7703_v34 = vadd.f32 %v4765_v46, %v10221_v54  ;;  %v10278_v3 = vpop.f32.mrb[115].mxu1  ;;  %v10280_v42 = vpop.f32.mrb[115].mxu0  ;;  %v11304_v46 = vld [vmem:[#allocation18_spill] sm:$0xff] }
 0x4bb   : > { %v6889_v57 = vadd.f32 %v6888_v41, %v6608_v61  ;;  %v6607_v33 = vsel %vm6095_vm10, %v7701_v59, %v6351_v25  ;;  %vm6102_vm12 = vcmp.ge.f32.partialorder %v7702_v5, 0.0  ;;  %v6358_v36 = vmul.f32 0.01, %v7702_v5 }
 0x4bc   : > { %v6858_v38 = vadd.f32 %v6857_v58, %v6607_v33  ;;  %v6609_v1 = vsel %vm6097_vm11, %v7765_v2, %v6353_v48  ;;  %vm6104_vm13 = vcmp.ge.f32.partialorder %v7766_v8, 0.0  ;;  %v6360_v24 = vmul.f32 0.01, %v7766_v8  ;;  %5457 = vmatmul.mubr.bf16.gmra.mrb[220].mxu1 %v10061_v63 }
 0x4bd   : > { %v6920_v15 = vadd.f32 %v6919_v49, %v6609_v1  ;;  %v6614_v45 = vsel %vm6102_vm12, %v7702_v5, %v6358_v36  ;;  %vm6103_vm14 = vcmp.ge.f32.partialorder %v7703_v34, 0.0  ;;  %v6359_v62 = vmul.f32 0.01, %v7703_v34  ;;  %5843 = vmatmul.mubr.bf16.gmra.mrb[220].mxu0 %v10061_v63  ;;  %5499 = vmatprep.mubr.bf16.mxu1 %v11304_v46 }
 0x4be   : > { %v6828_v32 = vadd.f32 %v6827_v31, %v6614_v45  ;;  %v6616_v37 = vsel %vm6104_vm13, %v7766_v8, %v6360_v24  ;;  %v7767_v41 = vadd.f32 %v10266_v27, %v10225_v7  ;;  %v7704_v58 = vadd.f32 %v4769_v40, %v10213_v60  ;;  %5885 = vmatprep.mubr.bf16.mxu0 %v11304_v46 }
 0x4bf   : > { %v6890_v47 = vadd.f32 %v6889_v57, %v6616_v37  ;;  %v6615_v59 = vsel %vm6103_vm14, %v7703_v34, %v6359_v62  ;;  %v7768_v49 = vadd.f32 %v5155_v4, %v10216_v11  ;;  %v7705_v43 = vadd.f32 %v4771_v28, %v10221_v54  ;;  %v4779_v2 = vpop.f32.mrb[116].mxu1  ;;  %v5165_v25 = vpop.f32.mrb[116].mxu0 }
 0x4c0   : > { %v6859_v63 = vadd.f32 %v6858_v38, %v6615_v59  ;;  %vm6105_vm15 = vcmp.ge.f32.partialorder %v7767_v41, 0.0  ;;  %v6361_v5 = vmul.f32 0.01, %v7767_v41  ;;  %vm6110_vm0 = vcmp.ge.f32.partialorder %v7704_v58, 0.0  ;;  %v4781_v31 = vpop.f32.mrb[117].mxu1  ;;  %v5167_v8 = vpop.f32.mrb[117].mxu0 }
 0x4c1   : > { %v6366_v61 = vmul.f32 0.01, %v7704_v58  ;;  %vm6112_vm1 = vcmp.ge.f32.partialorder %v7768_v49, 0.0  ;;  %v6368_v27 = vmul.f32 0.01, %v7768_v49  ;;  %vm6111_vm2 = vcmp.ge.f32.partialorder %v7705_v43, 0.0 }
 0x4c2   : > { %v6617_v40 = vsel %vm6105_vm15, %v7767_v41, %v6361_v5  ;;  %v6367_v48 = vmul.f32 0.01, %v7705_v43  ;;  %v7769_v34 = vadd.f32 %v5157_v53, %v10225_v7  ;;  %v7706_v4 = vadd.f32 %v4773_v20, %v10213_v60  ;;  %v10293_v57 = vpop.f32.mrb[118].mxu1  ;;  %v10295_v28 = vpop.f32.mrb[118].mxu0  ;;  %v11305_v53 = vld [vmem:[#allocation17_spill] sm:$0xff] }
 0x4c3   : > { %v6921_v33 = vadd.f32 %v6920_v15, %v6617_v40  ;;  %v6622_v36 = vsel %vm6110_vm0, %v7704_v58, %v6366_v61  ;;  %v6624_v38 = vsel %vm6112_vm1, %v7768_v49, %v6368_v27  ;;  %v7770_v1 = vadd.f32 %v5159_v9, %v10216_v11  ;;  %v10298_v24 = vpop.f32.mrb[119].mxu1  ;;  %v10300_v45 = vpop.f32.mrb[119].mxu0 }
 0x4c4   : > { %v6829_v62 = vadd.f32 %v6828_v32, %v6622_v36  ;;  %v6891_v46 = vadd.f32 %v6890_v47, %v6624_v38  ;;  %v6623_v37 = vsel %vm6111_vm2, %v7705_v43, %v6367_v48  ;;  %vm6113_vm3 = vcmp.ge.f32.partialorder %v7769_v34, 0.0  ;;  %5500 = vmatmul.mubr.bf16.vlgmr.msra.gmra.mrb[160].mxu1 %v11305_v53 }
 0x4c5   : > { %v6860_v20 = vadd.f32 %v6859_v63, %v6623_v37  ;;  %v6369_v41 = vmul.f32 0.01, %v7769_v34  ;;  %vm6118_vm4 = vcmp.ge.f32.partialorder %v7706_v4, 0.0  ;;  %v6374_v59 = vmul.f32 0.01, %v7706_v4  ;;  %5886 = vmatmul.mubr.bf16.vlgmr.msra.gmra.mrb[160].mxu0 %v11305_v53  ;;  %5509 = vmatprep.mubr.bf16.mxu1 %v9525_v16 }
 0x4c6   : > { %vm6120_vm5 = vcmp.ge.f32.partialorder %v7770_v1, 0.0  ;;  %v6376_v9 = vmul.f32 0.01, %v7770_v1  ;;  %v7707_v15 = vadd.f32 %v10278_v3, %v10221_v54  ;;  %v7771_v32 = vadd.f32 %v10280_v42, %v10225_v7  ;;  %5895 = vmatprep.mubr.bf16.mxu0 %v9525_v16 }
 0x4c7   : > { %v6625_v58 = vsel %vm6113_vm3, %v7769_v34, %v6369_v41  ;;  %v6630_v47 = vsel %vm6118_vm4, %v7706_v4, %v6374_v59  ;;  %v7708_v49 = vadd.f32 %v4779_v2, %v10213_v60  ;;  %v7772_v43 = vadd.f32 %v5165_v25, %v10216_v11  ;;  %v4789_v63 = vpop.f32.mrb[120].mxu1  ;;  %v10312_v5 = vpop.f32.mrb[120].mxu0 }
 0x4c8   : > { %v6922_v61 = vadd.f32 %v6921_v33, %v6625_v58  ;;  %v6830_v27 = vadd.f32 %v6829_v62, %v6630_v47  ;;  %v6632_v40 = vsel %vm6120_vm5, %v7770_v1, %v6376_v9  ;;  %vm6119_vm6 = vcmp.ge.f32.partialorder %v7707_v15, 0.0  ;;  %v10314_v48 = vpop.f32.mrb[121].mxu1  ;;  %v10316_v3 = vpop.f32.mrb[121].mxu0 }
 0x4c9   : > { %v6892_v42 = vadd.f32 %v6891_v46, %v6632_v40  ;;  %v6375_v36 = vmul.f32 0.01, %v7707_v15  ;;  %vm6121_vm7 = vcmp.ge.f32.partialorder %v7771_v32, 0.0  ;;  %v6377_v16 = vmul.f32 0.01, %v7771_v32  ;;  %v10318_v34 = vpop.f32.mrb[122].mxu1 }
 0x4ca   : > { %vm6126_vm8 = vcmp.ge.f32.partialorder %v7708_v49, 0.0  ;;  %v6382_v2 = vmul.f32 0.01, %v7708_v49  ;;  %vm6128_vm9 = vcmp.ge.f32.partialorder %v7772_v43, 0.0  ;;  %v6384_v25 = vmul.f32 0.01, %v7772_v43 }
 0x4cb   : > { %v6631_v4 = vsel %vm6119_vm6, %v7707_v15, %v6375_v36  ;;  %v6633_v38 = vsel %vm6121_vm7, %v7771_v32, %v6377_v16  ;;  %v7709_v33 = vadd.f32 %v4781_v31, %v10221_v54  ;;  %v7773_v1 = vadd.f32 %v5167_v8, %v10225_v7  ;;  %v10322_v62 = vpop.f32.mrb[122].mxu0  ;;  %v10324_v37 = vpop.f32.mrb[123].mxu1 }
 0x4cc   : > { %v6861_v46 = vadd.f32 %v6860_v20, %v6631_v4  ;;  %v6923_v53 = vadd.f32 %v6922_v61, %v6633_v38  ;;  %v6638_v41 = vsel %vm6126_vm8, %v7708_v49, %v6382_v2  ;;  %v6640_v59 = vsel %vm6128_vm9, %v7772_v43, %v6384_v25  ;;  %v10326_v9 = vpop.f32.mrb[123].mxu0  ;;  %5510 = vmatmul.mubr.bf16.gmra.mrb[164].mxu1 %v9522_v12 }
 0x4cd   : > { %v6831_v58 = vadd.f32 %v6830_v27, %v6638_v41  ;;  %v6893_v47 = vadd.f32 %v6892_v42, %v6640_v59  ;;  %vm6127_vm10 = vcmp.ge.f32.partialorder %v7709_v33, 0.0  ;;  %v6383_v15 = vmul.f32 0.01, %v7709_v33  ;;  %5896 = vmatmul.mubr.bf16.gmra.mrb[164].mxu0 %v9522_v12  ;;  %5519 = vmatprep.mubr.bf16.mxu1 %v9537_v23 }
 0x4ce   : > { %vm6129_vm11 = vcmp.ge.f32.partialorder %v7773_v1, 0.0  ;;  %v6385_v31 = vmul.f32 0.01, %v7773_v1  ;;  %v7710_v8 = vadd.f32 %v10293_v57, %v10213_v60  ;;  %v7774_v20 = vadd.f32 %v10295_v28, %v10216_v11  ;;  %5905 = vmatprep.mubr.bf16.mxu0 %v9537_v23 }
 0x4cf   : > { %v6639_v32 = vsel %vm6127_vm10, %v7709_v33, %v6383_v15  ;;  %v7711_v49 = vadd.f32 %v10298_v24, %v10221_v54  ;;  %v7775_v43 = vadd.f32 %v10300_v45, %v10225_v7  ;;  %v7712_v12 = vadd.f32 %v4789_v63, %v10213_v60  ;;  %v10341_v61 = vpop.f32.mrb[124].mxu1  ;;  %v10343_v27 = vpop.f32.mrb[124].mxu0 }
 0x4d0   : > { %v6862_v40 = vadd.f32 %v6861_v46, %v6639_v32  ;;  %v6641_v57 = vsel %vm6129_vm11, %v7773_v1, %v6385_v31  ;;  %vm6134_vm12 = vcmp.ge.f32.partialorder %v7710_v8, 0.0  ;;  %v6390_v42 = vmul.f32 0.01, %v7710_v8  ;;  %v10345_v28 = vpop.f32.mrb[125].mxu1  ;;  %v10347_v23 = vpop.f32.mrb[125].mxu0 }
 0x4d1   : > { %v6924_v36 = vadd.f32 %v6923_v53, %v6641_v57  ;;  %vm6136_vm13 = vcmp.ge.f32.partialorder %v7774_v20, 0.0  ;;  %v6392_v24 = vmul.f32 0.01, %v7774_v20  ;;  %vm6135_vm14 = vcmp.ge.f32.partialorder %v7711_v49, 0.0  ;;  %v10349_v16 = vpop.f32.mrb[126].mxu1  ;;  %v10351_v45 = vpop.f32.mrb[126].mxu0 }
 0x4d2   : > { %v6646_v63 = vsel %vm6134_vm12, %v7710_v8, %v6390_v42  ;;  %v6391_v2 = vmul.f32 0.01, %v7711_v49  ;;  %vm6137_vm15 = vcmp.ge.f32.partialorder %v7775_v43, 0.0  ;;  %v6393_v25 = vmul.f32 0.01, %v7775_v43  ;;  %v10353_v4 = vpop.f32.mrb[127].mxu1 }
 0x4d3   : > { %v6832_v38 = vadd.f32 %v6831_v58, %v6646_v63  ;;  %v6648_v33 = vsel %vm6136_vm13, %v7774_v20, %v6392_v24  ;;  %vm6142_vm0 = vcmp.ge.f32.partialorder %v7712_v12, 0.0  ;;  %v6398_v1 = vmul.f32 0.01, %v7712_v12  ;;  %v10355_v46 = vpop.f32.mrb[127].mxu0 }
 0x4d4   : > { %v6894_v53 = vadd.f32 %v6893_v47, %v6648_v33  ;;  %v6647_v41 = vsel %vm6135_vm14, %v7711_v49, %v6391_v2  ;;  %v6649_v59 = vsel %vm6137_vm15, %v7775_v43, %v6393_v25  ;;  %v7776_v15 = vadd.f32 %v10312_v5, %v10216_v11  ;;  %5520 = vmatmul.mubr.bf16.gmra.mrb[168].mxu1 %v9534_v44 }
 0x4d5   : > { %v6863_v31 = vadd.f32 %v6862_v40, %v6647_v41  ;;  %v6925_v8 = vadd.f32 %v6924_v36, %v6649_v59  ;;  %v6654_v32 = vsel %vm6142_vm0, %v7712_v12, %v6398_v1  ;;  %v7713_v57 = vadd.f32 %v10314_v48, %v10221_v54  ;;  %5906 = vmatmul.mubr.bf16.gmra.mrb[168].mxu0 %v9534_v44 }
 0x4d6   : > { %v6833_v58 = vadd.f32 %v6832_v38, %v6654_v32  ;;  %vm6144_vm1 = vcmp.ge.f32.partialorder %v7776_v15, 0.0  ;;  %v6400_v20 = vmul.f32 0.01, %v7776_v15  ;;  %v7777_v47 = vadd.f32 %v10316_v3, %v10225_v7  ;;  %5529 = vmatprep.mubr.bf16.mxu1 %v9561_v35  ;;  %5915 = vmatprep.mubr.bf16.mxu0 %v9561_v35 }
 0x4d7   : > { %vm6143_vm2 = vcmp.ge.f32.partialorder %v7713_v57, 0.0  ;;  %v6399_v5 = vmul.f32 0.01, %v7713_v57  ;;  %v7714_v49 = vadd.f32 %v10318_v34, %v10213_v60  ;;  %v7778_v48 = vadd.f32 %v10322_v62, %v10216_v11  ;;  %v10371_v43 = vpop.f32.mrb[128].mxu1  ;;  %v10373_v44 = vpop.f32.mrb[128].mxu0 }
 0x4d8   : > { %v6656_v12 = vsel %vm6144_vm1, %v7776_v15, %v6400_v20  ;;  %vm6145_vm3 = vcmp.ge.f32.partialorder %v7777_v47, 0.0  ;;  %v6401_v40 = vmul.f32 0.01, %v7777_v47  ;;  %v7715_v3 = vadd.f32 %v10324_v37, %v10221_v54  ;;  %v10377_v42 = vpop.f32.mrb[129].mxu1  ;;  %v10379_v35 = vpop.f32.mrb[129].mxu0 }
 0x4d9   : > { %v6895_v36 = vadd.f32 %v6894_v53, %v6656_v12  ;;  %v6655_v24 = vsel %vm6143_vm2, %v7713_v57, %v6399_v5  ;;  %vm6150_vm4 = vcmp.ge.f32.partialorder %v7714_v49, 0.0  ;;  %v6406_v34 = vmul.f32 0.01, %v7714_v49  ;;  %v10381_v63 = vpop.f32.mrb[130].mxu1  ;;  %v10383_v62 = vpop.f32.mrb[130].mxu0 }
 0x4da   : > { %v6864_v2 = vadd.f32 %v6863_v31, %v6655_v24  ;;  %v6657_v25 = vsel %vm6145_vm3, %v7777_v47, %v6401_v40  ;;  %vm6152_vm5 = vcmp.ge.f32.partialorder %v7778_v48, 0.0  ;;  %v6408_v38 = vmul.f32 0.01, %v7778_v48  ;;  %v10385_v33 = vpop.f32.mrb[131].mxu1  ;;  %v10387_v1 = vpop.f32.mrb[131].mxu0 }
 0x4db   : > { %v6926_v37 = vadd.f32 %v6925_v8, %v6657_v25  ;;  %v6662_v41 = vsel %vm6150_vm4, %v7714_v49, %v6406_v34  ;;  %vm6151_vm6 = vcmp.ge.f32.partialorder %v7715_v3, 0.0  ;;  %v6407_v59 = vmul.f32 0.01, %v7715_v3 }
 0x4dc   : > { %v6834_v53 = vadd.f32 %v6833_v58, %v6662_v41  ;;  %v6664_v15 = vsel %vm6152_vm5, %v7778_v48, %v6408_v38  ;;  %v7779_v32 = vadd.f32 %v10326_v9, %v10225_v7  ;;  %v7716_v57 = vadd.f32 %v10341_v61, %v10213_v60  ;;  %5530 = vmatmul.mubr.bf16.gmra.mrb[172].mxu1 %v9558_v14 }
 0x4dd   : > { %v6896_v31 = vadd.f32 %v6895_v36, %v6664_v15  ;;  %v6663_v20 = vsel %vm6151_vm6, %v7715_v3, %v6407_v59  ;;  %v7780_v47 = vadd.f32 %v10343_v27, %v10216_v11  ;;  %v7717_v8 = vadd.f32 %v10345_v28, %v10221_v54  ;;  %5916 = vmatmul.mubr.bf16.gmra.mrb[172].mxu0 %v9558_v14 }
 0x4de   : > { %v6865_v58 = vadd.f32 %v6864_v2, %v6663_v20  ;;  %vm6153_vm7 = vcmp.ge.f32.partialorder %v7779_v32, 0.0  ;;  %v6409_v5 = vmul.f32 0.01, %v7779_v32  ;;  %vm6158_vm8 = vcmp.ge.f32.partialorder %v7716_v57, 0.0  ;;  %5539 = vmatprep.mubr.bf16.mxu1 %v9667_v0  ;;  %5925 = vmatprep.mubr.bf16.mxu0 %v9667_v0 }
 0x4df   : > { %v6414_v9 = vmul.f32 0.01, %v7716_v57  ;;  %vm6160_vm9 = vcmp.ge.f32.partialorder %v7780_v47, 0.0  ;;  %v6416_v61 = vmul.f32 0.01, %v7780_v47  ;;  %vm6159_vm10 = vcmp.ge.f32.partialorder %v7717_v8, 0.0 }
 0x4e0   : > { %v6665_v49 = vsel %vm6153_vm7, %v7779_v32, %v6409_v5  ;;  %v6415_v48 = vmul.f32 0.01, %v7717_v8  ;;  %v7781_v27 = vadd.f32 %v10347_v23, %v10225_v7  ;;  %v7718_v14 = vadd.f32 %v10349_v16, %v10213_v60  ;;  %v10405_v28 = vpop.f32.mrb[132].mxu1  ;;  %v10407_v12 = vpop.f32.mrb[132].mxu0 }
 0x4e1   : > { %v6927_v40 = vadd.f32 %v6926_v37, %v6665_v49  ;;  %v6670_v3 = vsel %vm6158_vm8, %v7716_v57, %v6414_v9  ;;  %v6672_v36 = vsel %vm6160_vm9, %v7780_v47, %v6416_v61  ;;  %v7782_v0 = vadd.f32 %v10351_v45, %v10216_v11  ;;  %v10411_v24 = vpop.f32.mrb[133].mxu1  ;;  %v10413_v34 = vpop.f32.mrb[133].mxu0 }
 0x4e2   : > { %v6835_v2 = vadd.f32 %v6834_v53, %v6670_v3  ;;  %v6897_v25 = vadd.f32 %v6896_v31, %v6672_v36  ;;  %v6671_v23 = vsel %vm6159_vm10, %v7717_v8, %v6415_v48  ;;  %vm6161_vm11 = vcmp.ge.f32.partialorder %v7781_v27, 0.0  ;;  %v10415_v38 = vpop.f32.mrb[134].mxu1  ;;  %v10417_v16 = vpop.f32.mrb[134].mxu0 }
 0x4e3   : > { %v6866_v41 = vadd.f32 %v6865_v58, %v6671_v23  ;;  %v6417_v59 = vmul.f32 0.01, %v7781_v27  ;;  %vm6166_vm12 = vcmp.ge.f32.partialorder %v7718_v14, 0.0  ;;  %v6422_v37 = vmul.f32 0.01, %v7718_v14  ;;  %v10419_v15 = vpop.f32.mrb[135].mxu1 }
 0x4e4   : > { %vm6168_vm13 = vcmp.ge.f32.partialorder %v7782_v0, 0.0  ;;  %v6424_v45 = vmul.f32 0.01, %v7782_v0  ;;  %v7719_v32 = vadd.f32 %v10353_v4, %v10221_v54  ;;  %v7783_v53 = vadd.f32 %v10355_v46, %v10225_v7  ;;  %v10425_v57 = vpop.f32.mrb[135].mxu0  ;;  %5540 = vmatmul.mubr.bf16.gmra.mrb[176].mxu1 %v9660_v39 }
 0x4e5   : > { %v6673_v31 = vsel %vm6161_vm11, %v7781_v27, %v6417_v59  ;;  %v6678_v20 = vsel %vm6166_vm12, %v7718_v14, %v6422_v37  ;;  %v7720_v47 = vadd.f32 %v10371_v43, %v10213_v60  ;;  %v7784_v8 = vadd.f32 %v10373_v44, %v10216_v11  ;;  %5926 = vmatmul.mubr.bf16.gmra.mrb[176].mxu0 %v9660_v39 }
 0x4e6   : > { %v6928_v58 = vadd.f32 %v6927_v40, %v6673_v31  ;;  %v6836_v5 = vadd.f32 %v6835_v2, %v6678_v20  ;;  %v6680_v4 = vsel %vm6168_vm13, %v7782_v0, %v6424_v45  ;;  %vm6167_vm14 = vcmp.ge.f32.partialorder %v7719_v32, 0.0  ;;  %5549 = vmatprep.mubr.bf16.mxu1 %v9797_v21  ;;  %5935 = vmatprep.mubr.bf16.mxu0 %v9797_v21 }
 0x4e7   : > { %v6898_v46 = vadd.f32 %v6897_v25, %v6680_v4  ;;  %v6423_v9 = vmul.f32 0.01, %v7719_v32  ;;  %vm6169_vm15 = vcmp.ge.f32.partialorder %v7783_v53, 0.0  ;;  %v6425_v61 = vmul.f32 0.01, %v7783_v53  ;;  %v10435_v49 = vpop.f32.mrb[136].mxu1 }
 0x4e8   : > { %vm6174_vm0 = vcmp.ge.f32.partialorder %v7720_v47, 0.0  ;;  %v6430_v43 = vmul.f32 0.01, %v7720_v47  ;;  %vm6176_vm1 = vcmp.ge.f32.partialorder %v7784_v8, 0.0  ;;  %v6432_v44 = vmul.f32 0.01, %v7784_v8 }
 0x4e9   : > { %v6679_v48 = vsel %vm6167_vm14, %v7719_v32, %v6423_v9  ;;  %v6681_v39 = vsel %vm6169_vm15, %v7783_v53, %v6425_v61  ;;  %v7721_v27 = vadd.f32 %v10377_v42, %v10221_v54  ;;  %v7785_v14 = vadd.f32 %v10379_v35, %v10225_v7  ;;  %v10441_v40 = vpop.f32.mrb[136].mxu0  ;;  %v10443_v21 = vpop.f32.mrb[137].mxu1 }
 0x4ea   : > { %v6867_v3 = vadd.f32 %v6866_v41, %v6679_v48  ;;  %v6929_v36 = vadd.f32 %v6928_v58, %v6681_v39  ;;  %v6686_v0 = vsel %vm6174_vm0, %v7720_v47, %v6430_v43  ;;  %v6688_v2 = vsel %vm6176_vm1, %v7784_v8, %v6432_v44  ;;  %v10445_v25 = vpop.f32.mrb[137].mxu0  ;;  %v10447_v23 = vpop.f32.mrb[138].mxu1 }
 0x4eb   : > { %v6837_v59 = vadd.f32 %v6836_v5, %v6686_v0  ;;  %v6899_v37 = vadd.f32 %v6898_v46, %v6688_v2  ;;  %vm6175_vm2 = vcmp.ge.f32.partialorder %v7721_v27, 0.0  ;;  %v6431_v45 = vmul.f32 0.01, %v7721_v27  ;;  %v10449_v42 = vpop.f32.mrb[138].mxu0  ;;  %v10451_v32 = vpop.f32.mrb[139].mxu1 }
 0x4ec   : > { %vm6177_vm3 = vcmp.ge.f32.partialorder %v7785_v14, 0.0  ;;  %v6433_v35 = vmul.f32 0.01, %v7785_v14  ;;  %v7722_v41 = vadd.f32 %v10381_v63, %v10213_v60  ;;  %v7786_v53 = vadd.f32 %v10383_v62, %v10216_v11  ;;  %v10457_v31 = vpop.f32.mrb[139].mxu0  ;;  %5550 = vmatmul.mubr.bf16.gmra.mrb[180].mxu1 %v9792_v18 }
 0x4ed   : > { %v6687_v20 = vsel %vm6175_vm2, %v7721_v27, %v6431_v45  ;;  %v7723_v47 = vadd.f32 %v10385_v33, %v10221_v54  ;;  %v7787_v8 = vadd.f32 %v10387_v1, %v10225_v7  ;;  %v7724_v58 = vadd.f32 %v10405_v28, %v10213_v60  ;;  %5936 = vmatmul.mubr.bf16.gmra.mrb[180].mxu0 %v9792_v18 }
 0x4ee   : > { %v6868_v63 = vadd.f32 %v6867_v3, %v6687_v20  ;;  %v6689_v5 = vsel %vm6177_vm3, %v7785_v14, %v6433_v35  ;;  %vm6182_vm4 = vcmp.ge.f32.partialorder %v7722_v41, 0.0  ;;  %v6438_v62 = vmul.f32 0.01, %v7722_v41  ;;  %5559 = vmatprep.mubr.bf16.mxu1 %v9849_v26  ;;  %5945 = vmatprep.mubr.bf16.mxu0 %v9849_v26 }
 0x4ef   : > { %v6930_v4 = vadd.f32 %v6929_v36, %v6689_v5  ;;  %vm6184_vm5 = vcmp.ge.f32.partialorder %v7786_v53, 0.0  ;;  %v6440_v46 = vmul.f32 0.01, %v7786_v53  ;;  %vm6183_vm6 = vcmp.ge.f32.partialorder %v7723_v47, 0.0  ;;  %v10469_v33 = vpop.f32.mrb[140].mxu1  ;;  %v10471_v1 = vpop.f32.mrb[140].mxu0 }
 0x4f0   : > { %v6694_v9 = vsel %vm6182_vm4, %v7722_v41, %v6438_v62  ;;  %v6439_v28 = vmul.f32 0.01, %v7723_v47  ;;  %vm6185_vm7 = vcmp.ge.f32.partialorder %v7787_v8, 0.0  ;;  %v6441_v18 = vmul.f32 0.01, %v7787_v8  ;;  %v10473_v61 = vpop.f32.mrb[141].mxu1 }
 0x4f1   : > { %v6838_v43 = vadd.f32 %v6837_v59, %v6694_v9  ;;  %v6696_v44 = vsel %vm6184_vm5, %v7786_v53, %v6440_v46  ;;  %vm6190_vm8 = vcmp.ge.f32.partialorder %v7724_v58, 0.0  ;;  %v6446_v48 = vmul.f32 0.01, %v7724_v58  ;;  %v10475_v39 = vpop.f32.mrb[141].mxu0  ;;  %v10477_v26 = vpop.f32.mrb[142].mxu1 }
 0x4f2   : > { %v6900_v27 = vadd.f32 %v6899_v37, %v6696_v44  ;;  %v6695_v14 = vsel %vm6183_vm6, %v7723_v47, %v6439_v28  ;;  %v6697_v3 = vsel %vm6185_vm7, %v7787_v8, %v6441_v18  ;;  %v7788_v36 = vadd.f32 %v10407_v12, %v10216_v11  ;;  %v10481_v0 = vpop.f32.mrb[142].mxu0  ;;  %v10483_v2 = vpop.f32.mrb[143].mxu1 }
 0x4f3   : > { %v6869_v45 = vadd.f32 %v6868_v63, %v6695_v14  ;;  %v6931_v35 = vadd.f32 %v6930_v4, %v6697_v3  ;;  %v6702_v59 = vsel %vm6190_vm8, %v7724_v58, %v6446_v48  ;;  %v7725_v41 = vadd.f32 %v10411_v24, %v10221_v54  ;;  %v10487_v53 = vpop.f32.mrb[143].mxu0 }
 0x4f4   : > { %v6839_v20 = vadd.f32 %v6838_v43, %v6702_v59  ;;  %vm6192_vm9 = vcmp.ge.f32.partialorder %v7788_v36, 0.0  ;;  %v6448_v37 = vmul.f32 0.01, %v7788_v36  ;;  %v7789_v47 = vadd.f32 %v10413_v34, %v10225_v7  ;;  %5560 = vmatmul.mubr.bf16.gmra.mrb[184].mxu1 %v9847_v22 }
 0x4f5   : > { %vm6191_vm10 = vcmp.ge.f32.partialorder %v7725_v41, 0.0  ;;  %v6447_v12 = vmul.f32 0.01, %v7725_v41  ;;  %v7726_v8 = vadd.f32 %v10415_v38, %v10213_v60  ;;  %v7790_v58 = vadd.f32 %v10417_v16, %v10216_v11  ;;  %5946 = vmatmul.mubr.bf16.gmra.mrb[184].mxu0 %v9847_v22  ;;  %5569 = vmatprep.mubr.bf16.mxu1 %v9878_v56 }
 0x4f6   : > { %v6704_v24 = vsel %vm6192_vm9, %v7788_v36, %v6448_v37  ;;  %vm6193_vm11 = vcmp.ge.f32.partialorder %v7789_v47, 0.0  ;;  %v6449_v63 = vmul.f32 0.01, %v7789_v47  ;;  %v7727_v34 = vadd.f32 %v10419_v15, %v10221_v54  ;;  %5955 = vmatprep.mubr.bf16.mxu0 %v9878_v56 }
 0x4f7   : > { %v6901_v5 = vadd.f32 %v6900_v27, %v6704_v24  ;;  %v6703_v62 = vsel %vm6191_vm10, %v7725_v41, %v6447_v12  ;;  %vm6198_vm12 = vcmp.ge.f32.partialorder %v7726_v8, 0.0  ;;  %v6454_v4 = vmul.f32 0.01, %v7726_v8  ;;  %v10501_v38 = vpop.f32.mrb[144].mxu1  ;;  %v10503_v46 = vpop.f32.mrb[144].mxu0 }
 0x4f8   : > { %v6870_v16 = vadd.f32 %v6869_v45, %v6703_v62  ;;  %v6705_v22 = vsel %vm6193_vm11, %v7789_v47, %v6449_v63  ;;  %vm6200_vm13 = vcmp.ge.f32.partialorder %v7790_v58, 0.0  ;;  %v6456_v9 = vmul.f32 0.01, %v7790_v58  ;;  %v10505_v28 = vpop.f32.mrb[145].mxu1  ;;  %v10507_v18 = vpop.f32.mrb[145].mxu0 }
 0x4f9   : > { %v6932_v43 = vadd.f32 %v6931_v35, %v6705_v22  ;;  %v6710_v15 = vsel %vm6198_vm12, %v7726_v8, %v6454_v4  ;;  %vm6199_vm14 = vcmp.ge.f32.partialorder %v7727_v34, 0.0  ;;  %v6455_v56 = vmul.f32 0.01, %v7727_v34  ;;  %v10509_v44 = vpop.f32.mrb[146].mxu1  ;;  %v10511_v48 = vpop.f32.mrb[146].mxu0 }
 0x4fa   : > { %v6840_v27 = vadd.f32 %v6839_v20, %v6710_v15  ;;  %v6712_v14 = vsel %vm6200_vm13, %v7790_v58, %v6456_v9  ;;  %v7791_v3 = vadd.f32 %v10425_v57, %v10225_v7  ;;  %v7728_v36 = vadd.f32 %v10435_v49, %v10213_v60  ;;  %v10517_v45 = vpop.f32.mrb[147].mxu1  ;;  %v10519_v59 = vpop.f32.mrb[147].mxu0 }
 0x4fb   : > { %v6902_v35 = vadd.f32 %v6901_v5, %v6712_v14  ;;  %v6711_v41 = vsel %vm6199_vm14, %v7727_v34, %v6455_v56  ;;  %v7792_v37 = vadd.f32 %v10441_v40, %v10216_v11  ;;  %v7729_v47 = vadd.f32 %v10443_v21, %v10221_v54 }
 0x4fc   : > { %v6871_v20 = vadd.f32 %v6870_v16, %v6711_v41  ;;  %vm6201_vm15 = vcmp.ge.f32.partialorder %v7791_v3, 0.0  ;;  %v6457_v12 = vmul.f32 0.01, %v7791_v3  ;;  %vm6206_vm0 = vcmp.ge.f32.partialorder %v7728_v36, 0.0  ;;  %5570 = vmatmul.mubr.bf16.gmra.mrb[188].mxu1 %v9874_v6 }
 0x4fd   : > { %v6462_v57 = vmul.f32 0.01, %v7728_v36  ;;  %vm6208_vm1 = vcmp.ge.f32.partialorder %v7792_v37, 0.0  ;;  %v6464_v49 = vmul.f32 0.01, %v7792_v37  ;;  %vm6207_vm2 = vcmp.ge.f32.partialorder %v7729_v47, 0.0  ;;  %5956 = vmatmul.mubr.bf16.gmra.mrb[188].mxu0 %v9874_v6  ;;  %5579 = vmatprep.mubr.bf16.mxu1 %v9899_v55 }
 0x4fe   : > { %v6713_v8 = vsel %vm6201_vm15, %v7791_v3, %v6457_v12  ;;  %v6463_v58 = vmul.f32 0.01, %v7729_v47  ;;  %v7793_v40 = vadd.f32 %v10445_v25, %v10225_v7  ;;  %v7730_v21 = vadd.f32 %v10447_v23, %v10213_v60  ;;  %5965 = vmatprep.mubr.bf16.mxu0 %v9899_v55 }
 0x4ff   : > { %v6933_v24 = vadd.f32 %v6932_v43, %v6713_v8  ;;  %v6718_v63 = vsel %vm6206_vm0, %v7728_v36, %v6462_v57  ;;  %v6720_v34 = vsel %vm6208_vm1, %v7792_v37, %v6464_v49  ;;  %v7794_v5 = vadd.f32 %v10449_v42, %v10216_v11  ;;  %v10535_v62 = vpop.f32.mrb[148].mxu1  ;;  %v10537_v6 = vpop.f32.mrb[148].mxu0 }
 0x500   : > { %v6841_v4 = vadd.f32 %v6840_v27, %v6718_v63  ;;  %v6903_v16 = vadd.f32 %v6902_v35, %v6720_v34  ;;  %v6719_v22 = vsel %vm6207_vm2, %v7729_v47, %v6463_v58  ;;  %vm6209_vm3 = vcmp.ge.f32.partialorder %v7793_v40, 0.0  ;;  %v10540_v25 = vpop.f32.mrb[149].mxu1  ;;  %v10542_v23 = vpop.f32.mrb[149].mxu0 }
 0x501   : > { %v6872_v55 = vadd.f32 %v6871_v20, %v6719_v22  ;;  %v6465_v9 = vmul.f32 0.01, %v7793_v40  ;;  %vm6214_vm4 = vcmp.ge.f32.partialorder %v7730_v21, 0.0  ;;  %v6470_v43 = vmul.f32 0.01, %v7730_v21  ;;  %v10544_v15 = vpop.f32.mrb[150].mxu1 }
 0x502   : > { %vm6216_vm5 = vcmp.ge.f32.partialorder %v7794_v5, 0.0  ;;  %v6472_v42 = vmul.f32 0.01, %v7794_v5  ;;  %v7731_v56 = vadd.f32 %v10451_v32, %v10221_v54  ;;  %v7795_v27 = vadd.f32 %v10457_v31, %v10225_v7  ;;  %v10550_v14 = vpop.f32.mrb[150].mxu0  ;;  %v10552_v3 = vpop.f32.mrb[151].mxu1 }
 0x503   : > { %v6721_v36 = vsel %vm6209_vm3, %v7793_v40, %v6465_v9  ;;  %v6726_v35 = vsel %vm6214_vm4, %v7730_v21, %v6470_v43  ;;  %v7732_v41 = vadd.f32 %v10469_v33, %v10213_v60  ;;  %v7796_v37 = vadd.f32 %v10471_v1, %v10216_v11  ;;  %v10558_v47 = vpop.f32.mrb[151].mxu0 }
 0x504   : > { %v6934_v20 = vadd.f32 %v6933_v24, %v6721_v36  ;;  %v6842_v12 = vadd.f32 %v6841_v4, %v6726_v35  ;;  %v6728_v32 = vsel %vm6216_vm5, %v7794_v5, %v6472_v42  ;;  %vm6215_vm6 = vcmp.ge.f32.partialorder %v7731_v56, 0.0  ;;  %5580 = vmatmul.mubr.bf16.gmra.mrb[192].mxu1 %v9895_v10 }
 0x505   : > { %v6904_v31 = vadd.f32 %v6903_v16, %v6728_v32  ;;  %v6471_v57 = vmul.f32 0.01, %v7731_v56  ;;  %vm6217_vm7 = vcmp.ge.f32.partialorder %v7795_v27, 0.0  ;;  %v6473_v49 = vmul.f32 0.01, %v7795_v27  ;;  %5966 = vmatmul.mubr.bf16.gmra.mrb[192].mxu0 %v9895_v10  ;;  %5589 = vmatprep.mubr.bf16.mxu1 %v9929_v50 }
 0x506   : > { %vm6222_vm8 = vcmp.ge.f32.partialorder %v7732_v41, 0.0  ;;  %v6478_v33 = vmul.f32 0.01, %v7732_v41  ;;  %vm6224_vm9 = vcmp.ge.f32.partialorder %v7796_v37, 0.0  ;;  %v6480_v1 = vmul.f32 0.01, %v7796_v37  ;;  %5975 = vmatprep.mubr.bf16.mxu0 %v9929_v50 }
 0x507   : > { %v6727_v8 = vsel %vm6215_vm6, %v7731_v56, %v6471_v57  ;;  %v6729_v58 = vsel %vm6217_vm7, %v7795_v27, %v6473_v49  ;;  %v7733_v40 = vadd.f32 %v10473_v61, %v10221_v54  ;;  %v7797_v21 = vadd.f32 %v10475_v39, %v10225_v7  ;;  %v10568_v24 = vpop.f32.mrb[152].mxu1  ;;  %v10570_v63 = vpop.f32.mrb[152].mxu0 }
 0x508   : > { %v6873_v10 = vadd.f32 %v6872_v55, %v6727_v8  ;;  %v6935_v34 = vadd.f32 %v6934_v20, %v6729_v58  ;;  %v6734_v5 = vsel %vm6222_vm8, %v7732_v41, %v6478_v33  ;;  %v6736_v4 = vsel %vm6224_vm9, %v7796_v37, %v6480_v1  ;;  %v10572_v16 = vpop.f32.mrb[153].mxu1  ;;  %v10574_v22 = vpop.f32.mrb[153].mxu0 }
 0x509   : > { %v6843_v50 = vadd.f32 %v6842_v12, %v6734_v5  ;;  %v6905_v9 = vadd.f32 %v6904_v31, %v6736_v4  ;;  %vm6223_vm10 = vcmp.ge.f32.partialorder %v7733_v40, 0.0  ;;  %v6479_v43 = vmul.f32 0.01, %v7733_v40  ;;  %v10576_v61 = vpop.f32.mrb[154].mxu1  ;;  %v10578_v42 = vpop.f32.mrb[154].mxu0 }
 0x50a   : > { %vm6225_vm11 = vcmp.ge.f32.partialorder %v7797_v21, 0.0  ;;  %v6481_v39 = vmul.f32 0.01, %v7797_v21  ;;  %v7734_v55 = vadd.f32 %v10477_v26, %v10213_v60  ;;  %v7798_v56 = vadd.f32 %v10481_v0, %v10216_v11  ;;  %v10584_v27 = vpop.f32.mrb[155].mxu1  ;;  %v10586_v36 = vpop.f32.mrb[155].mxu0 }
 0x50b   : > { %v6735_v35 = vsel %vm6223_vm10, %v7733_v40, %v6479_v43  ;;  %v7735_v41 = vadd.f32 %v10483_v2, %v10221_v54  ;;  %v7799_v37 = vadd.f32 %v10487_v53, %v10225_v7  ;;  %v7736_v20 = vadd.f32 %v10501_v38, %v10213_v60 }
 0x50c   : > { %v6874_v12 = vadd.f32 %v6873_v10, %v6735_v35  ;;  %v6737_v32 = vsel %vm6225_vm11, %v7797_v21, %v6481_v39  ;;  %vm6230_vm12 = vcmp.ge.f32.partialorder %v7734_v55, 0.0  ;;  %v6486_v26 = vmul.f32 0.01, %v7734_v55  ;;  %5590 = vmatmul.mubr.bf16.gmra.mrb[196].mxu1 %v9925_v51 }
 0x50d   : > { %v6936_v0 = vadd.f32 %v6935_v34, %v6737_v32  ;;  %vm6232_vm13 = vcmp.ge.f32.partialorder %v7798_v56, 0.0  ;;  %v6488_v31 = vmul.f32 0.01, %v7798_v56  ;;  %vm6231_vm14 = vcmp.ge.f32.partialorder %v7735_v41, 0.0  ;;  %5976 = vmatmul.mubr.bf16.gmra.mrb[196].mxu0 %v9925_v51  ;;  %5599 = vmatprep.mubr.bf16.mxu1 %v9957_v19 }
 0x50e   : > { %v6742_v2 = vsel %vm6230_vm12, %v7734_v55, %v6486_v26  ;;  %v6487_v57 = vmul.f32 0.01, %v7735_v41  ;;  %vm6233_vm15 = vcmp.ge.f32.partialorder %v7799_v37, 0.0  ;;  %v6489_v53 = vmul.f32 0.01, %v7799_v37  ;;  %5985 = vmatprep.mubr.bf16.mxu0 %v9957_v19 }
 0x50f   : > { %v6844_v38 = vadd.f32 %v6843_v50, %v6742_v2  ;;  %v6744_v49 = vsel %vm6232_vm13, %v7798_v56, %v6488_v31  ;;  %vm6238_vm0 = vcmp.ge.f32.partialorder %v7736_v20, 0.0  ;;  %v6494_v33 = vmul.f32 0.01, %v7736_v20  ;;  %v10598_v1 = vpop.f32.mrb[156].mxu1  ;;  %v10600_v8 = vpop.f32.mrb[156].mxu0 }
 0x510   : > { %v6906_v58 = vadd.f32 %v6905_v9, %v6744_v49  ;;  %v6743_v40 = vsel %vm6231_vm14, %v7735_v41, %v6487_v57  ;;  %v6745_v21 = vsel %vm6233_vm15, %v7799_v37, %v6489_v53  ;;  %v7800_v51 = vadd.f32 %v10503_v46, %v10216_v11  ;;  %v10604_v10 = vpop.f32.mrb[157].mxu1  ;;  %v10606_v34 = vpop.f32.mrb[157].mxu0 }
 0x511   : > { %v6875_v5 = vadd.f32 %v6874_v12, %v6743_v40  ;;  %v6937_v19 = vadd.f32 %v6936_v0, %v6745_v21  ;;  %v6750_v4 = vsel %vm6238_vm0, %v7736_v20, %v6494_v33  ;;  %v7737_v50 = vadd.f32 %v10505_v28, %v10221_v54  ;;  %v10610_v43 = vpop.f32.mrb[158].mxu1  ;;  %v10612_v39 = vpop.f32.mrb[158].mxu0 }
 0x512   : > { %v6845_v9 = vadd.f32 %v6844_v38, %v6750_v4  ;;  %vm6240_vm1 = vcmp.ge.f32.partialorder %v7800_v51, 0.0  ;;  %v6496_v55 = vmul.f32 0.01, %v7800_v51  ;;  %v7801_v46 = vadd.f32 %v10507_v18, %v10225_v7  ;;  %v10616_v56 = vpop.f32.mrb[159].mxu1  ;;  %v10618_v35 = vpop.f32.mrb[159].mxu0 }
 0x513   : > { %vm6239_vm2 = vcmp.ge.f32.partialorder %v7737_v50, 0.0  ;;  %v6495_v41 = vmul.f32 0.01, %v7737_v50  ;;  %v7738_v37 = vadd.f32 %v10509_v44, %v10213_v60  ;;  %v7802_v28 = vadd.f32 %v10511_v48, %v10216_v11 }
 0x514   : > { %v6752_v20 = vsel %vm6240_vm1, %v7800_v51, %v6496_v55  ;;  %vm6241_vm3 = vcmp.ge.f32.partialorder %v7801_v46, 0.0  ;;  %v6497_v12 = vmul.f32 0.01, %v7801_v46  ;;  %v7739_v32 = vadd.f32 %v10517_v45, %v10221_v54  ;;  %5600 = vmatmul.mubr.bf16.gmra.mrb[200].mxu1 %v9953_v52 }
 0x515   : > { %v6907_v18 = vadd.f32 %v6906_v58, %v6752_v20  ;;  %v6751_v26 = vsel %vm6239_vm2, %v7737_v50, %v6495_v41  ;;  %vm6246_vm4 = vcmp.ge.f32.partialorder %v7738_v37, 0.0  ;;  %v6502_v0 = vmul.f32 0.01, %v7738_v37  ;;  %5986 = vmatmul.mubr.bf16.gmra.mrb[200].mxu0 %v9953_v52  ;;  %5609 = vmatprep.mubr.bf16.mxu1 %v9979_v30 }
 0x516   : > { %v6876_v44 = vadd.f32 %v6875_v5, %v6751_v26  ;;  %v6753_v31 = vsel %vm6241_vm3, %v7801_v46, %v6497_v12  ;;  %vm6248_vm5 = vcmp.ge.f32.partialorder %v7802_v28, 0.0  ;;  %v6504_v48 = vmul.f32 0.01, %v7802_v28  ;;  %5995 = vmatprep.mubr.bf16.mxu0 %v9979_v30 }
 0x517   : > { %v6938_v2 = vadd.f32 %v6937_v19, %v6753_v31  ;;  %v6758_v57 = vsel %vm6246_vm4, %v7738_v37, %v6502_v0  ;;  %vm6247_vm6 = vcmp.ge.f32.partialorder %v7739_v32, 0.0  ;;  %v6503_v45 = vmul.f32 0.01, %v7739_v32 }
 0x518   : > { %v6846_v53 = vadd.f32 %v6845_v9, %v6758_v57  ;;  %v6760_v38 = vsel %vm6248_vm5, %v7802_v28, %v6504_v48  ;;  %v7803_v49 = vadd.f32 %v10519_v59, %v10225_v7  ;;  %v7740_v52 = vadd.f32 %v10535_v62, %v10213_v60 }
 0x519   : > { %v6908_v33 = vadd.f32 %v6907_v18, %v6760_v38  ;;  %v6759_v58 = vsel %vm6247_vm6, %v7739_v32, %v6503_v45  ;;  %v7804_v40 = vadd.f32 %v10537_v6, %v10216_v11  ;;  %v7741_v30 = vadd.f32 %v10540_v25, %v10221_v54 }
 0x51a   : > { %v6877_v21 = vadd.f32 %v6876_v44, %v6759_v58  ;;  %vm6249_vm7 = vcmp.ge.f32.partialorder %v7803_v49, 0.0  ;;  %v6505_v51 = vmul.f32 0.01, %v7803_v49  ;;  %vm6254_vm8 = vcmp.ge.f32.partialorder %v7740_v52, 0.0 }
 0x51b   : > { %v6510_v5 = vmul.f32 0.01, %v7740_v52  ;;  %vm6256_vm9 = vcmp.ge.f32.partialorder %v7804_v40, 0.0  ;;  %v6512_v19 = vmul.f32 0.01, %v7804_v40  ;;  %vm6255_vm10 = vcmp.ge.f32.partialorder %v7741_v30, 0.0 }
 0x51c   : > { %v6761_v59 = vsel %vm6249_vm7, %v7803_v49, %v6505_v51  ;;  %v6511_v4 = vmul.f32 0.01, %v7741_v30  ;;  %v7805_v62 = vadd.f32 %v10542_v23, %v10225_v7  ;;  %v7742_v50 = vadd.f32 %v10544_v15, %v10213_v60  ;;  %5610 = vmatmul.mubr.bf16.gmra.mrb[204].mxu1 %v9975_v13 }
 0x51d   : > { %v6939_v6 = vadd.f32 %v6938_v2, %v6761_v59  ;;  %v6766_v25 = vsel %vm6254_vm8, %v7740_v52, %v6510_v5  ;;  %v6768_v9 = vsel %vm6256_vm9, %v7804_v40, %v6512_v19  ;;  %v7806_v55 = vadd.f32 %v10550_v14, %v10216_v11  ;;  %5996 = vmatmul.mubr.bf16.gmra.mrb[204].mxu0 %v9975_v13 }
 0x51e   : > { %v6847_v46 = vadd.f32 %v6846_v53, %v6766_v25  ;;  %v6909_v41 = vadd.f32 %v6908_v33, %v6768_v9  ;;  %v6767_v37 = vsel %vm6255_vm10, %v7741_v30, %v6511_v4  ;;  %vm6257_vm11 = vcmp.ge.f32.partialorder %v7805_v62, 0.0  ;;  %5619 = vmatprep.mubr.bf16.mxu1 %v10001_v29  ;;  %6005 = vmatprep.mubr.bf16.mxu0 %v10001_v29  ;;  %v11306_v33 = vld [vmem:[#allocation44_spill] sm:$0xff]  ;;  %v11307_v9 = vld [vmem:[#allocation42_spill] sm:$0xff] }
 0x51f   : > { %v6878_v23 = vadd.f32 %v6877_v21, %v6767_v37  ;;  %v6513_v15 = vmul.f32 0.01, %v7805_v62  ;;  %vm6262_vm12 = vcmp.ge.f32.partialorder %v7742_v50, 0.0  ;;  %v6518_v28 = vmul.f32 0.01, %v7742_v50 }
 0x520   : > { %vm6264_vm13 = vcmp.ge.f32.partialorder %v7806_v55, 0.0  ;;  %v6520_v20 = vmul.f32 0.01, %v7806_v55  ;;  %v7743_v12 = vadd.f32 %v10552_v3, %v10221_v54  ;;  %v7807_v13 = vadd.f32 %v10558_v47, %v10225_v7 }
 0x521   : > { %v6769_v14 = vsel %vm6257_vm11, %v7805_v62, %v6513_v15  ;;  %v6774_v32 = vsel %vm6262_vm12, %v7742_v50, %v6518_v28  ;;  %v7744_v18 = vadd.f32 %v10568_v24, %v10213_v60  ;;  %v7808_v29 = vadd.f32 %v10570_v63, %v10216_v11 }
 0x522   : > { %v6940_v26 = vadd.f32 %v6939_v6, %v6769_v14  ;;  %v6848_v0 = vadd.f32 %v6847_v46, %v6774_v32  ;;  %v6776_v44 = vsel %vm6264_vm13, %v7806_v55, %v6520_v20  ;;  %vm6263_vm14 = vcmp.ge.f32.partialorder %v7743_v12, 0.0 }
 0x523   : > { %v6910_v31 = vadd.f32 %v6909_v41, %v6776_v44  ;;  %v6519_v48 = vmul.f32 0.01, %v7743_v12  ;;  %vm6265_vm15 = vcmp.ge.f32.partialorder %v7807_v13, 0.0  ;;  %v6521_v2 = vmul.f32 0.01, %v7807_v13 }
 0x524   : > { %vm6270_vm0 = vcmp.ge.f32.partialorder %v7744_v18, 0.0  ;;  %v6526_v3 = vmul.f32 0.01, %v7744_v18  ;;  %vm6272_vm1 = vcmp.ge.f32.partialorder %v7808_v29, 0.0  ;;  %v6528_v47 = vmul.f32 0.01, %v7808_v29  ;;  %5620 = vmatmul.mubr.bf16.gmra.mrb[208].mxu1 %v9997_v17 }
 0x525   : > { %v6775_v57 = vsel %vm6263_vm14, %v7743_v12, %v6519_v48  ;;  %v6777_v45 = vsel %vm6265_vm15, %v7807_v13, %v6521_v2  ;;  %v7745_v24 = vadd.f32 %v10572_v16, %v10221_v54  ;;  %v7809_v63 = vadd.f32 %v10574_v22, %v10225_v7  ;;  %6006 = vmatmul.mubr.bf16.gmra.mrb[208].mxu0 %v9997_v17 }
 0x526   : > { %v6879_v53 = vadd.f32 %v6878_v23, %v6775_v57  ;;  %v6941_v38 = vadd.f32 %v6940_v26, %v6777_v45  ;;  %v6782_v49 = vsel %vm6270_vm0, %v7744_v18, %v6526_v3  ;;  %v6784_v52 = vsel %vm6272_vm1, %v7808_v29, %v6528_v47  ;;  %5629 = vmatprep.mubr.bf16.mxu1 %v11306_v33  ;;  %v11309_v47 = vld [vmem:[#allocation46_spill] sm:$0xff]  ;;  %v6814_v57 = vld [vmem:[#allocation2] sm:$0xff]  ;;  %v6816_v45 = vld [vmem:[#allocation2 + $0x10] sm:$0xff] }
 0x527   : > { %v6849_v58 = vadd.f32 %v6848_v0, %v6782_v49  ;;  %v6911_v40 = vadd.f32 %v6910_v31, %v6784_v52  ;;  %vm6271_vm2 = vcmp.ge.f32.partialorder %v7745_v24, 0.0  ;;  %v6527_v30 = vmul.f32 0.01, %v7745_v24  ;;  %6015 = vmatprep.mubr.bf16.mxu0 %v11306_v33 }
 0x528   : > { %vm6273_vm3 = vcmp.ge.f32.partialorder %v7809_v63, 0.0  ;;  %v6529_v21 = vmul.f32 0.01, %v7809_v63  ;;  %v7746_v16 = vadd.f32 %v10576_v61, %v10213_v60  ;;  %v7810_v17 = vadd.f32 %v10578_v42, %v10216_v11 }
 0x529   : > { %v6783_v22 = vsel %vm6271_vm2, %v7745_v24, %v6527_v30  ;;  %v7747_v51 = vadd.f32 %v10584_v27, %v10221_v54  ;;  %v7811_v5 = vadd.f32 %v10586_v36, %v10225_v7  ;;  %v7748_v19 = vadd.f32 %v10598_v1, %v10213_v60  ;;  %v11308_v1 = vld [vmem:[#allocation48_spill] sm:$0xff] }
 0x52a   : > { %v6880_v59 = vadd.f32 %v6879_v53, %v6783_v22  ;;  %v6785_v4 = vsel %vm6273_vm3, %v7809_v63, %v6529_v21  ;;  %vm6278_vm4 = vcmp.ge.f32.partialorder %v7746_v16, 0.0  ;;  %v6534_v62 = vmul.f32 0.01, %v7746_v16  ;;  %v6817_v21 = vld [vmem:[#allocation2 + $0x18] sm:$0xff] }
 0x52b   : > { %v6942_v50 = vadd.f32 %v6941_v38, %v6785_v4  ;;  %vm6280_vm5 = vcmp.ge.f32.partialorder %v7810_v17, 0.0  ;;  %v6536_v61 = vmul.f32 0.01, %v7810_v17  ;;  %vm6279_vm6 = vcmp.ge.f32.partialorder %v7747_v51, 0.0  ;;  %v6815_v38 = vld [vmem:[#allocation2 + $0x8] sm:$0xff] }
 0x52c   : > { %v6790_v6 = vsel %vm6278_vm4, %v7746_v16, %v6534_v62  ;;  %v6535_v42 = vmul.f32 0.01, %v7747_v51  ;;  %vm6281_vm7 = vcmp.ge.f32.partialorder %v7811_v5, 0.0  ;;  %v6537_v25 = vmul.f32 0.01, %v7811_v5  ;;  %5630 = vmatmul.mubr.bf16.gmra.mrb[212].mxu1 %v11307_v9 }
 0x52d   : > { %v6850_v27 = vadd.f32 %v6849_v58, %v6790_v6  ;;  %v6792_v55 = vsel %vm6280_vm5, %v7810_v17, %v6536_v61  ;;  %vm6286_vm8 = vcmp.ge.f32.partialorder %v7748_v19, 0.0  ;;  %v6542_v36 = vmul.f32 0.01, %v7748_v19  ;;  %6016 = vmatmul.mubr.bf16.gmra.mrb[212].mxu0 %v11307_v9  ;;  %5639 = vmatprep.mubr.bf16.mxu1 %v11308_v1  ;;  %v11311_v17 = vld [vmem:[#allocation49_spill] sm:$0xff] }
 0x52e   : > { %v6912_v46 = vadd.f32 %v6911_v40, %v6792_v55  ;;  %v6791_v41 = vsel %vm6279_vm6, %v7747_v51, %v6535_v42  ;;  %v6793_v37 = vsel %vm6281_vm7, %v7811_v5, %v6537_v25  ;;  %v7812_v23 = vadd.f32 %v10600_v8, %v10216_v11  ;;  %6025 = vmatprep.mubr.bf16.mxu0 %v11308_v1 }
 0x52f   : > { %v6881_v15 = vadd.f32 %v6880_v59, %v6791_v41  ;;  %v6943_v28 = vadd.f32 %v6942_v50, %v6793_v37  ;;  %v6798_v20 = vsel %vm6286_vm8, %v7748_v19, %v6542_v36  ;;  %v7749_v12 = vadd.f32 %v10604_v10, %v10221_v54  ;;  %v8464_v59 = vld [vmem:[%s11131_s8] sm:$0xff] }
 0x530   : > { %v6851_v13 = vadd.f32 %v6850_v27, %v6798_v20  ;;  %vm6288_vm9 = vcmp.ge.f32.partialorder %v7812_v23, 0.0  ;;  %v6544_v14 = vmul.f32 0.01, %v7812_v23  ;;  %v7813_v32 = vadd.f32 %v10606_v34, %v10225_v7 }
 0x531   : > { %vm6287_vm10 = vcmp.ge.f32.partialorder %v7749_v12, 0.0  ;;  %v6543_v18 = vmul.f32 0.01, %v7749_v12  ;;  %v7750_v29 = vadd.f32 %v10610_v43, %v10213_v60  ;;  %v7814_v8 = vadd.f32 %v10612_v39, %v10216_v11  ;;  %v11310_v39 = vld [vmem:[#allocation50_spill] sm:$0xff] }
 0x532   : > { %v6800_v26 = vsel %vm6288_vm9, %v7812_v23, %v6544_v14  ;;  %vm6289_vm11 = vcmp.ge.f32.partialorder %v7813_v32, 0.0  ;;  %v6545_v0 = vmul.f32 0.01, %v7813_v32  ;;  %v7751_v10 = vadd.f32 %v10616_v56, %v10221_v54 }
 0x533   : > { %v6913_v44 = vadd.f32 %v6912_v46, %v6800_v26  ;;  %v6799_v31 = vsel %vm6287_vm10, %v7749_v12, %v6543_v18  ;;  %vm6294_vm12 = vcmp.ge.f32.partialorder %v7750_v29, 0.0  ;;  %v6550_v48 = vmul.f32 0.01, %v7750_v29 }
 0x534   : > { %v6882_v2 = vadd.f32 %v6881_v15, %v6799_v31  ;;  %v6801_v34 = vsel %vm6289_vm11, %v7813_v32, %v6545_v0  ;;  %vm6296_vm13 = vcmp.ge.f32.partialorder %v7814_v8, 0.0  ;;  %v6552_v3 = vmul.f32 0.01, %v7814_v8  ;;  %5640 = vmatmul.mubr.bf16.gmra.mrb[216].mxu1 %v11309_v47 }
 0x535   : > { %v6944_v60 = vadd.f32 %v6943_v28, %v6801_v34  ;;  %v6806_v43 = vsel %vm6294_vm12, %v7750_v29, %v6550_v48  ;;  %vm6295_vm14 = vcmp.ge.f32.partialorder %v7751_v10, 0.0  ;;  %v6551_v11 = vmul.f32 0.01, %v7751_v10  ;;  %6026 = vmatmul.mubr.bf16.gmra.mrb[216].mxu0 %v11309_v47  ;;  %5649 = vmatprep.mubr.bf16.mxu1 %v11310_v39 }
 0x536   : > { %v6852_v54 = vadd.f32 %v6851_v13, %v6806_v43  ;;  %v6808_v56 = vsel %vm6296_vm13, %v7814_v8, %v6552_v3  ;;  %v7815_v24 = vadd.f32 %v10618_v35, %v10225_v7  ;;  %6035 = vmatprep.mubr.bf16.mxu0 %v11310_v39  ;;  %v11312_v35 = vld [vmem:[#allocation13_spill] sm:$0xff] }
 0x537   : > { %v6914_v63 = vadd.f32 %v6913_v44, %v6808_v56  ;;  %v6807_v53 = vsel %vm6295_vm14, %v7751_v10, %v6551_v11  ;;  %v3200_v22 = vsub.s32 4, %v11312_v35  ;;  %v3208_v51 = vsub.s32 6, %v11312_v35 }
 0x538   : > { %v7070_v49 = vadd.f32 %v6852_v54, %v6814_v57  ;;  %v6883_v52 = vadd.f32 %v6882_v2, %v6807_v53  ;;  %vm6297_vm15 = vcmp.ge.f32.partialorder %v7815_v24, 0.0  ;;  %v6553_v33 = vmul.f32 0.01, %v7815_v24 }
 0x539   : > { %v7072_v58 = vadd.f32 %v6914_v63, %v6816_v45  ;;  %v3204_v5 = vsub.s32 5, %v11312_v35  ;;  %v3212_v19 = vsub.s32 7, %v11312_v35  ;;  %v10705_v4 = vrot.slane %v8464_v59, %v3200_v22 }
 0x53a   : > { %7078 = vst [vmem:[#allocation2] sm:$0xff] %v7070_v49  ;;  %v7071_v40 = vadd.f32 %v6883_v52, %v6815_v38  ;;  %v6809_v30 = vsel %vm6297_vm15, %v7815_v24, %v6553_v33  ;;  %v10707_v62 = vrot.slane %v8464_v59, %v3208_v51 }
 0x53b   : > { %7080 = vst [vmem:[#allocation2 + $0x10] sm:$0xff] %v7072_v58  ;;  %v6945_v16 = vadd.f32 %v6944_v60, %v6809_v30  ;;  %v10709_v50 = vrot.slane %v8464_v59, %v3204_v5  ;;  %v10711_v61 = vrot.slane %v8464_v59, %v3212_v19 }
 0x53c   : > { %7079 = vst [vmem:[#allocation2 + $0x8] sm:$0xff] %v7071_v40  ;;  %5650 = vmatmul.mubr.bf16.gmra.mrb[220].mxu1 %v11311_v17 }
 0x53d   : > { %v7073_v7 = vadd.f32 %v6945_v16, %v6817_v21  ;;  %6036 = vmatmul.mubr.bf16.gmra.mrb[220].mxu0 %v11311_v17 }
 0x53f   : > { %7081 = vst [vmem:[#allocation2 + $0x18] sm:$0xff] %v7073_v7 }
 0x597   : > { %v5501_v6 = vpop.f32.mrb[160].mxu1 }
 0x598   : > { %v7816_v42 = vadd.f32 %v5501_v6, %v10705_v4  ;;  %v5887_v25 = vpop.f32.mrb[160].mxu0  ;;  %v5503_v9 = vpop.f32.mrb[161].mxu1 }
 0x599   : > { %v7880_v27 = vadd.f32 %v5887_v25, %v10707_v62  ;;  %v7817_v55 = vadd.f32 %v5503_v9, %v10709_v50  ;;  %v5889_v36 = vpop.f32.mrb[161].mxu0  ;;  %v5505_v1 = vpop.f32.mrb[162].mxu1 }
 0x59a   : > { %vm6050_vm0 = vcmp.ge.f32.partialorder %v7816_v42, 0.0  ;;  %v6306_v46 = vmul.f32 0.01, %v7816_v42  ;;  %v7881_v41 = vadd.f32 %v5889_v36, %v10711_v61  ;;  %v7818_v37 = vadd.f32 %v5505_v1, %v10705_v4  ;;  %v5891_v23 = vpop.f32.mrb[162].mxu0  ;;  %v5507_v15 = vpop.f32.mrb[163].mxu1 }
 0x59b   : > { %vm6052_vm1 = vcmp.ge.f32.partialorder %v7880_v27, 0.0  ;;  %v6308_v28 = vmul.f32 0.01, %v7880_v27  ;;  %vm6051_vm2 = vcmp.ge.f32.partialorder %v7817_v55, 0.0  ;;  %v6307_v20 = vmul.f32 0.01, %v7817_v55 }
 0x59c   : > { %vm6053_vm3 = vcmp.ge.f32.partialorder %v7881_v41, 0.0  ;;  %v6309_v12 = vmul.f32 0.01, %v7881_v41  ;;  %vm6058_vm4 = vcmp.ge.f32.partialorder %v7818_v37, 0.0  ;;  %v5893_v13 = vpop.f32.mrb[163].mxu0  ;;  %v6562_v14 = vsel %vm6050_vm0, %v7816_v42, %v6306_v46 }
 0x59d   : > { %v6314_v32 = vmul.f32 0.01, %v7818_v37  ;;  %v7882_v18 = vadd.f32 %v5891_v23, %v10707_v62  ;;  %v6564_v29 = vsel %vm6052_vm1, %v7880_v27, %v6308_v28  ;;  %v6563_v8 = vsel %vm6051_vm2, %v7817_v55, %v6307_v20 }
 0x59e   : > { %v7819_v26 = vadd.f32 %v5507_v15, %v10709_v50  ;;  %v7883_v0 = vadd.f32 %v5893_v13, %v10711_v61  ;;  %v6565_v10 = vsel %vm6053_vm3, %v7881_v41, %v6309_v12 }
 0x59f   : > { %v6570_v44 = vsel %vm6058_vm4, %v7818_v37, %v6314_v32  ;;  %vm6060_vm5 = vcmp.ge.f32.partialorder %v7882_v18, 0.0  ;;  %v6316_v31 = vmul.f32 0.01, %v7882_v18  ;;  %v5511_v48 = vpop.f32.mrb[164].mxu1 }
 0x5a0   : > { %v6946_v2 = vadd.f32 %v6570_v44, %v6562_v14  ;;  %vm6059_vm6 = vcmp.ge.f32.partialorder %v7819_v26, 0.0  ;;  %v6315_v34 = vmul.f32 0.01, %v7819_v26  ;;  %vm6061_vm7 = vcmp.ge.f32.partialorder %v7883_v0, 0.0  ;;  %v5897_v3 = vpop.f32.mrb[164].mxu0  ;;  %v5513_v47 = vpop.f32.mrb[165].mxu1 }
 0x5a1   : > { %v6572_v60 = vsel %vm6060_vm5, %v7882_v18, %v6316_v31  ;;  %v6317_v43 = vmul.f32 0.01, %v7883_v0  ;;  %v7820_v57 = vadd.f32 %v5511_v48, %v10705_v4  ;;  %v7884_v11 = vadd.f32 %v5897_v3, %v10707_v62  ;;  %v5899_v39 = vpop.f32.mrb[165].mxu0  ;;  %v5515_v54 = vpop.f32.mrb[166].mxu1 }
 0x5a2   : > { %v7008_v56 = vadd.f32 %v6572_v60, %v6564_v29  ;;  %v6571_v45 = vsel %vm6059_vm6, %v7819_v26, %v6315_v34  ;;  %v7821_v24 = vadd.f32 %v5513_v47, %v10709_v50  ;;  %v7885_v63 = vadd.f32 %v5899_v39, %v10711_v61  ;;  %v5901_v53 = vpop.f32.mrb[166].mxu0  ;;  %v5517_v38 = vpop.f32.mrb[167].mxu1 }
 0x5a3   : > { %v6977_v49 = vadd.f32 %v6571_v45, %v6563_v8  ;;  %v6573_v52 = vsel %vm6061_vm7, %v7883_v0, %v6317_v43  ;;  %vm6066_vm8 = vcmp.ge.f32.partialorder %v7820_v57, 0.0  ;;  %v6322_v33 = vmul.f32 0.01, %v7820_v57  ;;  %v5903_v58 = vpop.f32.mrb[167].mxu0 }
 0x5a4   : > { %v7039_v40 = vadd.f32 %v6573_v52, %v6565_v10  ;;  %vm6068_vm9 = vcmp.ge.f32.partialorder %v7884_v11, 0.0  ;;  %v6324_v30 = vmul.f32 0.01, %v7884_v11  ;;  %vm6067_vm10 = vcmp.ge.f32.partialorder %v7821_v24, 0.0 }
 0x5a5   : > { %v6578_v21 = vsel %vm6066_vm8, %v7820_v57, %v6322_v33  ;;  %v6323_v16 = vmul.f32 0.01, %v7821_v24  ;;  %vm6069_vm11 = vcmp.ge.f32.partialorder %v7885_v63, 0.0  ;;  %v6325_v17 = vmul.f32 0.01, %v7885_v63 }
 0x5a6   : > { %v6947_v7 = vadd.f32 %v6946_v2, %v6578_v21  ;;  %v6580_v35 = vsel %vm6068_vm9, %v7884_v11, %v6324_v30  ;;  %v7822_v22 = vadd.f32 %v5515_v54, %v10705_v4  ;;  %v7886_v51 = vadd.f32 %v5901_v53, %v10707_v62 }
 0x5a7   : > { %v7009_v5 = vadd.f32 %v7008_v56, %v6580_v35  ;;  %v6579_v19 = vsel %vm6067_vm10, %v7821_v24, %v6323_v16  ;;  %v6581_v59 = vsel %vm6069_vm11, %v7885_v63, %v6325_v17  ;;  %v7823_v6 = vadd.f32 %v5517_v38, %v10709_v50  ;;  %v5521_v42 = vpop.f32.mrb[168].mxu1 }
 0x5a8   : > { %v6978_v25 = vadd.f32 %v6977_v49, %v6579_v19  ;;  %v7040_v9 = vadd.f32 %v7039_v40, %v6581_v59  ;;  %vm6074_vm12 = vcmp.ge.f32.partialorder %v7822_v22, 0.0  ;;  %v6330_v27 = vmul.f32 0.01, %v7822_v22  ;;  %v5907_v55 = vpop.f32.mrb[168].mxu0  ;;  %v5523_v36 = vpop.f32.mrb[169].mxu1 }
 0x5a9   : > { %vm6076_vm13 = vcmp.ge.f32.partialorder %v7886_v51, 0.0  ;;  %v6332_v1 = vmul.f32 0.01, %v7886_v51  ;;  %vm6075_vm14 = vcmp.ge.f32.partialorder %v7823_v6, 0.0  ;;  %v6331_v46 = vmul.f32 0.01, %v7823_v6 }
 0x5aa   : > { %v6586_v41 = vsel %vm6074_vm12, %v7822_v22, %v6330_v27  ;;  %v7887_v37 = vadd.f32 %v5903_v58, %v10711_v61  ;;  %v7824_v23 = vadd.f32 %v5521_v42, %v10705_v4  ;;  %v7888_v15 = vadd.f32 %v5907_v55, %v10707_v62  ;;  %v5909_v28 = vpop.f32.mrb[169].mxu0  ;;  %v5525_v20 = vpop.f32.mrb[170].mxu1 }
 0x5ab   : > { %v6948_v12 = vadd.f32 %v6947_v7, %v6586_v41  ;;  %v6588_v13 = vsel %vm6076_vm13, %v7886_v51, %v6332_v1  ;;  %v6587_v14 = vsel %vm6075_vm14, %v7823_v6, %v6331_v46  ;;  %v7825_v32 = vadd.f32 %v5523_v36, %v10709_v50  ;;  %v5911_v18 = vpop.f32.mrb[170].mxu0  ;;  %v5527_v29 = vpop.f32.mrb[171].mxu1 }
 0x5ac   : > { %v7010_v8 = vadd.f32 %v7009_v5, %v6588_v13  ;;  %v6979_v26 = vadd.f32 %v6978_v25, %v6587_v14  ;;  %vm6077_vm15 = vcmp.ge.f32.partialorder %v7887_v37, 0.0  ;;  %v6333_v0 = vmul.f32 0.01, %v7887_v37  ;;  %v5913_v10 = vpop.f32.mrb[171].mxu0 }
 0x5ad   : > { %vm6082_vm0 = vcmp.ge.f32.partialorder %v7824_v23, 0.0  ;;  %v6338_v44 = vmul.f32 0.01, %v7824_v23  ;;  %vm6084_vm1 = vcmp.ge.f32.partialorder %v7888_v15, 0.0  ;;  %v6340_v31 = vmul.f32 0.01, %v7888_v15 }
 0x5ae   : > { %v6589_v48 = vsel %vm6077_vm15, %v7887_v37, %v6333_v0  ;;  %vm6083_vm2 = vcmp.ge.f32.partialorder %v7825_v32, 0.0  ;;  %v6339_v2 = vmul.f32 0.01, %v7825_v32  ;;  %v7889_v34 = vadd.f32 %v5909_v28, %v10711_v61 }
 0x5af   : > { %v7041_v3 = vadd.f32 %v7040_v9, %v6589_v48  ;;  %v6594_v47 = vsel %vm6082_vm0, %v7824_v23, %v6338_v44  ;;  %v6596_v60 = vsel %vm6084_vm1, %v7888_v15, %v6340_v31  ;;  %v7826_v43 = vadd.f32 %v5525_v20, %v10705_v4  ;;  %v5531_v57 = vpop.f32.mrb[172].mxu1 }
 0x5b0   : > { %v6949_v11 = vadd.f32 %v6948_v12, %v6594_v47  ;;  %v7011_v39 = vadd.f32 %v7010_v8, %v6596_v60  ;;  %v6595_v54 = vsel %vm6083_vm2, %v7825_v32, %v6339_v2  ;;  %vm6085_vm3 = vcmp.ge.f32.partialorder %v7889_v34, 0.0  ;;  %v5917_v56 = vpop.f32.mrb[172].mxu0  ;;  %v5533_v45 = vpop.f32.mrb[173].mxu1 }
 0x5b1   : > { %v6980_v24 = vadd.f32 %v6979_v26, %v6595_v54  ;;  %v6341_v63 = vmul.f32 0.01, %v7889_v34  ;;  %vm6090_vm4 = vcmp.ge.f32.partialorder %v7826_v43, 0.0  ;;  %v6346_v53 = vmul.f32 0.01, %v7826_v43  ;;  %v5919_v38 = vpop.f32.mrb[173].mxu0 }
 0x5b2   : > { %v7890_v49 = vadd.f32 %v5911_v18, %v10707_v62  ;;  %v7827_v52 = vadd.f32 %v5527_v29, %v10709_v50  ;;  %v7891_v33 = vadd.f32 %v5913_v10, %v10711_v61  ;;  %v7828_v58 = vadd.f32 %v5531_v57, %v10705_v4  ;;  %v5535_v40 = vpop.f32.mrb[174].mxu1  ;;  %v5921_v30 = vpop.f32.mrb[174].mxu0 }
 0x5b3   : > { %v6597_v21 = vsel %vm6085_vm3, %v7889_v34, %v6341_v63  ;;  %v6602_v16 = vsel %vm6090_vm4, %v7826_v43, %v6346_v53  ;;  %v7892_v17 = vadd.f32 %v5917_v56, %v10707_v62  ;;  %v7829_v7 = vadd.f32 %v5533_v45, %v10709_v50  ;;  %v5537_v35 = vpop.f32.mrb[175].mxu1  ;;  %v5923_v22 = vpop.f32.mrb[175].mxu0 }
 0x5b4   : > { %v7042_v51 = vadd.f32 %v7041_v3, %v6597_v21  ;;  %v6950_v5 = vadd.f32 %v6949_v11, %v6602_v16  ;;  %vm6092_vm5 = vcmp.ge.f32.partialorder %v7890_v49, 0.0  ;;  %v6348_v19 = vmul.f32 0.01, %v7890_v49 }
 0x5b5   : > { %vm6091_vm6 = vcmp.ge.f32.partialorder %v7827_v52, 0.0  ;;  %v6347_v59 = vmul.f32 0.01, %v7827_v52  ;;  %vm6093_vm7 = vcmp.ge.f32.partialorder %v7891_v33, 0.0  ;;  %v6349_v6 = vmul.f32 0.01, %v7891_v33 }
 0x5b6   : > { %v6604_v42 = vsel %vm6092_vm5, %v7890_v49, %v6348_v19  ;;  %vm6098_vm8 = vcmp.ge.f32.partialorder %v7828_v58, 0.0  ;;  %v6354_v25 = vmul.f32 0.01, %v7828_v58  ;;  %vm6100_vm9 = vcmp.ge.f32.partialorder %v7892_v17, 0.0 }
 0x5b7   : > { %v7012_v9 = vadd.f32 %v7011_v39, %v6604_v42  ;;  %v6603_v27 = vsel %vm6091_vm6, %v7827_v52, %v6347_v59  ;;  %v6605_v55 = vsel %vm6093_vm7, %v7891_v33, %v6349_v6  ;;  %v6356_v36 = vmul.f32 0.01, %v7892_v17  ;;  %v5541_v1 = vpop.f32.mrb[176].mxu1 }
 0x5b8   : > { %v6981_v46 = vadd.f32 %v6980_v24, %v6603_v27  ;;  %v7043_v41 = vadd.f32 %v7042_v51, %v6605_v55  ;;  %v6610_v37 = vsel %vm6098_vm8, %v7828_v58, %v6354_v25  ;;  %vm6099_vm10 = vcmp.ge.f32.partialorder %v7829_v7, 0.0  ;;  %v5927_v23 = vpop.f32.mrb[176].mxu0  ;;  %v5543_v15 = vpop.f32.mrb[177].mxu1 }
 0x5b9   : > { %v6951_v28 = vadd.f32 %v6950_v5, %v6610_v37  ;;  %v6612_v20 = vsel %vm6100_vm9, %v7892_v17, %v6356_v36  ;;  %v6355_v12 = vmul.f32 0.01, %v7829_v7  ;;  %v7893_v13 = vadd.f32 %v5919_v38, %v10711_v61  ;;  %v5929_v14 = vpop.f32.mrb[177].mxu0  ;;  %v5545_v32 = vpop.f32.mrb[178].mxu1 }
 0x5ba   : > { %v7013_v18 = vadd.f32 %v7012_v9, %v6612_v20  ;;  %v7830_v29 = vadd.f32 %v5535_v40, %v10705_v4  ;;  %v7894_v8 = vadd.f32 %v5921_v30, %v10707_v62  ;;  %v7831_v26 = vadd.f32 %v5537_v35, %v10709_v50  ;;  %v5931_v0 = vpop.f32.mrb[178].mxu0  ;;  %v5547_v10 = vpop.f32.mrb[179].mxu1 }
 0x5bb   : > { %v6611_v44 = vsel %vm6099_vm10, %v7829_v7, %v6355_v12  ;;  %vm6101_vm11 = vcmp.ge.f32.partialorder %v7893_v13, 0.0  ;;  %v6357_v31 = vmul.f32 0.01, %v7893_v13  ;;  %v7895_v48 = vadd.f32 %v5923_v22, %v10711_v61  ;;  %v5933_v2 = vpop.f32.mrb[179].mxu0 }
 0x5bc   : > { %v6982_v34 = vadd.f32 %v6981_v46, %v6611_v44  ;;  %vm6106_vm12 = vcmp.ge.f32.partialorder %v7830_v29, 0.0  ;;  %v6362_v3 = vmul.f32 0.01, %v7830_v29  ;;  %vm6108_vm13 = vcmp.ge.f32.partialorder %v7894_v8, 0.0 }
 0x5bd   : > { %v6613_v47 = vsel %vm6101_vm11, %v7893_v13, %v6357_v31  ;;  %v6364_v60 = vmul.f32 0.01, %v7894_v8  ;;  %vm6107_vm14 = vcmp.ge.f32.partialorder %v7831_v26, 0.0  ;;  %v6363_v43 = vmul.f32 0.01, %v7831_v26 }
 0x5be   : > { %v7044_v57 = vadd.f32 %v7043_v41, %v6613_v47  ;;  %v6618_v11 = vsel %vm6106_vm12, %v7830_v29, %v6362_v3  ;;  %vm6109_vm15 = vcmp.ge.f32.partialorder %v7895_v48, 0.0  ;;  %v6365_v39 = vmul.f32 0.01, %v7895_v48 }
 0x5bf   : > { %v6952_v54 = vadd.f32 %v6951_v28, %v6618_v11  ;;  %v6620_v56 = vsel %vm6108_vm13, %v7894_v8, %v6364_v60  ;;  %v6619_v45 = vsel %vm6107_vm14, %v7831_v26, %v6363_v43  ;;  %v7832_v24 = vadd.f32 %v5541_v1, %v10705_v4  ;;  %v5551_v63 = vpop.f32.mrb[180].mxu1 }
 0x5c0   : > { %v7014_v53 = vadd.f32 %v7013_v18, %v6620_v56  ;;  %v6983_v38 = vadd.f32 %v6982_v34, %v6619_v45  ;;  %v6621_v49 = vsel %vm6109_vm15, %v7895_v48, %v6365_v39  ;;  %v7896_v52 = vadd.f32 %v5927_v23, %v10707_v62  ;;  %v5937_v33 = vpop.f32.mrb[180].mxu0  ;;  %v5553_v58 = vpop.f32.mrb[181].mxu1 }
 0x5c1   : > { %v7045_v40 = vadd.f32 %v7044_v57, %v6621_v49  ;;  %vm6114_vm0 = vcmp.ge.f32.partialorder %v7832_v24, 0.0  ;;  %v6370_v30 = vmul.f32 0.01, %v7832_v24  ;;  %v7833_v21 = vadd.f32 %v5543_v15, %v10709_v50  ;;  %v5939_v16 = vpop.f32.mrb[181].mxu0  ;;  %v5555_v17 = vpop.f32.mrb[182].mxu1 }
 0x5c2   : > { %vm6116_vm1 = vcmp.ge.f32.partialorder %v7896_v52, 0.0  ;;  %v6372_v7 = vmul.f32 0.01, %v7896_v52  ;;  %v7897_v35 = vadd.f32 %v5929_v14, %v10711_v61  ;;  %v7834_v22 = vadd.f32 %v5545_v32, %v10705_v4  ;;  %v5941_v51 = vpop.f32.mrb[182].mxu0  ;;  %v5557_v5 = vpop.f32.mrb[183].mxu1 }
 0x5c3   : > { %v6626_v19 = vsel %vm6114_vm0, %v7832_v24, %v6370_v30  ;;  %vm6115_vm2 = vcmp.ge.f32.partialorder %v7833_v21, 0.0  ;;  %v6371_v59 = vmul.f32 0.01, %v7833_v21  ;;  %v7898_v6 = vadd.f32 %v5931_v0, %v10707_v62  ;;  %v5943_v42 = vpop.f32.mrb[183].mxu0 }
 0x5c4   : > { %v6953_v25 = vadd.f32 %v6952_v54, %v6626_v19  ;;  %v6628_v9 = vsel %vm6116_vm1, %v7896_v52, %v6372_v7  ;;  %vm6117_vm3 = vcmp.ge.f32.partialorder %v7897_v35, 0.0  ;;  %v6373_v27 = vmul.f32 0.01, %v7897_v35 }
 0x5c5   : > { %v7015_v55 = vadd.f32 %v7014_v53, %v6628_v9  ;;  %v6627_v36 = vsel %vm6115_vm2, %v7833_v21, %v6371_v59  ;;  %vm6122_vm4 = vcmp.ge.f32.partialorder %v7834_v22, 0.0  ;;  %v6378_v1 = vmul.f32 0.01, %v7834_v22 }
 0x5c6   : > { %v6984_v46 = vadd.f32 %v6983_v38, %v6627_v36  ;;  %v6629_v41 = vsel %vm6117_vm3, %v7897_v35, %v6373_v27  ;;  %vm6124_vm5 = vcmp.ge.f32.partialorder %v7898_v6, 0.0  ;;  %v6380_v37 = vmul.f32 0.01, %v7898_v6 }
 0x5c7   : > { %v7046_v23 = vadd.f32 %v7045_v40, %v6629_v41  ;;  %v6634_v15 = vsel %vm6122_vm4, %v7834_v22, %v6378_v1  ;;  %v7835_v28 = vadd.f32 %v5547_v10, %v10709_v50  ;;  %v7899_v20 = vadd.f32 %v5933_v2, %v10711_v61  ;;  %v5561_v12 = vpop.f32.mrb[184].mxu1 }
 0x5c8   : > { %v6954_v13 = vadd.f32 %v6953_v25, %v6634_v15  ;;  %v6636_v14 = vsel %vm6124_vm5, %v7898_v6, %v6380_v37  ;;  %v7836_v32 = vadd.f32 %v5551_v63, %v10705_v4  ;;  %v7900_v18 = vadd.f32 %v5937_v33, %v10707_v62  ;;  %v5947_v29 = vpop.f32.mrb[184].mxu0  ;;  %v5563_v8 = vpop.f32.mrb[185].mxu1 }
 0x5c9   : > { %v7016_v26 = vadd.f32 %v7015_v55, %v6636_v14  ;;  %vm6123_vm6 = vcmp.ge.f32.partialorder %v7835_v28, 0.0  ;;  %v6379_v0 = vmul.f32 0.01, %v7835_v28  ;;  %vm6125_vm7 = vcmp.ge.f32.partialorder %v7899_v20, 0.0  ;;  %v10756_v44 = vpop.f32.mrb[185].mxu0  ;;  %v10758_v31 = vpop.f32.mrb[186].mxu1 }
 0x5ca   : > { %v6381_v10 = vmul.f32 0.01, %v7899_v20  ;;  %vm6130_vm8 = vcmp.ge.f32.partialorder %v7836_v32, 0.0  ;;  %v6386_v48 = vmul.f32 0.01, %v7836_v32  ;;  %vm6132_vm9 = vcmp.ge.f32.partialorder %v7900_v18, 0.0 }
 0x5cb   : > { %v6635_v2 = vsel %vm6123_vm6, %v7835_v28, %v6379_v0  ;;  %v6388_v34 = vmul.f32 0.01, %v7900_v18  ;;  %v7837_v3 = vadd.f32 %v5553_v58, %v10709_v50  ;;  %v7901_v47 = vadd.f32 %v5939_v16, %v10711_v61  ;;  %v5951_v60 = vpop.f32.mrb[186].mxu0  ;;  %v5567_v43 = vpop.f32.mrb[187].mxu1 }
 0x5cc   : > { %v6985_v57 = vadd.f32 %v6984_v46, %v6635_v2  ;;  %v6637_v11 = vsel %vm6125_vm7, %v7899_v20, %v6381_v10  ;;  %v6642_v39 = vsel %vm6130_vm8, %v7836_v32, %v6386_v48  ;;  %v7838_v54 = vadd.f32 %v5555_v17, %v10705_v4  ;;  %v5953_v56 = vpop.f32.mrb[187].mxu0 }
 0x5cd   : > { %v7047_v45 = vadd.f32 %v7046_v23, %v6637_v11  ;;  %v6955_v24 = vadd.f32 %v6954_v13, %v6642_v39  ;;  %v6644_v63 = vsel %vm6132_vm9, %v7900_v18, %v6388_v34  ;;  %vm6131_vm10 = vcmp.ge.f32.partialorder %v7837_v3, 0.0 }
 0x5ce   : > { %v7017_v53 = vadd.f32 %v7016_v26, %v6644_v63  ;;  %v6387_v38 = vmul.f32 0.01, %v7837_v3  ;;  %vm6133_vm11 = vcmp.ge.f32.partialorder %v7901_v47, 0.0  ;;  %v6389_v49 = vmul.f32 0.01, %v7901_v47 }
 0x5cf   : > { %vm6138_vm12 = vcmp.ge.f32.partialorder %v7838_v54, 0.0  ;;  %v6394_v52 = vmul.f32 0.01, %v7838_v54  ;;  %v7902_v33 = vadd.f32 %v5941_v51, %v10707_v62  ;;  %v7839_v58 = vadd.f32 %v5557_v5, %v10709_v50  ;;  %v10765_v40 = vpop.f32.mrb[188].mxu1 }
 0x5d0   : > { %v6643_v30 = vsel %vm6131_vm10, %v7837_v3, %v6387_v38  ;;  %v6645_v21 = vsel %vm6133_vm11, %v7901_v47, %v6389_v49  ;;  %v7903_v16 = vadd.f32 %v5943_v42, %v10711_v61  ;;  %v7840_v17 = vadd.f32 %v5561_v12, %v10705_v4  ;;  %v10769_v7 = vpop.f32.mrb[188].mxu0  ;;  %v10771_v35 = vpop.f32.mrb[189].mxu1 }
 0x5d1   : > { %v6986_v22 = vadd.f32 %v6985_v57, %v6643_v30  ;;  %v7048_v19 = vadd.f32 %v7047_v45, %v6645_v21  ;;  %v6650_v59 = vsel %vm6138_vm12, %v7838_v54, %v6394_v52  ;;  %vm6140_vm13 = vcmp.ge.f32.partialorder %v7902_v33, 0.0  ;;  %v10773_v6 = vpop.f32.mrb[189].mxu0  ;;  %v10775_v51 = vpop.f32.mrb[190].mxu1 }
 0x5d2   : > { %v6956_v5 = vadd.f32 %v6955_v24, %v6650_v59  ;;  %v6396_v25 = vmul.f32 0.01, %v7902_v33  ;;  %vm6139_vm14 = vcmp.ge.f32.partialorder %v7839_v58, 0.0  ;;  %v6395_v9 = vmul.f32 0.01, %v7839_v58  ;;  %v10777_v27 = vpop.f32.mrb[190].mxu0 }
 0x5d3   : > { %vm6141_vm15 = vcmp.ge.f32.partialorder %v7903_v16, 0.0  ;;  %v6397_v42 = vmul.f32 0.01, %v7903_v16  ;;  %vm6146_vm0 = vcmp.ge.f32.partialorder %v7840_v17, 0.0  ;;  %v6402_v55 = vmul.f32 0.01, %v7840_v17 }
 0x5d4   : > { %v6652_v36 = vsel %vm6140_vm13, %v7902_v33, %v6396_v25  ;;  %v6651_v1 = vsel %vm6139_vm14, %v7839_v58, %v6395_v9  ;;  %v7904_v46 = vadd.f32 %v5947_v29, %v10707_v62  ;;  %v7841_v41 = vadd.f32 %v5563_v8, %v10709_v50  ;;  %v10781_v37 = vpop.f32.mrb[191].mxu1  ;;  %v10783_v23 = vpop.f32.mrb[191].mxu0 }
 0x5d5   : > { %v7018_v15 = vadd.f32 %v7017_v53, %v6652_v36  ;;  %v6987_v28 = vadd.f32 %v6986_v22, %v6651_v1  ;;  %v6653_v20 = vsel %vm6141_vm15, %v7903_v16, %v6397_v42  ;;  %v6658_v12 = vsel %vm6146_vm0, %v7840_v17, %v6402_v55 }
 0x5d6   : > { %v7049_v13 = vadd.f32 %v7048_v19, %v6653_v20  ;;  %v6957_v14 = vadd.f32 %v6956_v5, %v6658_v12  ;;  %vm6148_vm1 = vcmp.ge.f32.partialorder %v7904_v46, 0.0  ;;  %v6404_v32 = vmul.f32 0.01, %v7904_v46 }
 0x5d7   : > { %vm6147_vm2 = vcmp.ge.f32.partialorder %v7841_v41, 0.0  ;;  %v6403_v18 = vmul.f32 0.01, %v7841_v41  ;;  %v7905_v26 = vadd.f32 %v10756_v44, %v10711_v61  ;;  %v7842_v29 = vadd.f32 %v10758_v31, %v10705_v4  ;;  %v10789_v8 = vpop.f32.mrb[192].mxu1 }
 0x5d8   : > { %v6660_v0 = vsel %vm6148_vm1, %v7904_v46, %v6404_v32  ;;  %v7906_v10 = vadd.f32 %v5951_v60, %v10707_v62  ;;  %v7843_v48 = vadd.f32 %v5567_v43, %v10709_v50  ;;  %v7907_v2 = vadd.f32 %v5953_v56, %v10711_v61  ;;  %v10794_v34 = vpop.f32.mrb[192].mxu0  ;;  %v10796_v3 = vpop.f32.mrb[193].mxu1 }
 0x5d9   : > { %v7019_v47 = vadd.f32 %v7018_v15, %v6660_v0  ;;  %v6659_v57 = vsel %vm6147_vm2, %v7841_v41, %v6403_v18  ;;  %vm6149_vm3 = vcmp.ge.f32.partialorder %v7905_v26, 0.0  ;;  %v6405_v44 = vmul.f32 0.01, %v7905_v26  ;;  %v10798_v11 = vpop.f32.mrb[193].mxu0  ;;  %v10800_v31 = vpop.f32.mrb[194].mxu1 }
 0x5da   : > { %v6988_v39 = vadd.f32 %v6987_v28, %v6659_v57  ;;  %vm6154_vm4 = vcmp.ge.f32.partialorder %v7842_v29, 0.0  ;;  %v6410_v54 = vmul.f32 0.01, %v7842_v29  ;;  %vm6156_vm5 = vcmp.ge.f32.partialorder %v7906_v10, 0.0  ;;  %v10802_v60 = vpop.f32.mrb[194].mxu0  ;;  %v10804_v43 = vpop.f32.mrb[195].mxu1 }
 0x5db   : > { %v6661_v56 = vsel %vm6149_vm3, %v7905_v26, %v6405_v44  ;;  %v6412_v45 = vmul.f32 0.01, %v7906_v10  ;;  %vm6155_vm6 = vcmp.ge.f32.partialorder %v7843_v48, 0.0  ;;  %v6411_v24 = vmul.f32 0.01, %v7843_v48  ;;  %v10806_v63 = vpop.f32.mrb[195].mxu0 }
 0x5dc   : > { %v7050_v53 = vadd.f32 %v7049_v13, %v6661_v56  ;;  %v6666_v38 = vsel %vm6154_vm4, %v7842_v29, %v6410_v54  ;;  %vm6157_vm7 = vcmp.ge.f32.partialorder %v7907_v2, 0.0  ;;  %v6413_v49 = vmul.f32 0.01, %v7907_v2 }
 0x5dd   : > { %v6958_v52 = vadd.f32 %v6957_v14, %v6666_v38  ;;  %v6668_v33 = vsel %vm6156_vm5, %v7906_v10, %v6412_v45  ;;  %v6667_v58 = vsel %vm6155_vm6, %v7843_v48, %v6411_v24  ;;  %v7844_v30 = vadd.f32 %v10765_v40, %v10705_v4 }
 0x5de   : > { %v7020_v21 = vadd.f32 %v7019_v47, %v6668_v33  ;;  %v6989_v16 = vadd.f32 %v6988_v39, %v6667_v58  ;;  %v6669_v17 = vsel %vm6157_vm7, %v7907_v2, %v6413_v49  ;;  %v7908_v22 = vadd.f32 %v10769_v7, %v10707_v62 }
 0x5df   : > { %v7051_v19 = vadd.f32 %v7050_v53, %v6669_v17  ;;  %vm6162_vm8 = vcmp.ge.f32.partialorder %v7844_v30, 0.0  ;;  %v6418_v59 = vmul.f32 0.01, %v7844_v30  ;;  %v7845_v5 = vadd.f32 %v10771_v35, %v10709_v50  ;;  %v10814_v25 = vpop.f32.mrb[196].mxu1 }
 0x5e0   : > { %vm6164_vm9 = vcmp.ge.f32.partialorder %v7908_v22, 0.0  ;;  %v6420_v9 = vmul.f32 0.01, %v7908_v22  ;;  %v7909_v42 = vadd.f32 %v10773_v6, %v10711_v61  ;;  %v7846_v40 = vadd.f32 %v10775_v51, %v10705_v4  ;;  %v10820_v55 = vpop.f32.mrb[196].mxu0  ;;  %v10822_v36 = vpop.f32.mrb[197].mxu1 }
 0x5e1   : > { %v6674_v7 = vsel %vm6162_vm8, %v7844_v30, %v6418_v59  ;;  %vm6163_vm10 = vcmp.ge.f32.partialorder %v7845_v5, 0.0  ;;  %v6419_v1 = vmul.f32 0.01, %v7845_v5  ;;  %v7910_v35 = vadd.f32 %v10777_v27, %v10707_v62  ;;  %v10826_v46 = vpop.f32.mrb[197].mxu0  ;;  %v10828_v41 = vpop.f32.mrb[198].mxu1 }
 0x5e2   : > { %v6959_v15 = vadd.f32 %v6958_v52, %v6674_v7  ;;  %v6676_v28 = vsel %vm6164_vm9, %v7908_v22, %v6420_v9  ;;  %vm6165_vm11 = vcmp.ge.f32.partialorder %v7909_v42, 0.0  ;;  %v6421_v6 = vmul.f32 0.01, %v7909_v42  ;;  %v10830_v20 = vpop.f32.mrb[198].mxu0  ;;  %v10832_v51 = vpop.f32.mrb[199].mxu1 }
 0x5e3   : > { %v7021_v12 = vadd.f32 %v7020_v21, %v6676_v28  ;;  %v6675_v13 = vsel %vm6163_vm10, %v7845_v5, %v6419_v1  ;;  %vm6170_vm12 = vcmp.ge.f32.partialorder %v7846_v40, 0.0  ;;  %v6426_v14 = vmul.f32 0.01, %v7846_v40  ;;  %v10834_v32 = vpop.f32.mrb[199].mxu0 }
 0x5e4   : > { %v6990_v18 = vadd.f32 %v6989_v16, %v6675_v13  ;;  %v6677_v27 = vsel %vm6165_vm11, %v7909_v42, %v6421_v6  ;;  %vm6172_vm13 = vcmp.ge.f32.partialorder %v7910_v35, 0.0  ;;  %v6428_v26 = vmul.f32 0.01, %v7910_v35 }
 0x5e5   : > { %v7052_v29 = vadd.f32 %v7051_v19, %v6677_v27  ;;  %v6682_v0 = vsel %vm6170_vm12, %v7846_v40, %v6426_v14  ;;  %v7847_v10 = vadd.f32 %v10781_v37, %v10709_v50  ;;  %v7911_v48 = vadd.f32 %v10783_v23, %v10711_v61 }
 0x5e6   : > { %v6960_v2 = vadd.f32 %v6959_v15, %v6682_v0  ;;  %v6684_v47 = vsel %vm6172_vm13, %v7910_v35, %v6428_v26  ;;  %v7848_v57 = vadd.f32 %v10789_v8, %v10705_v4  ;;  %v7912_v44 = vadd.f32 %v10794_v34, %v10707_v62 }
 0x5e7   : > { %v7022_v39 = vadd.f32 %v7021_v12, %v6684_v47  ;;  %vm6171_vm14 = vcmp.ge.f32.partialorder %v7847_v10, 0.0  ;;  %v6427_v54 = vmul.f32 0.01, %v7847_v10  ;;  %vm6173_vm15 = vcmp.ge.f32.partialorder %v7911_v48, 0.0  ;;  %v10844_v56 = vpop.f32.mrb[200].mxu1 }
 0x5e8   : > { %v6429_v45 = vmul.f32 0.01, %v7911_v48  ;;  %vm6178_vm0 = vcmp.ge.f32.partialorder %v7848_v57, 0.0  ;;  %v6434_v37 = vmul.f32 0.01, %v7848_v57  ;;  %vm6180_vm1 = vcmp.ge.f32.partialorder %v7912_v44, 0.0 }
 0x5e9   : > { %v6683_v24 = vsel %vm6171_vm14, %v7847_v10, %v6427_v54  ;;  %v6436_v23 = vmul.f32 0.01, %v7912_v44  ;;  %v7849_v53 = vadd.f32 %v10796_v3, %v10709_v50  ;;  %v7913_v8 = vadd.f32 %v10798_v11, %v10711_v61  ;;  %v10850_v38 = vpop.f32.mrb[200].mxu0  ;;  %v10852_v34 = vpop.f32.mrb[201].mxu1 }
 0x5ea   : > { %v6991_v49 = vadd.f32 %v6990_v18, %v6683_v24  ;;  %v6685_v52 = vsel %vm6173_vm15, %v7911_v48, %v6429_v45  ;;  %v6690_v33 = vsel %vm6178_vm0, %v7848_v57, %v6434_v37  ;;  %v7850_v58 = vadd.f32 %v10800_v31, %v10705_v4  ;;  %v10856_v30 = vpop.f32.mrb[201].mxu0  ;;  %v10858_v21 = vpop.f32.mrb[202].mxu1 }
 0x5eb   : > { %v7053_v16 = vadd.f32 %v7052_v29, %v6685_v52  ;;  %v6961_v17 = vadd.f32 %v6960_v2, %v6690_v33  ;;  %v6692_v3 = vsel %vm6180_vm1, %v7912_v44, %v6436_v23  ;;  %vm6179_vm2 = vcmp.ge.f32.partialorder %v7849_v53, 0.0  ;;  %v10860_v22 = vpop.f32.mrb[202].mxu0  ;;  %v10862_v11 = vpop.f32.mrb[203].mxu1 }
 0x5ec   : > { %v7023_v19 = vadd.f32 %v7022_v39, %v6692_v3  ;;  %v6435_v59 = vmul.f32 0.01, %v7849_v53  ;;  %vm6181_vm3 = vcmp.ge.f32.partialorder %v7913_v8, 0.0  ;;  %v6437_v5 = vmul.f32 0.01, %v7913_v8  ;;  %v10864_v9 = vpop.f32.mrb[203].mxu0 }
 0x5ed   : > { %vm6186_vm4 = vcmp.ge.f32.partialorder %v7850_v58, 0.0  ;;  %v6442_v31 = vmul.f32 0.01, %v7850_v58  ;;  %v7914_v42 = vadd.f32 %v10802_v60, %v10707_v62  ;;  %v7851_v40 = vadd.f32 %v10804_v43, %v10709_v50 }
 0x5ee   : > { %v6691_v7 = vsel %vm6179_vm2, %v7849_v53, %v6435_v59  ;;  %v6693_v1 = vsel %vm6181_vm3, %v7913_v8, %v6437_v5  ;;  %v7915_v35 = vadd.f32 %v10806_v63, %v10711_v61  ;;  %v7852_v15 = vadd.f32 %v10814_v25, %v10705_v4 }
 0x5ef   : > { %v6992_v28 = vadd.f32 %v6991_v49, %v6691_v7  ;;  %v7054_v6 = vadd.f32 %v7053_v16, %v6693_v1  ;;  %v6698_v12 = vsel %vm6186_vm4, %v7850_v58, %v6442_v31  ;;  %vm6188_vm5 = vcmp.ge.f32.partialorder %v7914_v42, 0.0  ;;  %v10874_v13 = vpop.f32.mrb[204].mxu1 }
 0x5f0   : > { %v6962_v14 = vadd.f32 %v6961_v17, %v6698_v12  ;;  %v6444_v18 = vmul.f32 0.01, %v7914_v42  ;;  %vm6187_vm6 = vcmp.ge.f32.partialorder %v7851_v40, 0.0  ;;  %v6443_v60 = vmul.f32 0.01, %v7851_v40  ;;  %v10876_v27 = vpop.f32.mrb[204].mxu0 }
 0x5f1   : > { %vm6189_vm7 = vcmp.ge.f32.partialorder %v7915_v35, 0.0  ;;  %v6445_v43 = vmul.f32 0.01, %v7915_v35  ;;  %vm6194_vm8 = vcmp.ge.f32.partialorder %v7852_v15, 0.0  ;;  %v6450_v26 = vmul.f32 0.01, %v7852_v15 }
 0x5f2   : > { %v6700_v63 = vsel %vm6188_vm5, %v7914_v42, %v6444_v18  ;;  %v6699_v29 = vsel %vm6187_vm6, %v7851_v40, %v6443_v60  ;;  %v7916_v25 = vadd.f32 %v10820_v55, %v10707_v62  ;;  %v7853_v0 = vadd.f32 %v10822_v36, %v10709_v50  ;;  %v10882_v10 = vpop.f32.mrb[205].mxu1  ;;  %v10884_v48 = vpop.f32.mrb[205].mxu0 }
 0x5f3   : > { %v7024_v2 = vadd.f32 %v7023_v19, %v6700_v63  ;;  %v6993_v47 = vadd.f32 %v6992_v28, %v6699_v29  ;;  %v6701_v57 = vsel %vm6189_vm7, %v7915_v35, %v6445_v43  ;;  %v6706_v44 = vsel %vm6194_vm8, %v7852_v15, %v6450_v26  ;;  %v10886_v39 = vpop.f32.mrb[206].mxu1  ;;  %v10888_v54 = vpop.f32.mrb[206].mxu0 }
 0x5f4   : > { %v7055_v45 = vadd.f32 %v7054_v6, %v6701_v57  ;;  %v6963_v37 = vadd.f32 %v6962_v14, %v6706_v44  ;;  %vm6196_vm9 = vcmp.ge.f32.partialorder %v7916_v25, 0.0  ;;  %v6452_v24 = vmul.f32 0.01, %v7916_v25  ;;  %v10890_v55 = vpop.f32.mrb[207].mxu1  ;;  %v10892_v23 = vpop.f32.mrb[207].mxu0 }
 0x5f5   : > { %vm6195_vm10 = vcmp.ge.f32.partialorder %v7853_v0, 0.0  ;;  %v6451_v36 = vmul.f32 0.01, %v7853_v0  ;;  %v7917_v53 = vadd.f32 %v10826_v46, %v10711_v61  ;;  %v7854_v8 = vadd.f32 %v10828_v41, %v10705_v4 }
 0x5f6   : > { %v6708_v49 = vsel %vm6196_vm9, %v7916_v25, %v6452_v24  ;;  %v7918_v52 = vadd.f32 %v10830_v20, %v10707_v62  ;;  %v7855_v33 = vadd.f32 %v10832_v51, %v10709_v50  ;;  %v7919_v58 = vadd.f32 %v10834_v32, %v10711_v61 }
 0x5f7   : > { %v7025_v16 = vadd.f32 %v7024_v2, %v6708_v49  ;;  %v6707_v17 = vsel %vm6195_vm10, %v7853_v0, %v6451_v36  ;;  %vm6197_vm11 = vcmp.ge.f32.partialorder %v7917_v53, 0.0  ;;  %v6453_v3 = vmul.f32 0.01, %v7917_v53  ;;  %v10904_v19 = vpop.f32.mrb[208].mxu1 }
 0x5f8   : > { %v6994_v46 = vadd.f32 %v6993_v47, %v6707_v17  ;;  %vm6202_vm12 = vcmp.ge.f32.partialorder %v7854_v8, 0.0  ;;  %v6458_v59 = vmul.f32 0.01, %v7854_v8  ;;  %vm6204_vm13 = vcmp.ge.f32.partialorder %v7918_v52, 0.0  ;;  %v10906_v41 = vpop.f32.mrb[208].mxu0  ;;  %v10908_v5 = vpop.f32.mrb[209].mxu1 }
 0x5f9   : > { %v6709_v20 = vsel %vm6197_vm11, %v7917_v53, %v6453_v3  ;;  %v6460_v31 = vmul.f32 0.01, %v7918_v52  ;;  %vm6203_vm14 = vcmp.ge.f32.partialorder %v7855_v33, 0.0  ;;  %v6459_v51 = vmul.f32 0.01, %v7855_v33  ;;  %v10910_v42 = vpop.f32.mrb[209].mxu0 }
 0x5fa   : > { %v7056_v32 = vadd.f32 %v7055_v45, %v6709_v20  ;;  %v6714_v40 = vsel %vm6202_vm12, %v7854_v8, %v6458_v59  ;;  %vm6205_vm15 = vcmp.ge.f32.partialorder %v7919_v58, 0.0  ;;  %v6461_v7 = vmul.f32 0.01, %v7919_v58  ;;  %v10912_v1 = vpop.f32.mrb[210].mxu1  ;;  %v10914_v35 = vpop.f32.mrb[210].mxu0 }
 0x5fb   : > { %v6964_v15 = vadd.f32 %v6963_v37, %v6714_v40  ;;  %v6716_v28 = vsel %vm6204_vm13, %v7918_v52, %v6460_v31  ;;  %v6715_v6 = vsel %vm6203_vm14, %v7855_v33, %v6459_v51  ;;  %v7856_v12 = vadd.f32 %v10844_v56, %v10705_v4  ;;  %v10918_v14 = vpop.f32.mrb[211].mxu1  ;;  %v10920_v18 = vpop.f32.mrb[211].mxu0 }
 0x5fc   : > { %v7026_v60 = vadd.f32 %v7025_v16, %v6716_v28  ;;  %v6995_v43 = vadd.f32 %v6994_v46, %v6715_v6  ;;  %v6717_v26 = vsel %vm6205_vm15, %v7919_v58, %v6461_v7  ;;  %v7920_v63 = vadd.f32 %v10850_v38, %v10707_v62 }
 0x5fd   : > { %v7057_v29 = vadd.f32 %v7056_v32, %v6717_v26  ;;  %vm6210_vm0 = vcmp.ge.f32.partialorder %v7856_v12, 0.0  ;;  %v6466_v25 = vmul.f32 0.01, %v7856_v12  ;;  %v7857_v0 = vadd.f32 %v10852_v34, %v10709_v50 }
 0x5fe   : > { %vm6212_vm1 = vcmp.ge.f32.partialorder %v7920_v63, 0.0  ;;  %v6468_v2 = vmul.f32 0.01, %v7920_v63  ;;  %v7921_v56 = vadd.f32 %v10856_v30, %v10711_v61  ;;  %v7858_v47 = vadd.f32 %v10858_v21, %v10705_v4 }
 0x5ff   : > { %v6722_v57 = vsel %vm6210_vm0, %v7856_v12, %v6466_v25  ;;  %vm6211_vm2 = vcmp.ge.f32.partialorder %v7857_v0, 0.0  ;;  %v6467_v44 = vmul.f32 0.01, %v7857_v0  ;;  %v7922_v38 = vadd.f32 %v10860_v22, %v10707_v62  ;;  %v10932_v45 = vpop.f32.mrb[212].mxu1 }
 0x600   : > { %v6965_v37 = vadd.f32 %v6964_v15, %v6722_v57  ;;  %v6724_v24 = vsel %vm6212_vm1, %v7920_v63, %v6468_v2  ;;  %vm6213_vm3 = vcmp.ge.f32.partialorder %v7921_v56, 0.0  ;;  %v6469_v34 = vmul.f32 0.01, %v7921_v56  ;;  %v10934_v36 = vpop.f32.mrb[212].mxu0  ;;  %v10936_v53 = vpop.f32.mrb[213].mxu1 }
 0x601   : > { %v7027_v30 = vadd.f32 %v7026_v60, %v6724_v24  ;;  %v6723_v8 = vsel %vm6211_vm2, %v7857_v0, %v6467_v44  ;;  %vm6218_vm4 = vcmp.ge.f32.partialorder %v7858_v47, 0.0  ;;  %v6474_v21 = vmul.f32 0.01, %v7858_v47  ;;  %v10938_v49 = vpop.f32.mrb[213].mxu0  ;;  %v10940_v52 = vpop.f32.mrb[214].mxu1 }
 0x602   : > { %v6996_v33 = vadd.f32 %v6995_v43, %v6723_v8  ;;  %v6725_v22 = vsel %vm6213_vm3, %v7921_v56, %v6469_v34  ;;  %vm6220_vm5 = vcmp.ge.f32.partialorder %v7922_v38, 0.0  ;;  %v6476_v58 = vmul.f32 0.01, %v7922_v38  ;;  %v10942_v16 = vpop.f32.mrb[214].mxu0  ;;  %v10944_v17 = vpop.f32.mrb[215].mxu1 }
 0x603   : > { %v7058_v3 = vadd.f32 %v7057_v29, %v6725_v22  ;;  %v6730_v46 = vsel %vm6218_vm4, %v7858_v47, %v6474_v21  ;;  %v7859_v59 = vadd.f32 %v10862_v11, %v10709_v50  ;;  %v7923_v20 = vadd.f32 %v10864_v9, %v10711_v61  ;;  %v10950_v31 = vpop.f32.mrb[215].mxu0 }
 0x604   : > { %v6966_v51 = vadd.f32 %v6965_v37, %v6730_v46  ;;  %v6732_v32 = vsel %vm6220_vm5, %v7922_v38, %v6476_v58  ;;  %v7860_v40 = vadd.f32 %v10874_v13, %v10705_v4  ;;  %v7924_v7 = vadd.f32 %v10876_v27, %v10707_v62 }
 0x605   : > { %v7028_v15 = vadd.f32 %v7027_v30, %v6732_v32  ;;  %vm6219_vm6 = vcmp.ge.f32.partialorder %v7859_v59, 0.0  ;;  %v6475_v28 = vmul.f32 0.01, %v7859_v59  ;;  %vm6221_vm7 = vcmp.ge.f32.partialorder %v7923_v20, 0.0 }
 0x606   : > { %v6477_v6 = vmul.f32 0.01, %v7923_v20  ;;  %vm6226_vm8 = vcmp.ge.f32.partialorder %v7860_v40, 0.0  ;;  %v6482_v11 = vmul.f32 0.01, %v7860_v40  ;;  %vm6228_vm9 = vcmp.ge.f32.partialorder %v7924_v7, 0.0 }
 0x607   : > { %v6731_v12 = vsel %vm6219_vm6, %v7859_v59, %v6475_v28  ;;  %v6484_v9 = vmul.f32 0.01, %v7924_v7  ;;  %v7861_v60 = vadd.f32 %v10882_v10, %v10709_v50  ;;  %v7925_v43 = vadd.f32 %v10884_v48, %v10711_v61  ;;  %v10960_v13 = vpop.f32.mrb[216].mxu1 }
 0x608   : > { %v6997_v26 = vadd.f32 %v6996_v33, %v6731_v12  ;;  %v6733_v27 = vsel %vm6221_vm7, %v7923_v20, %v6477_v6  ;;  %v6738_v63 = vsel %vm6226_vm8, %v7860_v40, %v6482_v11  ;;  %v7862_v29 = vadd.f32 %v10886_v39, %v10705_v4  ;;  %v10964_v25 = vpop.f32.mrb[216].mxu0  ;;  %v10966_v0 = vpop.f32.mrb[217].mxu1 }
 0x609   : > { %v7059_v2 = vadd.f32 %v7058_v3, %v6733_v27  ;;  %v6967_v56 = vadd.f32 %v6966_v51, %v6738_v63  ;;  %v6740_v47 = vsel %vm6228_vm9, %v7924_v7, %v6484_v9  ;;  %vm6227_vm10 = vcmp.ge.f32.partialorder %v7861_v60, 0.0  ;;  %v10968_v10 = vpop.f32.mrb[217].mxu0  ;;  %v10970_v57 = vpop.f32.mrb[218].mxu1 }
 0x60a   : > { %v7029_v48 = vadd.f32 %v7028_v15, %v6740_v47  ;;  %v6483_v44 = vmul.f32 0.01, %v7861_v60  ;;  %vm6229_vm11 = vcmp.ge.f32.partialorder %v7925_v43, 0.0  ;;  %v6485_v38 = vmul.f32 0.01, %v7925_v43  ;;  %v10972_v37 = vpop.f32.mrb[218].mxu0 }
 0x60b   : > { %vm6234_vm12 = vcmp.ge.f32.partialorder %v7862_v29, 0.0  ;;  %v6490_v39 = vmul.f32 0.01, %v7862_v29  ;;  %v7926_v24 = vadd.f32 %v10888_v54, %v10707_v62  ;;  %v7863_v34 = vadd.f32 %v10890_v55, %v10709_v50  ;;  %v10978_v30 = vpop.f32.mrb[219].mxu1  ;;  %v10980_v8 = vpop.f32.mrb[219].mxu0 }
 0x60c   : > { %v6739_v21 = vsel %vm6227_vm10, %v7861_v60, %v6483_v44  ;;  %v6741_v33 = vsel %vm6229_vm11, %v7925_v43, %v6485_v38  ;;  %v7927_v22 = vadd.f32 %v10892_v23, %v10711_v61  ;;  %v7864_v58 = vadd.f32 %v10904_v19, %v10705_v4 }
 0x60d   : > { %v6998_v3 = vadd.f32 %v6997_v26, %v6739_v21  ;;  %v7060_v46 = vadd.f32 %v7059_v2, %v6741_v33  ;;  %v6746_v59 = vsel %vm6234_vm12, %v7862_v29, %v6490_v39  ;;  %vm6236_vm13 = vcmp.ge.f32.partialorder %v7926_v24, 0.0 }
 0x60e   : > { %v6968_v54 = vadd.f32 %v6967_v56, %v6746_v59  ;;  %v6492_v20 = vmul.f32 0.01, %v7926_v24  ;;  %vm6235_vm14 = vcmp.ge.f32.partialorder %v7863_v34, 0.0  ;;  %v6491_v55 = vmul.f32 0.01, %v7863_v34 }
 0x60f   : > { %vm6237_vm15 = vcmp.ge.f32.partialorder %v7927_v22, 0.0  ;;  %v6493_v51 = vmul.f32 0.01, %v7927_v22  ;;  %vm6242_vm0 = vcmp.ge.f32.partialorder %v7864_v58, 0.0  ;;  %v6498_v32 = vmul.f32 0.01, %v7864_v58 }
 0x610   : > { %v6748_v40 = vsel %vm6236_vm13, %v7926_v24, %v6492_v20  ;;  %v6747_v7 = vsel %vm6235_vm14, %v7863_v34, %v6491_v55  ;;  %v7928_v23 = vadd.f32 %v10906_v41, %v10707_v62  ;;  %v7865_v19 = vadd.f32 %v10908_v5, %v10709_v50  ;;  %v10990_v15 = vpop.f32.mrb[220].mxu1  ;;  %v10992_v28 = vpop.f32.mrb[220].mxu0 }
 0x611   : > { %v7030_v6 = vadd.f32 %v7029_v48, %v6748_v40  ;;  %v6999_v11 = vadd.f32 %v6998_v3, %v6747_v7  ;;  %v6749_v12 = vsel %vm6237_vm15, %v7927_v22, %v6493_v51  ;;  %v6754_v9 = vsel %vm6242_vm0, %v7864_v58, %v6498_v32  ;;  %v10994_v60 = vpop.f32.mrb[221].mxu1  ;;  %v10996_v43 = vpop.f32.mrb[221].mxu0 }
 0x612   : > { %v7061_v26 = vadd.f32 %v7060_v46, %v6749_v12  ;;  %v6969_v27 = vadd.f32 %v6968_v54, %v6754_v9  ;;  %vm6244_vm1 = vcmp.ge.f32.partialorder %v7928_v23, 0.0  ;;  %v6500_v63 = vmul.f32 0.01, %v7928_v23  ;;  %v10998_v41 = vpop.f32.mrb[222].mxu1  ;;  %v11000_v29 = vpop.f32.mrb[222].mxu0 }
 0x613   : > { %vm6243_vm2 = vcmp.ge.f32.partialorder %v7865_v19, 0.0  ;;  %v6499_v5 = vmul.f32 0.01, %v7865_v19  ;;  %v7929_v2 = vadd.f32 %v10910_v42, %v10711_v61  ;;  %v7866_v56 = vadd.f32 %v10912_v1, %v10705_v4  ;;  %v11006_v47 = vpop.f32.mrb[223].mxu1  ;;  %v11008_v48 = vpop.f32.mrb[223].mxu0 }
 0x614   : > { %v6756_v44 = vsel %vm6244_vm1, %v7928_v23, %v6500_v63  ;;  %v7930_v38 = vadd.f32 %v10914_v35, %v10707_v62  ;;  %v7867_v39 = vadd.f32 %v10918_v14, %v10709_v50  ;;  %v7931_v24 = vadd.f32 %v10920_v18, %v10711_v61 }
 0x615   : > { %v7031_v34 = vadd.f32 %v7030_v6, %v6756_v44  ;;  %v6755_v21 = vsel %vm6243_vm2, %v7865_v19, %v6499_v5  ;;  %vm6245_vm3 = vcmp.ge.f32.partialorder %v7929_v2, 0.0  ;;  %v6501_v42 = vmul.f32 0.01, %v7929_v2 }
 0x616   : > { %v7000_v33 = vadd.f32 %v6999_v11, %v6755_v21  ;;  %vm6250_vm4 = vcmp.ge.f32.partialorder %v7866_v56, 0.0  ;;  %v6506_v1 = vmul.f32 0.01, %v7866_v56  ;;  %vm6252_vm5 = vcmp.ge.f32.partialorder %v7930_v38, 0.0 }
 0x617   : > { %v6757_v22 = vsel %vm6245_vm3, %v7929_v2, %v6501_v42  ;;  %v6508_v58 = vmul.f32 0.01, %v7930_v38  ;;  %vm6251_vm6 = vcmp.ge.f32.partialorder %v7867_v39, 0.0  ;;  %v6507_v3 = vmul.f32 0.01, %v7867_v39 }
 0x618   : > { %v7062_v46 = vadd.f32 %v7061_v26, %v6757_v22  ;;  %v6762_v35 = vsel %vm6250_vm4, %v7866_v56, %v6506_v1  ;;  %vm6253_vm7 = vcmp.ge.f32.partialorder %v7931_v24, 0.0  ;;  %v6509_v59 = vmul.f32 0.01, %v7931_v24 }
 0x619   : > { %v6970_v14 = vadd.f32 %v6969_v27, %v6762_v35  ;;  %v6764_v54 = vsel %vm6252_vm5, %v7930_v38, %v6508_v58  ;;  %v6763_v20 = vsel %vm6251_vm6, %v7867_v39, %v6507_v3  ;;  %v7868_v18 = vadd.f32 %v10932_v45, %v10705_v4 }
 0x61a   : > { %v7032_v55 = vadd.f32 %v7031_v34, %v6764_v54  ;;  %v7001_v51 = vadd.f32 %v7000_v33, %v6763_v20  ;;  %v6765_v32 = vsel %vm6253_vm7, %v7931_v24, %v6509_v59  ;;  %v7932_v40 = vadd.f32 %v10934_v36, %v10707_v62 }
 0x61b   : > { %v7063_v7 = vadd.f32 %v7062_v46, %v6765_v32  ;;  %vm6258_vm8 = vcmp.ge.f32.partialorder %v7868_v18, 0.0  ;;  %v6514_v23 = vmul.f32 0.01, %v7868_v18  ;;  %v7869_v19 = vadd.f32 %v10936_v53, %v10709_v50 }
 0x61c   : > { %vm6260_vm9 = vcmp.ge.f32.partialorder %v7932_v40, 0.0  ;;  %v6516_v6 = vmul.f32 0.01, %v7932_v40  ;;  %v7933_v11 = vadd.f32 %v10938_v49, %v10711_v61  ;;  %v7870_v45 = vadd.f32 %v10940_v52, %v10705_v4 }
 0x61d   : > { %v6770_v12 = vsel %vm6258_vm8, %v7868_v18, %v6514_v23  ;;  %vm6259_vm10 = vcmp.ge.f32.partialorder %v7869_v19, 0.0  ;;  %v6515_v9 = vmul.f32 0.01, %v7869_v19  ;;  %v7934_v36 = vadd.f32 %v10942_v16, %v10707_v62 }
 0x61e   : > { %v6971_v26 = vadd.f32 %v6970_v14, %v6770_v12  ;;  %v6772_v27 = vsel %vm6260_vm9, %v7932_v40, %v6516_v6  ;;  %vm6261_vm11 = vcmp.ge.f32.partialorder %v7933_v11, 0.0  ;;  %v6517_v63 = vmul.f32 0.01, %v7933_v11 }
 0x61f   : > { %v7033_v5 = vadd.f32 %v7032_v55, %v6772_v27  ;;  %v6771_v53 = vsel %vm6259_vm10, %v7869_v19, %v6515_v9  ;;  %vm6266_vm12 = vcmp.ge.f32.partialorder %v7870_v45, 0.0  ;;  %v6522_v2 = vmul.f32 0.01, %v7870_v45 }
 0x620   : > { %v7002_v56 = vadd.f32 %v7001_v51, %v6771_v53  ;;  %v6773_v44 = vsel %vm6261_vm11, %v7933_v11, %v6517_v63  ;;  %vm6268_vm13 = vcmp.ge.f32.partialorder %v7934_v36, 0.0  ;;  %v6524_v49 = vmul.f32 0.01, %v7934_v36 }
 0x621   : > { %v7064_v38 = vadd.f32 %v7063_v7, %v6773_v44  ;;  %v6778_v52 = vsel %vm6266_vm12, %v7870_v45, %v6522_v2  ;;  %v7871_v39 = vadd.f32 %v10944_v17, %v10709_v50  ;;  %v7935_v16 = vadd.f32 %v10950_v31, %v10711_v61 }
 0x622   : > { %v6972_v24 = vadd.f32 %v6971_v26, %v6778_v52  ;;  %v6780_v34 = vsel %vm6268_vm13, %v7934_v36, %v6524_v49  ;;  %v7872_v21 = vadd.f32 %v10960_v13, %v10705_v4  ;;  %v7936_v42 = vadd.f32 %v10964_v25, %v10707_v62 }
 0x623   : > { %v7034_v33 = vadd.f32 %v7033_v5, %v6780_v34  ;;  %vm6267_vm14 = vcmp.ge.f32.partialorder %v7871_v39, 0.0  ;;  %v6523_v1 = vmul.f32 0.01, %v7871_v39  ;;  %vm6269_vm15 = vcmp.ge.f32.partialorder %v7935_v16, 0.0 }
 0x624   : > { %v6525_v22 = vmul.f32 0.01, %v7935_v16  ;;  %vm6274_vm0 = vcmp.ge.f32.partialorder %v7872_v21, 0.0  ;;  %v6530_v58 = vmul.f32 0.01, %v7872_v21  ;;  %vm6276_vm1 = vcmp.ge.f32.partialorder %v7936_v42, 0.0 }
 0x625   : > { %v6779_v17 = vsel %vm6267_vm14, %v7871_v39, %v6523_v1  ;;  %v6532_v3 = vmul.f32 0.01, %v7936_v42  ;;  %v7873_v31 = vadd.f32 %v10966_v0, %v10709_v50  ;;  %v7937_v46 = vadd.f32 %v10968_v10, %v10711_v61 }
 0x626   : > { %v7003_v13 = vadd.f32 %v7002_v56, %v6779_v17  ;;  %v6781_v35 = vsel %vm6269_vm15, %v7935_v16, %v6525_v22  ;;  %v6786_v59 = vsel %vm6274_vm0, %v7872_v21, %v6530_v58  ;;  %v7874_v25 = vadd.f32 %v10970_v57, %v10705_v4  ;;  %v6819_v58 = vld [vmem:[#allocation2 + $0x28] sm:$0xff] }
 0x627   : > { %v7065_v14 = vadd.f32 %v7064_v38, %v6781_v35  ;;  %v6973_v54 = vadd.f32 %v6972_v24, %v6786_v59  ;;  %v6788_v20 = vsel %vm6276_vm1, %v7936_v42, %v6532_v3  ;;  %vm6275_vm2 = vcmp.ge.f32.partialorder %v7873_v31, 0.0 }
 0x628   : > { %v7035_v18 = vadd.f32 %v7034_v33, %v6788_v20  ;;  %v6531_v55 = vmul.f32 0.01, %v7873_v31  ;;  %vm6277_vm3 = vcmp.ge.f32.partialorder %v7937_v46, 0.0  ;;  %v6533_v51 = vmul.f32 0.01, %v7937_v46  ;;  %v7091_v20 = vld [vmem:[#allocation2 + $0x8] sm:$0xff] (!%p7665_p13) }
 0x629   : > { %vm6282_vm4 = vcmp.ge.f32.partialorder %v7874_v25, 0.0  ;;  %v6538_v32 = vmul.f32 0.01, %v7874_v25  ;;  %v7938_v0 = vadd.f32 %v10972_v37, %v10707_v62  ;;  %v7875_v10 = vadd.f32 %v10978_v30, %v10709_v50 }
 0x62a   : > { %v6787_v40 = vsel %vm6275_vm2, %v7873_v31, %v6531_v55  ;;  %v6789_v7 = vsel %vm6277_vm3, %v7937_v46, %v6533_v51  ;;  %v7939_v57 = vadd.f32 %v10980_v8, %v10711_v61  ;;  %v7876_v23 = vadd.f32 %v10990_v15, %v10705_v4  ;;  %v6821_v46 = vld [vmem:[#allocation2 + $0x38] sm:$0xff] }
 0x62b   : > { %v7004_v19 = vadd.f32 %v7003_v13, %v6787_v40  ;;  %v7066_v6 = vadd.f32 %v7065_v14, %v6789_v7  ;;  %v6794_v11 = vsel %vm6282_vm4, %v7874_v25, %v6538_v32  ;;  %vm6284_vm5 = vcmp.ge.f32.partialorder %v7938_v0, 0.0  ;;  %v7093_v55 = vld [vmem:[#allocation2 + $0x18] sm:$0xff] (!%p7665_p13) }
 0x62c   : > { %v6974_v45 = vadd.f32 %v6973_v54, %v6794_v11  ;;  %v6540_v12 = vmul.f32 0.01, %v7938_v0  ;;  %vm6283_vm6 = vcmp.ge.f32.partialorder %v7875_v10, 0.0  ;;  %v6539_v9 = vmul.f32 0.01, %v7875_v10  ;;  %v7090_v54 = vld [vmem:[#allocation2] sm:$0xff] (!%p7665_p13) }
 0x62d   : > { %vm6285_vm7 = vcmp.ge.f32.partialorder %v7939_v57, 0.0  ;;  %v6541_v37 = vmul.f32 0.01, %v7939_v57  ;;  %vm6290_vm8 = vcmp.ge.f32.partialorder %v7876_v23, 0.0  ;;  %v6546_v30 = vmul.f32 0.01, %v7876_v23 }
 0x62e   : > { %v6796_v36 = vsel %vm6284_vm5, %v7938_v0, %v6540_v12  ;;  %v6795_v26 = vsel %vm6283_vm6, %v7875_v10, %v6539_v9  ;;  %v7940_v8 = vadd.f32 %v10992_v28, %v10707_v62  ;;  %v7877_v15 = vadd.f32 %v10994_v60, %v10709_v50 }
 0x62f   : > { %v7036_v27 = vadd.f32 %v7035_v18, %v6796_v36  ;;  %v7005_v63 = vadd.f32 %v7004_v19, %v6795_v26  ;;  %v6797_v5 = vsel %vm6285_vm7, %v7939_v57, %v6541_v37  ;;  %v6802_v53 = vsel %vm6290_vm8, %v7876_v23, %v6546_v30  ;;  %v7092_v18 = vld [vmem:[#allocation2 + $0x10] sm:$0xff] (!%p7665_p13) }
 0x630   : > { %v7067_v2 = vadd.f32 %v7066_v6, %v6797_v5  ;;  %v6975_v56 = vadd.f32 %v6974_v45, %v6802_v53  ;;  %vm6292_vm9 = vcmp.ge.f32.partialorder %v7940_v8, 0.0  ;;  %v6548_v44 = vmul.f32 0.01, %v7940_v8 }
 0x631   : > { %vm6291_vm10 = vcmp.ge.f32.partialorder %v7877_v15, 0.0  ;;  %v6547_v49 = vmul.f32 0.01, %v7877_v15  ;;  %v7941_v38 = vadd.f32 %v10996_v43, %v10711_v61  ;;  %v7878_v52 = vadd.f32 %v10998_v41, %v10705_v4 }
 0x632   : > { %v6804_v28 = vsel %vm6292_vm9, %v7940_v8, %v6548_v44  ;;  %v7942_v60 = vadd.f32 %v11000_v29, %v10707_v62  ;;  %v7879_v39 = vadd.f32 %v11006_v47, %v10709_v50  ;;  %v7943_v16 = vadd.f32 %v11008_v48, %v10711_v61  ;;  %v6818_v29 = vld [vmem:[#allocation2 + $0x20] sm:$0xff]  ;;  %v6820_v61 = vld [vmem:[#allocation2 + $0x30] sm:$0xff] }
 0x633   : > { %v7037_v24 = vadd.f32 %v7036_v27, %v6804_v28  ;;  %v6803_v34 = vsel %vm6291_vm10, %v7877_v15, %v6547_v49  ;;  %vm6293_vm11 = vcmp.ge.f32.partialorder %v7941_v38, 0.0  ;;  %v6549_v21 = vmul.f32 0.01, %v7941_v38 }
 0x634   : > { %v7006_v42 = vadd.f32 %v7005_v63, %v6803_v34  ;;  %vm6298_vm12 = vcmp.ge.f32.partialorder %v7878_v52, 0.0  ;;  %v6554_v43 = vmul.f32 0.01, %v7878_v52  ;;  %vm6300_vm13 = vcmp.ge.f32.partialorder %v7942_v60, 0.0 }
 0x635   : > { %v6805_v33 = vsel %vm6293_vm11, %v7941_v38, %v6549_v21  ;;  %v6556_v4 = vmul.f32 0.01, %v7942_v60  ;;  %vm6299_vm14 = vcmp.ge.f32.partialorder %v7879_v39, 0.0  ;;  %v6555_v41 = vmul.f32 0.01, %v7879_v39 }
 0x636   : > { %v7068_v1 = vadd.f32 %v7067_v2, %v6805_v33  ;;  %v6810_v62 = vsel %vm6298_vm12, %v7878_v52, %v6554_v43  ;;  %vm6301_vm15 = vcmp.ge.f32.partialorder %v7943_v16, 0.0  ;;  %v6557_v50 = vmul.f32 0.01, %v7943_v16 }
 0x637   : > { %v6976_v47 = vadd.f32 %v6975_v56, %v6810_v62  ;;  %v6812_v22 = vsel %vm6300_vm13, %v7942_v60, %v6556_v4  ;;  %v6811_v48 = vsel %vm6299_vm14, %v7879_v39, %v6555_v41  ;;  %7089 = sbr.rel (%p7665_p13) target bundleno = 1630 (0x65e), region = 68  ;;  %v7098_v0 = vrot.slane (!%p7665_p13), %v7090_v54, 4 }
 0x638   : > { %v7038_v17 = vadd.f32 %v7037_v24, %v6812_v22  ;;  %v7007_v3 = vadd.f32 %v7006_v42, %v6811_v48  ;;  %v6813_v31 = vsel %vm6301_vm15, %v7943_v16, %v6557_v50  ;;  %v7104_v10 = vrot.slane (!%p7665_p13), %v7091_v20, 4 }
 0x639   : > { %v7074_v13 = vadd.f32 %v6976_v47, %v6818_v29  ;;  %v7069_v35 = vadd.f32 %v7068_v1, %v6813_v31  ;;  %v7110_v40 = vrot.slane (!%p7665_p13), %v7092_v18, 4  ;;  %v7116_v23 = vrot.slane (!%p7665_p13), %v7093_v55, 4 }
 0x63a   : > { %v7076_v59 = vadd.f32 %v7038_v17, %v6820_v61  ;;  %v7075_v25 = vadd.f32 %v7007_v3, %v6819_v58  ;;  %v8600_v11 = vmov (!%p7665_p13), 1966171168   ;;  %v7099_v12 = vadd.f32 (!%p7665_p13), %v7098_v0, %v7090_v54  ;;  %v11313_v0 = vld [vmem:[#allocation13_spill] sm:$0xff] (!%p7665_p13) }
 0x63b   : > { %7082 = vst [vmem:[#allocation2 + $0x20] sm:$0xff] %v7074_v13  ;;  %v7077_v14 = vadd.f32 %v7069_v35, %v6821_v46  ;;  %v7167_v45 = vunpack.c.l.s4 (!%p7665_p13), %v8600_v11  ;;  %v7105_v9 = vadd.f32 (!%p7665_p13), %v7104_v10, %v7091_v20  ;;  %v7111_v37 = vadd.f32 (!%p7665_p13), %v7110_v40, %v7092_v18 }
 0x63c   : > { %7084 = vst [vmem:[#allocation2 + $0x30] sm:$0xff] %v7076_v59  ;;  %7083 = vst [vmem:[#allocation2 + $0x28] sm:$0xff] %v7075_v25  ;;  %v7117_v36 = vadd.f32 (!%p7665_p13), %v7116_v23, %v7093_v55  ;;  %v7100_v27 = vrot.slane (!%p7665_p13), %v7099_v12, 2 }
 0x63d   : > { %7085 = vst [vmem:[#allocation2 + $0x38] sm:$0xff] %v7077_v14  ;;  %v7106_v63 = vrot.slane (!%p7665_p13), %v7105_v9, 2  ;;  %v7112_v5 = vrot.slane (!%p7665_p13), %v7111_v37, 2  ;;  %v7168_v18 = vunpack.c.0.s8 (!%p7665_p13), %v7167_v45 }
 0x63e   : > { %v7118_v2 = vrot.slane %v7117_v36, 2  ;;  %v7101_v38 = vadd.f32 %v7100_v27, %v7099_v12 }
 0x63f   : > { %v7107_v52 = vadd.f32 %v7106_v63, %v7105_v9  ;;  %v7113_v28 = vadd.f32 %v7112_v5, %v7111_v37  ;;  %v7171_v10 = vsub.s32 %v7168_v18, %v11313_v0 }
 0x640   : > { %v7119_v39 = vadd.f32 %v7118_v2, %v7117_v36  ;;  %v7102_v21 = vrot.slane %v7101_v38, 1 }
 0x641   : > { %v7108_v42 = vrot.slane %v7107_v52, 1  ;;  %v7114_v43 = vrot.slane %v7113_v28, 1 }
 0x642   : > { %v7094_v51 = vld [vmem:[#allocation2 + $0x20] sm:$0xff]  ;;  %v7120_v4 = vrot.slane %v7119_v39, 1  ;;  %v7103_v29 = vadd.f32 %v7102_v21, %v7101_v38 }
 0x643   : > { %v7095_v32 = vld [vmem:[#allocation2 + $0x28] sm:$0xff]  ;;  %v7096_v7 = vld [vmem:[#allocation2 + $0x30] sm:$0xff]  ;;  %v7122_v19 = vrot.slane %v7094_v51, 4  ;;  %v7109_v50 = vadd.f32 %v7108_v42, %v7107_v52  ;;  %v7115_v47 = vadd.f32 %v7114_v43, %v7113_v28 }
 0x644   : > { %v7097_v57 = vld [vmem:[#allocation2 + $0x38] sm:$0xff]  ;;  %v7128_v6 = vrot.slane %v7095_v32, 4  ;;  %v7134_v30 = vrot.slane %v7096_v7, 4  ;;  %v7121_v61 = vadd.f32 %v7120_v4, %v7119_v39  ;;  %v7146_v31 = vmul.f32 0.001953125, %v7103_v29 }
 0x645   : > { %v7123_v26 = vadd.f32 %v7122_v19, %v7094_v51  ;;  %v7140_v15 = vrot.slane %v7097_v57, 4  ;;  %v7147_v46 = vmul.f32 0.001953125, %v7109_v50  ;;  %v7148_v13 = vmul.f32 0.001953125, %v7115_v47 }
 0x646   : > { %v7129_v8 = vadd.f32 %v7128_v6, %v7095_v32  ;;  %v7135_v53 = vadd.f32 %v7134_v30, %v7096_v7  ;;  %v7149_v59 = vmul.f32 0.001953125, %v7121_v61 }
 0x647   : > { %v7124_v56 = vrot.slane %v7123_v26, 2  ;;  %v7141_v49 = vadd.f32 %v7140_v15, %v7097_v57  ;;  %v7162_v20 = vcombine.low %v7146_v31, %v7147_v46 }
 0x648   : > { %v7130_v44 = vrot.slane %v7129_v8, 2  ;;  %v7136_v60 = vrot.slane %v7135_v53, 2  ;;  %v7163_v51 = vcombine.low %v7148_v13, %v7149_v59 }
 0x649   : > { %v7125_v16 = vadd.f32 %v7124_v56, %v7123_v26  ;;  %v7142_v34 = vrot.slane %v7141_v49, 2  ;;  %v7172_v7 = vrot.slane %v7162_v20, %v7171_v10 }
 0x64a   : > { %v7131_v24 = vadd.f32 %v7130_v44, %v7129_v8  ;;  %v7137_v33 = vadd.f32 %v7136_v60, %v7135_v53  ;;  %v7179_v57 = vrot.slane %v7163_v51, %v7171_v10 }
 0x64b   : > { %v7126_v41 = vrot.slane %v7125_v16, 1  ;;  %v7143_v62 = vadd.f32 %v7142_v34, %v7141_v49 }
 0x64c   : > { %v7132_v1 = vrot.slane %v7131_v24, 1  ;;  %v7138_v22 = vrot.slane %v7137_v33, 1  ;;  %v7194_v6 = vcombine.low %v7172_v7, %v7179_v57 }
 0x64d   : > { %v7127_v48 = vadd.f32 %v7126_v41, %v7125_v16  ;;  %v7144_v17 = vrot.slane %v7143_v62, 1 }
 0x64e   : > { %v7133_v58 = vadd.f32 %v7132_v1, %v7131_v24  ;;  %v7139_v3 = vadd.f32 %v7138_v22, %v7137_v33  ;;  %v7202_v12 = vrot.slane %v7194_v6, %v7171_v10 }
 0x64f   : > { %v7145_v35 = vadd.f32 %v7144_v17, %v7143_v62  ;;  %v7150_v25 = vmul.f32 0.001953125, %v7127_v48 }
 0x650   : > { %v7151_v14 = vmul.f32 0.001953125, %v7133_v58  ;;  %v7152_v54 = vmul.f32 0.001953125, %v7139_v3 }
 0x651   : > { %v7153_v55 = vmul.f32 0.001953125, %v7145_v35 }
 0x652   : > { %v7164_v32 = vcombine.low %v7150_v25, %v7151_v14 }
 0x653   : > { %v7165_v40 = vcombine.low %v7152_v54, %v7153_v55 }
 0x654   : > { %v7186_v23 = vrot.slane %v7164_v32, %v7171_v10 }
 0x655   : > { %v7193_v19 = vrot.slane %v7165_v40, %v7171_v10 }
 0x657   : > { %v7195_v11 = vcombine.low %v7186_v23, %v7193_v19 }
 0x659   : > { %v7209_v9 = vrot.slane %v7195_v11, %v7171_v10 }
 0x65b   : > { %v7210_v37 = vcombine.low %v7202_v12, %v7209_v9 }
 0x65d   : > { %7212 = vst [vmem:[%s363_s25] sm:$0xff] %v7210_v37 }
 0x65e PF: > { %s7671_s12 = sshll.u32 %s8579_s13, 7  ;;  %s7228_s19 = sshll.u32 %s363_s25, 4  ;;  %s7229_s19 = int_to_ptr.vmem [resolvable:$true] %s7228_s19 }
 0x65f   : > { %s11072_s17 = scalar_lea.hbm %s11132_s9, %s7671_s12  ;;  %s7214_s24 = scalar_lea.sflag [#allocation5], %s361_s14 }
 0x660   : > { %s8493_s29 = scalar_lea.vmem %s7229_s19, 128  ;;  %p11314_p2 = scmp.ne.s32.totalorder %s11217_s22, 0 }
 0x661   : > { %p8494_p0 = scmp.ne.s32.totalorder %s7229_s19, %s8493_s29  ;;  %s8601_s20 = smov [#allocation6]  }
 0x662   : > { %s8497_s21 = sshll.u32 %s8601_s20, 4  ;;  %s8498_s21 = int_to_ptr.vmem [resolvable:$false] %s8497_s21 }
 0x663   : > { %p8495_p5 = pnand %p8494_p0, %p11314_p2  ;;  %s8499_s28 = scalar_lea.vmem %s8498_s21, 256 }
 0x664   : > { %p8500_p7 = scmp.lt.s32.totalorder %s7229_s19, %s8498_s21  ;;  %p8501_p8 = scmp.lt.s32.totalorder %s8499_s28, %s8493_s29 }
 0x665   : > { %p8496_p6 = pneg %p8495_p5 }
 0x666   : > { %p8502_p11 = por %p8501_p8, %p8500_p7 }
 0x668   : > { %p8503_p12 = pnand %p8502_p11, %p8496_p6 }
 0x66a   : > { %8506 = shalt.err (!%p8503_p12)
}
 0x66b   : > { %s8507_s13 = scalar_lea.hbm %s11072_s17, 128  ;;  %s8511_s25 = scalar_lea.hbm %s11132_s9, 256 }
 0x66c   : > { %p8508_p1 = scmp.ne.s32.totalorder %s11072_s17, %s8507_s13  ;;  %p8512_p9 = scmp.lt.u32.totalorder %s11072_s17, %s11132_s9 }
 0x66d   : > { %p8513_p10 = scmp.lt.u32.totalorder %s8511_s25, %s8507_s13  ;;  %p8515_p0 = scmp.lt.u32.totalorder %s8507_s13, %s11072_s17 }
 0x66e   : > { %p8509_p4 = pnand %p8508_p1, %p11314_p2 }
 0x66f   : > { %p8514_p13 = por %p8513_p10, %p8512_p9 }
 0x670   : > { %p8510_p3 = pneg %p8509_p4 }
 0x671   : > { %p8516_p5 = por %p8515_p0, %p8514_p13 }
 0x673   : > { %p8517_p6 = pnand %p8516_p5, %p8510_p3 }
 0x675   : > { %8520 = shalt.err (!%p8517_p6)
}
 0x676   : > { %8204 = dma.vmem_to_hbm [thread:$0]  (%p11314_p2), %s7229_s19, 128, %s11072_s17, %s7214_s24  }
 0x677 PF: > { %p8216_p7 = scmp.ge.s32.totalorder %s8591_s16, 2  ;;  %s7240_s15 = sand.u32 1, %s8563_s30  }
 0x678   : > { %p11315_p8 = scmp.ne.s32.totalorder %s11219_s23, 0  ;;  %s7241_s29 = scalar_lea.sflag [#allocation5], %s7240_s15 }
 0x67a   : > { %p8211_p11 = pnand %p8216_p7, %p11315_p8 }
 0x67c   : > { %8558 = dma.done.wait (!%p8211_p11), %s7241_s29, 128  }
 0x67d   : > { %8560 = vsyncadd (!%p8211_p11), %s7241_s29, 4294967168  ;;  %s23_s16 = sadd.s32 1, %s8591_s16   ;;  %s11316_s12 = sld [smem:[#allocation9_spill]] }
 0x67e   : > { %p20_p12 = scmp.ge.s32.totalorder %s23_s16, 6   ;;  %s11317_s13 = sld [smem:[#allocation10_spill]] }
 0x67f   : > { %s11318_s14 = sld [smem:[#allocation11_spill]]  ;;  %s11319_s15 = sld [smem:[#allocation12_spill]] }
 0x680   : > { %s11320_s30 = smov %s8567_s10  ;;  %s11321_s10 = smov %s8571_s11 }
 0x681   : > { %s11322_s11 = smov %s8729_s27  ;;  %22 = sbr.rel (!%p20_p12) target bundleno = 6 (0x6), region = 104 }
 0x688   :  { %7246 = vsyncpa [#allocation4], 1 }
 0x689   :  { %7248 = vsyncpa [#allocation4 + $0x1], 1 }
 0x68a   :  { %7249 = vsyncpa [#allocation5], 1 }
 0x68b   :  { %7251 = vsyncpa [#allocation5 + $0x1], 1 }

</bundles_post_ra>
